<compile_context>
chip_gen: v5e
topology: v5e:2x2
jax: 0.10.0
libtpu: 0.0.40
codegen_flags: <defaults>
</compile_context>

<pallas_src>
import functools

import jax
import jax.numpy as jnp
from jax.experimental import pallas as pl
from jax.experimental.pallas import tpu as pltpu

LEAKY_ALPHA = 0.1
_VMEM_BUDGET = 40 * 1024 * 1024   # conservative: fits v7x's 64 MiB physical VMEM
_VMEM_LIMIT = 48 * 1024 * 1024


def _round_up(x, m):
    return ((x + m - 1) // m) * m


# ----------------------------------------------------------------------------
# Pallas kernel: fused im2col-matmul + bias + leaky relu.
# grid = (M_tiles, nk). nk == 1 for every realistic config (whole contraction
# and the whole weight matrix stay VMEM-resident). nk > 1 tiles K and
# accumulates directly into the f32 output block (constant along k).
# ----------------------------------------------------------------------------
def _conv_mm_kernel(alpha, nk, tk, patch_ref, w_ref, b_ref, o_ref):
    if nk == 1:
        y = jnp.dot(patch_ref[...], w_ref[...],
                    preferred_element_type=jnp.float32)
        y = y + b_ref[...]
        o_ref[...] = jnp.where(y >= 0, y, alpha * y)
        return

    k = pl.program_id(1)

    @pl.when(k == 0)
    def _():
        o_ref[...] = jnp.zeros_like(o_ref)

    w_k = w_ref[pl.ds(pl.multiple_of(k * tk, 128), tk), :]
    o_ref[...] += jnp.dot(patch_ref[...], w_k,
                          preferred_element_type=jnp.float32)

    @pl.when(k == nk - 1)
    def _():
        y = o_ref[...] + b_ref[...]
        o_ref[...] = jnp.where(y >= 0, y, alpha * y)


def _plan_tiles(m, kdim, cout, in_bytes):
    """Pick (tm, tk, nk) under a v7x-safe VMEM budget."""
    # Big M tiles amortize per-grid-step overhead; cap at 512 so large M still
    # splits into >=2 parallel tiles (v7x megacore).
    tm = min(512, _round_up(m, 8))

    def vmem_bytes(tk, nk):
        k_pad = tk * nk
        return (2 * tm * tk * in_bytes      # double-buffered patch tiles
                + k_pad * cout * in_bytes   # resident weight matrix
                + 2 * tm * cout * 4         # f32 output tile (+ writeback buf)
                + cout * 4)                 # bias

    tk, nk = kdim, 1
    while vmem_bytes(tk, nk) > _VMEM_BUDGET and tk > 128:
        nk += 1
        tk = _round_up(-(-kdim // nk), 128)
    return tm, tk, nk


def _im2col(xp, stride):
    """xp: zero-padded NDHWC activation. Returns (M, 27*Cin) slab + out dims."""
    n, dp, hp, wp, c = xp.shape
    do = (dp - 3) // stride + 1
    ho = (hp - 3) // stride + 1
    wo = (wp - 3) // stride + 1
    cols = []
    for kd in range(3):
        for kh in range(3):
            for kw in range(3):
                cols.append(
                    xp[:,
                       kd:kd + stride * (do - 1) + 1:stride,
                       kh:kh + stride * (ho - 1) + 1:stride,
                       kw:kw + stride * (wo - 1) + 1:stride,
                       :])
    col = jnp.concatenate(cols, axis=-1)            # (n, do, ho, wo, 27*c)
    return col.reshape(n * do * ho * wo, 27 * c), (n, do, ho, wo)


def conv3d_leaky_relu(x, w, b, stride, alpha):
    """x: (N, D, H, W, Cin) NDHWC. w: (Cout, Cin, 3, 3, 3) torch layout. b: (Cout,)."""
    cout = w.shape[0]
    # pad=[1,1,1,1,1,1] in the torch forward == symmetric zero-pad of 1 on D,H,W.
    xp = jnp.pad(x, ((0, 0), (1, 1), (1, 1), (1, 1), (0, 0)))
    # bf16 matmul operands (f32 accumulation in-kernel) halve both the MXU
    # passes and the HBM traffic of the im2col slab.
    patches, (n, do, ho, wo) = _im2col(xp.astype(jnp.bfloat16), stride)
    m, kdim = patches.shape
    # (Cout, Cin, kd, kh, kw) -> (kd, kh, kw, Cin, Cout) -> (27*Cin, Cout)
    wk = jnp.transpose(w, (2, 3, 4, 1, 0)).reshape(kdim, cout).astype(jnp.bfloat16)

    tm, tk, nk = _plan_tiles(m, kdim, cout, in_bytes=2)
    m_pad = _round_up(m, tm)
    k_pad = tk * nk
    if m_pad != m or k_pad != kdim:
        patches = jnp.pad(patches, ((0, m_pad - m), (0, k_pad - kdim)))
    if k_pad != kdim:
        wk = jnp.pad(wk, ((0, k_pad - kdim), (0, 0)))

    kernel = functools.partial(_conv_mm_kernel, alpha, nk, tk)
    # TODO(synk): for cout < 128 the output stores are lane-masked; a >=128-lane
    # output regrouping (or in-kernel halo-DMA im2col) could shave the
    # remaining store/HBM overhead on the cout=16/32 levels.
    out = pl.pallas_call(
        kernel,
        out_shape=jax.ShapeDtypeStruct((m_pad, cout), jnp.float32),
        grid_spec=pltpu.PrefetchScalarGridSpec(
            num_scalar_prefetch=0,
            grid=(m_pad // tm, nk),
            in_specs=[
                pl.BlockSpec((tm, tk), lambda i, k: (i, k)),        # patches
                pl.BlockSpec((k_pad, cout), lambda i, k: (0, 0)),   # weights (VMEM-resident)
                pl.BlockSpec((1, cout), lambda i, k: (0, 0)),       # bias
            ],
            out_specs=pl.BlockSpec((tm, cout), lambda i, k: (i, 0)),
        ),
        compiler_params=pltpu.CompilerParams(
            dimension_semantics=("parallel", "arbitrary"),
            vmem_limit_bytes=_VMEM_LIMIT),
    )(patches, wk, b.reshape(1, cout).astype(jnp.float32))

    return out[:m].reshape(n, do, ho, wo, cout)


# ----------------------------------------------------------------------------
# Parameter init (matches RRNFeaturePyramid.__init__ shapes; deterministic).
# ----------------------------------------------------------------------------
def init_params(key, num_channels=3, num_levels=3, channel_multiplier=1.0):
    filters = ((3, 16), (3, 32), (3, 64), (3, 96), (3, 128), (3, 196))[:num_levels]
    params = []
    c = num_channels
    for _level, (num_layers, num_filters) in enumerate(filters):
        group = []
        for _i in range(num_layers):
            cout = int(num_filters * channel_multiplier)
            key, wkey, bkey = jax.random.split(key, 3)
            fan_in = float(c * 3 * 3 * 3)
            w = jax.random.normal(wkey, (cout, c, 3, 3, 3), jnp.float32) / jnp.sqrt(fan_in)
            b = 0.01 * jax.random.normal(bkey, (cout,), jnp.float32)
            group.append((w, b))
            c = cout
        params.append(group)
    return params


# ----------------------------------------------------------------------------
# Full forward pass (matches RRNFeaturePyramid.forward, defaults:
# pyramid_resolution='half', level1_num_1x1=0 -> pad + 3x3x3 conv everywhere).
# ----------------------------------------------------------------------------
def rrn_feature_pyramid(x_ncdhw, params, alpha=LEAKY_ALPHA,
                        split_features_by_sample=False):
    x = jnp.transpose(x_ncdhw, (0, 2, 3, 4, 1))  # NCDHW -> NDHWC
    x = x * 2.0 - 1.0
    features = []
    for group in params:
        for i, (w, b) in enumerate(group):
            stride = 2 if i == 0 else 1  # pyramid_resolution='half'
            x = conv3d_leaky_relu(x, w, b, stride, alpha)
        features.append(jnp.transpose(x, (0, 4, 1, 2, 3)))  # back to NCDHW
    if split_features_by_sample:
        n = features[0].shape[0]
        features = [[f[i:i + 1] for f in features] for i in range(n)]
    return features


# ----------------------------------------------------------------------------
# Pure-JAX reference (f32 lax conv) for correctness checking.
# ----------------------------------------------------------------------------
def ref_forward(x_ncdhw, params, alpha=LEAKY_ALPHA):
    x = x_ncdhw * 2.0 - 1.0
    feats = []
    for group in params:
        for i, (w, b) in enumerate(group):
            stride = 2 if i == 0 else 1
            x = jnp.pad(x, ((0, 0), (0, 0), (1, 1), (1, 1), (1, 1)))
            x = jax.lax.conv_general_dilated(
                x, w, (stride, stride, stride), 'VALID',
                dimension_numbers=('NCDHW', 'OIDHW', 'NCDHW'))
            x = x + b.reshape(1, -1, 1, 1, 1)
            x = jnp.where(x >= 0, x, alpha * x)
        feats.append(x)
    return feats


if __name__ == "__main__":
    key = jax.random.PRNGKey(0)
    pkey, xkey = jax.random.split(key)

    num_levels = 3
    params = init_params(pkey, num_channels=3, num_levels=num_levels)
    # NCDHW input, like the PyTorch module (volumetric / video clip).
    x = jax.random.uniform(xkey, (2, 3, 16, 16, 16), jnp.float32)

    fwd = jax.jit(lambda inp: rrn_feature_pyramid(inp, params, alpha=LEAKY_ALPHA))
    feats = fwd(x)
    feats = [jax.block_until_ready(f) for f in feats]

    refs = ref_forward(x, params, alpha=LEAKY_ALPHA)
    for f, r in zip(feats, refs):
        assert f.shape == r.shape, (f.shape, r.shape)
        max_err = float(jnp.max(jnp.abs(f - r)))
        scale = float(jnp.max(jnp.abs(r))) + 1e-6
        # bf16 matmul operands with f32 accumulation: allow a few % of max|ref|.
        assert max_err <= 5e-2 * max(1.0, scale), (max_err, scale)

    print("KERNEL_OK")
</pallas_src>

<mosaic_0001>
module attributes {stable_mosaic.version = 11 : i64} {
  func.func @_conv_mm_kernel(%arg0: i32, %arg1: i32, %arg2: memref<512x81xbf16, #tpu.memory_space<vmem>>, %arg3: memref<81x16xbf16, #tpu.memory_space<vmem>>, %arg4: memref<1x16xf32, #tpu.memory_space<vmem>>, %arg5: memref<512x16xf32, #tpu.memory_space<vmem>>) attributes {dimension_semantics = [#tpu.dimension_semantics<parallel>, #tpu.dimension_semantics<arbitrary>], iteration_bounds = array<i64: 2, 1>, scalar_prefetch = 0 : i64, scratch_operands = 0 : i64, tpu.core_type = #tpu.core_type<tc>, window_params = [{transform_indices = @transform_0, window_bounds = array<i64: 512, 81>}, {pipeline_mode = #tpu.pipeline_mode<synchronous>, transform_indices = @transform_1, window_bounds = array<i64: 81, 16>}, {pipeline_mode = #tpu.pipeline_mode<synchronous>, transform_indices = @transform_2, window_bounds = array<i64: 1, 16>}, {transform_indices = @transform_3, window_bounds = array<i64: 512, 16>}]} {
    %c0 = arith.constant 0 : index
    %c0_0 = arith.constant 0 : index
    %0 = vector.load %arg2[%c0, %c0_0] : memref<512x81xbf16, #tpu.memory_space<vmem>>, vector<512x81xbf16>
    %c0_1 = arith.constant 0 : index
    %c0_2 = arith.constant 0 : index
    %1 = vector.load %arg3[%c0_1, %c0_2] : memref<81x16xbf16, #tpu.memory_space<vmem>>, vector<81x16xbf16>
    %cst = arith.constant dense<0.000000e+00> : vector<512x16xf32>
    %2 = tpu.matmul %0, %1, %cst {dimension_numbers = #tpu.dot_dimension_numbers<[1], [0], [0], [1], [0, 0, 1, 1], [], []>} : vector<512x81xbf16>, vector<81x16xbf16>, vector<512x16xf32> -> vector<512x16xf32>
    %c0_3 = arith.constant 0 : index
    %c0_4 = arith.constant 0 : index
    %3 = vector.load %arg4[%c0_3, %c0_4] : memref<1x16xf32, #tpu.memory_space<vmem>>, vector<1x16xf32>
    %4 = vector.broadcast %3 : vector<1x16xf32> to vector<512x16xf32>
    %5 = arith.addf %2, %4 : vector<512x16xf32>
    %cst_5 = arith.constant 0.000000e+00 : f32
    %6 = vector.broadcast %cst_5 : f32 to vector<512x16xf32>
    %7 = arith.cmpf oge, %5, %6 : vector<512x16xf32>
    %cst_6 = arith.constant 1.000000e-01 : f32
    %8 = vector.broadcast %cst_6 : f32 to vector<512x16xf32>
    %9 = arith.mulf %8, %5 : vector<512x16xf32>
    %10 = arith.select %7, %5, %9 : vector<512x16xi1>, vector<512x16xf32>
    %c0_7 = arith.constant 0 : index
    %c0_8 = arith.constant 0 : index
    %11 = vector.load %arg5[%c0_7, %c0_8] : memref<512x16xf32, #tpu.memory_space<vmem>>, vector<512x16xf32>
    tpu.vector_store %arg5[%c0_7, %c0_8], %10 {strides = array<i32>} : memref<512x16xf32, #tpu.memory_space<vmem>>, vector<512x16xf32>,
    return
  }
  func.func @transform_0(%arg0: i32, %arg1: i32) -> (i32, i32) {
    %c0_i32 = arith.constant 0 : i32
    return %arg0, %arg1 : i32, i32
  }
  func.func @transform_1(%arg0: i32, %arg1: i32) -> (i32, i32) {
    %c0_i32 = arith.constant 0 : i32
    %c0_i32_0 = arith.constant 0 : i32
    %c0_i32_1 = arith.constant 0 : i32
    return %c0_i32, %c0_i32_0 : i32, i32
  }
  func.func @transform_2(%arg0: i32, %arg1: i32) -> (i32, i32) {
    %c0_i32 = arith.constant 0 : i32
    %c0_i32_0 = arith.constant 0 : i32
    %c0_i32_1 = arith.constant 0 : i32
    return %c0_i32, %c0_i32_0 : i32, i32
  }
  func.func @transform_3(%arg0: i32, %arg1: i32) -> (i32, i32) {
    %c0_i32 = arith.constant 0 : i32
    %c0_i32_0 = arith.constant 0 : i32
    return %arg0, %c0_i32 : i32, i32
  }
}

module attributes {stable_mosaic.version = 11 : i64} {
  func.func @_conv_mm_kernel(%arg0: i32, %arg1: i32, %arg2: memref<512x432xbf16, #tpu.memory_space<vmem>>, %arg3: memref<432x16xbf16, #tpu.memory_space<vmem>>, %arg4: memref<1x16xf32, #tpu.memory_space<vmem>>, %arg5: memref<512x16xf32, #tpu.memory_space<vmem>>) attributes {dimension_semantics = [#tpu.dimension_semantics<parallel>, #tpu.dimension_semantics<arbitrary>], iteration_bounds = array<i64: 2, 1>, scalar_prefetch = 0 : i64, scratch_operands = 0 : i64, tpu.core_type = #tpu.core_type<tc>, window_params = [{transform_indices = @transform_0, window_bounds = array<i64: 512, 432>}, {pipeline_mode = #tpu.pipeline_mode<synchronous>, transform_indices = @transform_1, window_bounds = array<i64: 432, 16>}, {pipeline_mode = #tpu.pipeline_mode<synchronous>, transform_indices = @transform_2, window_bounds = array<i64: 1, 16>}, {transform_indices = @transform_3, window_bounds = array<i64: 512, 16>}]} {
    %c0 = arith.constant 0 : index
    %c0_0 = arith.constant 0 : index
    %0 = vector.load %arg2[%c0, %c0_0] : memref<512x432xbf16, #tpu.memory_space<vmem>>, vector<512x432xbf16>
    %c0_1 = arith.constant 0 : index
    %c0_2 = arith.constant 0 : index
    %1 = vector.load %arg3[%c0_1, %c0_2] : memref<432x16xbf16, #tpu.memory_space<vmem>>, vector<432x16xbf16>
    %cst = arith.constant dense<0.000000e+00> : vector<512x16xf32>
    %2 = tpu.matmul %0, %1, %cst {dimension_numbers = #tpu.dot_dimension_numbers<[1], [0], [0], [1], [0, 0, 1, 1], [], []>} : vector<512x432xbf16>, vector<432x16xbf16>, vector<512x16xf32> -> vector<512x16xf32>
    %c0_3 = arith.constant 0 : index
    %c0_4 = arith.constant 0 : index
    %3 = vector.load %arg4[%c0_3, %c0_4] : memref<1x16xf32, #tpu.memory_space<vmem>>, vector<1x16xf32>
    %4 = vector.broadcast %3 : vector<1x16xf32> to vector<512x16xf32>
    %5 = arith.addf %2, %4 : vector<512x16xf32>
    %cst_5 = arith.constant 0.000000e+00 : f32
    %6 = vector.broadcast %cst_5 : f32 to vector<512x16xf32>
    %7 = arith.cmpf oge, %5, %6 : vector<512x16xf32>
    %cst_6 = arith.constant 1.000000e-01 : f32
    %8 = vector.broadcast %cst_6 : f32 to vector<512x16xf32>
    %9 = arith.mulf %8, %5 : vector<512x16xf32>
    %10 = arith.select %7, %5, %9 : vector<512x16xi1>, vector<512x16xf32>
    %c0_7 = arith.constant 0 : index
    %c0_8 = arith.constant 0 : index
    %11 = vector.load %arg5[%c0_7, %c0_8] : memref<512x16xf32, #tpu.memory_space<vmem>>, vector<512x16xf32>
    tpu.vector_store %arg5[%c0_7, %c0_8], %10 {strides = array<i32>} : memref<512x16xf32, #tpu.memory_space<vmem>>, vector<512x16xf32>,
    return
  }
  func.func @transform_0(%arg0: i32, %arg1: i32) -> (i32, i32) {
    %c0_i32 = arith.constant 0 : i32
    return %arg0, %arg1 : i32, i32
  }
  func.func @transform_1(%arg0: i32, %arg1: i32) -> (i32, i32) {
    %c0_i32 = arith.constant 0 : i32
    %c0_i32_0 = arith.constant 0 : i32
    %c0_i32_1 = arith.constant 0 : i32
    return %c0_i32, %c0_i32_0 : i32, i32
  }
  func.func @transform_2(%arg0: i32, %arg1: i32) -> (i32, i32) {
    %c0_i32 = arith.constant 0 : i32
    %c0_i32_0 = arith.constant 0 : i32
    %c0_i32_1 = arith.constant 0 : i32
    return %c0_i32, %c0_i32_0 : i32, i32
  }
  func.func @transform_3(%arg0: i32, %arg1: i32) -> (i32, i32) {
    %c0_i32 = arith.constant 0 : i32
    %c0_i32_0 = arith.constant 0 : i32
    return %arg0, %c0_i32 : i32, i32
  }
}

module attributes {stable_mosaic.version = 11 : i64} {
  func.func @_conv_mm_kernel(%arg0: i32, %arg1: i32, %arg2: memref<128x432xbf16, #tpu.memory_space<vmem>>, %arg3: memref<432x32xbf16, #tpu.memory_space<vmem>>, %arg4: memref<1x32xf32, #tpu.memory_space<vmem>>, %arg5: memref<128x32xf32, #tpu.memory_space<vmem>>) attributes {dimension_semantics = [#tpu.dimension_semantics<parallel>, #tpu.dimension_semantics<arbitrary>], iteration_bounds = array<i64: 1, 1>, scalar_prefetch = 0 : i64, scratch_operands = 0 : i64, tpu.core_type = #tpu.core_type<tc>, window_params = [{transform_indices = @transform_0, window_bounds = array<i64: 128, 432>}, {pipeline_mode = #tpu.pipeline_mode<synchronous>, transform_indices = @transform_1, window_bounds = array<i64: 432, 32>}, {pipeline_mode = #tpu.pipeline_mode<synchronous>, transform_indices = @transform_2, window_bounds = array<i64: 1, 32>}, {transform_indices = @transform_3, window_bounds = array<i64: 128, 32>}]} {
    %c0 = arith.constant 0 : index
    %c0_0 = arith.constant 0 : index
    %0 = vector.load %arg2[%c0, %c0_0] : memref<128x432xbf16, #tpu.memory_space<vmem>>, vector<128x432xbf16>
    %c0_1 = arith.constant 0 : index
    %c0_2 = arith.constant 0 : index
    %1 = vector.load %arg3[%c0_1, %c0_2] : memref<432x32xbf16, #tpu.memory_space<vmem>>, vector<432x32xbf16>
    %cst = arith.constant dense<0.000000e+00> : vector<128x32xf32>
    %2 = tpu.matmul %0, %1, %cst {dimension_numbers = #tpu.dot_dimension_numbers<[1], [0], [0], [1], [0, 0, 1, 1], [], []>} : vector<128x432xbf16>, vector<432x32xbf16>, vector<128x32xf32> -> vector<128x32xf32>
    %c0_3 = arith.constant 0 : index
    %c0_4 = arith.constant 0 : index
    %3 = vector.load %arg4[%c0_3, %c0_4] : memref<1x32xf32, #tpu.memory_space<vmem>>, vector<1x32xf32>
    %4 = vector.broadcast %3 : vector<1x32xf32> to vector<128x32xf32>
    %5 = arith.addf %2, %4 : vector<128x32xf32>
    %cst_5 = arith.constant 0.000000e+00 : f32
    %6 = vector.broadcast %cst_5 : f32 to vector<128x32xf32>
    %7 = arith.cmpf oge, %5, %6 : vector<128x32xf32>
    %cst_6 = arith.constant 1.000000e-01 : f32
    %8 = vector.broadcast %cst_6 : f32 to vector<128x32xf32>
    %9 = arith.mulf %8, %5 : vector<128x32xf32>
    %10 = arith.select %7, %5, %9 : vector<128x32xi1>, vector<128x32xf32>
    %c0_7 = arith.constant 0 : index
    %c0_8 = arith.constant 0 : index
    %11 = vector.load %arg5[%c0_7, %c0_8] : memref<128x32xf32, #tpu.memory_space<vmem>>, vector<128x32xf32>
    tpu.vector_store %arg5[%c0_7, %c0_8], %10 {strides = array<i32>} : memref<128x32xf32, #tpu.memory_space<vmem>>, vector<128x32xf32>,
    return
  }
  func.func @transform_0(%arg0: i32, %arg1: i32) -> (i32, i32) {
    %c0_i32 = arith.constant 0 : i32
    return %arg0, %arg1 : i32, i32
  }
  func.func @transform_1(%arg0: i32, %arg1: i32) -> (i32, i32) {
    %c0_i32 = arith.constant 0 : i32
    %c0_i32_0 = arith.constant 0 : i32
    %c0_i32_1 = arith.constant 0 : i32
    return %c0_i32, %c0_i32_0 : i32, i32
  }
  func.func @transform_2(%arg0: i32, %arg1: i32) -> (i32, i32) {
    %c0_i32 = arith.constant 0 : i32
    %c0_i32_0 = arith.constant 0 : i32
    %c0_i32_1 = arith.constant 0 : i32
    return %c0_i32, %c0_i32_0 : i32, i32
  }
  func.func @transform_3(%arg0: i32, %arg1: i32) -> (i32, i32) {
    %c0_i32 = arith.constant 0 : i32
    %c0_i32_0 = arith.constant 0 : i32
    return %arg0, %c0_i32 : i32, i32
  }
}

module attributes {stable_mosaic.version = 11 : i64} {
  func.func @_conv_mm_kernel(%arg0: i32, %arg1: i32, %arg2: memref<128x864xbf16, #tpu.memory_space<vmem>>, %arg3: memref<864x32xbf16, #tpu.memory_space<vmem>>, %arg4: memref<1x32xf32, #tpu.memory_space<vmem>>, %arg5: memref<128x32xf32, #tpu.memory_space<vmem>>) attributes {dimension_semantics = [#tpu.dimension_semantics<parallel>, #tpu.dimension_semantics<arbitrary>], iteration_bounds = array<i64: 1, 1>, scalar_prefetch = 0 : i64, scratch_operands = 0 : i64, tpu.core_type = #tpu.core_type<tc>, window_params = [{transform_indices = @transform_0, window_bounds = array<i64: 128, 864>}, {pipeline_mode = #tpu.pipeline_mode<synchronous>, transform_indices = @transform_1, window_bounds = array<i64: 864, 32>}, {pipeline_mode = #tpu.pipeline_mode<synchronous>, transform_indices = @transform_2, window_bounds = array<i64: 1, 32>}, {transform_indices = @transform_3, window_bounds = array<i64: 128, 32>}]} {
    %c0 = arith.constant 0 : index
    %c0_0 = arith.constant 0 : index
    %0 = vector.load %arg2[%c0, %c0_0] : memref<128x864xbf16, #tpu.memory_space<vmem>>, vector<128x864xbf16>
    %c0_1 = arith.constant 0 : index
    %c0_2 = arith.constant 0 : index
    %1 = vector.load %arg3[%c0_1, %c0_2] : memref<864x32xbf16, #tpu.memory_space<vmem>>, vector<864x32xbf16>
    %cst = arith.constant dense<0.000000e+00> : vector<128x32xf32>
    %2 = tpu.matmul %0, %1, %cst {dimension_numbers = #tpu.dot_dimension_numbers<[1], [0], [0], [1], [0, 0, 1, 1], [], []>} : vector<128x864xbf16>, vector<864x32xbf16>, vector<128x32xf32> -> vector<128x32xf32>
    %c0_3 = arith.constant 0 : index
    %c0_4 = arith.constant 0 : index
    %3 = vector.load %arg4[%c0_3, %c0_4] : memref<1x32xf32, #tpu.memory_space<vmem>>, vector<1x32xf32>
    %4 = vector.broadcast %3 : vector<1x32xf32> to vector<128x32xf32>
    %5 = arith.addf %2, %4 : vector<128x32xf32>
    %cst_5 = arith.constant 0.000000e+00 : f32
    %6 = vector.broadcast %cst_5 : f32 to vector<128x32xf32>
    %7 = arith.cmpf oge, %5, %6 : vector<128x32xf32>
    %cst_6 = arith.constant 1.000000e-01 : f32
    %8 = vector.broadcast %cst_6 : f32 to vector<128x32xf32>
    %9 = arith.mulf %8, %5 : vector<128x32xf32>
    %10 = arith.select %7, %5, %9 : vector<128x32xi1>, vector<128x32xf32>
    %c0_7 = arith.constant 0 : index
    %c0_8 = arith.constant 0 : index
    %11 = vector.load %arg5[%c0_7, %c0_8] : memref<128x32xf32, #tpu.memory_space<vmem>>, vector<128x32xf32>
    tpu.vector_store %arg5[%c0_7, %c0_8], %10 {strides = array<i32>} : memref<128x32xf32, #tpu.memory_space<vmem>>, vector<128x32xf32>,
    return
  }
  func.func @transform_0(%arg0: i32, %arg1: i32) -> (i32, i32) {
    %c0_i32 = arith.constant 0 : i32
    return %arg0, %arg1 : i32, i32
  }
  func.func @transform_1(%arg0: i32, %arg1: i32) -> (i32, i32) {
    %c0_i32 = arith.constant 0 : i32
    %c0_i32_0 = arith.constant 0 : i32
    %c0_i32_1 = arith.constant 0 : i32
    return %c0_i32, %c0_i32_0 : i32, i32
  }
  func.func @transform_2(%arg0: i32, %arg1: i32) -> (i32, i32) {
    %c0_i32 = arith.constant 0 : i32
    %c0_i32_0 = arith.constant 0 : i32
    %c0_i32_1 = arith.constant 0 : i32
    return %c0_i32, %c0_i32_0 : i32, i32
  }
  func.func @transform_3(%arg0: i32, %arg1: i32) -> (i32, i32) {
    %c0_i32 = arith.constant 0 : i32
    %c0_i32_0 = arith.constant 0 : i32
    return %arg0, %c0_i32 : i32, i32
  }
}

module attributes {stable_mosaic.version = 11 : i64} {
  func.func @_conv_mm_kernel(%arg0: i32, %arg1: i32, %arg2: memref<16x864xbf16, #tpu.memory_space<vmem>>, %arg3: memref<864x64xbf16, #tpu.memory_space<vmem>>, %arg4: memref<1x64xf32, #tpu.memory_space<vmem>>, %arg5: memref<16x64xf32, #tpu.memory_space<vmem>>) attributes {dimension_semantics = [#tpu.dimension_semantics<parallel>, #tpu.dimension_semantics<arbitrary>], iteration_bounds = array<i64: 1, 1>, scalar_prefetch = 0 : i64, scratch_operands = 0 : i64, tpu.core_type = #tpu.core_type<tc>, window_params = [{transform_indices = @transform_0, window_bounds = array<i64: 16, 864>}, {pipeline_mode = #tpu.pipeline_mode<synchronous>, transform_indices = @transform_1, window_bounds = array<i64: 864, 64>}, {pipeline_mode = #tpu.pipeline_mode<synchronous>, transform_indices = @transform_2, window_bounds = array<i64: 1, 64>}, {transform_indices = @transform_3, window_bounds = array<i64: 16, 64>}]} {
    %c0 = arith.constant 0 : index
    %c0_0 = arith.constant 0 : index
    %0 = vector.load %arg2[%c0, %c0_0] : memref<16x864xbf16, #tpu.memory_space<vmem>>, vector<16x864xbf16>
    %c0_1 = arith.constant 0 : index
    %c0_2 = arith.constant 0 : index
    %1 = vector.load %arg3[%c0_1, %c0_2] : memref<864x64xbf16, #tpu.memory_space<vmem>>, vector<864x64xbf16>
    %cst = arith.constant dense<0.000000e+00> : vector<16x64xf32>
    %2 = tpu.matmul %0, %1, %cst {dimension_numbers = #tpu.dot_dimension_numbers<[1], [0], [0], [1], [0, 0, 1, 1], [], []>} : vector<16x864xbf16>, vector<864x64xbf16>, vector<16x64xf32> -> vector<16x64xf32>
    %c0_3 = arith.constant 0 : index
    %c0_4 = arith.constant 0 : index
    %3 = vector.load %arg4[%c0_3, %c0_4] : memref<1x64xf32, #tpu.memory_space<vmem>>, vector<1x64xf32>
    %4 = vector.broadcast %3 : vector<1x64xf32> to vector<16x64xf32>
    %5 = arith.addf %2, %4 : vector<16x64xf32>
    %cst_5 = arith.constant 0.000000e+00 : f32
    %6 = vector.broadcast %cst_5 : f32 to vector<16x64xf32>
    %7 = arith.cmpf oge, %5, %6 : vector<16x64xf32>
    %cst_6 = arith.constant 1.000000e-01 : f32
    %8 = vector.broadcast %cst_6 : f32 to vector<16x64xf32>
    %9 = arith.mulf %8, %5 : vector<16x64xf32>
    %10 = arith.select %7, %5, %9 : vector<16x64xi1>, vector<16x64xf32>
    %c0_7 = arith.constant 0 : index
    %c0_8 = arith.constant 0 : index
    %11 = vector.load %arg5[%c0_7, %c0_8] : memref<16x64xf32, #tpu.memory_space<vmem>>, vector<16x64xf32>
    tpu.vector_store %arg5[%c0_7, %c0_8], %10 {strides = array<i32>} : memref<16x64xf32, #tpu.memory_space<vmem>>, vector<16x64xf32>,
    return
  }
  func.func @transform_0(%arg0: i32, %arg1: i32) -> (i32, i32) {
    %c0_i32 = arith.constant 0 : i32
    return %arg0, %arg1 : i32, i32
  }
  func.func @transform_1(%arg0: i32, %arg1: i32) -> (i32, i32) {
    %c0_i32 = arith.constant 0 : i32
    %c0_i32_0 = arith.constant 0 : i32
    %c0_i32_1 = arith.constant 0 : i32
    return %c0_i32, %c0_i32_0 : i32, i32
  }
  func.func @transform_2(%arg0: i32, %arg1: i32) -> (i32, i32) {
    %c0_i32 = arith.constant 0 : i32
    %c0_i32_0 = arith.constant 0 : i32
    %c0_i32_1 = arith.constant 0 : i32
    return %c0_i32, %c0_i32_0 : i32, i32
  }
  func.func @transform_3(%arg0: i32, %arg1: i32) -> (i32, i32) {
    %c0_i32 = arith.constant 0 : i32
    %c0_i32_0 = arith.constant 0 : i32
    return %arg0, %c0_i32 : i32, i32
  }
}

module attributes {stable_mosaic.version = 11 : i64} {
  func.func @_conv_mm_kernel(%arg0: i32, %arg1: i32, %arg2: memref<16x1728xbf16, #tpu.memory_space<vmem>>, %arg3: memref<1728x64xbf16, #tpu.memory_space<vmem>>, %arg4: memref<1x64xf32, #tpu.memory_space<vmem>>, %arg5: memref<16x64xf32, #tpu.memory_space<vmem>>) attributes {dimension_semantics = [#tpu.dimension_semantics<parallel>, #tpu.dimension_semantics<arbitrary>], iteration_bounds = array<i64: 1, 1>, scalar_prefetch = 0 : i64, scratch_operands = 0 : i64, tpu.core_type = #tpu.core_type<tc>, window_params = [{transform_indices = @transform_0, window_bounds = array<i64: 16, 1728>}, {pipeline_mode = #tpu.pipeline_mode<synchronous>, transform_indices = @transform_1, window_bounds = array<i64: 1728, 64>}, {pipeline_mode = #tpu.pipeline_mode<synchronous>, transform_indices = @transform_2, window_bounds = array<i64: 1, 64>}, {transform_indices = @transform_3, window_bounds = array<i64: 16, 64>}]} {
    %c0 = arith.constant 0 : index
    %c0_0 = arith.constant 0 : index
    %0 = vector.load %arg2[%c0, %c0_0] : memref<16x1728xbf16, #tpu.memory_space<vmem>>, vector<16x1728xbf16>
    %c0_1 = arith.constant 0 : index
    %c0_2 = arith.constant 0 : index
    %1 = vector.load %arg3[%c0_1, %c0_2] : memref<1728x64xbf16, #tpu.memory_space<vmem>>, vector<1728x64xbf16>
    %cst = arith.constant dense<0.000000e+00> : vector<16x64xf32>
    %2 = tpu.matmul %0, %1, %cst {dimension_numbers = #tpu.dot_dimension_numbers<[1], [0], [0], [1], [0, 0, 1, 1], [], []>} : vector<16x1728xbf16>, vector<1728x64xbf16>, vector<16x64xf32> -> vector<16x64xf32>
    %c0_3 = arith.constant 0 : index
    %c0_4 = arith.constant 0 : index
    %3 = vector.load %arg4[%c0_3, %c0_4] : memref<1x64xf32, #tpu.memory_space<vmem>>, vector<1x64xf32>
    %4 = vector.broadcast %3 : vector<1x64xf32> to vector<16x64xf32>
    %5 = arith.addf %2, %4 : vector<16x64xf32>
    %cst_5 = arith.constant 0.000000e+00 : f32
    %6 = vector.broadcast %cst_5 : f32 to vector<16x64xf32>
    %7 = arith.cmpf oge, %5, %6 : vector<16x64xf32>
    %cst_6 = arith.constant 1.000000e-01 : f32
    %8 = vector.broadcast %cst_6 : f32 to vector<16x64xf32>
    %9 = arith.mulf %8, %5 : vector<16x64xf32>
    %10 = arith.select %7, %5, %9 : vector<16x64xi1>, vector<16x64xf32>
    %c0_7 = arith.constant 0 : index
    %c0_8 = arith.constant 0 : index
    %11 = vector.load %arg5[%c0_7, %c0_8] : memref<16x64xf32, #tpu.memory_space<vmem>>, vector<16x64xf32>
    tpu.vector_store %arg5[%c0_7, %c0_8], %10 {strides = array<i32>} : memref<16x64xf32, #tpu.memory_space<vmem>>, vector<16x64xf32>,
    return
  }
  func.func @transform_0(%arg0: i32, %arg1: i32) -> (i32, i32) {
    %c0_i32 = arith.constant 0 : i32
    return %arg0, %arg1 : i32, i32
  }
  func.func @transform_1(%arg0: i32, %arg1: i32) -> (i32, i32) {
    %c0_i32 = arith.constant 0 : i32
    %c0_i32_0 = arith.constant 0 : i32
    %c0_i32_1 = arith.constant 0 : i32
    return %c0_i32, %c0_i32_0 : i32, i32
  }
  func.func @transform_2(%arg0: i32, %arg1: i32) -> (i32, i32) {
    %c0_i32 = arith.constant 0 : i32
    %c0_i32_0 = arith.constant 0 : i32
    %c0_i32_1 = arith.constant 0 : i32
    return %c0_i32, %c0_i32_0 : i32, i32
  }
  func.func @transform_3(%arg0: i32, %arg1: i32) -> (i32, i32) {
    %c0_i32 = arith.constant 0 : i32
    %c0_i32_0 = arith.constant 0 : i32
    return %arg0, %c0_i32 : i32, i32
  }
}

module attributes {stable_mosaic.version = 11 : i64} {
  func.func @_conv_mm_kernel(%arg0: i32, %arg1: i32, %arg2: memref<16x1728xbf16, #tpu.memory_space<vmem>>, %arg3: memref<1728x64xbf16, #tpu.memory_space<vmem>>, %arg4: memref<1x64xf32, #tpu.memory_space<vmem>>, %arg5: memref<16x64xf32, #tpu.memory_space<vmem>>) attributes {dimension_semantics = [#tpu.dimension_semantics<parallel>, #tpu.dimension_semantics<arbitrary>], iteration_bounds = array<i64: 1, 1>, scalar_prefetch = 0 : i64, scratch_operands = 0 : i64, tpu.core_type = #tpu.core_type<tc>, window_params = [{transform_indices = @transform_0, window_bounds = array<i64: 16, 1728>}, {pipeline_mode = #tpu.pipeline_mode<synchronous>, transform_indices = @transform_1, window_bounds = array<i64: 1728, 64>}, {pipeline_mode = #tpu.pipeline_mode<synchronous>, transform_indices = @transform_2, window_bounds = array<i64: 1, 64>}, {transform_indices = @transform_3, window_bounds = array<i64: 16, 64>}]} {
    %c0 = arith.constant 0 : index
    %c0_0 = arith.constant 0 : index
    %0 = vector.load %arg2[%c0, %c0_0] : memref<16x1728xbf16, #tpu.memory_space<vmem>>, vector<16x1728xbf16>
    %c0_1 = arith.constant 0 : index
    %c0_2 = arith.constant 0 : index
    %1 = vector.load %arg3[%c0_1, %c0_2] : memref<1728x64xbf16, #tpu.memory_space<vmem>>, vector<1728x64xbf16>
    %cst = arith.constant dense<0.000000e+00> : vector<16x64xf32>
    %2 = tpu.matmul %0, %1, %cst {dimension_numbers = #tpu.dot_dimension_numbers<[1], [0], [0], [1], [0, 0, 1, 1], [], []>} : vector<16x1728xbf16>, vector<1728x64xbf16>, vector<16x64xf32> -> vector<16x64xf32>
    %c0_3 = arith.constant 0 : index
    %c0_4 = arith.constant 0 : index
    %3 = vector.load %arg4[%c0_3, %c0_4] : memref<1x64xf32, #tpu.memory_space<vmem>>, vector<1x64xf32>
    %4 = vector.broadcast %3 : vector<1x64xf32> to vector<16x64xf32>
    %5 = arith.addf %2, %4 : vector<16x64xf32>
    %cst_5 = arith.constant 0.000000e+00 : f32
    %6 = vector.broadcast %cst_5 : f32 to vector<16x64xf32>
    %7 = arith.cmpf oge, %5, %6 : vector<16x64xf32>
    %cst_6 = arith.constant 1.000000e-01 : f32
    %8 = vector.broadcast %cst_6 : f32 to vector<16x64xf32>
    %9 = arith.mulf %8, %5 : vector<16x64xf32>
    %10 = arith.select %7, %5, %9 : vector<16x64xi1>, vector<16x64xf32>
    %c0_7 = arith.constant 0 : index
    %c0_8 = arith.constant 0 : index
    %11 = vector.load %arg5[%c0_7, %c0_8] : memref<16x64xf32, #tpu.memory_space<vmem>>, vector<16x64xf32>
    tpu.vector_store %arg5[%c0_7, %c0_8], %10 {strides = array<i32>} : memref<16x64xf32, #tpu.memory_space<vmem>>, vector<16x64xf32>,
    return
  }
  func.func @transform_0(%arg0: i32, %arg1: i32) -> (i32, i32) {
    %c0_i32 = arith.constant 0 : i32
    return %arg0, %arg1 : i32, i32
  }
  func.func @transform_1(%arg0: i32, %arg1: i32) -> (i32, i32) {
    %c0_i32 = arith.constant 0 : i32
    %c0_i32_0 = arith.constant 0 : i32
    %c0_i32_1 = arith.constant 0 : i32
    return %c0_i32, %c0_i32_0 : i32, i32
  }
  func.func @transform_2(%arg0: i32, %arg1: i32) -> (i32, i32) {
    %c0_i32 = arith.constant 0 : i32
    %c0_i32_0 = arith.constant 0 : i32
    %c0_i32_1 = arith.constant 0 : i32
    return %c0_i32, %c0_i32_0 : i32, i32
  }
  func.func @transform_3(%arg0: i32, %arg1: i32) -> (i32, i32) {
    %c0_i32 = arith.constant 0 : i32
    %c0_i32_0 = arith.constant 0 : i32
    return %arg0, %c0_i32 : i32, i32
  }
}

</mosaic_0001>

<bundles_post_ra>
// kernel: _lambda_.9
= control target key start
LH: loop header
LB: loop body
LE: loop exit
PB: predicated region body
PF: predicated region fallthrough
CT: control target
= control target key end

     0   :  { %s1384_s12 = smov 0   ;;  %s1386_s13 = smov 0   ;;  %s1707_s0 = inlined_call_operand.vmem [shape: bf16[1024,81], index: 0, kind: input, shape index: {}]   ;;  %s1708_s1 = inlined_call_operand.vmem [shape: bf16[81,16], index: 1, kind: input, shape index: {}]   ;;  %s1709_s2 = inlined_call_operand.vmem [shape: f32[1,16], index: 2, kind: input, shape index: {}]   ;;  %s1710_s3 = inlined_call_operand.vmem [shape: f32[1024,16], index: 3, kind: output, shape index: {}]  }
   0x1   :  { %s1388_s14 = smov 0  }
   0x2 LB: > { %s25_s15 = sadd.s32 1, %s1357_s13  ;;  %p1071_p0 = scmp.ge.s32.totalorder %s1361_s14, 1  ;;  %s1361_s14 = sphi %s1388_s14, %s13_s14   ;;  %s1357_s13 = sphi %s1386_s13, %s1712_s13   ;;  %s1353_s12 = sphi %s1384_s12, %s1711_s12  }
   0x3   : > { %p27_p1 = scmp.ge.s32.totalorder %s25_s15, 2  ;;  %p155_p2 = scmp.lt.s32.totalorder %s1361_s14, 3 }
   0x5   : > { %s1714_s15 = smov (%p27_p1, %s25_s15), 0  ;;  %p156_p3 = pnand %p1071_p0, %p155_p2 }
   0x6   : > { %s1072_s20 = sshll.u32 (!%p156_p3), %s1353_s12, 6 }
   0x7   : > { %159 = sbr.rel (%p156_p3) target bundleno = 302 (0x12e), region = 32  ;;  %p183_p4 = scmp.lt.s32.totalorder (!%p156_p3), %s1072_s20, 127 }
   0xc   : > { %v272_v0 = vld [vmem:[%s1708_s1 + $0x28] sm:$0x1]  ;;  %vm567_vm0 = vcmask 1040384   ;;  %v1363_v2 = vmov 0   ;;  %v1294_v6 = vld [vmem:[%s1708_s1 + $0x20] sm:$0xff]  ;;  %v1293_v7 = vld [vmem:[%s1708_s1 + $0x18] sm:$0xff] }
   0xd   : > { %v458_v1 = vunpack.c.l.b16 %v272_v0  ;;  %v569_v3 = vsel %vm567_vm0, 65535, %v1363_v2  ;;  %v1292_v8 = vld [vmem:[%s1708_s1 + $0x10] sm:$0xff]  ;;  %s1716_s20 = smov (!%p183_p4, %s1072_s20), 127  ;;  %v1291_v9 = vld [vmem:[%s1708_s1 + $0x8] sm:$0xff]  ;;  %v1290_v10 = vld [vmem:[%s1708_s1] sm:$0xff]  ;;  %vm470_vm1 = vcmask 662528  }
   0xe   : > { %s1073_s27 = sshll.u32 %s1716_s20, 2  ;;  %v1498_v43 = vld [vmem:[%s1709_s2] ss:$0 sm:$0xff]  ;;  %s1075_s8 = sshll.u32 %s1716_s20, 3  ;;  %vm934_vm2 = vcmask 130048  }
   0xf   : > { %v464_v4 = vpack.c.b16 %v458_v1, %v458_v1  ;;  %s1429_s5 = scalar_lea.vmem %s1707_s0, %s1073_s27  ;;  %s1506_s11 = scalar_lea.vmem %s1710_s3, %s1075_s8 }
  0x10   : > { %v1258_v11 = vld [vmem:[%s1429_s5] sm:$0xff]  ;;  %v1259_v15 = vld [vmem:[%s1429_s5 + $0x8] sm:$0xff]  ;;  %v1260_v19 = vld [vmem:[%s1429_s5 + $0x10] sm:$0xff] }
  0x11   : > { %v571_v5 = vand.u32 %v569_v3, %v464_v4  ;;  %v1266_v12 = vld [vmem:[%s1429_s5 + $0x40] sm:$0xff]  ;;  %v1267_v16 = vld [vmem:[%s1429_s5 + $0x48] sm:$0xff]  ;;  %v1268_v20 = vld [vmem:[%s1429_s5 + $0x50] sm:$0xff] }
  0x12   : > { %v1274_v13 = vld [vmem:[%s1429_s5 + $0x80] sm:$0xff]  ;;  %v1275_v17 = vld [vmem:[%s1429_s5 + $0x88] sm:$0xff]  ;;  %v1276_v21 = vld [vmem:[%s1429_s5 + $0x90] sm:$0xff] }
  0x13   : > { %575 = vmatpush.bf16.msra.mxu0 %v571_v5  ;;  %1295 = vmatpush.bf16.msra.mxu1 %v571_v5  ;;  %v1282_v14 = vld [vmem:[%s1429_s5 + $0xc0] sm:$0xff]  ;;  %v1283_v18 = vld [vmem:[%s1429_s5 + $0xc8] sm:$0xff]  ;;  %v1284_v22 = vld [vmem:[%s1429_s5 + $0xd0] sm:$0xff] }
  0x14   : > { %1296 = vmatpush.bf16.msra.mxu2 %v571_v5  ;;  %1297 = vmatpush.bf16.msra.mxu3 %v571_v5  ;;  %v1261_v23 = vld [vmem:[%s1429_s5 + $0x18] sm:$0xff]  ;;  %v1262_v27 = vld [vmem:[%s1429_s5 + $0x20] sm:$0xff]  ;;  %v1263_v31 = vld [vmem:[%s1429_s5 + $0x28] sm:$0xff] }
  0x15   : > { %v1269_v24 = vld [vmem:[%s1429_s5 + $0x58] sm:$0xff]  ;;  %v1270_v28 = vld [vmem:[%s1429_s5 + $0x60] sm:$0xff]  ;;  %v1271_v32 = vld [vmem:[%s1429_s5 + $0x68] sm:$0xff] }
  0x16   : > { %v1277_v25 = vld [vmem:[%s1429_s5 + $0x98] sm:$0xff]  ;;  %v1278_v29 = vld [vmem:[%s1429_s5 + $0xa0] sm:$0xff]  ;;  %v1279_v33 = vld [vmem:[%s1429_s5 + $0xa8] sm:$0xff] }
  0x17   : > { %576 = vmatpush.bf16.msra.mxu0 %v1294_v6  ;;  %1298 = vmatpush.bf16.msra.mxu1 %v1294_v6  ;;  %v1285_v26 = vld [vmem:[%s1429_s5 + $0xd8] sm:$0xff]  ;;  %v1286_v30 = vld [vmem:[%s1429_s5 + $0xe0] sm:$0xff]  ;;  %v1287_v34 = vld [vmem:[%s1429_s5 + $0xe8] sm:$0xff] }
  0x18   : > { %1299 = vmatpush.bf16.msra.mxu2 %v1294_v6  ;;  %1300 = vmatpush.bf16.msra.mxu3 %v1294_v6  ;;  %v1264_v35 = vld [vmem:[%s1429_s5 + $0x30] sm:$0xff]  ;;  %v1265_v39 = vld [vmem:[%s1429_s5 + $0x38] sm:$0xff] }
  0x19   : > { %v1272_v36 = vld [vmem:[%s1429_s5 + $0x70] sm:$0xff]  ;;  %v1273_v40 = vld [vmem:[%s1429_s5 + $0x78] sm:$0xff] }
  0x1a   : > { %v1280_v37 = vld [vmem:[%s1429_s5 + $0xb0] sm:$0xff]  ;;  %v1281_v41 = vld [vmem:[%s1429_s5 + $0xb8] sm:$0xff] }
  0x1b   : > { %577 = vmatpush.bf16.msra.mxu0 %v1293_v7  ;;  %1301 = vmatpush.bf16.msra.mxu1 %v1293_v7  ;;  %v1288_v38 = vld [vmem:[%s1429_s5 + $0xf0] sm:$0xff]  ;;  %v1289_v42 = vld [vmem:[%s1429_s5 + $0xf8] sm:$0xff] }
  0x1c   : > { %1302 = vmatpush.bf16.msra.mxu2 %v1293_v7  ;;  %1303 = vmatpush.bf16.msra.mxu3 %v1293_v7 }
  0x1f   : > { %578 = vmatpush.bf16.msra.mxu0 %v1292_v8  ;;  %1304 = vmatpush.bf16.msra.mxu1 %v1292_v8 }
  0x20   : > { %1305 = vmatpush.bf16.msra.mxu2 %v1292_v8  ;;  %1306 = vmatpush.bf16.msra.mxu3 %v1292_v8 }
  0x23   : > { %579 = vmatpush.bf16.msra.mxu0 %v1291_v9  ;;  %1307 = vmatpush.bf16.msra.mxu1 %v1291_v9 }
  0x24   : > { %1308 = vmatpush.bf16.msra.mxu2 %v1291_v9  ;;  %1309 = vmatpush.bf16.msra.mxu3 %v1291_v9 }
  0x27   : > { %580 = vmatpush.bf16.msra.mxu0 %v1290_v10  ;;  %1310 = vmatpush.bf16.msra.mxu1 %v1290_v10 }
  0x28   : > { %1311 = vmatpush.bf16.msra.mxu2 %v1290_v10  ;;  %1312 = vmatpush.bf16.msra.mxu3 %v1290_v10 }
  0x2a   : > { %1224 = vmatmul.msk.bf16.vlgmr.msra.gmra.mxu0 %vm470_vm1, %v1258_v11  ;;  %1232 = vmatmul.msk.bf16.vlgmr.msra.gmra.mxu1 %vm470_vm1, %v1266_v12 }
  0x2b   : > { %1240 = vmatmul.msk.bf16.vlgmr.msra.gmra.mxu2 %vm470_vm1, %v1274_v13  ;;  %1248 = vmatmul.msk.bf16.vlgmr.msra.gmra.mxu3 %vm470_vm1, %v1282_v14 }
  0x3a   : > { %1225 = vmatmul.msk.bf16.gmra.mxu0 %vm470_vm1, %v1259_v15  ;;  %1233 = vmatmul.msk.bf16.gmra.mxu1 %vm470_vm1, %v1267_v16 }
  0x3b   : > { %1241 = vmatmul.msk.bf16.gmra.mxu2 %vm470_vm1, %v1275_v17  ;;  %1249 = vmatmul.msk.bf16.gmra.mxu3 %vm470_vm1, %v1283_v18 }
  0x4a   : > { %1226 = vmatmul.msk.bf16.gmra.mxu0 %vm470_vm1, %v1260_v19  ;;  %1234 = vmatmul.msk.bf16.gmra.mxu1 %vm470_vm1, %v1268_v20 }
  0x4b   : > { %1242 = vmatmul.msk.bf16.gmra.mxu2 %vm470_vm1, %v1276_v21  ;;  %1250 = vmatmul.msk.bf16.gmra.mxu3 %vm470_vm1, %v1284_v22 }
  0x5a   : > { %1227 = vmatmul.msk.bf16.gmra.mxu0 %vm470_vm1, %v1261_v23  ;;  %1235 = vmatmul.msk.bf16.gmra.mxu1 %vm470_vm1, %v1269_v24 }
  0x5b   : > { %1243 = vmatmul.msk.bf16.gmra.mxu2 %vm470_vm1, %v1277_v25  ;;  %1251 = vmatmul.msk.bf16.gmra.mxu3 %vm470_vm1, %v1285_v26 }
  0x6a   : > { %1228 = vmatmul.msk.bf16.gmra.mxu0 %vm470_vm1, %v1262_v27  ;;  %1236 = vmatmul.msk.bf16.gmra.mxu1 %vm470_vm1, %v1270_v28 }
  0x6b   : > { %1244 = vmatmul.msk.bf16.gmra.mxu2 %vm470_vm1, %v1278_v29  ;;  %1252 = vmatmul.msk.bf16.gmra.mxu3 %vm470_vm1, %v1286_v30 }
  0x7a   : > { %1229 = vmatmul.msk.bf16.gmra.mxu0 %vm470_vm1, %v1263_v31  ;;  %1237 = vmatmul.msk.bf16.gmra.mxu1 %vm470_vm1, %v1271_v32 }
  0x7b   : > { %1245 = vmatmul.msk.bf16.gmra.mxu2 %vm470_vm1, %v1279_v33  ;;  %1253 = vmatmul.msk.bf16.gmra.mxu3 %vm470_vm1, %v1287_v34 }
  0x8a   : > { %1230 = vmatmul.msk.bf16.gmra.mxu0 %vm470_vm1, %v1264_v35  ;;  %1238 = vmatmul.msk.bf16.gmra.mxu1 %vm470_vm1, %v1272_v36 }
  0x8b   : > { %1246 = vmatmul.msk.bf16.gmra.mxu2 %vm470_vm1, %v1280_v37  ;;  %1254 = vmatmul.msk.bf16.gmra.mxu3 %vm470_vm1, %v1288_v38 }
  0x9a   : > { %1231 = vmatmul.msk.bf16.gmra.mxu0 %vm470_vm1, %v1265_v39  ;;  %1239 = vmatmul.msk.bf16.gmra.mxu1 %vm470_vm1, %v1273_v40 }
  0x9b   : > { %1247 = vmatmul.msk.bf16.gmra.mxu2 %vm470_vm1, %v1281_v41  ;;  %1255 = vmatmul.msk.bf16.gmra.mxu3 %vm470_vm1, %v1289_v42 }
  0xa7   : > { %v582_v44 = vpop.f32.mrf.mxu0  ;;  %v622_v45 = vpop.f32.mrf.mxu1 }
  0xa8   : > { %v583_v46 = vadd.f32 %v1498_v43, %v582_v44  ;;  %v623_v47 = vadd.f32 %v1498_v43, %v622_v45 }
  0xaa   : > { %vm742_vm3 = vcmp.ge.f32.partialorder %v583_v46, 0.0  ;;  %v806_v48 = vmul.f32 0.1, %v583_v46  ;;  %vm758_vm4 = vcmp.ge.f32.partialorder %v623_v47, 0.0  ;;  %v822_v49 = vmul.f32 0.1, %v623_v47 }
  0xac   : > { %v870_v50 = vsel %vm742_vm3, %v583_v46, %v806_v48  ;;  %v886_v51 = vsel %vm758_vm4, %v623_v47, %v822_v49 }
  0xad   : > { %935 = vst.msk [vmem:[%s1506_s11] sm:$0xff] %vm934_vm2, %v870_v50 }
  0xae   : > { %951 = vst.msk [vmem:[%s1506_s11 + $0x80] sm:$0xff] %vm934_vm2, %v886_v51  ;;  %v662_v52 = vpop.f32.mrf.mxu2  ;;  %v702_v53 = vpop.f32.mrf.mxu3 }
  0xaf   : > { %v663_v54 = vadd.f32 %v1498_v43, %v662_v52  ;;  %v703_v55 = vadd.f32 %v1498_v43, %v702_v53  ;;  %v584_v56 = vpop.f32.mrf.mxu0  ;;  %v624_v57 = vpop.f32.mrf.mxu1 }
  0xb0   : > { %v585_v58 = vadd.f32 %v1498_v43, %v584_v56  ;;  %v625_v59 = vadd.f32 %v1498_v43, %v624_v57 }
  0xb1   : > { %vm774_vm5 = vcmp.ge.f32.partialorder %v663_v54, 0.0  ;;  %v838_v60 = vmul.f32 0.1, %v663_v54  ;;  %vm790_vm6 = vcmp.ge.f32.partialorder %v703_v55, 0.0  ;;  %v854_v61 = vmul.f32 0.1, %v703_v55 }
  0xb2   : > { %vm743_vm7 = vcmp.ge.f32.partialorder %v585_v58, 0.0  ;;  %v807_v62 = vmul.f32 0.1, %v585_v58  ;;  %vm759_vm8 = vcmp.ge.f32.partialorder %v625_v59, 0.0  ;;  %v823_v63 = vmul.f32 0.1, %v625_v59 }
  0xb3   : > { %v902_v0 = vsel %vm774_vm5, %v663_v54, %v838_v60  ;;  %v918_v1 = vsel %vm790_vm6, %v703_v55, %v854_v61 }
  0xb4   : > { %967 = vst.msk [vmem:[%s1506_s11 + $0x100] sm:$0xff] %vm934_vm2, %v902_v0  ;;  %v871_v2 = vsel %vm743_vm7, %v585_v58, %v807_v62  ;;  %v887_v3 = vsel %vm759_vm8, %v625_v59, %v823_v63 }
  0xb5   : > { %983 = vst.msk [vmem:[%s1506_s11 + $0x180] sm:$0xff] %vm934_vm2, %v918_v1 }
  0xb6   : > { %936 = vst.msk [vmem:[%s1506_s11 + $0x8] sm:$0xff] %vm934_vm2, %v871_v2  ;;  %v664_v4 = vpop.f32.mrf.mxu2  ;;  %v704_v5 = vpop.f32.mrf.mxu3 }
  0xb7   : > { %952 = vst.msk [vmem:[%s1506_s11 + $0x88] sm:$0xff] %vm934_vm2, %v887_v3  ;;  %v665_v6 = vadd.f32 %v1498_v43, %v664_v4  ;;  %v705_v7 = vadd.f32 %v1498_v43, %v704_v5  ;;  %v587_v8 = vpop.f32.mrf.mxu0  ;;  %v627_v9 = vpop.f32.mrf.mxu1 }
  0xb8   : > { %v588_v10 = vadd.f32 %v1498_v43, %v587_v8  ;;  %v628_v11 = vadd.f32 %v1498_v43, %v627_v9 }
  0xb9   : > { %vm775_vm9 = vcmp.ge.f32.partialorder %v665_v6, 0.0  ;;  %v839_v12 = vmul.f32 0.1, %v665_v6  ;;  %vm791_vm10 = vcmp.ge.f32.partialorder %v705_v7, 0.0  ;;  %v855_v13 = vmul.f32 0.1, %v705_v7 }
  0xba   : > { %vm744_vm11 = vcmp.ge.f32.partialorder %v588_v10, 0.0  ;;  %v808_v14 = vmul.f32 0.1, %v588_v10  ;;  %vm760_vm12 = vcmp.ge.f32.partialorder %v628_v11, 0.0  ;;  %v824_v15 = vmul.f32 0.1, %v628_v11 }
  0xbb   : > { %v903_v16 = vsel %vm775_vm9, %v665_v6, %v839_v12  ;;  %v919_v17 = vsel %vm791_vm10, %v705_v7, %v855_v13 }
  0xbc   : > { %968 = vst.msk [vmem:[%s1506_s11 + $0x108] sm:$0xff] %vm934_vm2, %v903_v16  ;;  %v872_v18 = vsel %vm744_vm11, %v588_v10, %v808_v14  ;;  %v888_v19 = vsel %vm760_vm12, %v628_v11, %v824_v15 }
  0xbd   : > { %984 = vst.msk [vmem:[%s1506_s11 + $0x188] sm:$0xff] %vm934_vm2, %v919_v17 }
  0xbe   : > { %937 = vst.msk [vmem:[%s1506_s11 + $0x10] sm:$0xff] %vm934_vm2, %v872_v18  ;;  %v667_v20 = vpop.f32.mrf.mxu2  ;;  %v707_v21 = vpop.f32.mrf.mxu3 }
  0xbf   : > { %953 = vst.msk [vmem:[%s1506_s11 + $0x90] sm:$0xff] %vm934_vm2, %v888_v19  ;;  %v668_v22 = vadd.f32 %v1498_v43, %v667_v20  ;;  %v708_v23 = vadd.f32 %v1498_v43, %v707_v21  ;;  %v589_v24 = vpop.f32.mrf.mxu0  ;;  %v629_v25 = vpop.f32.mrf.mxu1 }
  0xc0   : > { %v590_v26 = vadd.f32 %v1498_v43, %v589_v24  ;;  %v630_v27 = vadd.f32 %v1498_v43, %v629_v25 }
  0xc1   : > { %vm776_vm13 = vcmp.ge.f32.partialorder %v668_v22, 0.0  ;;  %v840_v28 = vmul.f32 0.1, %v668_v22  ;;  %vm792_vm14 = vcmp.ge.f32.partialorder %v708_v23, 0.0  ;;  %v856_v29 = vmul.f32 0.1, %v708_v23 }
  0xc2   : > { %vm745_vm15 = vcmp.ge.f32.partialorder %v590_v26, 0.0  ;;  %v809_v30 = vmul.f32 0.1, %v590_v26  ;;  %vm761_vm0 = vcmp.ge.f32.partialorder %v630_v27, 0.0  ;;  %v825_v31 = vmul.f32 0.1, %v630_v27 }
  0xc3   : > { %v904_v32 = vsel %vm776_vm13, %v668_v22, %v840_v28  ;;  %v920_v33 = vsel %vm792_vm14, %v708_v23, %v856_v29 }
  0xc4   : > { %969 = vst.msk [vmem:[%s1506_s11 + $0x110] sm:$0xff] %vm934_vm2, %v904_v32  ;;  %v873_v34 = vsel %vm745_vm15, %v590_v26, %v809_v30  ;;  %v889_v35 = vsel %vm761_vm0, %v630_v27, %v825_v31 }
  0xc5   : > { %985 = vst.msk [vmem:[%s1506_s11 + $0x190] sm:$0xff] %vm934_vm2, %v920_v33 }
  0xc6   : > { %938 = vst.msk [vmem:[%s1506_s11 + $0x18] sm:$0xff] %vm934_vm2, %v873_v34  ;;  %v669_v36 = vpop.f32.mrf.mxu2  ;;  %v709_v37 = vpop.f32.mrf.mxu3 }
  0xc7   : > { %954 = vst.msk [vmem:[%s1506_s11 + $0x98] sm:$0xff] %vm934_vm2, %v889_v35  ;;  %v670_v38 = vadd.f32 %v1498_v43, %v669_v36  ;;  %v710_v39 = vadd.f32 %v1498_v43, %v709_v37  ;;  %v592_v40 = vpop.f32.mrf.mxu0  ;;  %v632_v41 = vpop.f32.mrf.mxu1 }
  0xc8   : > { %v593_v42 = vadd.f32 %v1498_v43, %v592_v40  ;;  %v633_v44 = vadd.f32 %v1498_v43, %v632_v41 }
  0xc9   : > { %vm777_vm1 = vcmp.ge.f32.partialorder %v670_v38, 0.0  ;;  %v841_v45 = vmul.f32 0.1, %v670_v38  ;;  %vm793_vm3 = vcmp.ge.f32.partialorder %v710_v39, 0.0  ;;  %v857_v46 = vmul.f32 0.1, %v710_v39 }
  0xca   : > { %vm746_vm4 = vcmp.ge.f32.partialorder %v593_v42, 0.0  ;;  %v810_v47 = vmul.f32 0.1, %v593_v42  ;;  %vm762_vm5 = vcmp.ge.f32.partialorder %v633_v44, 0.0  ;;  %v826_v48 = vmul.f32 0.1, %v633_v44 }
  0xcb   : > { %v905_v49 = vsel %vm777_vm1, %v670_v38, %v841_v45  ;;  %v921_v50 = vsel %vm793_vm3, %v710_v39, %v857_v46 }
  0xcc   : > { %970 = vst.msk [vmem:[%s1506_s11 + $0x118] sm:$0xff] %vm934_vm2, %v905_v49  ;;  %v874_v51 = vsel %vm746_vm4, %v593_v42, %v810_v47  ;;  %v890_v52 = vsel %vm762_vm5, %v633_v44, %v826_v48 }
  0xcd   : > { %986 = vst.msk [vmem:[%s1506_s11 + $0x198] sm:$0xff] %vm934_vm2, %v921_v50 }
  0xce   : > { %939 = vst.msk [vmem:[%s1506_s11 + $0x20] sm:$0xff] %vm934_vm2, %v874_v51  ;;  %v672_v53 = vpop.f32.mrf.mxu2  ;;  %v712_v54 = vpop.f32.mrf.mxu3 }
  0xcf   : > { %955 = vst.msk [vmem:[%s1506_s11 + $0xa0] sm:$0xff] %vm934_vm2, %v890_v52  ;;  %v673_v55 = vadd.f32 %v1498_v43, %v672_v53  ;;  %v713_v56 = vadd.f32 %v1498_v43, %v712_v54  ;;  %v594_v57 = vpop.f32.mrf.mxu0  ;;  %v634_v58 = vpop.f32.mrf.mxu1 }
  0xd0   : > { %v595_v59 = vadd.f32 %v1498_v43, %v594_v57  ;;  %v635_v60 = vadd.f32 %v1498_v43, %v634_v58 }
  0xd1   : > { %vm778_vm6 = vcmp.ge.f32.partialorder %v673_v55, 0.0  ;;  %v842_v61 = vmul.f32 0.1, %v673_v55  ;;  %vm794_vm7 = vcmp.ge.f32.partialorder %v713_v56, 0.0  ;;  %v858_v62 = vmul.f32 0.1, %v713_v56 }
  0xd2   : > { %vm747_vm8 = vcmp.ge.f32.partialorder %v595_v59, 0.0  ;;  %v811_v63 = vmul.f32 0.1, %v595_v59  ;;  %vm763_vm9 = vcmp.ge.f32.partialorder %v635_v60, 0.0  ;;  %v827_v0 = vmul.f32 0.1, %v635_v60 }
  0xd3   : > { %v906_v1 = vsel %vm778_vm6, %v673_v55, %v842_v61  ;;  %v922_v2 = vsel %vm794_vm7, %v713_v56, %v858_v62 }
  0xd4   : > { %971 = vst.msk [vmem:[%s1506_s11 + $0x120] sm:$0xff] %vm934_vm2, %v906_v1  ;;  %v875_v3 = vsel %vm747_vm8, %v595_v59, %v811_v63  ;;  %v891_v4 = vsel %vm763_vm9, %v635_v60, %v827_v0 }
  0xd5   : > { %987 = vst.msk [vmem:[%s1506_s11 + $0x1a0] sm:$0xff] %vm934_vm2, %v922_v2 }
  0xd6   : > { %940 = vst.msk [vmem:[%s1506_s11 + $0x28] sm:$0xff] %vm934_vm2, %v875_v3  ;;  %v674_v5 = vpop.f32.mrf.mxu2  ;;  %v714_v6 = vpop.f32.mrf.mxu3 }
  0xd7   : > { %956 = vst.msk [vmem:[%s1506_s11 + $0xa8] sm:$0xff] %vm934_vm2, %v891_v4  ;;  %v675_v7 = vadd.f32 %v1498_v43, %v674_v5  ;;  %v715_v8 = vadd.f32 %v1498_v43, %v714_v6  ;;  %v597_v9 = vpop.f32.mrf.mxu0  ;;  %v637_v10 = vpop.f32.mrf.mxu1 }
  0xd8   : > { %v598_v11 = vadd.f32 %v1498_v43, %v597_v9  ;;  %v638_v12 = vadd.f32 %v1498_v43, %v637_v10 }
  0xd9   : > { %vm779_vm10 = vcmp.ge.f32.partialorder %v675_v7, 0.0  ;;  %v843_v13 = vmul.f32 0.1, %v675_v7  ;;  %vm795_vm11 = vcmp.ge.f32.partialorder %v715_v8, 0.0  ;;  %v859_v14 = vmul.f32 0.1, %v715_v8 }
  0xda   : > { %vm748_vm12 = vcmp.ge.f32.partialorder %v598_v11, 0.0  ;;  %v812_v15 = vmul.f32 0.1, %v598_v11  ;;  %vm764_vm13 = vcmp.ge.f32.partialorder %v638_v12, 0.0  ;;  %v828_v16 = vmul.f32 0.1, %v638_v12 }
  0xdb   : > { %v907_v17 = vsel %vm779_vm10, %v675_v7, %v843_v13  ;;  %v923_v18 = vsel %vm795_vm11, %v715_v8, %v859_v14 }
  0xdc   : > { %972 = vst.msk [vmem:[%s1506_s11 + $0x128] sm:$0xff] %vm934_vm2, %v907_v17  ;;  %v876_v19 = vsel %vm748_vm12, %v598_v11, %v812_v15  ;;  %v892_v20 = vsel %vm764_vm13, %v638_v12, %v828_v16 }
  0xdd   : > { %988 = vst.msk [vmem:[%s1506_s11 + $0x1a8] sm:$0xff] %vm934_vm2, %v923_v18 }
  0xde   : > { %941 = vst.msk [vmem:[%s1506_s11 + $0x30] sm:$0xff] %vm934_vm2, %v876_v19  ;;  %v677_v21 = vpop.f32.mrf.mxu2  ;;  %v717_v22 = vpop.f32.mrf.mxu3 }
  0xdf   : > { %957 = vst.msk [vmem:[%s1506_s11 + $0xb0] sm:$0xff] %vm934_vm2, %v892_v20  ;;  %v678_v23 = vadd.f32 %v1498_v43, %v677_v21  ;;  %v718_v24 = vadd.f32 %v1498_v43, %v717_v22  ;;  %v599_v25 = vpop.f32.mrf.mxu0  ;;  %v639_v26 = vpop.f32.mrf.mxu1 }
  0xe0   : > { %v600_v27 = vadd.f32 %v1498_v43, %v599_v25  ;;  %v640_v28 = vadd.f32 %v1498_v43, %v639_v26 }
  0xe1   : > { %vm780_vm14 = vcmp.ge.f32.partialorder %v678_v23, 0.0  ;;  %v844_v29 = vmul.f32 0.1, %v678_v23  ;;  %vm796_vm15 = vcmp.ge.f32.partialorder %v718_v24, 0.0  ;;  %v860_v30 = vmul.f32 0.1, %v718_v24 }
  0xe2   : > { %vm749_vm0 = vcmp.ge.f32.partialorder %v600_v27, 0.0  ;;  %v813_v31 = vmul.f32 0.1, %v600_v27  ;;  %vm765_vm1 = vcmp.ge.f32.partialorder %v640_v28, 0.0  ;;  %v829_v32 = vmul.f32 0.1, %v640_v28 }
  0xe3   : > { %v908_v33 = vsel %vm780_vm14, %v678_v23, %v844_v29  ;;  %v924_v34 = vsel %vm796_vm15, %v718_v24, %v860_v30 }
  0xe4   : > { %973 = vst.msk [vmem:[%s1506_s11 + $0x130] sm:$0xff] %vm934_vm2, %v908_v33  ;;  %v877_v35 = vsel %vm749_vm0, %v600_v27, %v813_v31  ;;  %v893_v36 = vsel %vm765_vm1, %v640_v28, %v829_v32 }
  0xe5   : > { %989 = vst.msk [vmem:[%s1506_s11 + $0x1b0] sm:$0xff] %vm934_vm2, %v924_v34 }
  0xe6   : > { %942 = vst.msk [vmem:[%s1506_s11 + $0x38] sm:$0xff] %vm934_vm2, %v877_v35  ;;  %v679_v37 = vpop.f32.mrf.mxu2  ;;  %v719_v38 = vpop.f32.mrf.mxu3 }
  0xe7   : > { %958 = vst.msk [vmem:[%s1506_s11 + $0xb8] sm:$0xff] %vm934_vm2, %v893_v36  ;;  %v680_v39 = vadd.f32 %v1498_v43, %v679_v37  ;;  %v720_v40 = vadd.f32 %v1498_v43, %v719_v38  ;;  %v602_v41 = vpop.f32.mrf.mxu0  ;;  %v642_v42 = vpop.f32.mrf.mxu1 }
  0xe8   : > { %v603_v44 = vadd.f32 %v1498_v43, %v602_v41  ;;  %v643_v45 = vadd.f32 %v1498_v43, %v642_v42 }
  0xe9   : > { %vm781_vm3 = vcmp.ge.f32.partialorder %v680_v39, 0.0  ;;  %v845_v46 = vmul.f32 0.1, %v680_v39  ;;  %vm797_vm4 = vcmp.ge.f32.partialorder %v720_v40, 0.0  ;;  %v861_v47 = vmul.f32 0.1, %v720_v40 }
  0xea   : > { %vm750_vm5 = vcmp.ge.f32.partialorder %v603_v44, 0.0  ;;  %v814_v48 = vmul.f32 0.1, %v603_v44  ;;  %vm766_vm6 = vcmp.ge.f32.partialorder %v643_v45, 0.0  ;;  %v830_v49 = vmul.f32 0.1, %v643_v45 }
  0xeb   : > { %v909_v50 = vsel %vm781_vm3, %v680_v39, %v845_v46  ;;  %v925_v51 = vsel %vm797_vm4, %v720_v40, %v861_v47 }
  0xec   : > { %974 = vst.msk [vmem:[%s1506_s11 + $0x138] sm:$0xff] %vm934_vm2, %v909_v50  ;;  %v878_v52 = vsel %vm750_vm5, %v603_v44, %v814_v48  ;;  %v894_v53 = vsel %vm766_vm6, %v643_v45, %v830_v49 }
  0xed   : > { %990 = vst.msk [vmem:[%s1506_s11 + $0x1b8] sm:$0xff] %vm934_vm2, %v925_v51 }
  0xee   : > { %943 = vst.msk [vmem:[%s1506_s11 + $0x40] sm:$0xff] %vm934_vm2, %v878_v52  ;;  %v682_v54 = vpop.f32.mrf.mxu2  ;;  %v722_v55 = vpop.f32.mrf.mxu3 }
  0xef   : > { %959 = vst.msk [vmem:[%s1506_s11 + $0xc0] sm:$0xff] %vm934_vm2, %v894_v53  ;;  %v683_v56 = vadd.f32 %v1498_v43, %v682_v54  ;;  %v723_v57 = vadd.f32 %v1498_v43, %v722_v55  ;;  %v604_v58 = vpop.f32.mrf.mxu0  ;;  %v644_v59 = vpop.f32.mrf.mxu1 }
  0xf0   : > { %v605_v60 = vadd.f32 %v1498_v43, %v604_v58  ;;  %v645_v61 = vadd.f32 %v1498_v43, %v644_v59 }
  0xf1   : > { %vm782_vm7 = vcmp.ge.f32.partialorder %v683_v56, 0.0  ;;  %v846_v62 = vmul.f32 0.1, %v683_v56  ;;  %vm798_vm8 = vcmp.ge.f32.partialorder %v723_v57, 0.0  ;;  %v862_v63 = vmul.f32 0.1, %v723_v57 }
  0xf2   : > { %vm751_vm9 = vcmp.ge.f32.partialorder %v605_v60, 0.0  ;;  %v815_v0 = vmul.f32 0.1, %v605_v60  ;;  %vm767_vm10 = vcmp.ge.f32.partialorder %v645_v61, 0.0  ;;  %v831_v1 = vmul.f32 0.1, %v645_v61 }
  0xf3   : > { %v910_v2 = vsel %vm782_vm7, %v683_v56, %v846_v62  ;;  %v926_v3 = vsel %vm798_vm8, %v723_v57, %v862_v63 }
  0xf4   : > { %975 = vst.msk [vmem:[%s1506_s11 + $0x140] sm:$0xff] %vm934_vm2, %v910_v2  ;;  %v879_v4 = vsel %vm751_vm9, %v605_v60, %v815_v0  ;;  %v895_v5 = vsel %vm767_vm10, %v645_v61, %v831_v1 }
  0xf5   : > { %991 = vst.msk [vmem:[%s1506_s11 + $0x1c0] sm:$0xff] %vm934_vm2, %v926_v3 }
  0xf6   : > { %944 = vst.msk [vmem:[%s1506_s11 + $0x48] sm:$0xff] %vm934_vm2, %v879_v4  ;;  %v684_v6 = vpop.f32.mrf.mxu2  ;;  %v724_v7 = vpop.f32.mrf.mxu3 }
  0xf7   : > { %960 = vst.msk [vmem:[%s1506_s11 + $0xc8] sm:$0xff] %vm934_vm2, %v895_v5  ;;  %v685_v8 = vadd.f32 %v1498_v43, %v684_v6  ;;  %v725_v9 = vadd.f32 %v1498_v43, %v724_v7  ;;  %v607_v10 = vpop.f32.mrf.mxu0  ;;  %v647_v11 = vpop.f32.mrf.mxu1 }
  0xf8   : > { %v608_v12 = vadd.f32 %v1498_v43, %v607_v10  ;;  %v648_v13 = vadd.f32 %v1498_v43, %v647_v11 }
  0xf9   : > { %vm783_vm11 = vcmp.ge.f32.partialorder %v685_v8, 0.0  ;;  %v847_v14 = vmul.f32 0.1, %v685_v8  ;;  %vm799_vm12 = vcmp.ge.f32.partialorder %v725_v9, 0.0  ;;  %v863_v15 = vmul.f32 0.1, %v725_v9 }
  0xfa   : > { %vm752_vm13 = vcmp.ge.f32.partialorder %v608_v12, 0.0  ;;  %v816_v16 = vmul.f32 0.1, %v608_v12  ;;  %vm768_vm14 = vcmp.ge.f32.partialorder %v648_v13, 0.0  ;;  %v832_v17 = vmul.f32 0.1, %v648_v13 }
  0xfb   : > { %v911_v18 = vsel %vm783_vm11, %v685_v8, %v847_v14  ;;  %v927_v19 = vsel %vm799_vm12, %v725_v9, %v863_v15 }
  0xfc   : > { %976 = vst.msk [vmem:[%s1506_s11 + $0x148] sm:$0xff] %vm934_vm2, %v911_v18  ;;  %v880_v20 = vsel %vm752_vm13, %v608_v12, %v816_v16  ;;  %v896_v21 = vsel %vm768_vm14, %v648_v13, %v832_v17 }
  0xfd   : > { %992 = vst.msk [vmem:[%s1506_s11 + $0x1c8] sm:$0xff] %vm934_vm2, %v927_v19 }
  0xfe   : > { %945 = vst.msk [vmem:[%s1506_s11 + $0x50] sm:$0xff] %vm934_vm2, %v880_v20  ;;  %v687_v22 = vpop.f32.mrf.mxu2  ;;  %v727_v23 = vpop.f32.mrf.mxu3 }
  0xff   : > { %961 = vst.msk [vmem:[%s1506_s11 + $0xd0] sm:$0xff] %vm934_vm2, %v896_v21  ;;  %v688_v24 = vadd.f32 %v1498_v43, %v687_v22  ;;  %v728_v25 = vadd.f32 %v1498_v43, %v727_v23  ;;  %v609_v26 = vpop.f32.mrf.mxu0  ;;  %v649_v27 = vpop.f32.mrf.mxu1 }
 0x100   : > { %v610_v28 = vadd.f32 %v1498_v43, %v609_v26  ;;  %v650_v29 = vadd.f32 %v1498_v43, %v649_v27 }
 0x101   : > { %vm784_vm15 = vcmp.ge.f32.partialorder %v688_v24, 0.0  ;;  %v848_v30 = vmul.f32 0.1, %v688_v24  ;;  %vm800_vm0 = vcmp.ge.f32.partialorder %v728_v25, 0.0  ;;  %v864_v31 = vmul.f32 0.1, %v728_v25 }
 0x102   : > { %vm753_vm1 = vcmp.ge.f32.partialorder %v610_v28, 0.0  ;;  %v817_v32 = vmul.f32 0.1, %v610_v28  ;;  %vm769_vm3 = vcmp.ge.f32.partialorder %v650_v29, 0.0  ;;  %v833_v33 = vmul.f32 0.1, %v650_v29 }
 0x103   : > { %v912_v34 = vsel %vm784_vm15, %v688_v24, %v848_v30  ;;  %v928_v35 = vsel %vm800_vm0, %v728_v25, %v864_v31 }
 0x104   : > { %977 = vst.msk [vmem:[%s1506_s11 + $0x150] sm:$0xff] %vm934_vm2, %v912_v34  ;;  %v881_v36 = vsel %vm753_vm1, %v610_v28, %v817_v32  ;;  %v897_v37 = vsel %vm769_vm3, %v650_v29, %v833_v33 }
 0x105   : > { %993 = vst.msk [vmem:[%s1506_s11 + $0x1d0] sm:$0xff] %vm934_vm2, %v928_v35 }
 0x106   : > { %946 = vst.msk [vmem:[%s1506_s11 + $0x58] sm:$0xff] %vm934_vm2, %v881_v36  ;;  %v689_v38 = vpop.f32.mrf.mxu2  ;;  %v729_v39 = vpop.f32.mrf.mxu3 }
 0x107   : > { %962 = vst.msk [vmem:[%s1506_s11 + $0xd8] sm:$0xff] %vm934_vm2, %v897_v37  ;;  %v690_v40 = vadd.f32 %v1498_v43, %v689_v38  ;;  %v730_v41 = vadd.f32 %v1498_v43, %v729_v39  ;;  %v612_v42 = vpop.f32.mrf.mxu0  ;;  %v652_v44 = vpop.f32.mrf.mxu1 }
 0x108   : > { %v613_v45 = vadd.f32 %v1498_v43, %v612_v42  ;;  %v653_v46 = vadd.f32 %v1498_v43, %v652_v44 }
 0x109   : > { %vm785_vm4 = vcmp.ge.f32.partialorder %v690_v40, 0.0  ;;  %v849_v47 = vmul.f32 0.1, %v690_v40  ;;  %vm801_vm5 = vcmp.ge.f32.partialorder %v730_v41, 0.0  ;;  %v865_v48 = vmul.f32 0.1, %v730_v41 }
 0x10a   : > { %vm754_vm6 = vcmp.ge.f32.partialorder %v613_v45, 0.0  ;;  %v818_v49 = vmul.f32 0.1, %v613_v45  ;;  %vm770_vm7 = vcmp.ge.f32.partialorder %v653_v46, 0.0  ;;  %v834_v50 = vmul.f32 0.1, %v653_v46 }
 0x10b   : > { %v913_v51 = vsel %vm785_vm4, %v690_v40, %v849_v47  ;;  %v929_v52 = vsel %vm801_vm5, %v730_v41, %v865_v48 }
 0x10c   : > { %978 = vst.msk [vmem:[%s1506_s11 + $0x158] sm:$0xff] %vm934_vm2, %v913_v51  ;;  %v882_v53 = vsel %vm754_vm6, %v613_v45, %v818_v49  ;;  %v898_v54 = vsel %vm770_vm7, %v653_v46, %v834_v50 }
 0x10d   : > { %994 = vst.msk [vmem:[%s1506_s11 + $0x1d8] sm:$0xff] %vm934_vm2, %v929_v52 }
 0x10e   : > { %947 = vst.msk [vmem:[%s1506_s11 + $0x60] sm:$0xff] %vm934_vm2, %v882_v53  ;;  %v692_v55 = vpop.f32.mrf.mxu2  ;;  %v732_v56 = vpop.f32.mrf.mxu3 }
 0x10f   : > { %963 = vst.msk [vmem:[%s1506_s11 + $0xe0] sm:$0xff] %vm934_vm2, %v898_v54  ;;  %v693_v57 = vadd.f32 %v1498_v43, %v692_v55  ;;  %v733_v58 = vadd.f32 %v1498_v43, %v732_v56  ;;  %v614_v59 = vpop.f32.mrf.mxu0  ;;  %v654_v60 = vpop.f32.mrf.mxu1 }
 0x110   : > { %v615_v61 = vadd.f32 %v1498_v43, %v614_v59  ;;  %v655_v62 = vadd.f32 %v1498_v43, %v654_v60 }
 0x111   : > { %vm786_vm8 = vcmp.ge.f32.partialorder %v693_v57, 0.0  ;;  %v850_v63 = vmul.f32 0.1, %v693_v57  ;;  %vm802_vm9 = vcmp.ge.f32.partialorder %v733_v58, 0.0  ;;  %v866_v0 = vmul.f32 0.1, %v733_v58 }
 0x112   : > { %vm755_vm10 = vcmp.ge.f32.partialorder %v615_v61, 0.0  ;;  %v819_v1 = vmul.f32 0.1, %v615_v61  ;;  %vm771_vm11 = vcmp.ge.f32.partialorder %v655_v62, 0.0  ;;  %v835_v2 = vmul.f32 0.1, %v655_v62 }
 0x113   : > { %v914_v3 = vsel %vm786_vm8, %v693_v57, %v850_v63  ;;  %v930_v4 = vsel %vm802_vm9, %v733_v58, %v866_v0 }
 0x114   : > { %979 = vst.msk [vmem:[%s1506_s11 + $0x160] sm:$0xff] %vm934_vm2, %v914_v3  ;;  %v883_v5 = vsel %vm755_vm10, %v615_v61, %v819_v1  ;;  %v899_v6 = vsel %vm771_vm11, %v655_v62, %v835_v2 }
 0x115   : > { %995 = vst.msk [vmem:[%s1506_s11 + $0x1e0] sm:$0xff] %vm934_vm2, %v930_v4 }
 0x116   : > { %948 = vst.msk [vmem:[%s1506_s11 + $0x68] sm:$0xff] %vm934_vm2, %v883_v5  ;;  %v694_v7 = vpop.f32.mrf.mxu2  ;;  %v734_v8 = vpop.f32.mrf.mxu3 }
 0x117   : > { %964 = vst.msk [vmem:[%s1506_s11 + $0xe8] sm:$0xff] %vm934_vm2, %v899_v6  ;;  %v695_v9 = vadd.f32 %v1498_v43, %v694_v7  ;;  %v735_v10 = vadd.f32 %v1498_v43, %v734_v8  ;;  %v617_v11 = vpop.f32.mrf.mxu0  ;;  %v657_v12 = vpop.f32.mrf.mxu1 }
 0x118   : > { %v618_v13 = vadd.f32 %v1498_v43, %v617_v11  ;;  %v658_v14 = vadd.f32 %v1498_v43, %v657_v12 }
 0x119   : > { %vm787_vm12 = vcmp.ge.f32.partialorder %v695_v9, 0.0  ;;  %v851_v15 = vmul.f32 0.1, %v695_v9  ;;  %vm803_vm13 = vcmp.ge.f32.partialorder %v735_v10, 0.0  ;;  %v867_v16 = vmul.f32 0.1, %v735_v10 }
 0x11a   : > { %vm756_vm14 = vcmp.ge.f32.partialorder %v618_v13, 0.0  ;;  %v820_v17 = vmul.f32 0.1, %v618_v13  ;;  %vm772_vm15 = vcmp.ge.f32.partialorder %v658_v14, 0.0  ;;  %v836_v18 = vmul.f32 0.1, %v658_v14 }
 0x11b   : > { %v915_v19 = vsel %vm787_vm12, %v695_v9, %v851_v15  ;;  %v931_v20 = vsel %vm803_vm13, %v735_v10, %v867_v16 }
 0x11c   : > { %980 = vst.msk [vmem:[%s1506_s11 + $0x168] sm:$0xff] %vm934_vm2, %v915_v19  ;;  %v884_v21 = vsel %vm756_vm14, %v618_v13, %v820_v17  ;;  %v900_v22 = vsel %vm772_vm15, %v658_v14, %v836_v18 }
 0x11d   : > { %996 = vst.msk [vmem:[%s1506_s11 + $0x1e8] sm:$0xff] %vm934_vm2, %v931_v20 }
 0x11e   : > { %949 = vst.msk [vmem:[%s1506_s11 + $0x70] sm:$0xff] %vm934_vm2, %v884_v21  ;;  %v697_v23 = vpop.f32.mrf.mxu2  ;;  %v737_v24 = vpop.f32.mrf.mxu3 }
 0x11f   : > { %965 = vst.msk [vmem:[%s1506_s11 + $0xf0] sm:$0xff] %vm934_vm2, %v900_v22  ;;  %v698_v25 = vadd.f32 %v1498_v43, %v697_v23  ;;  %v738_v26 = vadd.f32 %v1498_v43, %v737_v24  ;;  %v619_v27 = vpop.f32.mrf.mxu0  ;;  %v659_v28 = vpop.f32.mrf.mxu1 }
 0x120   : > { %v620_v29 = vadd.f32 %v1498_v43, %v619_v27  ;;  %v660_v30 = vadd.f32 %v1498_v43, %v659_v28 }
 0x121   : > { %vm788_vm0 = vcmp.ge.f32.partialorder %v698_v25, 0.0  ;;  %v852_v31 = vmul.f32 0.1, %v698_v25  ;;  %vm804_vm1 = vcmp.ge.f32.partialorder %v738_v26, 0.0  ;;  %v868_v32 = vmul.f32 0.1, %v738_v26 }
 0x122   : > { %vm757_vm3 = vcmp.ge.f32.partialorder %v620_v29, 0.0  ;;  %v821_v33 = vmul.f32 0.1, %v620_v29  ;;  %vm773_vm4 = vcmp.ge.f32.partialorder %v660_v30, 0.0  ;;  %v837_v34 = vmul.f32 0.1, %v660_v30 }
 0x123   : > { %v916_v35 = vsel %vm788_vm0, %v698_v25, %v852_v31  ;;  %v932_v36 = vsel %vm804_vm1, %v738_v26, %v868_v32 }
 0x124   : > { %981 = vst.msk [vmem:[%s1506_s11 + $0x170] sm:$0xff] %vm934_vm2, %v916_v35  ;;  %v885_v37 = vsel %vm757_vm3, %v620_v29, %v821_v33  ;;  %v901_v38 = vsel %vm773_vm4, %v660_v30, %v837_v34 }
 0x125   : > { %997 = vst.msk [vmem:[%s1506_s11 + $0x1f0] sm:$0xff] %vm934_vm2, %v932_v36 }
 0x126   : > { %950 = vst.msk [vmem:[%s1506_s11 + $0x78] sm:$0xff] %vm934_vm2, %v885_v37  ;;  %v699_v39 = vpop.f32.mrf.mxu2  ;;  %v739_v40 = vpop.f32.mrf.mxu3 }
 0x127   : > { %966 = vst.msk [vmem:[%s1506_s11 + $0xf8] sm:$0xff] %vm934_vm2, %v901_v38  ;;  %v700_v41 = vadd.f32 %v1498_v43, %v699_v39  ;;  %v740_v42 = vadd.f32 %v1498_v43, %v739_v40 }
 0x129   : > { %vm789_vm5 = vcmp.ge.f32.partialorder %v700_v41, 0.0  ;;  %v853_v44 = vmul.f32 0.1, %v700_v41  ;;  %vm805_vm6 = vcmp.ge.f32.partialorder %v740_v42, 0.0  ;;  %v869_v45 = vmul.f32 0.1, %v740_v42 }
 0x12b   : > { %v917_v46 = vsel %vm789_vm5, %v700_v41, %v853_v44  ;;  %v933_v47 = vsel %vm805_vm6, %v740_v42, %v869_v45 }
 0x12c   : > { %982 = vst.msk [vmem:[%s1506_s11 + $0x178] sm:$0xff] %vm934_vm2, %v917_v46 }
 0x12d   : > { %998 = vst.msk [vmem:[%s1506_s11 + $0x1f8] sm:$0xff] %vm934_vm2, %v933_v47 }
 0x12e PF: > { %s13_s14 = sadd.s32 1, %s1361_s14   ;;  %s1711_s12 = smov %s1357_s13 }
 0x12f   : > { %p10_p5 = scmp.ge.s32.totalorder %s13_s14, 4   ;;  %s1712_s13 = smov %s1714_s15 }
 0x131   :  { %12 = sbr.rel (!%p10_p5) target bundleno = 2 (0x2), region = 62 }

// kernel: _lambda_.10
= control target key start
LH: loop header
LB: loop body
LE: loop exit
PB: predicated region body
PF: predicated region fallthrough
CT: control target
= control target key end

     0   :  { %s3154_s12 = smov 0   ;;  %s3156_s13 = smov 0   ;;  %s3771_s0 = inlined_call_operand.vmem [shape: bf16[1024,432], index: 0, kind: input, shape index: {}]   ;;  %s3772_s1 = inlined_call_operand.vmem [shape: bf16[432,16], index: 1, kind: input, shape index: {}]   ;;  %s3773_s2 = inlined_call_operand.vmem [shape: f32[1,16], index: 2, kind: input, shape index: {}]   ;;  %s3774_s3 = inlined_call_operand.vmem [shape: f32[1024,16], index: 3, kind: output, shape index: {}]  }
   0x1   :  { %s3158_s14 = smov 0  }
   0x2 LB: > { %s25_s15 = sadd.s32 1, %s3128_s13  ;;  %p2267_p0 = scmp.ge.s32.totalorder %s3132_s14, 1  ;;  %s3132_s14 = sphi %s3158_s14, %s13_s14   ;;  %s3128_s13 = sphi %s3156_s13, %s3776_s13   ;;  %s3124_s12 = sphi %s3154_s12, %s3775_s12  }
   0x3   : > { %p27_p1 = scmp.ge.s32.totalorder %s25_s15, 2  ;;  %p158_p2 = scmp.lt.s32.totalorder %s3132_s14, 3 }
   0x5   : > { %s3778_s15 = smov (%p27_p1, %s25_s15), 0  ;;  %p159_p3 = pnand %p2267_p0, %p158_p2 }
   0x6   : > { %s2268_s22 = sshll.u32 (!%p159_p3), %s3124_s12, 6 }
   0x7   : > { %162 = sbr.rel (%p159_p3) target bundleno = 690 (0x2b2), region = 32  ;;  %p189_p4 = scmp.lt.s32.totalorder (!%p159_p3), %s2268_s22, 127 }
   0xc   : > { %v3063_v0 = vld [vmem:[%s3772_s1 + $0x38] sm:$0xff]  ;;  %v3062_v3 = vld [vmem:[%s3772_s1 + $0x30] sm:$0xff]  ;;  %s3780_s22 = smov (!%p189_p4, %s2268_s22), 127  ;;  %v3061_v7 = vld [vmem:[%s3772_s1 + $0x28] sm:$0xff]  ;;  %vm1162_vm0 = vcmask 392192   ;;  %vm2127_vm2 = vcmask 130048  }
   0xd   : > { %v3071_v1 = vld [vmem:[%s3772_s1 + $0x78] sm:$0xff]  ;;  %1259 = vmatpush.bf16.msra.mxu0 %v3063_v0  ;;  %v3070_v4 = vld [vmem:[%s3772_s1 + $0x70] sm:$0xff]  ;;  %v3069_v8 = vld [vmem:[%s3772_s1 + $0x68] sm:$0xff]  ;;  %s2927_s8 = sshll.u32 %s3780_s22, 4  ;;  %s2272_s5 = sshll.u32 %s3780_s22, 3 }
   0xe   : > { %v3079_v2 = vld [vmem:[%s3772_s1 + $0xb8] sm:$0xff]  ;;  %1428 = vmatpush.bf16.msra.mxu1 %v3071_v1  ;;  %v3078_v5 = vld [vmem:[%s3772_s1 + $0xb0] sm:$0xff]  ;;  %v3077_v9 = vld [vmem:[%s3772_s1 + $0xa8] sm:$0xff]  ;;  %s3211_s18 = scalar_lea.vmem %s3771_s0, %s2927_s8  ;;  %s3359_s8 = scalar_lea.vmem %s3774_s3, %s2272_s5 }
   0xf   : > { %1597 = vmatpush.bf16.msra.mxu2 %v3079_v2  ;;  %v3082_v6 = vld [vmem:[%s3772_s1 + $0xd0] sm:$0xff]  ;;  %v3081_v10 = vld [vmem:[%s3772_s1 + $0xc8] sm:$0xff]  ;;  %v3060_v11 = vld [vmem:[%s3772_s1 + $0x20] sm:$0xff] }
  0x10   : > { %1771 = vmatpush.bf16.msra.mxu3 %v3082_v6  ;;  %v3068_v12 = vld [vmem:[%s3772_s1 + $0x60] sm:$0xff]  ;;  %v2929_v15 = vld [vmem:[%s3211_s18 + $0xc] sm:$0xf]  ;;  %v2285_v16 = vld [vmem:[%s3211_s18 + $0x18] sm:$0xf0] }
  0x11   : > { %1260 = vmatpush.bf16.msra.mxu0 %v3062_v3  ;;  %v3076_v13 = vld [vmem:[%s3772_s1 + $0xa0] sm:$0xff]  ;;  %v3059_v17 = vld [vmem:[%s3772_s1 + $0x18] sm:$0xff]  ;;  %v2288_v20 = vor.u32 %v2929_v15, %v2285_v16  ;;  %v3058_v21 = vld [vmem:[%s3772_s1 + $0x10] sm:$0xff] }
  0x12   : > { %1429 = vmatpush.bf16.msra.mxu1 %v3070_v4  ;;  %v3080_v14 = vld [vmem:[%s3772_s1 + $0xc0] sm:$0xff]  ;;  %v3067_v18 = vld [vmem:[%s3772_s1 + $0x58] sm:$0xff]  ;;  %v3066_v22 = vld [vmem:[%s3772_s1 + $0x50] sm:$0xff] }
  0x13   : > { %1598 = vmatpush.bf16.msra.mxu2 %v3078_v5  ;;  %v3075_v19 = vld [vmem:[%s3772_s1 + $0x98] sm:$0xff]  ;;  %v3074_v23 = vld [vmem:[%s3772_s1 + $0x90] sm:$0xff]  ;;  %v3057_v24 = vld [vmem:[%s3772_s1 + $0x8] sm:$0xff] }
  0x14   : > { %1772 = vmatpush.bf16.msra.mxu3 %v3081_v10  ;;  %v3065_v25 = vld [vmem:[%s3772_s1 + $0x48] sm:$0xff]  ;;  %v3056_v27 = vld [vmem:[%s3772_s1] sm:$0xff]  ;;  %v2930_v30 = vld [vmem:[%s3211_s18 + $0xc] sm:$0xf0] }
  0x15   : > { %1261 = vmatpush.bf16.msra.mxu0 %v3061_v7  ;;  %v3073_v26 = vld [vmem:[%s3772_s1 + $0x88] sm:$0xff]  ;;  %v3064_v28 = vld [vmem:[%s3772_s1 + $0x40] sm:$0xff]  ;;  %v2277_v32 = vld [vmem:[%s3211_s18 + $0x10] sm:$0xf0] }
  0x16   : > { %1430 = vmatpush.bf16.msra.mxu1 %v3069_v8  ;;  %v2275_v29 = vld [vmem:[%s3211_s18] sm:$0xf]  ;;  %v2928_v31 = vld [vmem:[%s3211_s18 + $0x4] sm:$0xf]  ;;  %v2283_v34 = vld [vmem:[%s3211_s18 + $0x8] sm:$0xf] }
  0x17   : > { %1599 = vmatpush.bf16.msra.mxu2 %v3077_v9  ;;  %v3072_v33 = vld [vmem:[%s3772_s1 + $0x80] sm:$0xff]  ;;  %v2931_v35 = vld [vmem:[%s3211_s18 + $0x14] sm:$0xf0]  ;;  %v2933_v36 = vld [vmem:[%s3211_s18 + $0x2c] sm:$0xf]  ;;  %v2276_v38 = vor.u32 %v2930_v30, %v2275_v29  ;;  %v2280_v39 = vor.u32 %v2928_v31, %v2277_v32 }
  0x18   : > { %1773 = vmatpush.bf16.msra.mxu3 %v3080_v14  ;;  %v2301_v37 = vld [vmem:[%s3211_s18 + $0x38] sm:$0xf0]  ;;  %v2284_v40 = vor.u32 %v2931_v35, %v2283_v34  ;;  %v2291_v42 = vld [vmem:[%s3211_s18 + $0x20] sm:$0xf]  ;;  %v2934_v43 = vld [vmem:[%s3211_s18 + $0x2c] sm:$0xf0] }
  0x19   : > { %1262 = vmatpush.bf16.msra.mxu0 %v3060_v11  ;;  %v2304_v41 = vor.u32 %v2933_v36, %v2301_v37  ;;  %v2932_v44 = vld [vmem:[%s3211_s18 + $0x24] sm:$0xf]  ;;  %v2293_v45 = vld [vmem:[%s3211_s18 + $0x30] sm:$0xf0]  ;;  %v2299_v46 = vld [vmem:[%s3211_s18 + $0x28] sm:$0xf]  ;;  %v2292_v50 = vor.u32 %v2934_v43, %v2291_v42 }
  0x1a   : > { %1431 = vmatpush.bf16.msra.mxu1 %v3068_v12  ;;  %v2935_v47 = vld [vmem:[%s3211_s18 + $0x34] sm:$0xf0]  ;;  %v2937_v48 = vld [vmem:[%s3211_s18 + $0x4c] sm:$0xf]  ;;  %v2317_v49 = vld [vmem:[%s3211_s18 + $0x58] sm:$0xf0]  ;;  %v2296_v51 = vor.u32 %v2932_v44, %v2293_v45 }
  0x1b   : > { %1600 = vmatpush.bf16.msra.mxu2 %v3076_v13  ;;  %2893 = vmatmul.msk.bf16.vlgmr.msra.gmra.mxu3 %vm1162_vm0, %v2288_v20  ;;  %v2300_v52 = vor.u32 %v2935_v47, %v2299_v46  ;;  %v2320_v53 = vor.u32 %v2937_v48, %v2317_v49  ;;  %v2307_v54 = vld [vmem:[%s3211_s18 + $0x40] sm:$0xf]  ;;  %v2938_v55 = vld [vmem:[%s3211_s18 + $0x4c] sm:$0xf0]  ;;  %v2936_v56 = vld [vmem:[%s3211_s18 + $0x44] sm:$0xf] }
  0x1c   : > { %v2309_v57 = vld [vmem:[%s3211_s18 + $0x50] sm:$0xf0]  ;;  %v2315_v58 = vld [vmem:[%s3211_s18 + $0x48] sm:$0xf]  ;;  %v2939_v59 = vld [vmem:[%s3211_s18 + $0x54] sm:$0xf0]  ;;  %v2308_v62 = vor.u32 %v2938_v55, %v2307_v54 }
  0x1d   : > { %1263 = vmatpush.bf16.msra.mxu0 %v3059_v17  ;;  %v2941_v60 = vld [vmem:[%s3211_s18 + $0x6c] sm:$0xf]  ;;  %v2333_v61 = vld [vmem:[%s3211_s18 + $0x78] sm:$0xf0]  ;;  %v2312_v63 = vor.u32 %v2936_v56, %v2309_v57  ;;  %v2316_v0 = vor.u32 %v2939_v59, %v2315_v58  ;;  %v2323_v2 = vld [vmem:[%s3211_s18 + $0x60] sm:$0xf] }
  0x1e   : > { %1432 = vmatpush.bf16.msra.mxu1 %v3067_v18  ;;  %v2336_v1 = vor.u32 %v2941_v60, %v2333_v61  ;;  %v2942_v3 = vld [vmem:[%s3211_s18 + $0x6c] sm:$0xf0]  ;;  %v2940_v4 = vld [vmem:[%s3211_s18 + $0x64] sm:$0xf]  ;;  %v2325_v5 = vld [vmem:[%s3211_s18 + $0x70] sm:$0xf0] }
  0x1f   : > { %1601 = vmatpush.bf16.msra.mxu2 %v3075_v19  ;;  %v2331_v6 = vld [vmem:[%s3211_s18 + $0x68] sm:$0xf]  ;;  %v2943_v7 = vld [vmem:[%s3211_s18 + $0x74] sm:$0xf0]  ;;  %v2945_v8 = vld [vmem:[%s3211_s18 + $0x8c] sm:$0xf]  ;;  %v2324_v10 = vor.u32 %v2942_v3, %v2323_v2  ;;  %v2328_v11 = vor.u32 %v2940_v4, %v2325_v5 }
  0x20   : > { %v2349_v9 = vld [vmem:[%s3211_s18 + $0x98] sm:$0xf0]  ;;  %v2332_v12 = vor.u32 %v2943_v7, %v2331_v6  ;;  %v2339_v14 = vld [vmem:[%s3211_s18 + $0x80] sm:$0xf]  ;;  %v2946_v15 = vld [vmem:[%s3211_s18 + $0x8c] sm:$0xf0] }
  0x21   : > { %1264 = vmatpush.bf16.msra.mxu0 %v3058_v21  ;;  %v2352_v13 = vor.u32 %v2945_v8, %v2349_v9  ;;  %v2944_v16 = vld [vmem:[%s3211_s18 + $0x84] sm:$0xf]  ;;  %v2341_v17 = vld [vmem:[%s3211_s18 + $0x90] sm:$0xf0]  ;;  %v2347_v18 = vld [vmem:[%s3211_s18 + $0x88] sm:$0xf] }
  0x22   : > { %1433 = vmatpush.bf16.msra.mxu1 %v3066_v22  ;;  %v2947_v19 = vld [vmem:[%s3211_s18 + $0x94] sm:$0xf0]  ;;  %v2949_v20 = vld [vmem:[%s3211_s18 + $0xac] sm:$0xf]  ;;  %v2365_v21 = vld [vmem:[%s3211_s18 + $0xb8] sm:$0xf0]  ;;  %v2340_v22 = vor.u32 %v2946_v15, %v2339_v14 }
  0x23   : > { %1602 = vmatpush.bf16.msra.mxu2 %v3074_v23  ;;  %v2344_v23 = vor.u32 %v2944_v16, %v2341_v17  ;;  %v2357_v29 = vld [vmem:[%s3211_s18 + $0xb0] sm:$0xf0]  ;;  %v2363_v30 = vld [vmem:[%s3211_s18 + $0xa8] sm:$0xf]  ;;  %v2951_v31 = vld [vmem:[%s3211_s18 + $0xb4] sm:$0xf0] }
  0x24   : > { %v2953_v32 = vld [vmem:[%s3211_s18 + $0xcc] sm:$0xf]  ;;  %v2364_v36 = vor.u32 %v2951_v31, %v2363_v30  ;;  %v2379_v42 = vld [vmem:[%s3211_s18 + $0xc8] sm:$0xf]  ;;  %v2955_v43 = vld [vmem:[%s3211_s18 + $0xd4] sm:$0xf0] }
  0x25   : > { %1265 = vmatpush.bf16.msra.mxu0 %v3057_v24  ;;  %v2348_v24 = vor.u32 %v2947_v19, %v2347_v18  ;;  %v2957_v44 = vld [vmem:[%s3211_s18 + $0xec] sm:$0xf]  ;;  %v2397_v45 = vld [vmem:[%s3211_s18 + $0xf8] sm:$0xf0]  ;;  %v2380_v48 = vor.u32 %v2955_v43, %v2379_v42  ;;  %v2395_v54 = vld [vmem:[%s3211_s18 + $0xe8] sm:$0xf] }
  0x26   : > { %1434 = vmatpush.bf16.msra.mxu1 %v3065_v25  ;;  %v2368_v25 = vor.u32 %v2949_v20, %v2365_v21  ;;  %v2400_v49 = vor.u32 %v2957_v44, %v2397_v45  ;;  %v2959_v55 = vld [vmem:[%s3211_s18 + $0xf4] sm:$0xf0]  ;;  %v2961_v56 = vld [vmem:[%s3211_s18 + $0x10c] sm:$0xf]  ;;  %v2413_v57 = vld [vmem:[%s3211_s18 + $0x118] sm:$0xf0] }
  0x27   : > { %1603 = vmatpush.bf16.msra.mxu2 %v3073_v26  ;;  %v2355_v26 = vld [vmem:[%s3211_s18 + $0xa0] sm:$0xf]  ;;  %v2396_v60 = vor.u32 %v2959_v55, %v2395_v54  ;;  %v2416_v61 = vor.u32 %v2961_v56, %v2413_v57  ;;  %v2405_v2 = vld [vmem:[%s3211_s18 + $0x110] sm:$0xf0]  ;;  %v2411_v4 = vld [vmem:[%s3211_s18 + $0x108] sm:$0xf] }
  0x28   : > { %v3343_v3 = vld [vmem:[%s3773_s2] ss:$0 sm:$0xff]  ;;  %v2963_v5 = vld [vmem:[%s3211_s18 + $0x114] sm:$0xf0]  ;;  %v2965_v6 = vld [vmem:[%s3211_s18 + $0x12c] sm:$0xf] }
  0x29   : > { %1266 = vmatpush.bf16.msra.mxu0 %v3056_v27  ;;  %v2950_v27 = vld [vmem:[%s3211_s18 + $0xac] sm:$0xf0]  ;;  %v2429_v7 = vld [vmem:[%s3211_s18 + $0x138] sm:$0xf0]  ;;  %v2967_v30 = vld [vmem:[%s3211_s18 + $0x134] sm:$0xf0] }
  0x2a   : > { %1435 = vmatpush.bf16.msra.mxu1 %v3064_v28  ;;  %v2948_v28 = vld [vmem:[%s3211_s18 + $0xa4] sm:$0xf]  ;;  %v2356_v34 = vor.u32 %v2950_v27, %v2355_v26  ;;  %v2432_v15 = vor.u32 %v2965_v6, %v2429_v7  ;;  %v2435_v56 = vld [vmem:[%s3211_s18 + $0x140] sm:$0xf]  ;;  %v2970_v57 = vld [vmem:[%s3211_s18 + $0x14c] sm:$0xf0] }
  0x2b   : > { %1604 = vmatpush.bf16.msra.mxu2 %v3072_v33  ;;  %2894 = vmatmul.msk.bf16.gmra.mxu3 %vm1162_vm0, %v2304_v41  ;;  %v2381_v33 = vld [vmem:[%s3211_s18 + $0xd8] sm:$0xf0]  ;;  %v2360_v35 = vor.u32 %v2948_v28, %v2357_v29  ;;  %v2373_v41 = vld [vmem:[%s3211_s18 + $0xd0] sm:$0xf0]  ;;  %v2964_v26 = vld [vmem:[%s3211_s18 + $0x124] sm:$0xf] }
  0x2c   : > { %1267 = vmatmul.bf16.vlgmr.msra.gmra.mxu0 %v2276_v38  ;;  %v2384_v37 = vor.u32 %v2953_v32, %v2381_v33  ;;  %v2371_v38 = vld [vmem:[%s3211_s18 + $0xc0] sm:$0xf]  ;;  %v2421_v28 = vld [vmem:[%s3211_s18 + $0x130] sm:$0xf0]  ;;  %v2427_v29 = vld [vmem:[%s3211_s18 + $0x128] sm:$0xf] }
  0x2d   : > { %1436 = vmatmul.bf16.vlgmr.msra.gmra.mxu1 %v2280_v39  ;;  %v2954_v39 = vld [vmem:[%s3211_s18 + $0xcc] sm:$0xf0]  ;;  %v2969_v33 = vld [vmem:[%s3211_s18 + $0x14c] sm:$0xf] }
  0x2e   : > { %1605 = vmatmul.bf16.vlgmr.msra.gmra.mxu2 %v2284_v40  ;;  %v2952_v40 = vld [vmem:[%s3211_s18 + $0xc4] sm:$0xf]  ;;  %v2372_v46 = vor.u32 %v2954_v39, %v2371_v38 }
  0x2f   : > { %v2376_v47 = vor.u32 %v2952_v40, %v2373_v41  ;;  %v2428_v41 = vor.u32 %v2967_v30, %v2427_v29  ;;  %v2453_v29 = vld [vmem:[%s3211_s18 + $0x170] sm:$0xf0]  ;;  %v2459_v30 = vld [vmem:[%s3211_s18 + $0x168] sm:$0xf] }
  0x3b   : > { %2895 = vmatmul.msk.bf16.gmra.mxu3 %vm1162_vm0, %v2320_v53  ;;  %v2389_v53 = vld [vmem:[%s3211_s18 + $0xf0] sm:$0xf0] }
  0x3c   : > { %1272 = vmatmul.bf16.gmra.mxu0 %v2292_v50  ;;  %v2387_v50 = vld [vmem:[%s3211_s18 + $0xe0] sm:$0xf] }
  0x3d   : > { %1441 = vmatmul.bf16.gmra.mxu1 %v2296_v51  ;;  %v2958_v51 = vld [vmem:[%s3211_s18 + $0xec] sm:$0xf0] }
  0x3e   : > { %1610 = vmatmul.bf16.gmra.mxu2 %v2300_v52  ;;  %v2956_v52 = vld [vmem:[%s3211_s18 + $0xe4] sm:$0xf]  ;;  %v2388_v58 = vor.u32 %v2958_v51, %v2387_v50 }
  0x3f   : > { %v2392_v59 = vor.u32 %v2956_v52, %v2389_v53 }
  0x4b   : > { %2896 = vmatmul.msk.bf16.gmra.mxu3 %vm1162_vm0, %v2336_v1  ;;  %v2960_v1 = vld [vmem:[%s3211_s18 + $0x104] sm:$0xf] }
  0x4c   : > { %1277 = vmatmul.bf16.gmra.mxu0 %v2308_v62  ;;  %v2408_v9 = vor.u32 %v2960_v1, %v2405_v2  ;;  %v2973_v1 = vld [vmem:[%s3211_s18 + $0x16c] sm:$0xf]  ;;  %v2461_v2 = vld [vmem:[%s3211_s18 + $0x178] sm:$0xf0] }
  0x4d   : > { %1446 = vmatmul.bf16.gmra.mxu1 %v2312_v63  ;;  %v2403_v63 = vld [vmem:[%s3211_s18 + $0x100] sm:$0xf] }
  0x4e   : > { %1615 = vmatmul.bf16.gmra.mxu2 %v2316_v0  ;;  %v2962_v0 = vld [vmem:[%s3211_s18 + $0x10c] sm:$0xf0] }
  0x4f   : > { %v2404_v8 = vor.u32 %v2962_v0, %v2403_v63 }
  0x5b   : > { %2897 = vmatmul.msk.bf16.gmra.mxu3 %vm1162_vm0, %v2352_v13 }
  0x5c   : > { %1282 = vmatmul.bf16.gmra.mxu0 %v2324_v10 }
  0x5d   : > { %1451 = vmatmul.bf16.gmra.mxu1 %v2328_v11 }
  0x5e   : > { %1620 = vmatmul.bf16.gmra.mxu2 %v2332_v12  ;;  %v2412_v12 = vor.u32 %v2963_v5, %v2411_v4  ;;  %v2436_v5 = vor.u32 %v2970_v57, %v2435_v56  ;;  %v2467_v57 = vld [vmem:[%s3211_s18 + $0x180] sm:$0xf] }
  0x6b   : > { %2898 = vmatmul.msk.bf16.gmra.mxu3 %vm1162_vm0, %v2368_v25  ;;  %v2966_v25 = vld [vmem:[%s3211_s18 + $0x12c] sm:$0xf0] }
  0x6c   : > { %1287 = vmatmul.bf16.gmra.mxu0 %v2340_v22 }
  0x6d   : > { %1456 = vmatmul.bf16.gmra.mxu1 %v2344_v23 }
  0x6e   : > { %1625 = vmatmul.bf16.gmra.mxu2 %v2348_v24  ;;  %v2419_v24 = vld [vmem:[%s3211_s18 + $0x120] sm:$0xf] }
  0x7b   : > { %2899 = vmatmul.msk.bf16.gmra.mxu3 %vm1162_vm0, %v2384_v37  ;;  %v2424_v37 = vor.u32 %v2964_v26, %v2421_v28  ;;  %v2974_v26 = vld [vmem:[%s3211_s18 + $0x16c] sm:$0xf0] }
  0x7c   : > { %1292 = vmatmul.bf16.gmra.mxu0 %v2356_v34  ;;  %v2445_v34 = vld [vmem:[%s3211_s18 + $0x158] sm:$0xf0] }
  0x7d   : > { %1461 = vmatmul.bf16.gmra.mxu1 %v2360_v35  ;;  %v2448_v44 = vor.u32 %v2969_v33, %v2445_v34  ;;  %v2977_v34 = vld [vmem:[%s3211_s18 + $0x18c] sm:$0xf] }
  0x7e   : > { %1630 = vmatmul.bf16.gmra.mxu2 %v2364_v36  ;;  %v2420_v36 = vor.u32 %v2966_v25, %v2419_v24  ;;  %v2451_v25 = vld [vmem:[%s3211_s18 + $0x160] sm:$0xf] }
  0x8b   : > { %2900 = vmatmul.msk.bf16.gmra.mxu3 %vm1162_vm0, %v2400_v49 }
  0x8c   : > { %1297 = vmatmul.bf16.gmra.mxu0 %v2372_v46 }
  0x8d   : > { %1466 = vmatmul.bf16.gmra.mxu1 %v2376_v47 }
  0x8e   : > { %1635 = vmatmul.bf16.gmra.mxu2 %v2380_v48 }
  0x9b   : > { %2901 = vmatmul.msk.bf16.gmra.mxu3 %vm1162_vm0, %v2416_v61  ;;  %v2443_v61 = vld [vmem:[%s3211_s18 + $0x148] sm:$0xf] }
  0x9c   : > { %1302 = vmatmul.bf16.gmra.mxu0 %v2388_v58  ;;  %v2968_v58 = vld [vmem:[%s3211_s18 + $0x144] sm:$0xf] }
  0x9d   : > { %1471 = vmatmul.bf16.gmra.mxu1 %v2392_v59 }
  0x9e   : > { %1640 = vmatmul.bf16.gmra.mxu2 %v2396_v60  ;;  %v1775_v62 = vpop.f32.mrf.mxu3  ;;  %v2437_v60 = vld [vmem:[%s3211_s18 + $0x150] sm:$0xf0] }
  0x9f   : > { %v2440_v6 = vor.u32 %v2968_v58, %v2437_v60  ;;  %v2978_v58 = vld [vmem:[%s3211_s18 + $0x18c] sm:$0xf0] }
  0xa6   : > { %v1777_v14 = vpop.f32.mrf.mxu3 }
  0xa9   : > { %v1268_v10 = vpop.f32.mrf.mxu0 }
  0xaa   : > { %v1437_v11 = vpop.f32.mrf.mxu1  ;;  %v1269_v13 = vadd.f32 %v3343_v3, %v1268_v10 }
  0xab   : > { %2902 = vmatmul.msk.bf16.gmra.mxu3 %vm1162_vm0, %v2432_v15 }
  0xac   : > { %1307 = vmatmul.bf16.gmra.mxu0 %v2404_v8  ;;  %v1438_v16 = vadd.f32 %v1437_v11, %v1269_v13  ;;  %v2464_v13 = vor.u32 %v2973_v1, %v2461_v2  ;;  %v2981_v2 = vld [vmem:[%s3211_s18 + $0x1ac] sm:$0xf] }
  0xad   : > { %1476 = vmatmul.bf16.gmra.mxu1 %v2408_v9 }
  0xae   : > { %1645 = vmatmul.bf16.gmra.mxu2 %v2412_v12  ;;  %v1780_v21 = vpop.f32.mrf.mxu3 }
  0xb1   : > { %v1606_v17 = vpop.f32.mrf.mxu2  ;;  %v1270_v19 = vpop.f32.mrf.mxu0 }
  0xb2   : > { %v1607_v18 = vadd.f32 %v1606_v17, %v1438_v16  ;;  %v1439_v20 = vpop.f32.mrf.mxu1  ;;  %v1271_v23 = vadd.f32 %v3343_v3, %v1270_v19 }
  0xb4   : > { %v1776_v22 = vadd.f32 %v1775_v62, %v1607_v18  ;;  %v1440_v32 = vadd.f32 %v1439_v20, %v1271_v23  ;;  %v2971_v62 = vld [vmem:[%s3211_s18 + $0x154] sm:$0xf0] }
  0xb5   : > { %v2444_v10 = vor.u32 %v2971_v62, %v2443_v61  ;;  %v2469_v61 = vld [vmem:[%s3211_s18 + $0x190] sm:$0xf0]  ;;  %v2475_v62 = vld [vmem:[%s3211_s18 + $0x188] sm:$0xf] }
  0xb6   : > { %vm1935_vm1 = vcmp.ge.f32.partialorder %v1776_v22, 0.0  ;;  %v1999_v27 = vmul.f32 0.1, %v1776_v22  ;;  %v1782_v43 = vpop.f32.mrf.mxu3 }
  0xb8   : > { %v2063_v31 = vsel %vm1935_vm1, %v1776_v22, %v1999_v27  ;;  %v2972_v27 = vld [vmem:[%s3211_s18 + $0x164] sm:$0xf] }
  0xb9   : > { %2128 = vst.msk [vmem:[%s3359_s8] sm:$0xff] %vm2127_vm2, %v2063_v31  ;;  %v1608_v35 = vpop.f32.mrf.mxu2  ;;  %v1273_v39 = vpop.f32.mrf.mxu0  ;;  %v2975_v31 = vld [vmem:[%s3211_s18 + $0x174] sm:$0xf0] }
  0xba   : > { %v1609_v38 = vadd.f32 %v1608_v35, %v1440_v32  ;;  %v1442_v40 = vpop.f32.mrf.mxu1  ;;  %v1274_v42 = vadd.f32 %v3343_v3, %v1273_v39  ;;  %v2477_v35 = vld [vmem:[%s3211_s18 + $0x198] sm:$0xf0] }
  0xbb   : > { %2903 = vmatmul.msk.bf16.gmra.mxu3 %vm1162_vm0, %v2448_v44 }
  0xbc   : > { %v1778_v45 = vadd.f32 %v1777_v14, %v1609_v38  ;;  %1312 = vmatmul.bf16.gmra.mxu0 %v2420_v36  ;;  %v1443_v47 = vadd.f32 %v1442_v40, %v1274_v42  ;;  %v2456_v38 = vor.u32 %v2972_v27, %v2453_v29  ;;  %v2460_v42 = vor.u32 %v2975_v31, %v2459_v30  ;;  %v2982_v27 = vld [vmem:[%s3211_s18 + $0x1ac] sm:$0xf0]  ;;  %v2485_v30 = vld [vmem:[%s3211_s18 + $0x1b0] sm:$0xf0]  ;;  %v2491_v31 = vld [vmem:[%s3211_s18 + $0x1a8] sm:$0xf] }
  0xbd   : > { %1481 = vmatmul.bf16.gmra.mxu1 %v2424_v37  ;;  %v2452_v37 = vor.u32 %v2974_v26, %v2451_v25  ;;  %v2483_v26 = vld [vmem:[%s3211_s18 + $0x1a0] sm:$0xf] }
  0xbe   : > { %vm1936_vm3 = vcmp.ge.f32.partialorder %v1778_v45, 0.0  ;;  %v2000_v46 = vmul.f32 0.1, %v1778_v45  ;;  %1650 = vmatmul.bf16.gmra.mxu2 %v2428_v41  ;;  %v1785_v53 = vpop.f32.mrf.mxu3 }
  0xc0   : > { %v2064_v48 = vsel %vm1936_vm3, %v1778_v45, %v2000_v46  ;;  %v2480_v45 = vor.u32 %v2977_v34, %v2477_v35  ;;  %v2985_v35 = vld [vmem:[%s3211_s18 + $0x1cc] sm:$0xf] }
  0xc1   : > { %2129 = vst.msk [vmem:[%s3359_s8 + $0x8] sm:$0xff] %vm2127_vm2, %v2064_v48  ;;  %v1611_v49 = vpop.f32.mrf.mxu2  ;;  %v1275_v51 = vpop.f32.mrf.mxu0 }
  0xc2   : > { %v1612_v50 = vadd.f32 %v1611_v49, %v1443_v47  ;;  %v1444_v52 = vpop.f32.mrf.mxu1  ;;  %v1276_v55 = vadd.f32 %v3343_v3, %v1275_v51 }
  0xc4   : > { %v1781_v54 = vadd.f32 %v1780_v21, %v1612_v50  ;;  %v1445_v0 = vadd.f32 %v1444_v52, %v1276_v55 }
  0xc6   : > { %vm1937_vm4 = vcmp.ge.f32.partialorder %v1781_v54, 0.0  ;;  %v2001_v59 = vmul.f32 0.1, %v1781_v54  ;;  %v1787_v12 = vpop.f32.mrf.mxu3 }
  0xc8   : > { %v2065_v63 = vsel %vm1937_vm4, %v1781_v54, %v2001_v59  ;;  %v2976_v59 = vld [vmem:[%s3211_s18 + $0x184] sm:$0xf] }
  0xc9   : > { %2130 = vst.msk [vmem:[%s3359_s8 + $0x10] sm:$0xff] %vm2127_vm2, %v2065_v63  ;;  %v1613_v4 = vpop.f32.mrf.mxu2  ;;  %v1278_v8 = vpop.f32.mrf.mxu0  ;;  %v2979_v63 = vld [vmem:[%s3211_s18 + $0x194] sm:$0xf0] }
  0xca   : > { %v1614_v7 = vadd.f32 %v1613_v4, %v1445_v0  ;;  %v1447_v9 = vpop.f32.mrf.mxu1  ;;  %v1279_v11 = vadd.f32 %v3343_v3, %v1278_v8  ;;  %v2493_v4 = vld [vmem:[%s3211_s18 + $0x1b8] sm:$0xf0] }
  0xcb   : > { %2904 = vmatmul.msk.bf16.gmra.mxu3 %vm1162_vm0, %v2464_v13 }
  0xcc   : > { %v1783_v14 = vadd.f32 %v1782_v43, %v1614_v7  ;;  %1317 = vmatmul.bf16.gmra.mxu0 %v2436_v5  ;;  %v1448_v16 = vadd.f32 %v1447_v9, %v1279_v11  ;;  %v2472_v7 = vor.u32 %v2976_v59, %v2469_v61  ;;  %v2476_v11 = vor.u32 %v2979_v63, %v2475_v62  ;;  %v2986_v59 = vld [vmem:[%s3211_s18 + $0x1cc] sm:$0xf0]  ;;  %v2501_v62 = vld [vmem:[%s3211_s18 + $0x1d0] sm:$0xf0]  ;;  %v2507_v63 = vld [vmem:[%s3211_s18 + $0x1c8] sm:$0xf] }
  0xcd   : > { %1486 = vmatmul.bf16.gmra.mxu1 %v2440_v6  ;;  %v2468_v6 = vor.u32 %v2978_v58, %v2467_v57  ;;  %v2499_v58 = vld [vmem:[%s3211_s18 + $0x1c0] sm:$0xf] }
  0xce   : > { %vm1938_vm5 = vcmp.ge.f32.partialorder %v1783_v14, 0.0  ;;  %v2002_v15 = vmul.f32 0.1, %v1783_v14  ;;  %1655 = vmatmul.bf16.gmra.mxu2 %v2444_v10  ;;  %v1790_v22 = vpop.f32.mrf.mxu3 }
  0xd0   : > { %v2066_v17 = vsel %vm1938_vm5, %v1783_v14, %v2002_v15  ;;  %v2496_v14 = vor.u32 %v2981_v2, %v2493_v4  ;;  %v2989_v4 = vld [vmem:[%s3211_s18 + $0x1ec] sm:$0xf] }
  0xd1   : > { %2131 = vst.msk [vmem:[%s3359_s8 + $0x18] sm:$0xff] %vm2127_vm2, %v2066_v17  ;;  %v1616_v18 = vpop.f32.mrf.mxu2  ;;  %v1280_v20 = vpop.f32.mrf.mxu0 }
  0xd2   : > { %v1617_v19 = vadd.f32 %v1616_v18, %v1448_v16  ;;  %v1449_v21 = vpop.f32.mrf.mxu1  ;;  %v1281_v24 = vadd.f32 %v3343_v3, %v1280_v20 }
  0xd4   : > { %v1786_v23 = vadd.f32 %v1785_v53, %v1617_v19  ;;  %v1450_v33 = vadd.f32 %v1449_v21, %v1281_v24 }
  0xd6   : > { %vm1939_vm6 = vcmp.ge.f32.partialorder %v1786_v23, 0.0  ;;  %v2003_v28 = vmul.f32 0.1, %v1786_v23  ;;  %v1792_v44 = vpop.f32.mrf.mxu3 }
  0xd8   : > { %v2067_v32 = vsel %vm1939_vm6, %v1786_v23, %v2003_v28  ;;  %v2980_v28 = vld [vmem:[%s3211_s18 + $0x1a4] sm:$0xf] }
  0xd9   : > { %2132 = vst.msk [vmem:[%s3359_s8 + $0x20] sm:$0xff] %vm2127_vm2, %v2067_v32  ;;  %v1618_v36 = vpop.f32.mrf.mxu2  ;;  %v1283_v40 = vpop.f32.mrf.mxu0  ;;  %v2983_v32 = vld [vmem:[%s3211_s18 + $0x1b4] sm:$0xf0] }
  0xda   : > { %v1619_v39 = vadd.f32 %v1618_v36, %v1450_v33  ;;  %v1452_v41 = vpop.f32.mrf.mxu1  ;;  %v1284_v43 = vadd.f32 %v3343_v3, %v1283_v40  ;;  %v2509_v36 = vld [vmem:[%s3211_s18 + $0x1d8] sm:$0xf0] }
  0xdb   : > { %2905 = vmatmul.msk.bf16.gmra.mxu3 %vm1162_vm0, %v2480_v45 }
  0xdc   : > { %v1788_v46 = vadd.f32 %v1787_v12, %v1619_v39  ;;  %1322 = vmatmul.bf16.gmra.mxu0 %v2452_v37  ;;  %v1453_v48 = vadd.f32 %v1452_v41, %v1284_v43  ;;  %v2488_v39 = vor.u32 %v2980_v28, %v2485_v30  ;;  %v2492_v43 = vor.u32 %v2983_v32, %v2491_v31  ;;  %v2990_v28 = vld [vmem:[%s3211_s18 + $0x1ec] sm:$0xf0]  ;;  %v2517_v31 = vld [vmem:[%s3211_s18 + $0x1f0] sm:$0xf0]  ;;  %v2523_v32 = vld [vmem:[%s3211_s18 + $0x1e8] sm:$0xf] }
  0xdd   : > { %1491 = vmatmul.bf16.gmra.mxu1 %v2456_v38  ;;  %v2484_v38 = vor.u32 %v2982_v27, %v2483_v26  ;;  %v2515_v27 = vld [vmem:[%s3211_s18 + $0x1e0] sm:$0xf] }
  0xde   : > { %vm1940_vm7 = vcmp.ge.f32.partialorder %v1788_v46, 0.0  ;;  %v2004_v47 = vmul.f32 0.1, %v1788_v46  ;;  %1660 = vmatmul.bf16.gmra.mxu2 %v2460_v42  ;;  %v1795_v54 = vpop.f32.mrf.mxu3 }
  0xe0   : > { %v2068_v49 = vsel %vm1940_vm7, %v1788_v46, %v2004_v47  ;;  %v2512_v46 = vor.u32 %v2985_v35, %v2509_v36  ;;  %v2993_v36 = vld [vmem:[%s3211_s18 + $0x20c] sm:$0xf] }
  0xe1   : > { %2133 = vst.msk [vmem:[%s3359_s8 + $0x28] sm:$0xff] %vm2127_vm2, %v2068_v49  ;;  %v1621_v50 = vpop.f32.mrf.mxu2  ;;  %v1285_v52 = vpop.f32.mrf.mxu0 }
  0xe2   : > { %v1622_v51 = vadd.f32 %v1621_v50, %v1453_v48  ;;  %v1454_v53 = vpop.f32.mrf.mxu1  ;;  %v1286_v56 = vadd.f32 %v3343_v3, %v1285_v52 }
  0xe4   : > { %v1791_v55 = vadd.f32 %v1790_v22, %v1622_v51  ;;  %v1455_v1 = vadd.f32 %v1454_v53, %v1286_v56 }
  0xe6   : > { %vm1941_vm8 = vcmp.ge.f32.partialorder %v1791_v55, 0.0  ;;  %v2005_v60 = vmul.f32 0.1, %v1791_v55  ;;  %v1797_v13 = vpop.f32.mrf.mxu3 }
  0xe8   : > { %v2069_v0 = vsel %vm1941_vm8, %v1791_v55, %v2005_v60  ;;  %v2984_v60 = vld [vmem:[%s3211_s18 + $0x1c4] sm:$0xf] }
  0xe9   : > { %2134 = vst.msk [vmem:[%s3359_s8 + $0x30] sm:$0xff] %vm2127_vm2, %v2069_v0  ;;  %v1623_v5 = vpop.f32.mrf.mxu2  ;;  %v1288_v9 = vpop.f32.mrf.mxu0  ;;  %v2987_v0 = vld [vmem:[%s3211_s18 + $0x1d4] sm:$0xf0] }
  0xea   : > { %v1624_v8 = vadd.f32 %v1623_v5, %v1455_v1  ;;  %v1457_v10 = vpop.f32.mrf.mxu1  ;;  %v1289_v12 = vadd.f32 %v3343_v3, %v1288_v9  ;;  %v2525_v5 = vld [vmem:[%s3211_s18 + $0x1f8] sm:$0xf0] }
  0xeb   : > { %2906 = vmatmul.msk.bf16.gmra.mxu3 %vm1162_vm0, %v2496_v14 }
  0xec   : > { %v1793_v15 = vadd.f32 %v1792_v44, %v1624_v8  ;;  %1327 = vmatmul.bf16.gmra.mxu0 %v2468_v6  ;;  %v1458_v17 = vadd.f32 %v1457_v10, %v1289_v12  ;;  %v2504_v8 = vor.u32 %v2984_v60, %v2501_v62  ;;  %v2508_v12 = vor.u32 %v2987_v0, %v2507_v63  ;;  %v2994_v60 = vld [vmem:[%s3211_s18 + $0x20c] sm:$0xf0]  ;;  %v2533_v63 = vld [vmem:[%s3211_s18 + $0x210] sm:$0xf0]  ;;  %v2539_v0 = vld [vmem:[%s3211_s18 + $0x208] sm:$0xf] }
  0xed   : > { %1496 = vmatmul.bf16.gmra.mxu1 %v2472_v7  ;;  %v2500_v7 = vor.u32 %v2986_v59, %v2499_v58  ;;  %v2531_v59 = vld [vmem:[%s3211_s18 + $0x200] sm:$0xf] }
  0xee   : > { %vm1942_vm9 = vcmp.ge.f32.partialorder %v1793_v15, 0.0  ;;  %v2006_v16 = vmul.f32 0.1, %v1793_v15  ;;  %1665 = vmatmul.bf16.gmra.mxu2 %v2476_v11  ;;  %v1800_v23 = vpop.f32.mrf.mxu3 }
  0xf0   : > { %v2070_v18 = vsel %vm1942_vm9, %v1793_v15, %v2006_v16  ;;  %v2528_v15 = vor.u32 %v2989_v4, %v2525_v5  ;;  %v2997_v5 = vld [vmem:[%s3211_s18 + $0x22c] sm:$0xf] }
  0xf1   : > { %2135 = vst.msk [vmem:[%s3359_s8 + $0x38] sm:$0xff] %vm2127_vm2, %v2070_v18  ;;  %v1626_v19 = vpop.f32.mrf.mxu2  ;;  %v1290_v21 = vpop.f32.mrf.mxu0 }
  0xf2   : > { %v1627_v20 = vadd.f32 %v1626_v19, %v1458_v17  ;;  %v1459_v22 = vpop.f32.mrf.mxu1  ;;  %v1291_v25 = vadd.f32 %v3343_v3, %v1290_v21 }
  0xf4   : > { %v1796_v24 = vadd.f32 %v1795_v54, %v1627_v20  ;;  %v1460_v34 = vadd.f32 %v1459_v22, %v1291_v25 }
  0xf6   : > { %vm1943_vm10 = vcmp.ge.f32.partialorder %v1796_v24, 0.0  ;;  %v2007_v29 = vmul.f32 0.1, %v1796_v24  ;;  %v1802_v45 = vpop.f32.mrf.mxu3 }
  0xf8   : > { %v2071_v33 = vsel %vm1943_vm10, %v1796_v24, %v2007_v29  ;;  %v2988_v29 = vld [vmem:[%s3211_s18 + $0x1e4] sm:$0xf] }
  0xf9   : > { %2136 = vst.msk [vmem:[%s3359_s8 + $0x40] sm:$0xff] %vm2127_vm2, %v2071_v33  ;;  %v1628_v37 = vpop.f32.mrf.mxu2  ;;  %v1293_v41 = vpop.f32.mrf.mxu0  ;;  %v2991_v33 = vld [vmem:[%s3211_s18 + $0x1f4] sm:$0xf0] }
  0xfa   : > { %v1629_v40 = vadd.f32 %v1628_v37, %v1460_v34  ;;  %v1462_v42 = vpop.f32.mrf.mxu1  ;;  %v1294_v44 = vadd.f32 %v3343_v3, %v1293_v41  ;;  %v2541_v37 = vld [vmem:[%s3211_s18 + $0x218] sm:$0xf0] }
  0xfb   : > { %2907 = vmatmul.msk.bf16.gmra.mxu3 %vm1162_vm0, %v2512_v46 }
  0xfc   : > { %v1798_v47 = vadd.f32 %v1797_v13, %v1629_v40  ;;  %1332 = vmatmul.bf16.gmra.mxu0 %v2484_v38  ;;  %v1463_v49 = vadd.f32 %v1462_v42, %v1294_v44  ;;  %v2520_v40 = vor.u32 %v2988_v29, %v2517_v31  ;;  %v2524_v44 = vor.u32 %v2991_v33, %v2523_v32  ;;  %v2998_v29 = vld [vmem:[%s3211_s18 + $0x22c] sm:$0xf0]  ;;  %v2549_v32 = vld [vmem:[%s3211_s18 + $0x230] sm:$0xf0]  ;;  %v2555_v33 = vld [vmem:[%s3211_s18 + $0x228] sm:$0xf] }
  0xfd   : > { %1501 = vmatmul.bf16.gmra.mxu1 %v2488_v39  ;;  %v2516_v39 = vor.u32 %v2990_v28, %v2515_v27  ;;  %v2547_v28 = vld [vmem:[%s3211_s18 + $0x220] sm:$0xf] }
  0xfe   : > { %vm1944_vm11 = vcmp.ge.f32.partialorder %v1798_v47, 0.0  ;;  %v2008_v48 = vmul.f32 0.1, %v1798_v47  ;;  %1670 = vmatmul.bf16.gmra.mxu2 %v2492_v43  ;;  %v1805_v55 = vpop.f32.mrf.mxu3 }
 0x100   : > { %v2072_v50 = vsel %vm1944_vm11, %v1798_v47, %v2008_v48  ;;  %v2544_v47 = vor.u32 %v2993_v36, %v2541_v37  ;;  %v3001_v37 = vld [vmem:[%s3211_s18 + $0x24c] sm:$0xf] }
 0x101   : > { %2137 = vst.msk [vmem:[%s3359_s8 + $0x48] sm:$0xff] %vm2127_vm2, %v2072_v50  ;;  %v1631_v51 = vpop.f32.mrf.mxu2  ;;  %v1295_v53 = vpop.f32.mrf.mxu0 }
 0x102   : > { %v1632_v52 = vadd.f32 %v1631_v51, %v1463_v49  ;;  %v1464_v54 = vpop.f32.mrf.mxu1  ;;  %v1296_v57 = vadd.f32 %v3343_v3, %v1295_v53 }
 0x104   : > { %v1801_v56 = vadd.f32 %v1800_v23, %v1632_v52  ;;  %v1465_v2 = vadd.f32 %v1464_v54, %v1296_v57 }
 0x106   : > { %vm1945_vm12 = vcmp.ge.f32.partialorder %v1801_v56, 0.0  ;;  %v2009_v61 = vmul.f32 0.1, %v1801_v56  ;;  %v1807_v14 = vpop.f32.mrf.mxu3 }
 0x108   : > { %v2073_v1 = vsel %vm1945_vm12, %v1801_v56, %v2009_v61  ;;  %v2992_v61 = vld [vmem:[%s3211_s18 + $0x204] sm:$0xf] }
 0x109   : > { %2138 = vst.msk [vmem:[%s3359_s8 + $0x50] sm:$0xff] %vm2127_vm2, %v2073_v1  ;;  %v1633_v6 = vpop.f32.mrf.mxu2  ;;  %v1298_v10 = vpop.f32.mrf.mxu0  ;;  %v2995_v1 = vld [vmem:[%s3211_s18 + $0x214] sm:$0xf0] }
 0x10a   : > { %v1634_v9 = vadd.f32 %v1633_v6, %v1465_v2  ;;  %v1467_v11 = vpop.f32.mrf.mxu1  ;;  %v1299_v13 = vadd.f32 %v3343_v3, %v1298_v10  ;;  %v2557_v6 = vld [vmem:[%s3211_s18 + $0x238] sm:$0xf0] }
 0x10b   : > { %2908 = vmatmul.msk.bf16.gmra.mxu3 %vm1162_vm0, %v2528_v15 }
 0x10c   : > { %v1803_v16 = vadd.f32 %v1802_v45, %v1634_v9  ;;  %1337 = vmatmul.bf16.gmra.mxu0 %v2500_v7  ;;  %v1468_v18 = vadd.f32 %v1467_v11, %v1299_v13  ;;  %v2536_v9 = vor.u32 %v2992_v61, %v2533_v63  ;;  %v2540_v13 = vor.u32 %v2995_v1, %v2539_v0  ;;  %v3002_v61 = vld [vmem:[%s3211_s18 + $0x24c] sm:$0xf0]  ;;  %v2565_v0 = vld [vmem:[%s3211_s18 + $0x250] sm:$0xf0]  ;;  %v2571_v1 = vld [vmem:[%s3211_s18 + $0x248] sm:$0xf] }
 0x10d   : > { %1506 = vmatmul.bf16.gmra.mxu1 %v2504_v8  ;;  %v2532_v8 = vor.u32 %v2994_v60, %v2531_v59  ;;  %v2563_v60 = vld [vmem:[%s3211_s18 + $0x240] sm:$0xf] }
 0x10e   : > { %vm1946_vm13 = vcmp.ge.f32.partialorder %v1803_v16, 0.0  ;;  %v2010_v17 = vmul.f32 0.1, %v1803_v16  ;;  %1675 = vmatmul.bf16.gmra.mxu2 %v2508_v12  ;;  %v1810_v24 = vpop.f32.mrf.mxu3 }
 0x110   : > { %v2074_v19 = vsel %vm1946_vm13, %v1803_v16, %v2010_v17  ;;  %v2560_v16 = vor.u32 %v2997_v5, %v2557_v6  ;;  %v3005_v6 = vld [vmem:[%s3211_s18 + $0x26c] sm:$0xf] }
 0x111   : > { %2139 = vst.msk [vmem:[%s3359_s8 + $0x58] sm:$0xff] %vm2127_vm2, %v2074_v19  ;;  %v1636_v20 = vpop.f32.mrf.mxu2  ;;  %v1300_v22 = vpop.f32.mrf.mxu0 }
 0x112   : > { %v1637_v21 = vadd.f32 %v1636_v20, %v1468_v18  ;;  %v1469_v23 = vpop.f32.mrf.mxu1  ;;  %v1301_v26 = vadd.f32 %v3343_v3, %v1300_v22 }
 0x114   : > { %v1806_v25 = vadd.f32 %v1805_v55, %v1637_v21  ;;  %v1470_v35 = vadd.f32 %v1469_v23, %v1301_v26 }
 0x116   : > { %vm1947_vm14 = vcmp.ge.f32.partialorder %v1806_v25, 0.0  ;;  %v2011_v30 = vmul.f32 0.1, %v1806_v25  ;;  %v1812_v46 = vpop.f32.mrf.mxu3 }
 0x118   : > { %v2075_v34 = vsel %vm1947_vm14, %v1806_v25, %v2011_v30  ;;  %v2996_v30 = vld [vmem:[%s3211_s18 + $0x224] sm:$0xf] }
 0x119   : > { %2140 = vst.msk [vmem:[%s3359_s8 + $0x60] sm:$0xff] %vm2127_vm2, %v2075_v34  ;;  %v1638_v38 = vpop.f32.mrf.mxu2  ;;  %v1303_v42 = vpop.f32.mrf.mxu0  ;;  %v2999_v34 = vld [vmem:[%s3211_s18 + $0x234] sm:$0xf0] }
 0x11a   : > { %v1639_v41 = vadd.f32 %v1638_v38, %v1470_v35  ;;  %v1472_v43 = vpop.f32.mrf.mxu1  ;;  %v1304_v45 = vadd.f32 %v3343_v3, %v1303_v42  ;;  %v2573_v38 = vld [vmem:[%s3211_s18 + $0x258] sm:$0xf0] }
 0x11b   : > { %2909 = vmatmul.msk.bf16.gmra.mxu3 %vm1162_vm0, %v2544_v47 }
 0x11c   : > { %v1808_v48 = vadd.f32 %v1807_v14, %v1639_v41  ;;  %1342 = vmatmul.bf16.gmra.mxu0 %v2516_v39  ;;  %v1473_v50 = vadd.f32 %v1472_v43, %v1304_v45  ;;  %v2552_v41 = vor.u32 %v2996_v30, %v2549_v32  ;;  %v2556_v45 = vor.u32 %v2999_v34, %v2555_v33  ;;  %v3006_v30 = vld [vmem:[%s3211_s18 + $0x26c] sm:$0xf0]  ;;  %v2581_v33 = vld [vmem:[%s3211_s18 + $0x270] sm:$0xf0]  ;;  %v2587_v34 = vld [vmem:[%s3211_s18 + $0x268] sm:$0xf] }
 0x11d   : > { %1511 = vmatmul.bf16.gmra.mxu1 %v2520_v40  ;;  %v2548_v40 = vor.u32 %v2998_v29, %v2547_v28  ;;  %v2579_v29 = vld [vmem:[%s3211_s18 + $0x260] sm:$0xf] }
 0x11e   : > { %vm1948_vm15 = vcmp.ge.f32.partialorder %v1808_v48, 0.0  ;;  %v2012_v49 = vmul.f32 0.1, %v1808_v48  ;;  %1680 = vmatmul.bf16.gmra.mxu2 %v2524_v44  ;;  %v1815_v56 = vpop.f32.mrf.mxu3 }
 0x120   : > { %v2076_v51 = vsel %vm1948_vm15, %v1808_v48, %v2012_v49  ;;  %v2576_v48 = vor.u32 %v3001_v37, %v2573_v38  ;;  %v3009_v38 = vld [vmem:[%s3211_s18 + $0x28c] sm:$0xf] }
 0x121   : > { %2141 = vst.msk [vmem:[%s3359_s8 + $0x68] sm:$0xff] %vm2127_vm2, %v2076_v51  ;;  %v1641_v52 = vpop.f32.mrf.mxu2  ;;  %v1305_v54 = vpop.f32.mrf.mxu0 }
 0x122   : > { %v1642_v53 = vadd.f32 %v1641_v52, %v1473_v50  ;;  %v1474_v55 = vpop.f32.mrf.mxu1  ;;  %v1306_v58 = vadd.f32 %v3343_v3, %v1305_v54 }
 0x124   : > { %v1811_v57 = vadd.f32 %v1810_v24, %v1642_v53  ;;  %v1475_v4 = vadd.f32 %v1474_v55, %v1306_v58 }
 0x126   : > { %vm1949_vm1 = vcmp.ge.f32.partialorder %v1811_v57, 0.0  ;;  %v2013_v62 = vmul.f32 0.1, %v1811_v57  ;;  %v1817_v15 = vpop.f32.mrf.mxu3 }
 0x128   : > { %v2077_v2 = vsel %vm1949_vm1, %v1811_v57, %v2013_v62  ;;  %v3000_v62 = vld [vmem:[%s3211_s18 + $0x244] sm:$0xf] }
 0x129   : > { %2142 = vst.msk [vmem:[%s3359_s8 + $0x70] sm:$0xff] %vm2127_vm2, %v2077_v2  ;;  %v1643_v7 = vpop.f32.mrf.mxu2  ;;  %v1308_v11 = vpop.f32.mrf.mxu0  ;;  %v3003_v2 = vld [vmem:[%s3211_s18 + $0x254] sm:$0xf0] }
 0x12a   : > { %v1644_v10 = vadd.f32 %v1643_v7, %v1475_v4  ;;  %v1477_v12 = vpop.f32.mrf.mxu1  ;;  %v1309_v14 = vadd.f32 %v3343_v3, %v1308_v11  ;;  %v2589_v7 = vld [vmem:[%s3211_s18 + $0x278] sm:$0xf0] }
 0x12b   : > { %2910 = vmatmul.msk.bf16.gmra.mxu3 %vm1162_vm0, %v2560_v16 }
 0x12c   : > { %v1813_v17 = vadd.f32 %v1812_v46, %v1644_v10  ;;  %1347 = vmatmul.bf16.gmra.mxu0 %v2532_v8  ;;  %v1478_v19 = vadd.f32 %v1477_v12, %v1309_v14  ;;  %v2568_v10 = vor.u32 %v3000_v62, %v2565_v0  ;;  %v2572_v14 = vor.u32 %v3003_v2, %v2571_v1  ;;  %v3010_v62 = vld [vmem:[%s3211_s18 + $0x28c] sm:$0xf0]  ;;  %v2597_v1 = vld [vmem:[%s3211_s18 + $0x290] sm:$0xf0]  ;;  %v2603_v2 = vld [vmem:[%s3211_s18 + $0x288] sm:$0xf] }
 0x12d   : > { %1516 = vmatmul.bf16.gmra.mxu1 %v2536_v9  ;;  %v2564_v9 = vor.u32 %v3002_v61, %v2563_v60  ;;  %v2595_v61 = vld [vmem:[%s3211_s18 + $0x280] sm:$0xf] }
 0x12e   : > { %vm1950_vm3 = vcmp.ge.f32.partialorder %v1813_v17, 0.0  ;;  %v2014_v18 = vmul.f32 0.1, %v1813_v17  ;;  %1685 = vmatmul.bf16.gmra.mxu2 %v2540_v13  ;;  %v1820_v25 = vpop.f32.mrf.mxu3 }
 0x130   : > { %v2078_v20 = vsel %vm1950_vm3, %v1813_v17, %v2014_v18  ;;  %v2592_v17 = vor.u32 %v3005_v6, %v2589_v7  ;;  %v3013_v7 = vld [vmem:[%s3211_s18 + $0x2ac] sm:$0xf] }
 0x131   : > { %2143 = vst.msk [vmem:[%s3359_s8 + $0x78] sm:$0xff] %vm2127_vm2, %v2078_v20  ;;  %v1646_v21 = vpop.f32.mrf.mxu2  ;;  %v1310_v23 = vpop.f32.mrf.mxu0 }
 0x132   : > { %v1647_v22 = vadd.f32 %v1646_v21, %v1478_v19  ;;  %v1479_v24 = vpop.f32.mrf.mxu1  ;;  %v1311_v27 = vadd.f32 %v3343_v3, %v1310_v23 }
 0x134   : > { %v1816_v26 = vadd.f32 %v1815_v56, %v1647_v22  ;;  %v1480_v36 = vadd.f32 %v1479_v24, %v1311_v27 }
 0x136   : > { %vm1951_vm4 = vcmp.ge.f32.partialorder %v1816_v26, 0.0  ;;  %v2015_v31 = vmul.f32 0.1, %v1816_v26  ;;  %v1822_v47 = vpop.f32.mrf.mxu3 }
 0x138   : > { %v2079_v35 = vsel %vm1951_vm4, %v1816_v26, %v2015_v31  ;;  %v3004_v31 = vld [vmem:[%s3211_s18 + $0x264] sm:$0xf] }
 0x139   : > { %2144 = vst.msk [vmem:[%s3359_s8 + $0x80] sm:$0xff] %vm2127_vm2, %v2079_v35  ;;  %v1648_v39 = vpop.f32.mrf.mxu2  ;;  %v1313_v43 = vpop.f32.mrf.mxu0  ;;  %v3007_v35 = vld [vmem:[%s3211_s18 + $0x274] sm:$0xf0] }
 0x13a   : > { %v1649_v42 = vadd.f32 %v1648_v39, %v1480_v36  ;;  %v1482_v44 = vpop.f32.mrf.mxu1  ;;  %v1314_v46 = vadd.f32 %v3343_v3, %v1313_v43  ;;  %v2605_v39 = vld [vmem:[%s3211_s18 + $0x298] sm:$0xf0] }
 0x13b   : > { %2911 = vmatmul.msk.bf16.gmra.mxu3 %vm1162_vm0, %v2576_v48 }
 0x13c   : > { %v1818_v49 = vadd.f32 %v1817_v15, %v1649_v42  ;;  %1352 = vmatmul.bf16.gmra.mxu0 %v2548_v40  ;;  %v1483_v51 = vadd.f32 %v1482_v44, %v1314_v46  ;;  %v2584_v42 = vor.u32 %v3004_v31, %v2581_v33  ;;  %v2588_v46 = vor.u32 %v3007_v35, %v2587_v34  ;;  %v3014_v31 = vld [vmem:[%s3211_s18 + $0x2ac] sm:$0xf0]  ;;  %v2613_v34 = vld [vmem:[%s3211_s18 + $0x2b0] sm:$0xf0]  ;;  %v2619_v35 = vld [vmem:[%s3211_s18 + $0x2a8] sm:$0xf] }
 0x13d   : > { %1521 = vmatmul.bf16.gmra.mxu1 %v2552_v41  ;;  %v2580_v41 = vor.u32 %v3006_v30, %v2579_v29  ;;  %v2611_v30 = vld [vmem:[%s3211_s18 + $0x2a0] sm:$0xf] }
 0x13e   : > { %vm1952_vm5 = vcmp.ge.f32.partialorder %v1818_v49, 0.0  ;;  %v2016_v50 = vmul.f32 0.1, %v1818_v49  ;;  %1690 = vmatmul.bf16.gmra.mxu2 %v2556_v45  ;;  %v1825_v57 = vpop.f32.mrf.mxu3 }
 0x140   : > { %v2080_v52 = vsel %vm1952_vm5, %v1818_v49, %v2016_v50  ;;  %v2608_v49 = vor.u32 %v3009_v38, %v2605_v39  ;;  %v3017_v39 = vld [vmem:[%s3211_s18 + $0x2cc] sm:$0xf] }
 0x141   : > { %2145 = vst.msk [vmem:[%s3359_s8 + $0x88] sm:$0xff] %vm2127_vm2, %v2080_v52  ;;  %v1651_v53 = vpop.f32.mrf.mxu2  ;;  %v1315_v55 = vpop.f32.mrf.mxu0 }
 0x142   : > { %v1652_v54 = vadd.f32 %v1651_v53, %v1483_v51  ;;  %v1484_v56 = vpop.f32.mrf.mxu1  ;;  %v1316_v59 = vadd.f32 %v3343_v3, %v1315_v55 }
 0x144   : > { %v1821_v58 = vadd.f32 %v1820_v25, %v1652_v54  ;;  %v1485_v5 = vadd.f32 %v1484_v56, %v1316_v59 }
 0x146   : > { %vm1953_vm6 = vcmp.ge.f32.partialorder %v1821_v58, 0.0  ;;  %v2017_v63 = vmul.f32 0.1, %v1821_v58  ;;  %v1827_v16 = vpop.f32.mrf.mxu3 }
 0x148   : > { %v2081_v4 = vsel %vm1953_vm6, %v1821_v58, %v2017_v63  ;;  %v3008_v63 = vld [vmem:[%s3211_s18 + $0x284] sm:$0xf] }
 0x149   : > { %2146 = vst.msk [vmem:[%s3359_s8 + $0x90] sm:$0xff] %vm2127_vm2, %v2081_v4  ;;  %v1653_v8 = vpop.f32.mrf.mxu2  ;;  %v1318_v12 = vpop.f32.mrf.mxu0  ;;  %v3011_v4 = vld [vmem:[%s3211_s18 + $0x294] sm:$0xf0] }
 0x14a   : > { %v1654_v11 = vadd.f32 %v1653_v8, %v1485_v5  ;;  %v1487_v13 = vpop.f32.mrf.mxu1  ;;  %v1319_v15 = vadd.f32 %v3343_v3, %v1318_v12  ;;  %v2621_v8 = vld [vmem:[%s3211_s18 + $0x2b8] sm:$0xf0] }
 0x14b   : > { %2912 = vmatmul.msk.bf16.gmra.mxu3 %vm1162_vm0, %v2592_v17 }
 0x14c   : > { %v1823_v18 = vadd.f32 %v1822_v47, %v1654_v11  ;;  %1357 = vmatmul.bf16.gmra.mxu0 %v2564_v9  ;;  %v1488_v20 = vadd.f32 %v1487_v13, %v1319_v15  ;;  %v2600_v11 = vor.u32 %v3008_v63, %v2597_v1  ;;  %v2604_v15 = vor.u32 %v3011_v4, %v2603_v2  ;;  %v3018_v63 = vld [vmem:[%s3211_s18 + $0x2cc] sm:$0xf0]  ;;  %v2629_v2 = vld [vmem:[%s3211_s18 + $0x2d0] sm:$0xf0]  ;;  %v2635_v4 = vld [vmem:[%s3211_s18 + $0x2c8] sm:$0xf] }
 0x14d   : > { %1526 = vmatmul.bf16.gmra.mxu1 %v2568_v10  ;;  %v2596_v10 = vor.u32 %v3010_v62, %v2595_v61  ;;  %v2627_v62 = vld [vmem:[%s3211_s18 + $0x2c0] sm:$0xf] }
 0x14e   : > { %vm1954_vm7 = vcmp.ge.f32.partialorder %v1823_v18, 0.0  ;;  %v2018_v19 = vmul.f32 0.1, %v1823_v18  ;;  %1695 = vmatmul.bf16.gmra.mxu2 %v2572_v14  ;;  %v1830_v26 = vpop.f32.mrf.mxu3 }
 0x150   : > { %v2082_v21 = vsel %vm1954_vm7, %v1823_v18, %v2018_v19  ;;  %v2624_v18 = vor.u32 %v3013_v7, %v2621_v8  ;;  %v3021_v8 = vld [vmem:[%s3211_s18 + $0x2ec] sm:$0xf] }
 0x151   : > { %2147 = vst.msk [vmem:[%s3359_s8 + $0x98] sm:$0xff] %vm2127_vm2, %v2082_v21  ;;  %v1656_v22 = vpop.f32.mrf.mxu2  ;;  %v1320_v24 = vpop.f32.mrf.mxu0 }
 0x152   : > { %v1657_v23 = vadd.f32 %v1656_v22, %v1488_v20  ;;  %v1489_v25 = vpop.f32.mrf.mxu1  ;;  %v1321_v28 = vadd.f32 %v3343_v3, %v1320_v24 }
 0x154   : > { %v1826_v27 = vadd.f32 %v1825_v57, %v1657_v23  ;;  %v1490_v37 = vadd.f32 %v1489_v25, %v1321_v28 }
 0x156   : > { %vm1955_vm8 = vcmp.ge.f32.partialorder %v1826_v27, 0.0  ;;  %v2019_v32 = vmul.f32 0.1, %v1826_v27  ;;  %v1832_v48 = vpop.f32.mrf.mxu3 }
 0x158   : > { %v2083_v36 = vsel %vm1955_vm8, %v1826_v27, %v2019_v32  ;;  %v3012_v32 = vld [vmem:[%s3211_s18 + $0x2a4] sm:$0xf] }
 0x159   : > { %2148 = vst.msk [vmem:[%s3359_s8 + $0xa0] sm:$0xff] %vm2127_vm2, %v2083_v36  ;;  %v1658_v40 = vpop.f32.mrf.mxu2  ;;  %v1323_v44 = vpop.f32.mrf.mxu0  ;;  %v3015_v36 = vld [vmem:[%s3211_s18 + $0x2b4] sm:$0xf0] }
 0x15a   : > { %v1659_v43 = vadd.f32 %v1658_v40, %v1490_v37  ;;  %v1492_v45 = vpop.f32.mrf.mxu1  ;;  %v1324_v47 = vadd.f32 %v3343_v3, %v1323_v44  ;;  %v2637_v40 = vld [vmem:[%s3211_s18 + $0x2d8] sm:$0xf0] }
 0x15b   : > { %2913 = vmatmul.msk.bf16.gmra.mxu3 %vm1162_vm0, %v2608_v49 }
 0x15c   : > { %v1828_v50 = vadd.f32 %v1827_v16, %v1659_v43  ;;  %1362 = vmatmul.bf16.gmra.mxu0 %v2580_v41  ;;  %v1493_v52 = vadd.f32 %v1492_v45, %v1324_v47  ;;  %v2616_v43 = vor.u32 %v3012_v32, %v2613_v34  ;;  %v3551_v47 = vld [vmem:[%s3773_s2] ss:$0 sm:$0xff]  ;;  %v3022_v32 = vld [vmem:[%s3211_s18 + $0x2ec] sm:$0xf0] }
 0x15d   : > { %1531 = vmatmul.bf16.gmra.mxu1 %v2584_v42  ;;  %v2612_v42 = vor.u32 %v3014_v31, %v2611_v30  ;;  %v2643_v31 = vld [vmem:[%s3211_s18 + $0x2e0] sm:$0xf] }
 0x15e   : > { %vm1956_vm9 = vcmp.ge.f32.partialorder %v1828_v50, 0.0  ;;  %v2020_v51 = vmul.f32 0.1, %v1828_v50  ;;  %1700 = vmatmul.bf16.gmra.mxu2 %v2588_v46  ;;  %v1835_v58 = vpop.f32.mrf.mxu3  ;;  %v2620_v46 = vor.u32 %v3015_v36, %v2619_v35  ;;  %v2645_v35 = vld [vmem:[%s3211_s18 + $0x2f0] sm:$0xf0] }
 0x15f   : > { %v2651_v36 = vld [vmem:[%s3211_s18 + $0x2e8] sm:$0xf] }
 0x160   : > { %v2084_v53 = vsel %vm1956_vm9, %v1828_v50, %v2020_v51  ;;  %v2640_v50 = vor.u32 %v3017_v39, %v2637_v40  ;;  %v3025_v40 = vld [vmem:[%s3211_s18 + $0x30c] sm:$0xf] }
 0x161   : > { %2149 = vst.msk [vmem:[%s3359_s8 + $0xa8] sm:$0xff] %vm2127_vm2, %v2084_v53  ;;  %v1661_v54 = vpop.f32.mrf.mxu2  ;;  %v1325_v56 = vpop.f32.mrf.mxu0 }
 0x162   : > { %v1662_v55 = vadd.f32 %v1661_v54, %v1493_v52  ;;  %v1494_v57 = vpop.f32.mrf.mxu1  ;;  %v1326_v60 = vadd.f32 %v3343_v3, %v1325_v56 }
 0x164   : > { %v1831_v59 = vadd.f32 %v1830_v26, %v1662_v55  ;;  %v1495_v6 = vadd.f32 %v1494_v57, %v1326_v60 }
 0x166   : > { %vm1957_vm10 = vcmp.ge.f32.partialorder %v1831_v59, 0.0  ;;  %v2021_v0 = vmul.f32 0.1, %v1831_v59  ;;  %v1837_v17 = vpop.f32.mrf.mxu3 }
 0x168   : > { %v2085_v5 = vsel %vm1957_vm10, %v1831_v59, %v2021_v0  ;;  %v3016_v0 = vld [vmem:[%s3211_s18 + $0x2c4] sm:$0xf] }
 0x169   : > { %2150 = vst.msk [vmem:[%s3359_s8 + $0xb0] sm:$0xff] %vm2127_vm2, %v2085_v5  ;;  %v1663_v9 = vpop.f32.mrf.mxu2  ;;  %v1328_v13 = vpop.f32.mrf.mxu0  ;;  %v3019_v5 = vld [vmem:[%s3211_s18 + $0x2d4] sm:$0xf0] }
 0x16a   : > { %v1664_v12 = vadd.f32 %v1663_v9, %v1495_v6  ;;  %v1497_v14 = vpop.f32.mrf.mxu1  ;;  %v1329_v16 = vadd.f32 %v3343_v3, %v1328_v13  ;;  %v2653_v9 = vld [vmem:[%s3211_s18 + $0x2f8] sm:$0xf0] }
 0x16b   : > { %2914 = vmatmul.msk.bf16.gmra.mxu3 %vm1162_vm0, %v2624_v18 }
 0x16c   : > { %v1833_v19 = vadd.f32 %v1832_v48, %v1664_v12  ;;  %1367 = vmatmul.bf16.gmra.mxu0 %v2596_v10  ;;  %v1498_v21 = vadd.f32 %v1497_v14, %v1329_v16  ;;  %v2632_v12 = vor.u32 %v3016_v0, %v2629_v2  ;;  %v2636_v16 = vor.u32 %v3019_v5, %v2635_v4  ;;  %v3026_v0 = vld [vmem:[%s3211_s18 + $0x30c] sm:$0xf0]  ;;  %v2661_v4 = vld [vmem:[%s3211_s18 + $0x310] sm:$0xf0]  ;;  %v2667_v5 = vld [vmem:[%s3211_s18 + $0x308] sm:$0xf] }
 0x16d   : > { %1536 = vmatmul.bf16.gmra.mxu1 %v2600_v11  ;;  %v2628_v11 = vor.u32 %v3018_v63, %v2627_v62  ;;  %v2659_v63 = vld [vmem:[%s3211_s18 + $0x300] sm:$0xf] }
 0x16e   : > { %vm1958_vm11 = vcmp.ge.f32.partialorder %v1833_v19, 0.0  ;;  %v2022_v20 = vmul.f32 0.1, %v1833_v19  ;;  %1705 = vmatmul.bf16.gmra.mxu2 %v2604_v15  ;;  %v1840_v27 = vpop.f32.mrf.mxu3 }
 0x170   : > { %v2086_v22 = vsel %vm1958_vm11, %v1833_v19, %v2022_v20  ;;  %v2656_v19 = vor.u32 %v3021_v8, %v2653_v9  ;;  %v3029_v9 = vld [vmem:[%s3211_s18 + $0x32c] sm:$0xf] }
 0x171   : > { %2151 = vst.msk [vmem:[%s3359_s8 + $0xb8] sm:$0xff] %vm2127_vm2, %v2086_v22  ;;  %v1666_v23 = vpop.f32.mrf.mxu2  ;;  %v1330_v25 = vpop.f32.mrf.mxu0 }
 0x172   : > { %v1667_v24 = vadd.f32 %v1666_v23, %v1498_v21  ;;  %v1499_v26 = vpop.f32.mrf.mxu1  ;;  %v1331_v29 = vadd.f32 %v3343_v3, %v1330_v25 }
 0x174   : > { %v1836_v28 = vadd.f32 %v1835_v58, %v1667_v24  ;;  %v1500_v38 = vadd.f32 %v1499_v26, %v1331_v29 }
 0x176   : > { %vm1959_vm12 = vcmp.ge.f32.partialorder %v1836_v28, 0.0  ;;  %v2023_v33 = vmul.f32 0.1, %v1836_v28  ;;  %v1842_v49 = vpop.f32.mrf.mxu3 }
 0x178   : > { %v2087_v37 = vsel %vm1959_vm12, %v1836_v28, %v2023_v33  ;;  %v3020_v33 = vld [vmem:[%s3211_s18 + $0x2e4] sm:$0xf] }
 0x179   : > { %2152 = vst.msk [vmem:[%s3359_s8 + $0xc0] sm:$0xff] %vm2127_vm2, %v2087_v37  ;;  %v1668_v41 = vpop.f32.mrf.mxu2  ;;  %v1333_v45 = vpop.f32.mrf.mxu0  ;;  %v3023_v37 = vld [vmem:[%s3211_s18 + $0x2f4] sm:$0xf0] }
 0x17a   : > { %v1669_v44 = vadd.f32 %v1668_v41, %v1500_v38  ;;  %v1502_v3 = vpop.f32.mrf.mxu1  ;;  %v1334_v48 = vadd.f32 %v3551_v47, %v1333_v45  ;;  %v2669_v41 = vld [vmem:[%s3211_s18 + $0x318] sm:$0xf0] }
 0x17b   : > { %2915 = vmatmul.msk.bf16.gmra.mxu3 %vm1162_vm0, %v2640_v50 }
 0x17c   : > { %v1838_v51 = vadd.f32 %v1837_v17, %v1669_v44  ;;  %1372 = vmatmul.bf16.gmra.mxu0 %v2612_v42  ;;  %v1503_v53 = vadd.f32 %v1502_v3, %v1334_v48  ;;  %v2648_v44 = vor.u32 %v3020_v33, %v2645_v35  ;;  %v2652_v48 = vor.u32 %v3023_v37, %v2651_v36  ;;  %v3030_v33 = vld [vmem:[%s3211_s18 + $0x32c] sm:$0xf0]  ;;  %v2677_v36 = vld [vmem:[%s3211_s18 + $0x330] sm:$0xf0]  ;;  %v2683_v37 = vld [vmem:[%s3211_s18 + $0x328] sm:$0xf] }
 0x17d   : > { %1541 = vmatmul.bf16.gmra.mxu1 %v2616_v43  ;;  %v2644_v43 = vor.u32 %v3022_v32, %v2643_v31  ;;  %v2675_v32 = vld [vmem:[%s3211_s18 + $0x320] sm:$0xf] }
 0x17e   : > { %vm1960_vm13 = vcmp.ge.f32.partialorder %v1838_v51, 0.0  ;;  %v2024_v52 = vmul.f32 0.1, %v1838_v51  ;;  %1710 = vmatmul.bf16.gmra.mxu2 %v2620_v46  ;;  %v1845_v59 = vpop.f32.mrf.mxu3 }
 0x180   : > { %v2088_v54 = vsel %vm1960_vm13, %v1838_v51, %v2024_v52  ;;  %v2672_v51 = vor.u32 %v3025_v40, %v2669_v41  ;;  %v3033_v41 = vld [vmem:[%s3211_s18 + $0x34c] sm:$0xf] }
 0x181   : > { %2153 = vst.msk [vmem:[%s3359_s8 + $0xc8] sm:$0xff] %vm2127_vm2, %v2088_v54  ;;  %v1671_v55 = vpop.f32.mrf.mxu2  ;;  %v1335_v57 = vpop.f32.mrf.mxu0 }
 0x182   : > { %v1672_v56 = vadd.f32 %v1671_v55, %v1503_v53  ;;  %v1504_v58 = vpop.f32.mrf.mxu1  ;;  %v1336_v61 = vadd.f32 %v3551_v47, %v1335_v57 }
 0x184   : > { %v1841_v60 = vadd.f32 %v1840_v27, %v1672_v56  ;;  %v1505_v7 = vadd.f32 %v1504_v58, %v1336_v61 }
 0x186   : > { %vm1961_vm14 = vcmp.ge.f32.partialorder %v1841_v60, 0.0  ;;  %v2025_v1 = vmul.f32 0.1, %v1841_v60  ;;  %v1847_v18 = vpop.f32.mrf.mxu3 }
 0x188   : > { %v2089_v6 = vsel %vm1961_vm14, %v1841_v60, %v2025_v1  ;;  %v3024_v1 = vld [vmem:[%s3211_s18 + $0x304] sm:$0xf] }
 0x189   : > { %2154 = vst.msk [vmem:[%s3359_s8 + $0xd0] sm:$0xff] %vm2127_vm2, %v2089_v6  ;;  %v1673_v10 = vpop.f32.mrf.mxu2  ;;  %v1338_v14 = vpop.f32.mrf.mxu0  ;;  %v3027_v6 = vld [vmem:[%s3211_s18 + $0x314] sm:$0xf0] }
 0x18a   : > { %v1674_v13 = vadd.f32 %v1673_v10, %v1505_v7  ;;  %v1507_v15 = vpop.f32.mrf.mxu1  ;;  %v1339_v17 = vadd.f32 %v3551_v47, %v1338_v14  ;;  %v2685_v10 = vld [vmem:[%s3211_s18 + $0x338] sm:$0xf0] }
 0x18b   : > { %2916 = vmatmul.msk.bf16.gmra.mxu3 %vm1162_vm0, %v2656_v19 }
 0x18c   : > { %v1843_v20 = vadd.f32 %v1842_v49, %v1674_v13  ;;  %1377 = vmatmul.bf16.gmra.mxu0 %v2628_v11  ;;  %v1508_v22 = vadd.f32 %v1507_v15, %v1339_v17  ;;  %v2664_v13 = vor.u32 %v3024_v1, %v2661_v4  ;;  %v2668_v17 = vor.u32 %v3027_v6, %v2667_v5  ;;  %v3034_v1 = vld [vmem:[%s3211_s18 + $0x34c] sm:$0xf0]  ;;  %v2693_v5 = vld [vmem:[%s3211_s18 + $0x350] sm:$0xf0]  ;;  %v2699_v6 = vld [vmem:[%s3211_s18 + $0x348] sm:$0xf] }
 0x18d   : > { %1546 = vmatmul.bf16.gmra.mxu1 %v2632_v12  ;;  %v2660_v12 = vor.u32 %v3026_v0, %v2659_v63  ;;  %v2691_v0 = vld [vmem:[%s3211_s18 + $0x340] sm:$0xf] }
 0x18e   : > { %vm1962_vm15 = vcmp.ge.f32.partialorder %v1843_v20, 0.0  ;;  %v2026_v21 = vmul.f32 0.1, %v1843_v20  ;;  %1715 = vmatmul.bf16.gmra.mxu2 %v2636_v16  ;;  %v1850_v28 = vpop.f32.mrf.mxu3 }
 0x190   : > { %v2090_v23 = vsel %vm1962_vm15, %v1843_v20, %v2026_v21  ;;  %v2688_v20 = vor.u32 %v3029_v9, %v2685_v10  ;;  %v3037_v10 = vld [vmem:[%s3211_s18 + $0x36c] sm:$0xf] }
 0x191   : > { %2155 = vst.msk [vmem:[%s3359_s8 + $0xd8] sm:$0xff] %vm2127_vm2, %v2090_v23  ;;  %v1676_v24 = vpop.f32.mrf.mxu2  ;;  %v1340_v26 = vpop.f32.mrf.mxu0 }
 0x192   : > { %v1677_v25 = vadd.f32 %v1676_v24, %v1508_v22  ;;  %v1509_v27 = vpop.f32.mrf.mxu1  ;;  %v1341_v30 = vadd.f32 %v3551_v47, %v1340_v26 }
 0x194   : > { %v1846_v29 = vadd.f32 %v1845_v59, %v1677_v25  ;;  %v1510_v39 = vadd.f32 %v1509_v27, %v1341_v30 }
 0x196   : > { %vm1963_vm1 = vcmp.ge.f32.partialorder %v1846_v29, 0.0  ;;  %v2027_v34 = vmul.f32 0.1, %v1846_v29  ;;  %v1852_v50 = vpop.f32.mrf.mxu3 }
 0x198   : > { %v2091_v38 = vsel %vm1963_vm1, %v1846_v29, %v2027_v34  ;;  %v3028_v34 = vld [vmem:[%s3211_s18 + $0x324] sm:$0xf] }
 0x199   : > { %2156 = vst.msk [vmem:[%s3359_s8 + $0xe0] sm:$0xff] %vm2127_vm2, %v2091_v38  ;;  %v1678_v42 = vpop.f32.mrf.mxu2  ;;  %v1343_v3 = vpop.f32.mrf.mxu0  ;;  %v3031_v38 = vld [vmem:[%s3211_s18 + $0x334] sm:$0xf0] }
 0x19a   : > { %v1679_v45 = vadd.f32 %v1678_v42, %v1510_v39  ;;  %v1512_v46 = vpop.f32.mrf.mxu1  ;;  %v1344_v49 = vadd.f32 %v3551_v47, %v1343_v3  ;;  %v2701_v42 = vld [vmem:[%s3211_s18 + $0x358] sm:$0xf0] }
 0x19b   : > { %2917 = vmatmul.msk.bf16.gmra.mxu3 %vm1162_vm0, %v2672_v51 }
 0x19c   : > { %v1848_v52 = vadd.f32 %v1847_v18, %v1679_v45  ;;  %1382 = vmatmul.bf16.gmra.mxu0 %v2644_v43  ;;  %v1513_v54 = vadd.f32 %v1512_v46, %v1344_v49  ;;  %v2680_v45 = vor.u32 %v3028_v34, %v2677_v36  ;;  %v2684_v49 = vor.u32 %v3031_v38, %v2683_v37  ;;  %v3038_v34 = vld [vmem:[%s3211_s18 + $0x36c] sm:$0xf0]  ;;  %v2709_v37 = vld [vmem:[%s3211_s18 + $0x370] sm:$0xf0]  ;;  %v2715_v38 = vld [vmem:[%s3211_s18 + $0x368] sm:$0xf] }
 0x19d   : > { %1551 = vmatmul.bf16.gmra.mxu1 %v2648_v44  ;;  %v2676_v44 = vor.u32 %v3030_v33, %v2675_v32  ;;  %v2707_v33 = vld [vmem:[%s3211_s18 + $0x360] sm:$0xf] }
 0x19e   : > { %vm1964_vm3 = vcmp.ge.f32.partialorder %v1848_v52, 0.0  ;;  %v2028_v53 = vmul.f32 0.1, %v1848_v52  ;;  %1720 = vmatmul.bf16.gmra.mxu2 %v2652_v48  ;;  %v1855_v60 = vpop.f32.mrf.mxu3 }
 0x1a0   : > { %v2092_v55 = vsel %vm1964_vm3, %v1848_v52, %v2028_v53  ;;  %v2704_v52 = vor.u32 %v3033_v41, %v2701_v42  ;;  %v3041_v42 = vld [vmem:[%s3211_s18 + $0x38c] sm:$0xf] }
 0x1a1   : > { %2157 = vst.msk [vmem:[%s3359_s8 + $0xe8] sm:$0xff] %vm2127_vm2, %v2092_v55  ;;  %v1681_v56 = vpop.f32.mrf.mxu2  ;;  %v1345_v58 = vpop.f32.mrf.mxu0 }
 0x1a2   : > { %v1682_v57 = vadd.f32 %v1681_v56, %v1513_v54  ;;  %v1514_v59 = vpop.f32.mrf.mxu1  ;;  %v1346_v62 = vadd.f32 %v3551_v47, %v1345_v58 }
 0x1a4   : > { %v1851_v61 = vadd.f32 %v1850_v28, %v1682_v57  ;;  %v1515_v8 = vadd.f32 %v1514_v59, %v1346_v62 }
 0x1a6   : > { %vm1965_vm4 = vcmp.ge.f32.partialorder %v1851_v61, 0.0  ;;  %v2029_v2 = vmul.f32 0.1, %v1851_v61  ;;  %v1857_v19 = vpop.f32.mrf.mxu3 }
 0x1a8   : > { %v2093_v7 = vsel %vm1965_vm4, %v1851_v61, %v2029_v2  ;;  %v3032_v2 = vld [vmem:[%s3211_s18 + $0x344] sm:$0xf] }
 0x1a9   : > { %2158 = vst.msk [vmem:[%s3359_s8 + $0xf0] sm:$0xff] %vm2127_vm2, %v2093_v7  ;;  %v1683_v11 = vpop.f32.mrf.mxu2  ;;  %v1348_v15 = vpop.f32.mrf.mxu0  ;;  %v3035_v7 = vld [vmem:[%s3211_s18 + $0x354] sm:$0xf0] }
 0x1aa   : > { %v1684_v14 = vadd.f32 %v1683_v11, %v1515_v8  ;;  %v1517_v16 = vpop.f32.mrf.mxu1  ;;  %v1349_v18 = vadd.f32 %v3551_v47, %v1348_v15  ;;  %v2717_v11 = vld [vmem:[%s3211_s18 + $0x378] sm:$0xf0] }
 0x1ab   : > { %2918 = vmatmul.msk.bf16.gmra.mxu3 %vm1162_vm0, %v2688_v20 }
 0x1ac   : > { %v1853_v21 = vadd.f32 %v1852_v50, %v1684_v14  ;;  %1387 = vmatmul.bf16.gmra.mxu0 %v2660_v12  ;;  %v1518_v23 = vadd.f32 %v1517_v16, %v1349_v18  ;;  %v2696_v14 = vor.u32 %v3032_v2, %v2693_v5  ;;  %v2700_v18 = vor.u32 %v3035_v7, %v2699_v6  ;;  %v3042_v2 = vld [vmem:[%s3211_s18 + $0x38c] sm:$0xf0]  ;;  %v2725_v6 = vld [vmem:[%s3211_s18 + $0x390] sm:$0xf0]  ;;  %v2731_v7 = vld [vmem:[%s3211_s18 + $0x388] sm:$0xf] }
 0x1ad   : > { %1556 = vmatmul.bf16.gmra.mxu1 %v2664_v13  ;;  %v2692_v13 = vor.u32 %v3034_v1, %v2691_v0  ;;  %v2723_v1 = vld [vmem:[%s3211_s18 + $0x380] sm:$0xf] }
 0x1ae   : > { %vm1966_vm5 = vcmp.ge.f32.partialorder %v1853_v21, 0.0  ;;  %v2030_v22 = vmul.f32 0.1, %v1853_v21  ;;  %1725 = vmatmul.bf16.gmra.mxu2 %v2668_v17  ;;  %v1860_v29 = vpop.f32.mrf.mxu3 }
 0x1b0   : > { %v2094_v24 = vsel %vm1966_vm5, %v1853_v21, %v2030_v22  ;;  %v2720_v21 = vor.u32 %v3037_v10, %v2717_v11  ;;  %v3045_v11 = vld [vmem:[%s3211_s18 + $0x3ac] sm:$0xf] }
 0x1b1   : > { %2159 = vst.msk [vmem:[%s3359_s8 + $0xf8] sm:$0xff] %vm2127_vm2, %v2094_v24  ;;  %v1686_v25 = vpop.f32.mrf.mxu2  ;;  %v1350_v27 = vpop.f32.mrf.mxu0 }
 0x1b2   : > { %v1687_v26 = vadd.f32 %v1686_v25, %v1518_v23  ;;  %v1519_v28 = vpop.f32.mrf.mxu1  ;;  %v1351_v31 = vadd.f32 %v3551_v47, %v1350_v27 }
 0x1b4   : > { %v1856_v30 = vadd.f32 %v1855_v60, %v1687_v26  ;;  %v1520_v40 = vadd.f32 %v1519_v28, %v1351_v31 }
 0x1b6   : > { %vm1967_vm6 = vcmp.ge.f32.partialorder %v1856_v30, 0.0  ;;  %v2031_v35 = vmul.f32 0.1, %v1856_v30  ;;  %v1862_v51 = vpop.f32.mrf.mxu3 }
 0x1b8   : > { %v2095_v39 = vsel %vm1967_vm6, %v1856_v30, %v2031_v35  ;;  %v3036_v35 = vld [vmem:[%s3211_s18 + $0x364] sm:$0xf] }
 0x1b9   : > { %2160 = vst.msk [vmem:[%s3359_s8 + $0x100] sm:$0xff] %vm2127_vm2, %v2095_v39  ;;  %v1688_v43 = vpop.f32.mrf.mxu2  ;;  %v1353_v46 = vpop.f32.mrf.mxu0  ;;  %v3039_v39 = vld [vmem:[%s3211_s18 + $0x374] sm:$0xf0] }
 0x1ba   : > { %v1689_v3 = vadd.f32 %v1688_v43, %v1520_v40  ;;  %v1522_v48 = vpop.f32.mrf.mxu1  ;;  %v1354_v50 = vadd.f32 %v3551_v47, %v1353_v46  ;;  %v2733_v43 = vld [vmem:[%s3211_s18 + $0x398] sm:$0xf0] }
 0x1bb   : > { %2919 = vmatmul.msk.bf16.gmra.mxu3 %vm1162_vm0, %v2704_v52 }
 0x1bc   : > { %v1858_v53 = vadd.f32 %v1857_v19, %v1689_v3  ;;  %1392 = vmatmul.bf16.gmra.mxu0 %v2676_v44  ;;  %v1523_v55 = vadd.f32 %v1522_v48, %v1354_v50  ;;  %v2712_v3 = vor.u32 %v3036_v35, %v2709_v37  ;;  %v2716_v50 = vor.u32 %v3039_v39, %v2715_v38  ;;  %v3046_v35 = vld [vmem:[%s3211_s18 + $0x3ac] sm:$0xf0]  ;;  %v2741_v38 = vld [vmem:[%s3211_s18 + $0x3b0] sm:$0xf0]  ;;  %v2747_v39 = vld [vmem:[%s3211_s18 + $0x3a8] sm:$0xf] }
 0x1bd   : > { %1561 = vmatmul.bf16.gmra.mxu1 %v2680_v45  ;;  %v2708_v45 = vor.u32 %v3038_v34, %v2707_v33  ;;  %v2739_v34 = vld [vmem:[%s3211_s18 + $0x3a0] sm:$0xf] }
 0x1be   : > { %vm1968_vm7 = vcmp.ge.f32.partialorder %v1858_v53, 0.0  ;;  %v2032_v54 = vmul.f32 0.1, %v1858_v53  ;;  %1730 = vmatmul.bf16.gmra.mxu2 %v2684_v49  ;;  %v1865_v61 = vpop.f32.mrf.mxu3 }
 0x1c0   : > { %v2096_v56 = vsel %vm1968_vm7, %v1858_v53, %v2032_v54  ;;  %v2736_v53 = vor.u32 %v3041_v42, %v2733_v43  ;;  %v3049_v43 = vld [vmem:[%s3211_s18 + $0x3cc] sm:$0xf] }
 0x1c1   : > { %2161 = vst.msk [vmem:[%s3359_s8 + $0x108] sm:$0xff] %vm2127_vm2, %v2096_v56  ;;  %v1691_v57 = vpop.f32.mrf.mxu2  ;;  %v1355_v59 = vpop.f32.mrf.mxu0 }
 0x1c2   : > { %v1692_v58 = vadd.f32 %v1691_v57, %v1523_v55  ;;  %v1524_v60 = vpop.f32.mrf.mxu1  ;;  %v1356_v63 = vadd.f32 %v3551_v47, %v1355_v59 }
 0x1c4   : > { %v1861_v62 = vadd.f32 %v1860_v29, %v1692_v58  ;;  %v1525_v9 = vadd.f32 %v1524_v60, %v1356_v63 }
 0x1c6   : > { %vm1969_vm8 = vcmp.ge.f32.partialorder %v1861_v62, 0.0  ;;  %v2033_v4 = vmul.f32 0.1, %v1861_v62  ;;  %v1867_v20 = vpop.f32.mrf.mxu3 }
 0x1c8   : > { %v2097_v8 = vsel %vm1969_vm8, %v1861_v62, %v2033_v4  ;;  %v3040_v4 = vld [vmem:[%s3211_s18 + $0x384] sm:$0xf] }
 0x1c9   : > { %2162 = vst.msk [vmem:[%s3359_s8 + $0x110] sm:$0xff] %vm2127_vm2, %v2097_v8  ;;  %v1693_v12 = vpop.f32.mrf.mxu2  ;;  %v1358_v16 = vpop.f32.mrf.mxu0  ;;  %v3043_v8 = vld [vmem:[%s3211_s18 + $0x394] sm:$0xf0] }
 0x1ca   : > { %v1694_v15 = vadd.f32 %v1693_v12, %v1525_v9  ;;  %v1527_v17 = vpop.f32.mrf.mxu1  ;;  %v1359_v19 = vadd.f32 %v3551_v47, %v1358_v16  ;;  %v2749_v12 = vld [vmem:[%s3211_s18 + $0x3b8] sm:$0xf0] }
 0x1cb   : > { %2920 = vmatmul.msk.bf16.gmra.mxu3 %vm1162_vm0, %v2720_v21 }
 0x1cc   : > { %v1863_v22 = vadd.f32 %v1862_v51, %v1694_v15  ;;  %1397 = vmatmul.bf16.gmra.mxu0 %v2692_v13  ;;  %v1528_v24 = vadd.f32 %v1527_v17, %v1359_v19  ;;  %v2728_v15 = vor.u32 %v3040_v4, %v2725_v6  ;;  %v2732_v19 = vor.u32 %v3043_v8, %v2731_v7  ;;  %v3050_v4 = vld [vmem:[%s3211_s18 + $0x3cc] sm:$0xf0]  ;;  %v2757_v7 = vld [vmem:[%s3211_s18 + $0x3d0] sm:$0xf0]  ;;  %v2763_v8 = vld [vmem:[%s3211_s18 + $0x3c8] sm:$0xf] }
 0x1cd   : > { %1566 = vmatmul.bf16.gmra.mxu1 %v2696_v14  ;;  %v2724_v14 = vor.u32 %v3042_v2, %v2723_v1  ;;  %v2755_v2 = vld [vmem:[%s3211_s18 + $0x3c0] sm:$0xf] }
 0x1ce   : > { %vm1970_vm9 = vcmp.ge.f32.partialorder %v1863_v22, 0.0  ;;  %v2034_v23 = vmul.f32 0.1, %v1863_v22  ;;  %1735 = vmatmul.bf16.gmra.mxu2 %v2700_v18  ;;  %v1870_v30 = vpop.f32.mrf.mxu3 }
 0x1d0   : > { %v2098_v25 = vsel %vm1970_vm9, %v1863_v22, %v2034_v23  ;;  %v2752_v22 = vor.u32 %v3045_v11, %v2749_v12  ;;  %v3053_v12 = vld [vmem:[%s3211_s18 + $0x3ec] sm:$0xf] }
 0x1d1   : > { %2163 = vst.msk [vmem:[%s3359_s8 + $0x118] sm:$0xff] %vm2127_vm2, %v2098_v25  ;;  %v1696_v26 = vpop.f32.mrf.mxu2  ;;  %v1360_v28 = vpop.f32.mrf.mxu0 }
 0x1d2   : > { %v1697_v27 = vadd.f32 %v1696_v26, %v1528_v24  ;;  %v1529_v29 = vpop.f32.mrf.mxu1  ;;  %v1361_v32 = vadd.f32 %v3551_v47, %v1360_v28 }
 0x1d4   : > { %v1866_v31 = vadd.f32 %v1865_v61, %v1697_v27  ;;  %v1530_v41 = vadd.f32 %v1529_v29, %v1361_v32 }
 0x1d6   : > { %vm1971_vm10 = vcmp.ge.f32.partialorder %v1866_v31, 0.0  ;;  %v2035_v36 = vmul.f32 0.1, %v1866_v31  ;;  %v1872_v52 = vpop.f32.mrf.mxu3 }
 0x1d8   : > { %v2099_v40 = vsel %vm1971_vm10, %v1866_v31, %v2035_v36  ;;  %v3044_v36 = vld [vmem:[%s3211_s18 + $0x3a4] sm:$0xf] }
 0x1d9   : > { %2164 = vst.msk [vmem:[%s3359_s8 + $0x120] sm:$0xff] %vm2127_vm2, %v2099_v40  ;;  %v1698_v44 = vpop.f32.mrf.mxu2  ;;  %v1363_v48 = vpop.f32.mrf.mxu0  ;;  %v3047_v40 = vld [vmem:[%s3211_s18 + $0x3b4] sm:$0xf0] }
 0x1da   : > { %v1699_v46 = vadd.f32 %v1698_v44, %v1530_v41  ;;  %v1532_v49 = vpop.f32.mrf.mxu1  ;;  %v1364_v51 = vadd.f32 %v3551_v47, %v1363_v48  ;;  %v2765_v44 = vld [vmem:[%s3211_s18 + $0x3d8] sm:$0xf0] }
 0x1db   : > { %2921 = vmatmul.msk.bf16.gmra.mxu3 %vm1162_vm0, %v2736_v53 }
 0x1dc   : > { %v1868_v54 = vadd.f32 %v1867_v20, %v1699_v46  ;;  %1402 = vmatmul.bf16.gmra.mxu0 %v2708_v45  ;;  %v1533_v56 = vadd.f32 %v1532_v49, %v1364_v51  ;;  %v2744_v46 = vor.u32 %v3044_v36, %v2741_v38  ;;  %v2748_v51 = vor.u32 %v3047_v40, %v2747_v39  ;;  %v3054_v36 = vld [vmem:[%s3211_s18 + $0x3ec] sm:$0xf0]  ;;  %v2773_v39 = vld [vmem:[%s3211_s18 + $0x3f0] sm:$0xf0]  ;;  %v2779_v40 = vld [vmem:[%s3211_s18 + $0x3e8] sm:$0xf] }
 0x1dd   : > { %1571 = vmatmul.bf16.gmra.mxu1 %v2712_v3  ;;  %v2740_v3 = vor.u32 %v3046_v35, %v2739_v34  ;;  %v2771_v35 = vld [vmem:[%s3211_s18 + $0x3e0] sm:$0xf] }
 0x1de   : > { %vm1972_vm11 = vcmp.ge.f32.partialorder %v1868_v54, 0.0  ;;  %v2036_v55 = vmul.f32 0.1, %v1868_v54  ;;  %1740 = vmatmul.bf16.gmra.mxu2 %v2716_v50  ;;  %v1875_v62 = vpop.f32.mrf.mxu3 }
 0x1e0   : > { %v2100_v57 = vsel %vm1972_vm11, %v1868_v54, %v2036_v55  ;;  %v2768_v54 = vor.u32 %v3049_v43, %v2765_v44 }
 0x1e1   : > { %2165 = vst.msk [vmem:[%s3359_s8 + $0x128] sm:$0xff] %vm2127_vm2, %v2100_v57  ;;  %v1701_v58 = vpop.f32.mrf.mxu2  ;;  %v1365_v60 = vpop.f32.mrf.mxu0 }
 0x1e2   : > { %v1702_v59 = vadd.f32 %v1701_v58, %v1533_v56  ;;  %v1534_v61 = vpop.f32.mrf.mxu1  ;;  %v1366_v0 = vadd.f32 %v3551_v47, %v1365_v60 }
 0x1e4   : > { %v1871_v63 = vadd.f32 %v1870_v30, %v1702_v59  ;;  %v1535_v10 = vadd.f32 %v1534_v61, %v1366_v0 }
 0x1e6   : > { %vm1973_vm12 = vcmp.ge.f32.partialorder %v1871_v63, 0.0  ;;  %v2037_v5 = vmul.f32 0.1, %v1871_v63  ;;  %v1877_v21 = vpop.f32.mrf.mxu3 }
 0x1e8   : > { %v2101_v9 = vsel %vm1973_vm12, %v1871_v63, %v2037_v5  ;;  %v3048_v5 = vld [vmem:[%s3211_s18 + $0x3c4] sm:$0xf] }
 0x1e9   : > { %2166 = vst.msk [vmem:[%s3359_s8 + $0x130] sm:$0xff] %vm2127_vm2, %v2101_v9  ;;  %v1703_v13 = vpop.f32.mrf.mxu2  ;;  %v1368_v17 = vpop.f32.mrf.mxu0  ;;  %v3051_v9 = vld [vmem:[%s3211_s18 + $0x3d4] sm:$0xf0] }
 0x1ea   : > { %v1704_v16 = vadd.f32 %v1703_v13, %v1535_v10  ;;  %v1537_v18 = vpop.f32.mrf.mxu1  ;;  %v1369_v20 = vadd.f32 %v3551_v47, %v1368_v17  ;;  %v2781_v13 = vld [vmem:[%s3211_s18 + $0x3f8] sm:$0xf0] }
 0x1eb   : > { %2922 = vmatmul.msk.bf16.gmra.mxu3 %vm1162_vm0, %v2752_v22 }
 0x1ec   : > { %v1873_v23 = vadd.f32 %v1872_v52, %v1704_v16  ;;  %1407 = vmatmul.bf16.gmra.mxu0 %v2724_v14  ;;  %v1538_v25 = vadd.f32 %v1537_v18, %v1369_v20  ;;  %v2760_v16 = vor.u32 %v3048_v5, %v2757_v7  ;;  %v2764_v20 = vor.u32 %v3051_v9, %v2763_v8 }
 0x1ed   : > { %1576 = vmatmul.bf16.gmra.mxu1 %v2728_v15  ;;  %v2756_v15 = vor.u32 %v3050_v4, %v2755_v2 }
 0x1ee   : > { %vm1974_vm13 = vcmp.ge.f32.partialorder %v1873_v23, 0.0  ;;  %v2038_v24 = vmul.f32 0.1, %v1873_v23  ;;  %1745 = vmatmul.bf16.gmra.mxu2 %v2732_v19  ;;  %v1880_v31 = vpop.f32.mrf.mxu3 }
 0x1f0   : > { %v2102_v26 = vsel %vm1974_vm13, %v1873_v23, %v2038_v24  ;;  %v2784_v23 = vor.u32 %v3053_v12, %v2781_v13 }
 0x1f1   : > { %2167 = vst.msk [vmem:[%s3359_s8 + $0x138] sm:$0xff] %vm2127_vm2, %v2102_v26  ;;  %v1706_v27 = vpop.f32.mrf.mxu2  ;;  %v1370_v29 = vpop.f32.mrf.mxu0 }
 0x1f2   : > { %v1707_v28 = vadd.f32 %v1706_v27, %v1538_v25  ;;  %v1539_v30 = vpop.f32.mrf.mxu1  ;;  %v1371_v33 = vadd.f32 %v3551_v47, %v1370_v29 }
 0x1f4   : > { %v1876_v32 = vadd.f32 %v1875_v62, %v1707_v28  ;;  %v1540_v42 = vadd.f32 %v1539_v30, %v1371_v33 }
 0x1f6   : > { %vm1975_vm14 = vcmp.ge.f32.partialorder %v1876_v32, 0.0  ;;  %v2039_v37 = vmul.f32 0.1, %v1876_v32  ;;  %v1882_v53 = vpop.f32.mrf.mxu3 }
 0x1f8   : > { %v2103_v41 = vsel %vm1975_vm14, %v1876_v32, %v2039_v37  ;;  %v3052_v37 = vld [vmem:[%s3211_s18 + $0x3e4] sm:$0xf] }
 0x1f9   : > { %2168 = vst.msk [vmem:[%s3359_s8 + $0x140] sm:$0xff] %vm2127_vm2, %v2103_v41  ;;  %v1708_v45 = vpop.f32.mrf.mxu2  ;;  %v1373_v49 = vpop.f32.mrf.mxu0  ;;  %v3055_v41 = vld [vmem:[%s3211_s18 + $0x3f4] sm:$0xf0] }
 0x1fa   : > { %v1709_v48 = vadd.f32 %v1708_v45, %v1540_v42  ;;  %v1542_v50 = vpop.f32.mrf.mxu1  ;;  %v1374_v52 = vadd.f32 %v3551_v47, %v1373_v49  ;;  %v2772_v45 = vor.u32 %v3054_v36, %v2771_v35 }
 0x1fb   : > { %2923 = vmatmul.msk.bf16.gmra.mxu3 %vm1162_vm0, %v2768_v54 }
 0x1fc   : > { %v1878_v55 = vadd.f32 %v1877_v21, %v1709_v48  ;;  %1412 = vmatmul.bf16.gmra.mxu0 %v2740_v3  ;;  %v1543_v57 = vadd.f32 %v1542_v50, %v1374_v52  ;;  %v2776_v3 = vor.u32 %v3052_v37, %v2773_v39  ;;  %v2780_v50 = vor.u32 %v3055_v41, %v2779_v40 }
 0x1fd   : > { %1581 = vmatmul.bf16.gmra.mxu1 %v2744_v46 }
 0x1fe   : > { %vm1976_vm15 = vcmp.ge.f32.partialorder %v1878_v55, 0.0  ;;  %v2040_v56 = vmul.f32 0.1, %v1878_v55  ;;  %1750 = vmatmul.bf16.gmra.mxu2 %v2748_v51  ;;  %v1885_v63 = vpop.f32.mrf.mxu3 }
 0x200   : > { %v2104_v58 = vsel %vm1976_vm15, %v1878_v55, %v2040_v56 }
 0x201   : > { %2169 = vst.msk [vmem:[%s3359_s8 + $0x148] sm:$0xff] %vm2127_vm2, %v2104_v58  ;;  %v1711_v59 = vpop.f32.mrf.mxu2  ;;  %v1375_v61 = vpop.f32.mrf.mxu0 }
 0x202   : > { %v1712_v60 = vadd.f32 %v1711_v59, %v1543_v57  ;;  %v1544_v62 = vpop.f32.mrf.mxu1  ;;  %v1376_v1 = vadd.f32 %v3551_v47, %v1375_v61 }
 0x204   : > { %v1881_v0 = vadd.f32 %v1880_v31, %v1712_v60  ;;  %v1545_v11 = vadd.f32 %v1544_v62, %v1376_v1 }
 0x206   : > { %vm1977_vm1 = vcmp.ge.f32.partialorder %v1881_v0, 0.0  ;;  %v2041_v6 = vmul.f32 0.1, %v1881_v0  ;;  %v1887_v22 = vpop.f32.mrf.mxu3 }
 0x208   : > { %v2105_v10 = vsel %vm1977_vm1, %v1881_v0, %v2041_v6 }
 0x209   : > { %2170 = vst.msk [vmem:[%s3359_s8 + $0x150] sm:$0xff] %vm2127_vm2, %v2105_v10  ;;  %v1713_v14 = vpop.f32.mrf.mxu2  ;;  %v1378_v18 = vpop.f32.mrf.mxu0 }
 0x20a   : > { %v1714_v17 = vadd.f32 %v1713_v14, %v1545_v11  ;;  %v1547_v19 = vpop.f32.mrf.mxu1  ;;  %v1379_v21 = vadd.f32 %v3551_v47, %v1378_v18 }
 0x20b   : > { %2924 = vmatmul.msk.bf16.gmra.mxu3 %vm1162_vm0, %v2784_v23 }
 0x20c   : > { %v1883_v24 = vadd.f32 %v1882_v53, %v1714_v17  ;;  %1417 = vmatmul.bf16.gmra.mxu0 %v2756_v15  ;;  %v1548_v26 = vadd.f32 %v1547_v19, %v1379_v21 }
 0x20d   : > { %1586 = vmatmul.bf16.gmra.mxu1 %v2760_v16 }
 0x20e   : > { %vm1978_vm3 = vcmp.ge.f32.partialorder %v1883_v24, 0.0  ;;  %v2042_v25 = vmul.f32 0.1, %v1883_v24  ;;  %1755 = vmatmul.bf16.gmra.mxu2 %v2764_v20  ;;  %v1890_v32 = vpop.f32.mrf.mxu3 }
 0x210   : > { %v2106_v27 = vsel %vm1978_vm3, %v1883_v24, %v2042_v25 }
 0x211   : > { %2171 = vst.msk [vmem:[%s3359_s8 + $0x158] sm:$0xff] %vm2127_vm2, %v2106_v27  ;;  %v1716_v28 = vpop.f32.mrf.mxu2  ;;  %v1380_v30 = vpop.f32.mrf.mxu0 }
 0x212   : > { %v1717_v29 = vadd.f32 %v1716_v28, %v1548_v26  ;;  %v1549_v31 = vpop.f32.mrf.mxu1  ;;  %v1381_v34 = vadd.f32 %v3551_v47, %v1380_v30 }
 0x214   : > { %v1886_v33 = vadd.f32 %v1885_v63, %v1717_v29  ;;  %v1550_v43 = vadd.f32 %v1549_v31, %v1381_v34 }
 0x216   : > { %vm1979_vm4 = vcmp.ge.f32.partialorder %v1886_v33, 0.0  ;;  %v2043_v38 = vmul.f32 0.1, %v1886_v33  ;;  %v1892_v52 = vpop.f32.mrf.mxu3 }
 0x218   : > { %v2107_v42 = vsel %vm1979_vm4, %v1886_v33, %v2043_v38 }
 0x219   : > { %2172 = vst.msk [vmem:[%s3359_s8 + $0x160] sm:$0xff] %vm2127_vm2, %v2107_v42  ;;  %v1718_v44 = vpop.f32.mrf.mxu2  ;;  %v1383_v48 = vpop.f32.mrf.mxu0 }
 0x21a   : > { %v1719_v46 = vadd.f32 %v1718_v44, %v1550_v43  ;;  %v1552_v49 = vpop.f32.mrf.mxu1  ;;  %v1384_v51 = vadd.f32 %v3551_v47, %v1383_v48 }
 0x21c   : > { %v1888_v53 = vadd.f32 %v1887_v22, %v1719_v46  ;;  %1422 = vmatmul.bf16.gmra.mxu0 %v2772_v45  ;;  %v1553_v55 = vadd.f32 %v1552_v49, %v1384_v51 }
 0x21d   : > { %1591 = vmatmul.bf16.gmra.mxu1 %v2776_v3 }
 0x21e   : > { %vm1980_vm0 = vcmp.ge.f32.partialorder %v1888_v53, 0.0  ;;  %v2044_v54 = vmul.f32 0.1, %v1888_v53  ;;  %1760 = vmatmul.bf16.gmra.mxu2 %v2780_v50  ;;  %v1895_v61 = vpop.f32.mrf.mxu3 }
 0x220   : > { %v2108_v56 = vsel %vm1980_vm0, %v1888_v53, %v2044_v54 }
 0x221   : > { %2173 = vst.msk [vmem:[%s3359_s8 + $0x168] sm:$0xff] %vm2127_vm2, %v2108_v56  ;;  %v1721_v57 = vpop.f32.mrf.mxu2  ;;  %v1385_v59 = vpop.f32.mrf.mxu0 }
 0x222   : > { %v1722_v58 = vadd.f32 %v1721_v57, %v1553_v55  ;;  %v1554_v60 = vpop.f32.mrf.mxu1  ;;  %v1386_v63 = vadd.f32 %v3551_v47, %v1385_v59 }
 0x224   : > { %v1891_v62 = vadd.f32 %v1890_v32, %v1722_v58  ;;  %v1555_v2 = vadd.f32 %v1554_v60, %v1386_v63 }
 0x226   : > { %vm1981_vm5 = vcmp.ge.f32.partialorder %v1891_v62, 0.0  ;;  %v2045_v0 = vmul.f32 0.1, %v1891_v62  ;;  %v1897_v9 = vpop.f32.mrf.mxu3 }
 0x228   : > { %v2109_v1 = vsel %vm1981_vm5, %v1891_v62, %v2045_v0 }
 0x229   : > { %2174 = vst.msk [vmem:[%s3359_s8 + $0x170] sm:$0xff] %vm2127_vm2, %v2109_v1  ;;  %v1723_v4 = vpop.f32.mrf.mxu2  ;;  %v1388_v6 = vpop.f32.mrf.mxu0 }
 0x22a   : > { %v1724_v5 = vadd.f32 %v1723_v4, %v1555_v2  ;;  %v1557_v7 = vpop.f32.mrf.mxu1  ;;  %v1389_v8 = vadd.f32 %v3551_v47, %v1388_v6 }
 0x22c   : > { %v1893_v10 = vadd.f32 %v1892_v52, %v1724_v5  ;;  %v1558_v12 = vadd.f32 %v1557_v7, %v1389_v8 }
 0x22e   : > { %vm1982_vm6 = vcmp.ge.f32.partialorder %v1893_v10, 0.0  ;;  %v2046_v11 = vmul.f32 0.1, %v1893_v10  ;;  %v1900_v18 = vpop.f32.mrf.mxu3 }
 0x230   : > { %v2110_v13 = vsel %vm1982_vm6, %v1893_v10, %v2046_v11 }
 0x231   : > { %2175 = vst.msk [vmem:[%s3359_s8 + $0x178] sm:$0xff] %vm2127_vm2, %v2110_v13  ;;  %v1726_v14 = vpop.f32.mrf.mxu2  ;;  %v1390_v16 = vpop.f32.mrf.mxu0 }
 0x232   : > { %v1727_v15 = vadd.f32 %v1726_v14, %v1558_v12  ;;  %v1559_v17 = vpop.f32.mrf.mxu1  ;;  %v1391_v20 = vadd.f32 %v3551_v47, %v1390_v16 }
 0x234   : > { %v1896_v19 = vadd.f32 %v1895_v61, %v1727_v15  ;;  %v1560_v23 = vadd.f32 %v1559_v17, %v1391_v20 }
 0x236   : > { %vm1983_vm7 = vcmp.ge.f32.partialorder %v1896_v19, 0.0  ;;  %v2047_v21 = vmul.f32 0.1, %v1896_v19  ;;  %v1902_v29 = vpop.f32.mrf.mxu3 }
 0x238   : > { %v2111_v22 = vsel %vm1983_vm7, %v1896_v19, %v2047_v21 }
 0x239   : > { %2176 = vst.msk [vmem:[%s3359_s8 + $0x180] sm:$0xff] %vm2127_vm2, %v2111_v22  ;;  %v1728_v24 = vpop.f32.mrf.mxu2  ;;  %v1393_v26 = vpop.f32.mrf.mxu0 }
 0x23a   : > { %v1729_v25 = vadd.f32 %v1728_v24, %v1560_v23  ;;  %v1562_v27 = vpop.f32.mrf.mxu1  ;;  %v1394_v28 = vadd.f32 %v3551_v47, %v1393_v26 }
 0x23c   : > { %v1898_v30 = vadd.f32 %v1897_v9, %v1729_v25  ;;  %v1563_v32 = vadd.f32 %v1562_v27, %v1394_v28  ;;  %v3734_v25 = vld [vmem:[%s3773_s2] ss:$0 sm:$0xff] }
 0x23e   : > { %vm1984_vm8 = vcmp.ge.f32.partialorder %v1898_v30, 0.0  ;;  %v2048_v31 = vmul.f32 0.1, %v1898_v30  ;;  %v1905_v38 = vpop.f32.mrf.mxu3 }
 0x240   : > { %v2112_v33 = vsel %vm1984_vm8, %v1898_v30, %v2048_v31 }
 0x241   : > { %2177 = vst.msk [vmem:[%s3359_s8 + $0x188] sm:$0xff] %vm2127_vm2, %v2112_v33  ;;  %v1731_v34 = vpop.f32.mrf.mxu2  ;;  %v1395_v36 = vpop.f32.mrf.mxu0 }
 0x242   : > { %v1732_v35 = vadd.f32 %v1731_v34, %v1563_v32  ;;  %v1564_v37 = vpop.f32.mrf.mxu1  ;;  %v1396_v40 = vadd.f32 %v3551_v47, %v1395_v36 }
 0x244   : > { %v1901_v39 = vadd.f32 %v1900_v18, %v1732_v35  ;;  %v1565_v43 = vadd.f32 %v1564_v37, %v1396_v40 }
 0x246   : > { %vm1985_vm9 = vcmp.ge.f32.partialorder %v1901_v39, 0.0  ;;  %v2049_v41 = vmul.f32 0.1, %v1901_v39  ;;  %v1907_v49 = vpop.f32.mrf.mxu3 }
 0x248   : > { %v2113_v42 = vsel %vm1985_vm9, %v1901_v39, %v2049_v41 }
 0x249   : > { %2178 = vst.msk [vmem:[%s3359_s8 + $0x190] sm:$0xff] %vm2127_vm2, %v2113_v42  ;;  %v1733_v44 = vpop.f32.mrf.mxu2  ;;  %v1398_v3 = vpop.f32.mrf.mxu0 }
 0x24a   : > { %v1734_v45 = vadd.f32 %v1733_v44, %v1565_v43  ;;  %v1567_v46 = vpop.f32.mrf.mxu1  ;;  %v1399_v48 = vadd.f32 %v3551_v47, %v1398_v3 }
 0x24c   : > { %v1903_v50 = vadd.f32 %v1902_v29, %v1734_v45  ;;  %v1568_v52 = vadd.f32 %v1567_v46, %v1399_v48 }
 0x24e   : > { %vm1986_vm10 = vcmp.ge.f32.partialorder %v1903_v50, 0.0  ;;  %v2050_v51 = vmul.f32 0.1, %v1903_v50  ;;  %v1910_v58 = vpop.f32.mrf.mxu3 }
 0x250   : > { %v2114_v53 = vsel %vm1986_vm10, %v1903_v50, %v2050_v51 }
 0x251   : > { %2179 = vst.msk [vmem:[%s3359_s8 + $0x198] sm:$0xff] %vm2127_vm2, %v2114_v53  ;;  %v1736_v54 = vpop.f32.mrf.mxu2  ;;  %v1400_v56 = vpop.f32.mrf.mxu0 }
 0x252   : > { %v1737_v55 = vadd.f32 %v1736_v54, %v1568_v52  ;;  %v1569_v57 = vpop.f32.mrf.mxu1  ;;  %v1401_v60 = vadd.f32 %v3551_v47, %v1400_v56 }
 0x254   : > { %v1906_v59 = vadd.f32 %v1905_v38, %v1737_v55  ;;  %v1570_v63 = vadd.f32 %v1569_v57, %v1401_v60 }
 0x256   : > { %vm1987_vm11 = vcmp.ge.f32.partialorder %v1906_v59, 0.0  ;;  %v2051_v61 = vmul.f32 0.1, %v1906_v59  ;;  %v1912_v6 = vpop.f32.mrf.mxu3 }
 0x258   : > { %v2115_v62 = vsel %vm1987_vm11, %v1906_v59, %v2051_v61 }
 0x259   : > { %2180 = vst.msk [vmem:[%s3359_s8 + $0x1a0] sm:$0xff] %vm2127_vm2, %v2115_v62  ;;  %v1738_v0 = vpop.f32.mrf.mxu2  ;;  %v1403_v2 = vpop.f32.mrf.mxu0 }
 0x25a   : > { %v1739_v1 = vadd.f32 %v1738_v0, %v1570_v63  ;;  %v1572_v4 = vpop.f32.mrf.mxu1  ;;  %v1404_v5 = vadd.f32 %v3551_v47, %v1403_v2 }
 0x25c   : > { %v1908_v7 = vadd.f32 %v1907_v49, %v1739_v1  ;;  %v1573_v9 = vadd.f32 %v1572_v4, %v1404_v5 }
 0x25e   : > { %vm1988_vm12 = vcmp.ge.f32.partialorder %v1908_v7, 0.0  ;;  %v2052_v8 = vmul.f32 0.1, %v1908_v7  ;;  %v1915_v17 = vpop.f32.mrf.mxu3 }
 0x260   : > { %v2116_v10 = vsel %vm1988_vm12, %v1908_v7, %v2052_v8 }
 0x261   : > { %2181 = vst.msk [vmem:[%s3359_s8 + $0x1a8] sm:$0xff] %vm2127_vm2, %v2116_v10  ;;  %v1741_v11 = vpop.f32.mrf.mxu2  ;;  %v1405_v13 = vpop.f32.mrf.mxu0 }
 0x262   : > { %v1742_v12 = vadd.f32 %v1741_v11, %v1573_v9  ;;  %v1574_v14 = vpop.f32.mrf.mxu1  ;;  %v1406_v16 = vadd.f32 %v3551_v47, %v1405_v13 }
 0x264   : > { %v1911_v15 = vadd.f32 %v1910_v58, %v1742_v12  ;;  %v1575_v20 = vadd.f32 %v1574_v14, %v1406_v16 }
 0x266   : > { %vm1989_vm13 = vcmp.ge.f32.partialorder %v1911_v15, 0.0  ;;  %v2053_v18 = vmul.f32 0.1, %v1911_v15  ;;  %v1917_v29 = vpop.f32.mrf.mxu3 }
 0x268   : > { %v2117_v19 = vsel %vm1989_vm13, %v1911_v15, %v2053_v18 }
 0x269   : > { %2182 = vst.msk [vmem:[%s3359_s8 + $0x1b0] sm:$0xff] %vm2127_vm2, %v2117_v19  ;;  %v1743_v21 = vpop.f32.mrf.mxu2  ;;  %v1408_v23 = vpop.f32.mrf.mxu0 }
 0x26a   : > { %v1744_v22 = vadd.f32 %v1743_v21, %v1575_v20  ;;  %v1577_v24 = vpop.f32.mrf.mxu1  ;;  %v1409_v26 = vadd.f32 %v3734_v25, %v1408_v23 }
 0x26c   : > { %v1913_v47 = vadd.f32 %v1912_v6, %v1744_v22  ;;  %v1578_v28 = vadd.f32 %v1577_v24, %v1409_v26 }
 0x26e   : > { %vm1990_vm14 = vcmp.ge.f32.partialorder %v1913_v47, 0.0  ;;  %v2054_v27 = vmul.f32 0.1, %v1913_v47  ;;  %v1920_v41 = vpop.f32.mrf.mxu3 }
 0x270   : > { %v2118_v30 = vsel %vm1990_vm14, %v1913_v47, %v2054_v27 }
 0x271   : > { %2183 = vst.msk [vmem:[%s3359_s8 + $0x1b8] sm:$0xff] %vm2127_vm2, %v2118_v30  ;;  %v1746_v31 = vpop.f32.mrf.mxu2  ;;  %v1410_v33 = vpop.f32.mrf.mxu0 }
 0x272   : > { %v1747_v32 = vadd.f32 %v1746_v31, %v1578_v28  ;;  %v1579_v34 = vpop.f32.mrf.mxu1  ;;  %v1411_v36 = vadd.f32 %v3734_v25, %v1410_v33 }
 0x274   : > { %v1916_v35 = vadd.f32 %v1915_v17, %v1747_v32  ;;  %v1580_v39 = vadd.f32 %v1579_v34, %v1411_v36 }
 0x276   : > { %vm1991_vm15 = vcmp.ge.f32.partialorder %v1916_v35, 0.0  ;;  %v2055_v37 = vmul.f32 0.1, %v1916_v35  ;;  %v1922_v54 = vpop.f32.mrf.mxu3 }
 0x278   : > { %v2119_v38 = vsel %vm1991_vm15, %v1916_v35, %v2055_v37 }
 0x279   : > { %2184 = vst.msk [vmem:[%s3359_s8 + $0x1c0] sm:$0xff] %vm2127_vm2, %v2119_v38  ;;  %v1748_v40 = vpop.f32.mrf.mxu2  ;;  %v1413_v43 = vpop.f32.mrf.mxu0 }
 0x27a   : > { %v1749_v42 = vadd.f32 %v1748_v40, %v1580_v39  ;;  %v1582_v44 = vpop.f32.mrf.mxu1  ;;  %v1414_v45 = vadd.f32 %v3734_v25, %v1413_v43 }
 0x27c   : > { %v1918_v3 = vadd.f32 %v1917_v29, %v1749_v42  ;;  %v1583_v48 = vadd.f32 %v1582_v44, %v1414_v45 }
 0x27e   : > { %vm1992_vm1 = vcmp.ge.f32.partialorder %v1918_v3, 0.0  ;;  %v2056_v46 = vmul.f32 0.1, %v1918_v3  ;;  %v1925_v2 = vpop.f32.mrf.mxu3 }
 0x280   : > { %v2120_v49 = vsel %vm1992_vm1, %v1918_v3, %v2056_v46 }
 0x281   : > { %2185 = vst.msk [vmem:[%s3359_s8 + $0x1c8] sm:$0xff] %vm2127_vm2, %v2120_v49  ;;  %v1751_v50 = vpop.f32.mrf.mxu2  ;;  %v1415_v52 = vpop.f32.mrf.mxu0 }
 0x282   : > { %v1752_v51 = vadd.f32 %v1751_v50, %v1583_v48  ;;  %v1584_v53 = vpop.f32.mrf.mxu1  ;;  %v1416_v56 = vadd.f32 %v3734_v25, %v1415_v52 }
 0x284   : > { %v1921_v55 = vadd.f32 %v1920_v41, %v1752_v51  ;;  %v1585_v59 = vadd.f32 %v1584_v53, %v1416_v56 }
 0x286   : > { %vm1993_vm3 = vcmp.ge.f32.partialorder %v1921_v55, 0.0  ;;  %v2057_v57 = vmul.f32 0.1, %v1921_v55  ;;  %v1927_v14 = vpop.f32.mrf.mxu3 }
 0x288   : > { %v2121_v58 = vsel %vm1993_vm3, %v1921_v55, %v2057_v57 }
 0x289   : > { %2186 = vst.msk [vmem:[%s3359_s8 + $0x1d0] sm:$0xff] %vm2127_vm2, %v2121_v58  ;;  %v1753_v60 = vpop.f32.mrf.mxu2  ;;  %v1418_v62 = vpop.f32.mrf.mxu0 }
 0x28a   : > { %v1754_v61 = vadd.f32 %v1753_v60, %v1585_v59  ;;  %v1587_v63 = vpop.f32.mrf.mxu1  ;;  %v1419_v0 = vadd.f32 %v3734_v25, %v1418_v62 }
 0x28c   : > { %v1923_v1 = vadd.f32 %v1922_v54, %v1754_v61  ;;  %v1588_v5 = vadd.f32 %v1587_v63, %v1419_v0 }
 0x28e   : > { %vm1994_vm4 = vcmp.ge.f32.partialorder %v1923_v1, 0.0  ;;  %v2058_v4 = vmul.f32 0.1, %v1923_v1  ;;  %v1930_v47 = vpop.f32.mrf.mxu3 }
 0x290   : > { %v2122_v6 = vsel %vm1994_vm4, %v1923_v1, %v2058_v4 }
 0x291   : > { %2187 = vst.msk [vmem:[%s3359_s8 + $0x1d8] sm:$0xff] %vm2127_vm2, %v2122_v6  ;;  %v1756_v7 = vpop.f32.mrf.mxu2  ;;  %v1420_v9 = vpop.f32.mrf.mxu0 }
 0x292   : > { %v1757_v8 = vadd.f32 %v1756_v7, %v1588_v5  ;;  %v1589_v10 = vpop.f32.mrf.mxu1  ;;  %v1421_v12 = vadd.f32 %v3734_v25, %v1420_v9 }
 0x294   : > { %v1926_v11 = vadd.f32 %v1925_v2, %v1757_v8  ;;  %v1590_v16 = vadd.f32 %v1589_v10, %v1421_v12 }
 0x296   : > { %vm1995_vm0 = vcmp.ge.f32.partialorder %v1926_v11, 0.0  ;;  %v2059_v13 = vmul.f32 0.1, %v1926_v11  ;;  %v1932_v38 = vpop.f32.mrf.mxu3 }
 0x298   : > { %v2123_v15 = vsel %vm1995_vm0, %v1926_v11, %v2059_v13 }
 0x299   : > { %2188 = vst.msk [vmem:[%s3359_s8 + $0x1e0] sm:$0xff] %vm2127_vm2, %v2123_v15  ;;  %v1758_v17 = vpop.f32.mrf.mxu2  ;;  %v1423_v19 = vpop.f32.mrf.mxu0 }
 0x29a   : > { %v1759_v18 = vadd.f32 %v1758_v17, %v1590_v16  ;;  %v1424_v20 = vadd.f32 %v3734_v25, %v1423_v19  ;;  %v1592_v22 = vpop.f32.mrf.mxu1 }
 0x29c   : > { %v1928_v21 = vadd.f32 %v1927_v14, %v1759_v18  ;;  %v1593_v24 = vadd.f32 %v1592_v22, %v1424_v20 }
 0x29e   : > { %vm1996_vm5 = vcmp.ge.f32.partialorder %v1928_v21, 0.0  ;;  %v2060_v23 = vmul.f32 0.1, %v1928_v21 }
 0x2a0   : > { %v2124_v26 = vsel %vm1996_vm5, %v1928_v21, %v2060_v23 }
 0x2a1   : > { %2189 = vst.msk [vmem:[%s3359_s8 + $0x1e8] sm:$0xff] %vm2127_vm2, %v2124_v26  ;;  %v1761_v27 = vpop.f32.mrf.mxu2  ;;  %v1425_v29 = vpop.f32.mrf.mxu0 }
 0x2a2   : > { %v1762_v28 = vadd.f32 %v1761_v27, %v1593_v24  ;;  %v1426_v31 = vadd.f32 %v3734_v25, %v1425_v29  ;;  %v1594_v33 = vpop.f32.mrf.mxu1 }
 0x2a4   : > { %v1931_v30 = vadd.f32 %v1930_v47, %v1762_v28  ;;  %v1595_v35 = vadd.f32 %v1594_v33, %v1426_v31 }
 0x2a6   : > { %vm1997_vm6 = vcmp.ge.f32.partialorder %v1931_v30, 0.0  ;;  %v2061_v32 = vmul.f32 0.1, %v1931_v30 }
 0x2a8   : > { %v2125_v34 = vsel %vm1997_vm6, %v1931_v30, %v2061_v32 }
 0x2a9   : > { %2190 = vst.msk [vmem:[%s3359_s8 + $0x1f0] sm:$0xff] %vm2127_vm2, %v2125_v34  ;;  %v1763_v36 = vpop.f32.mrf.mxu2 }
 0x2aa   : > { %v1764_v37 = vadd.f32 %v1763_v36, %v1595_v35 }
 0x2ac   : > { %v1933_v39 = vadd.f32 %v1932_v38, %v1764_v37 }
 0x2ae   : > { %vm1998_vm7 = vcmp.ge.f32.partialorder %v1933_v39, 0.0  ;;  %v2062_v40 = vmul.f32 0.1, %v1933_v39 }
 0x2b0   : > { %v2126_v41 = vsel %vm1998_vm7, %v1933_v39, %v2062_v40 }
 0x2b1   : > { %2191 = vst.msk [vmem:[%s3359_s8 + $0x1f8] sm:$0xff] %vm2127_vm2, %v2126_v41 }
 0x2b2 PF: > { %s13_s14 = sadd.s32 1, %s3132_s14   ;;  %s3775_s12 = smov %s3128_s13 }
 0x2b3   : > { %p10_p5 = scmp.ge.s32.totalorder %s13_s14, 4   ;;  %s3776_s13 = smov %s3778_s15 }
 0x2b5   :  { %12 = sbr.rel (!%p10_p5) target bundleno = 2 (0x2), region = 62 }

// kernel: _lambda_.12
= control target key start
LH: loop header
LB: loop body
LE: loop exit
PB: predicated region body
PF: predicated region fallthrough
CT: control target
= control target key end

     0   :  { %vm419_vm0 = vcmask 392192   ;;  %vm688_vm2 = vcmask 261120   ;;  %s1399_s1 = inlined_call_operand.vmem [shape: bf16[432,32], index: 1, kind: input, shape index: {}]   ;;  %s1400_s0 = inlined_call_operand.vmem [shape: bf16[128,432], index: 0, kind: input, shape index: {}]   ;;  %s1401_s2 = inlined_call_operand.vmem [shape: f32[1,32], index: 2, kind: input, shape index: {}]   ;;  %s1402_s3 = inlined_call_operand.vmem [shape: f32[128,32], index: 3, kind: output, shape index: {}]  }
   0x1   :  { %v992_v0 = vld [vmem:[%s1399_s1 + $0x38] sm:$0xff]  ;;  %v991_v3 = vld [vmem:[%s1399_s1 + $0x30] sm:$0xff]  ;;  %v990_v7 = vld [vmem:[%s1399_s1 + $0x28] sm:$0xff] }
   0x2   :  { %v1000_v1 = vld [vmem:[%s1399_s1 + $0x78] sm:$0xff]  ;;  %444 = vmatpush.bf16.msra.mxu0 %v992_v0  ;;  %v999_v4 = vld [vmem:[%s1399_s1 + $0x70] sm:$0xff]  ;;  %v998_v8 = vld [vmem:[%s1399_s1 + $0x68] sm:$0xff] }
   0x3   :  { %v1008_v2 = vld [vmem:[%s1399_s1 + $0xb8] sm:$0xff]  ;;  %493 = vmatpush.bf16.msra.mxu1 %v1000_v1  ;;  %v1007_v5 = vld [vmem:[%s1399_s1 + $0xb0] sm:$0xff]  ;;  %v1006_v9 = vld [vmem:[%s1399_s1 + $0xa8] sm:$0xff] }
   0x4   :  { %542 = vmatpush.bf16.msra.mxu2 %v1008_v2  ;;  %v1011_v6 = vld [vmem:[%s1399_s1 + $0xd0] sm:$0xff]  ;;  %v1010_v10 = vld [vmem:[%s1399_s1 + $0xc8] sm:$0xff]  ;;  %v989_v11 = vld [vmem:[%s1399_s1 + $0x20] sm:$0xff] }
   0x5   :  { %596 = vmatpush.bf16.msra.mxu3 %v1011_v6  ;;  %v997_v12 = vld [vmem:[%s1399_s1 + $0x60] sm:$0xff]  ;;  %v954_v15 = vld [vmem:[%s1400_s0 + $0xc] sm:$0xf]  ;;  %v721_v16 = vld [vmem:[%s1400_s0 + $0x18] sm:$0xf0] }
   0x6   :  { %445 = vmatpush.bf16.msra.mxu0 %v991_v3  ;;  %v1005_v13 = vld [vmem:[%s1399_s1 + $0xa0] sm:$0xff]  ;;  %v988_v17 = vld [vmem:[%s1399_s1 + $0x18] sm:$0xff]  ;;  %v724_v20 = vor.u32 %v954_v15, %v721_v16  ;;  %v987_v21 = vld [vmem:[%s1399_s1 + $0x10] sm:$0xff] }
   0x7   :  { %494 = vmatpush.bf16.msra.mxu1 %v999_v4  ;;  %v1009_v14 = vld [vmem:[%s1399_s1 + $0xc0] sm:$0xff]  ;;  %v996_v18 = vld [vmem:[%s1399_s1 + $0x58] sm:$0xff]  ;;  %v995_v22 = vld [vmem:[%s1399_s1 + $0x50] sm:$0xff] }
   0x8   :  { %543 = vmatpush.bf16.msra.mxu2 %v1007_v5  ;;  %v1004_v19 = vld [vmem:[%s1399_s1 + $0x98] sm:$0xff]  ;;  %v1003_v23 = vld [vmem:[%s1399_s1 + $0x90] sm:$0xff]  ;;  %v986_v24 = vld [vmem:[%s1399_s1 + $0x8] sm:$0xff] }
   0x9   :  { %597 = vmatpush.bf16.msra.mxu3 %v1010_v10  ;;  %v994_v25 = vld [vmem:[%s1399_s1 + $0x48] sm:$0xff]  ;;  %v985_v27 = vld [vmem:[%s1399_s1] sm:$0xff]  ;;  %v955_v30 = vld [vmem:[%s1400_s0 + $0xc] sm:$0xf0] }
   0xa   :  { %446 = vmatpush.bf16.msra.mxu0 %v990_v7  ;;  %v1002_v26 = vld [vmem:[%s1399_s1 + $0x88] sm:$0xff]  ;;  %v993_v28 = vld [vmem:[%s1399_s1 + $0x40] sm:$0xff]  ;;  %v713_v32 = vld [vmem:[%s1400_s0 + $0x10] sm:$0xf0] }
   0xb   :  { %495 = vmatpush.bf16.msra.mxu1 %v998_v8  ;;  %v711_v29 = vld [vmem:[%s1400_s0] sm:$0xf]  ;;  %v953_v31 = vld [vmem:[%s1400_s0 + $0x4] sm:$0xf]  ;;  %v719_v34 = vld [vmem:[%s1400_s0 + $0x8] sm:$0xf] }
   0xc   :  { %544 = vmatpush.bf16.msra.mxu2 %v1006_v9  ;;  %v1001_v33 = vld [vmem:[%s1399_s1 + $0x80] sm:$0xff]  ;;  %v956_v35 = vld [vmem:[%s1400_s0 + $0x14] sm:$0xf0]  ;;  %v958_v36 = vld [vmem:[%s1400_s0 + $0x2c] sm:$0xf]  ;;  %v712_v38 = vor.u32 %v955_v30, %v711_v29  ;;  %v716_v39 = vor.u32 %v953_v31, %v713_v32 }
   0xd   :  { %598 = vmatpush.bf16.msra.mxu3 %v1009_v14  ;;  %v737_v37 = vld [vmem:[%s1400_s0 + $0x38] sm:$0xf0]  ;;  %v720_v40 = vor.u32 %v956_v35, %v719_v34  ;;  %v727_v42 = vld [vmem:[%s1400_s0 + $0x20] sm:$0xf]  ;;  %v959_v43 = vld [vmem:[%s1400_s0 + $0x2c] sm:$0xf0] }
   0xe   :  { %447 = vmatpush.bf16.msra.mxu0 %v989_v11  ;;  %v740_v41 = vor.u32 %v958_v36, %v737_v37  ;;  %v957_v44 = vld [vmem:[%s1400_s0 + $0x24] sm:$0xf]  ;;  %v729_v45 = vld [vmem:[%s1400_s0 + $0x30] sm:$0xf0]  ;;  %v735_v46 = vld [vmem:[%s1400_s0 + $0x28] sm:$0xf]  ;;  %v728_v50 = vor.u32 %v959_v43, %v727_v42 }
   0xf   :  { %496 = vmatpush.bf16.msra.mxu1 %v997_v12  ;;  %v960_v47 = vld [vmem:[%s1400_s0 + $0x34] sm:$0xf0]  ;;  %v962_v48 = vld [vmem:[%s1400_s0 + $0x4c] sm:$0xf]  ;;  %v753_v49 = vld [vmem:[%s1400_s0 + $0x58] sm:$0xf0]  ;;  %v732_v51 = vor.u32 %v957_v44, %v729_v45 }
  0x10   :  { %545 = vmatpush.bf16.msra.mxu2 %v1005_v13  ;;  %945 = vmatmul.msk.bf16.vlgmr.msra.gmra.mxu3 %vm419_vm0, %v724_v20  ;;  %v736_v52 = vor.u32 %v960_v47, %v735_v46  ;;  %v756_v53 = vor.u32 %v962_v48, %v753_v49  ;;  %v743_v54 = vld [vmem:[%s1400_s0 + $0x40] sm:$0xf]  ;;  %v963_v55 = vld [vmem:[%s1400_s0 + $0x4c] sm:$0xf0]  ;;  %v961_v56 = vld [vmem:[%s1400_s0 + $0x44] sm:$0xf] }
  0x11   :  { %v745_v57 = vld [vmem:[%s1400_s0 + $0x50] sm:$0xf0]  ;;  %v751_v58 = vld [vmem:[%s1400_s0 + $0x48] sm:$0xf]  ;;  %v964_v59 = vld [vmem:[%s1400_s0 + $0x54] sm:$0xf0]  ;;  %v744_v62 = vor.u32 %v963_v55, %v743_v54 }
  0x12   :  { %448 = vmatpush.bf16.msra.mxu0 %v988_v17  ;;  %v966_v60 = vld [vmem:[%s1400_s0 + $0x6c] sm:$0xf]  ;;  %v769_v61 = vld [vmem:[%s1400_s0 + $0x78] sm:$0xf0]  ;;  %v748_v63 = vor.u32 %v961_v56, %v745_v57  ;;  %v752_v0 = vor.u32 %v964_v59, %v751_v58  ;;  %v759_v2 = vld [vmem:[%s1400_s0 + $0x60] sm:$0xf] }
  0x13   :  { %497 = vmatpush.bf16.msra.mxu1 %v996_v18  ;;  %v772_v1 = vor.u32 %v966_v60, %v769_v61  ;;  %v967_v3 = vld [vmem:[%s1400_s0 + $0x6c] sm:$0xf0]  ;;  %v965_v4 = vld [vmem:[%s1400_s0 + $0x64] sm:$0xf]  ;;  %v761_v5 = vld [vmem:[%s1400_s0 + $0x70] sm:$0xf0] }
  0x14   :  { %546 = vmatpush.bf16.msra.mxu2 %v1004_v19  ;;  %v767_v6 = vld [vmem:[%s1400_s0 + $0x68] sm:$0xf]  ;;  %v968_v7 = vld [vmem:[%s1400_s0 + $0x74] sm:$0xf0]  ;;  %v970_v8 = vld [vmem:[%s1400_s0 + $0x8c] sm:$0xf]  ;;  %v760_v10 = vor.u32 %v967_v3, %v759_v2  ;;  %v764_v11 = vor.u32 %v965_v4, %v761_v5 }
  0x15   :  { %v785_v9 = vld [vmem:[%s1400_s0 + $0x98] sm:$0xf0]  ;;  %v768_v12 = vor.u32 %v968_v7, %v767_v6  ;;  %v775_v14 = vld [vmem:[%s1400_s0 + $0x80] sm:$0xf]  ;;  %v971_v15 = vld [vmem:[%s1400_s0 + $0x8c] sm:$0xf0] }
  0x16   :  { %449 = vmatpush.bf16.msra.mxu0 %v987_v21  ;;  %v788_v13 = vor.u32 %v970_v8, %v785_v9  ;;  %v969_v16 = vld [vmem:[%s1400_s0 + $0x84] sm:$0xf]  ;;  %v777_v17 = vld [vmem:[%s1400_s0 + $0x90] sm:$0xf0]  ;;  %v783_v18 = vld [vmem:[%s1400_s0 + $0x88] sm:$0xf] }
  0x17   :  { %498 = vmatpush.bf16.msra.mxu1 %v995_v22  ;;  %v972_v19 = vld [vmem:[%s1400_s0 + $0x94] sm:$0xf0]  ;;  %v974_v20 = vld [vmem:[%s1400_s0 + $0xac] sm:$0xf]  ;;  %v801_v21 = vld [vmem:[%s1400_s0 + $0xb8] sm:$0xf0]  ;;  %v776_v22 = vor.u32 %v971_v15, %v775_v14 }
  0x18   :  { %547 = vmatpush.bf16.msra.mxu2 %v1003_v23  ;;  %v780_v23 = vor.u32 %v969_v16, %v777_v17  ;;  %v793_v29 = vld [vmem:[%s1400_s0 + $0xb0] sm:$0xf0]  ;;  %v799_v30 = vld [vmem:[%s1400_s0 + $0xa8] sm:$0xf]  ;;  %v976_v31 = vld [vmem:[%s1400_s0 + $0xb4] sm:$0xf0] }
  0x19   :  { %v978_v32 = vld [vmem:[%s1400_s0 + $0xcc] sm:$0xf]  ;;  %v800_v36 = vor.u32 %v976_v31, %v799_v30  ;;  %v815_v42 = vld [vmem:[%s1400_s0 + $0xc8] sm:$0xf]  ;;  %v980_v43 = vld [vmem:[%s1400_s0 + $0xd4] sm:$0xf0] }
  0x1a   :  { %450 = vmatpush.bf16.msra.mxu0 %v986_v24  ;;  %v784_v24 = vor.u32 %v972_v19, %v783_v18  ;;  %v982_v44 = vld [vmem:[%s1400_s0 + $0xec] sm:$0xf]  ;;  %v833_v45 = vld [vmem:[%s1400_s0 + $0xf8] sm:$0xf0]  ;;  %v816_v48 = vor.u32 %v980_v43, %v815_v42  ;;  %v831_v54 = vld [vmem:[%s1400_s0 + $0xe8] sm:$0xf] }
  0x1b   :  { %499 = vmatpush.bf16.msra.mxu1 %v994_v25  ;;  %v804_v25 = vor.u32 %v974_v20, %v801_v21  ;;  %v836_v49 = vor.u32 %v982_v44, %v833_v45  ;;  %v984_v55 = vld [vmem:[%s1400_s0 + $0xf4] sm:$0xf0]  ;;  %v1317_v60 = vld [vmem:[%s1401_s2] ss:$0 sm:$0xff] }
  0x1c   :  { %548 = vmatpush.bf16.msra.mxu2 %v1002_v26  ;;  %v791_v26 = vld [vmem:[%s1400_s0 + $0xa0] sm:$0xf]  ;;  %v832_v58 = vor.u32 %v984_v55, %v831_v54 }
  0x1e   :  { %451 = vmatpush.bf16.msra.mxu0 %v985_v27  ;;  %v975_v27 = vld [vmem:[%s1400_s0 + $0xac] sm:$0xf0] }
  0x1f   :  { %500 = vmatpush.bf16.msra.mxu1 %v993_v28  ;;  %v973_v28 = vld [vmem:[%s1400_s0 + $0xa4] sm:$0xf]  ;;  %v792_v34 = vor.u32 %v975_v27, %v791_v26 }
  0x20   :  { %549 = vmatpush.bf16.msra.mxu2 %v1001_v33  ;;  %946 = vmatmul.msk.bf16.gmra.mxu3 %vm419_vm0, %v740_v41  ;;  %v817_v33 = vld [vmem:[%s1400_s0 + $0xd8] sm:$0xf0]  ;;  %v796_v35 = vor.u32 %v973_v28, %v793_v29  ;;  %v809_v41 = vld [vmem:[%s1400_s0 + $0xd0] sm:$0xf0] }
  0x21   :  { %452 = vmatmul.bf16.vlgmr.msra.gmra.mxu0 %v712_v38  ;;  %v820_v37 = vor.u32 %v978_v32, %v817_v33  ;;  %v807_v38 = vld [vmem:[%s1400_s0 + $0xc0] sm:$0xf] }
  0x22   :  { %501 = vmatmul.bf16.vlgmr.msra.gmra.mxu1 %v716_v39  ;;  %v979_v39 = vld [vmem:[%s1400_s0 + $0xcc] sm:$0xf0] }
  0x23   :  { %550 = vmatmul.bf16.vlgmr.msra.gmra.mxu2 %v720_v40  ;;  %v977_v40 = vld [vmem:[%s1400_s0 + $0xc4] sm:$0xf]  ;;  %v808_v46 = vor.u32 %v979_v39, %v807_v38 }
  0x24   :  { %v812_v47 = vor.u32 %v977_v40, %v809_v41 }
  0x30   :  { %947 = vmatmul.msk.bf16.gmra.mxu3 %vm419_vm0, %v756_v53  ;;  %v825_v53 = vld [vmem:[%s1400_s0 + $0xf0] sm:$0xf0] }
  0x31   :  { %457 = vmatmul.bf16.gmra.mxu0 %v728_v50  ;;  %v823_v50 = vld [vmem:[%s1400_s0 + $0xe0] sm:$0xf] }
  0x32   :  { %506 = vmatmul.bf16.gmra.mxu1 %v732_v51  ;;  %v983_v51 = vld [vmem:[%s1400_s0 + $0xec] sm:$0xf0] }
  0x33   :  { %555 = vmatmul.bf16.gmra.mxu2 %v736_v52  ;;  %v981_v52 = vld [vmem:[%s1400_s0 + $0xe4] sm:$0xf]  ;;  %v824_v56 = vor.u32 %v983_v51, %v823_v50 }
  0x34   :  { %v828_v57 = vor.u32 %v981_v52, %v825_v53 }
  0x40   :  { %948 = vmatmul.msk.bf16.gmra.mxu3 %vm419_vm0, %v772_v1 }
  0x41   :  { %462 = vmatmul.bf16.gmra.mxu0 %v744_v62 }
  0x42   :  { %511 = vmatmul.bf16.gmra.mxu1 %v748_v63 }
  0x43   :  { %560 = vmatmul.bf16.gmra.mxu2 %v752_v0 }
  0x50   :  { %949 = vmatmul.msk.bf16.gmra.mxu3 %vm419_vm0, %v788_v13 }
  0x51   :  { %467 = vmatmul.bf16.gmra.mxu0 %v760_v10 }
  0x52   :  { %516 = vmatmul.bf16.gmra.mxu1 %v764_v11 }
  0x53   :  { %565 = vmatmul.bf16.gmra.mxu2 %v768_v12 }
  0x60   :  { %950 = vmatmul.msk.bf16.gmra.mxu3 %vm419_vm0, %v804_v25 }
  0x61   :  { %472 = vmatmul.bf16.gmra.mxu0 %v776_v22 }
  0x62   :  { %521 = vmatmul.bf16.gmra.mxu1 %v780_v23 }
  0x63   :  { %570 = vmatmul.bf16.gmra.mxu2 %v784_v24 }
  0x70   :  { %951 = vmatmul.msk.bf16.gmra.mxu3 %vm419_vm0, %v820_v37 }
  0x71   :  { %477 = vmatmul.bf16.gmra.mxu0 %v792_v34 }
  0x72   :  { %526 = vmatmul.bf16.gmra.mxu1 %v796_v35 }
  0x73   :  { %575 = vmatmul.bf16.gmra.mxu2 %v800_v36 }
  0x80   :  { %952 = vmatmul.msk.bf16.gmra.mxu3 %vm419_vm0, %v836_v49 }
  0x81   :  { %482 = vmatmul.bf16.gmra.mxu0 %v808_v46 }
  0x82   :  { %531 = vmatmul.bf16.gmra.mxu1 %v812_v47 }
  0x83   :  { %580 = vmatmul.bf16.gmra.mxu2 %v816_v48 }
  0x91   :  { %487 = vmatmul.bf16.gmra.mxu0 %v824_v56 }
  0x92   :  { %536 = vmatmul.bf16.gmra.mxu1 %v828_v57 }
  0x93   :  { %585 = vmatmul.bf16.gmra.mxu2 %v832_v58  ;;  %v600_v59 = vpop.f32.mrf.mxu3 }
  0x9b   :  { %v602_v0 = vpop.f32.mrf.mxu3 }
  0x9e   :  { %v453_v61 = vpop.f32.mrf.mxu0 }
  0x9f   :  { %v502_v62 = vpop.f32.mrf.mxu1  ;;  %v454_v63 = vadd.f32 %v1317_v60, %v453_v61 }
  0xa1   :  { %v503_v1 = vadd.f32 %v502_v62, %v454_v63 }
  0xa3   :  { %v605_v6 = vpop.f32.mrf.mxu3 }
  0xa6   :  { %v551_v2 = vpop.f32.mrf.mxu2  ;;  %v455_v4 = vpop.f32.mrf.mxu0 }
  0xa7   :  { %v552_v3 = vadd.f32 %v551_v2, %v503_v1  ;;  %v504_v5 = vpop.f32.mrf.mxu1  ;;  %v456_v8 = vadd.f32 %v1317_v60, %v455_v4 }
  0xa9   :  { %v601_v7 = vadd.f32 %v600_v59, %v552_v3  ;;  %v505_v11 = vadd.f32 %v504_v5, %v456_v8 }
  0xab   :  { %vm640_vm1 = vcmp.ge.f32.partialorder %v601_v7, 0.0  ;;  %v656_v9 = vmul.f32 0.1, %v601_v7  ;;  %v607_v17 = vpop.f32.mrf.mxu3 }
  0xad   :  { %v672_v10 = vsel %vm640_vm1, %v601_v7, %v656_v9 }
  0xae   :  { %689 = vst.msk [vmem:[%s1402_s3] sm:$0xff] %vm688_vm2, %v672_v10  ;;  %v553_v12 = vpop.f32.mrf.mxu2  ;;  %v458_v14 = vpop.f32.mrf.mxu0 }
  0xaf   :  { %v554_v13 = vadd.f32 %v553_v12, %v505_v11  ;;  %v507_v15 = vpop.f32.mrf.mxu1  ;;  %v459_v16 = vadd.f32 %v1317_v60, %v458_v14 }
  0xb1   :  { %v603_v18 = vadd.f32 %v602_v0, %v554_v13  ;;  %v508_v20 = vadd.f32 %v507_v15, %v459_v16 }
  0xb3   :  { %vm641_vm3 = vcmp.ge.f32.partialorder %v603_v18, 0.0  ;;  %v657_v19 = vmul.f32 0.1, %v603_v18  ;;  %v610_v26 = vpop.f32.mrf.mxu3 }
  0xb5   :  { %v673_v21 = vsel %vm641_vm3, %v603_v18, %v657_v19 }
  0xb6   :  { %690 = vst.msk [vmem:[%s1402_s3 + $0x8] sm:$0xff] %vm688_vm2, %v673_v21  ;;  %v556_v22 = vpop.f32.mrf.mxu2  ;;  %v460_v24 = vpop.f32.mrf.mxu0 }
  0xb7   :  { %v557_v23 = vadd.f32 %v556_v22, %v508_v20  ;;  %v509_v25 = vpop.f32.mrf.mxu1  ;;  %v461_v28 = vadd.f32 %v1317_v60, %v460_v24 }
  0xb9   :  { %v606_v27 = vadd.f32 %v605_v6, %v557_v23  ;;  %v510_v31 = vadd.f32 %v509_v25, %v461_v28 }
  0xbb   :  { %vm642_vm4 = vcmp.ge.f32.partialorder %v606_v27, 0.0  ;;  %v658_v29 = vmul.f32 0.1, %v606_v27  ;;  %v612_v37 = vpop.f32.mrf.mxu3 }
  0xbd   :  { %v674_v30 = vsel %vm642_vm4, %v606_v27, %v658_v29 }
  0xbe   :  { %691 = vst.msk [vmem:[%s1402_s3 + $0x10] sm:$0xff] %vm688_vm2, %v674_v30  ;;  %v558_v32 = vpop.f32.mrf.mxu2  ;;  %v463_v34 = vpop.f32.mrf.mxu0 }
  0xbf   :  { %v559_v33 = vadd.f32 %v558_v32, %v510_v31  ;;  %v512_v35 = vpop.f32.mrf.mxu1  ;;  %v464_v36 = vadd.f32 %v1317_v60, %v463_v34 }
  0xc1   :  { %v608_v38 = vadd.f32 %v607_v17, %v559_v33  ;;  %v513_v40 = vadd.f32 %v512_v35, %v464_v36 }
  0xc3   :  { %vm643_vm5 = vcmp.ge.f32.partialorder %v608_v38, 0.0  ;;  %v659_v39 = vmul.f32 0.1, %v608_v38  ;;  %v615_v46 = vpop.f32.mrf.mxu3 }
  0xc5   :  { %v675_v41 = vsel %vm643_vm5, %v608_v38, %v659_v39 }
  0xc6   :  { %692 = vst.msk [vmem:[%s1402_s3 + $0x18] sm:$0xff] %vm688_vm2, %v675_v41  ;;  %v561_v42 = vpop.f32.mrf.mxu2  ;;  %v465_v44 = vpop.f32.mrf.mxu0 }
  0xc7   :  { %v562_v43 = vadd.f32 %v561_v42, %v513_v40  ;;  %v514_v45 = vpop.f32.mrf.mxu1  ;;  %v466_v48 = vadd.f32 %v1317_v60, %v465_v44 }
  0xc9   :  { %v611_v47 = vadd.f32 %v610_v26, %v562_v43  ;;  %v515_v51 = vadd.f32 %v514_v45, %v466_v48 }
  0xcb   :  { %vm644_vm6 = vcmp.ge.f32.partialorder %v611_v47, 0.0  ;;  %v660_v49 = vmul.f32 0.1, %v611_v47  ;;  %v617_v57 = vpop.f32.mrf.mxu3 }
  0xcd   :  { %v676_v50 = vsel %vm644_vm6, %v611_v47, %v660_v49 }
  0xce   :  { %693 = vst.msk [vmem:[%s1402_s3 + $0x20] sm:$0xff] %vm688_vm2, %v676_v50  ;;  %v563_v52 = vpop.f32.mrf.mxu2  ;;  %v468_v54 = vpop.f32.mrf.mxu0 }
  0xcf   :  { %v564_v53 = vadd.f32 %v563_v52, %v515_v51  ;;  %v517_v55 = vpop.f32.mrf.mxu1  ;;  %v469_v56 = vadd.f32 %v1317_v60, %v468_v54 }
  0xd1   :  { %v613_v58 = vadd.f32 %v612_v37, %v564_v53  ;;  %v518_v61 = vadd.f32 %v517_v55, %v469_v56 }
  0xd3   :  { %vm645_vm7 = vcmp.ge.f32.partialorder %v613_v58, 0.0  ;;  %v661_v59 = vmul.f32 0.1, %v613_v58  ;;  %v620_v5 = vpop.f32.mrf.mxu3 }
  0xd5   :  { %v677_v62 = vsel %vm645_vm7, %v613_v58, %v661_v59 }
  0xd6   :  { %694 = vst.msk [vmem:[%s1402_s3 + $0x28] sm:$0xff] %vm688_vm2, %v677_v62  ;;  %v566_v63 = vpop.f32.mrf.mxu2  ;;  %v470_v1 = vpop.f32.mrf.mxu0 }
  0xd7   :  { %v567_v0 = vadd.f32 %v566_v63, %v518_v61  ;;  %v519_v2 = vpop.f32.mrf.mxu1  ;;  %v471_v4 = vadd.f32 %v1317_v60, %v470_v1 }
  0xd9   :  { %v616_v3 = vadd.f32 %v615_v46, %v567_v0  ;;  %v520_v8 = vadd.f32 %v519_v2, %v471_v4 }
  0xdb   :  { %vm646_vm8 = vcmp.ge.f32.partialorder %v616_v3, 0.0  ;;  %v662_v6 = vmul.f32 0.1, %v616_v3  ;;  %v622_v17 = vpop.f32.mrf.mxu3 }
  0xdd   :  { %v678_v7 = vsel %vm646_vm8, %v616_v3, %v662_v6 }
  0xde   :  { %695 = vst.msk [vmem:[%s1402_s3 + $0x30] sm:$0xff] %vm688_vm2, %v678_v7  ;;  %v568_v9 = vpop.f32.mrf.mxu2  ;;  %v473_v11 = vpop.f32.mrf.mxu0 }
  0xdf   :  { %v569_v10 = vadd.f32 %v568_v9, %v520_v8  ;;  %v522_v12 = vpop.f32.mrf.mxu1  ;;  %v474_v13 = vadd.f32 %v1317_v60, %v473_v11 }
  0xe1   :  { %v618_v14 = vadd.f32 %v617_v57, %v569_v10  ;;  %v523_v16 = vadd.f32 %v522_v12, %v474_v13 }
  0xe3   :  { %vm647_vm9 = vcmp.ge.f32.partialorder %v618_v14, 0.0  ;;  %v663_v15 = vmul.f32 0.1, %v618_v14  ;;  %v625_v29 = vpop.f32.mrf.mxu3 }
  0xe5   :  { %v679_v18 = vsel %vm647_vm9, %v618_v14, %v663_v15 }
  0xe6   :  { %696 = vst.msk [vmem:[%s1402_s3 + $0x38] sm:$0xff] %vm688_vm2, %v679_v18  ;;  %v571_v19 = vpop.f32.mrf.mxu2  ;;  %v475_v21 = vpop.f32.mrf.mxu0 }
  0xe7   :  { %v572_v20 = vadd.f32 %v571_v19, %v523_v16  ;;  %v524_v22 = vpop.f32.mrf.mxu1  ;;  %v476_v24 = vadd.f32 %v1317_v60, %v475_v21 }
  0xe9   :  { %v621_v23 = vadd.f32 %v620_v5, %v572_v20  ;;  %v525_v27 = vadd.f32 %v524_v22, %v476_v24 }
  0xeb   :  { %vm648_vm10 = vcmp.ge.f32.partialorder %v621_v23, 0.0  ;;  %v664_v25 = vmul.f32 0.1, %v621_v23  ;;  %v627_v42 = vpop.f32.mrf.mxu3 }
  0xed   :  { %v680_v26 = vsel %vm648_vm10, %v621_v23, %v664_v25 }
  0xee   :  { %697 = vst.msk [vmem:[%s1402_s3 + $0x40] sm:$0xff] %vm688_vm2, %v680_v26  ;;  %v573_v28 = vpop.f32.mrf.mxu2  ;;  %v478_v31 = vpop.f32.mrf.mxu0 }
  0xef   :  { %v574_v30 = vadd.f32 %v573_v28, %v525_v27  ;;  %v527_v32 = vpop.f32.mrf.mxu1  ;;  %v479_v33 = vadd.f32 %v1317_v60, %v478_v31 }
  0xf1   :  { %v623_v34 = vadd.f32 %v622_v17, %v574_v30  ;;  %v528_v36 = vadd.f32 %v527_v32, %v479_v33 }
  0xf3   :  { %vm649_vm11 = vcmp.ge.f32.partialorder %v623_v34, 0.0  ;;  %v665_v35 = vmul.f32 0.1, %v623_v34  ;;  %v630_v54 = vpop.f32.mrf.mxu3 }
  0xf5   :  { %v681_v37 = vsel %vm649_vm11, %v623_v34, %v665_v35 }
  0xf6   :  { %698 = vst.msk [vmem:[%s1402_s3 + $0x48] sm:$0xff] %vm688_vm2, %v681_v37  ;;  %v576_v38 = vpop.f32.mrf.mxu2  ;;  %v480_v40 = vpop.f32.mrf.mxu0 }
  0xf7   :  { %v577_v39 = vadd.f32 %v576_v38, %v528_v36  ;;  %v529_v41 = vpop.f32.mrf.mxu1  ;;  %v481_v44 = vadd.f32 %v1317_v60, %v480_v40 }
  0xf9   :  { %v626_v43 = vadd.f32 %v625_v29, %v577_v39  ;;  %v530_v47 = vadd.f32 %v529_v41, %v481_v44 }
  0xfb   :  { %vm650_vm12 = vcmp.ge.f32.partialorder %v626_v43, 0.0  ;;  %v666_v45 = vmul.f32 0.1, %v626_v43  ;;  %v632_v2 = vpop.f32.mrf.mxu3 }
  0xfd   :  { %v682_v46 = vsel %vm650_vm12, %v626_v43, %v666_v45 }
  0xfe   :  { %699 = vst.msk [vmem:[%s1402_s3 + $0x50] sm:$0xff] %vm688_vm2, %v682_v46  ;;  %v578_v48 = vpop.f32.mrf.mxu2  ;;  %v483_v50 = vpop.f32.mrf.mxu0 }
  0xff   :  { %v579_v49 = vadd.f32 %v578_v48, %v530_v47  ;;  %v532_v51 = vpop.f32.mrf.mxu1  ;;  %v484_v52 = vadd.f32 %v1317_v60, %v483_v50 }
 0x101   :  { %v628_v53 = vadd.f32 %v627_v42, %v579_v49  ;;  %v533_v56 = vadd.f32 %v532_v51, %v484_v52 }
 0x103   :  { %vm651_vm13 = vcmp.ge.f32.partialorder %v628_v53, 0.0  ;;  %v667_v55 = vmul.f32 0.1, %v628_v53  ;;  %v635_v14 = vpop.f32.mrf.mxu3 }
 0x105   :  { %v683_v57 = vsel %vm651_vm13, %v628_v53, %v667_v55 }
 0x106   :  { %700 = vst.msk [vmem:[%s1402_s3 + $0x58] sm:$0xff] %vm688_vm2, %v683_v57  ;;  %v581_v58 = vpop.f32.mrf.mxu2  ;;  %v485_v61 = vpop.f32.mrf.mxu0 }
 0x107   :  { %v582_v59 = vadd.f32 %v581_v58, %v533_v56  ;;  %v534_v62 = vpop.f32.mrf.mxu1  ;;  %v486_v0 = vadd.f32 %v1317_v60, %v485_v61 }
 0x109   :  { %v631_v63 = vadd.f32 %v630_v54, %v582_v59  ;;  %v535_v4 = vadd.f32 %v534_v62, %v486_v0 }
 0x10b   :  { %vm652_vm14 = vcmp.ge.f32.partialorder %v631_v63, 0.0  ;;  %v668_v1 = vmul.f32 0.1, %v631_v63  ;;  %v637_v26 = vpop.f32.mrf.mxu3 }
 0x10d   :  { %v684_v3 = vsel %vm652_vm14, %v631_v63, %v668_v1 }
 0x10e   :  { %701 = vst.msk [vmem:[%s1402_s3 + $0x60] sm:$0xff] %vm688_vm2, %v684_v3  ;;  %v583_v5 = vpop.f32.mrf.mxu2  ;;  %v488_v7 = vpop.f32.mrf.mxu0 }
 0x10f   :  { %v584_v6 = vadd.f32 %v583_v5, %v535_v4  ;;  %v489_v8 = vadd.f32 %v1317_v60, %v488_v7  ;;  %v537_v10 = vpop.f32.mrf.mxu1 }
 0x111   :  { %v633_v9 = vadd.f32 %v632_v2, %v584_v6  ;;  %v538_v12 = vadd.f32 %v537_v10, %v489_v8 }
 0x113   :  { %vm653_vm15 = vcmp.ge.f32.partialorder %v633_v9, 0.0  ;;  %v669_v11 = vmul.f32 0.1, %v633_v9 }
 0x115   :  { %v685_v13 = vsel %vm653_vm15, %v633_v9, %v669_v11 }
 0x116   :  { %702 = vst.msk [vmem:[%s1402_s3 + $0x68] sm:$0xff] %vm688_vm2, %v685_v13  ;;  %v586_v15 = vpop.f32.mrf.mxu2  ;;  %v490_v17 = vpop.f32.mrf.mxu0 }
 0x117   :  { %v587_v16 = vadd.f32 %v586_v15, %v538_v12  ;;  %v491_v19 = vadd.f32 %v1317_v60, %v490_v17  ;;  %v539_v21 = vpop.f32.mrf.mxu1 }
 0x119   :  { %v636_v18 = vadd.f32 %v635_v14, %v587_v16  ;;  %v540_v23 = vadd.f32 %v539_v21, %v491_v19 }
 0x11b   :  { %vm654_vm0 = vcmp.ge.f32.partialorder %v636_v18, 0.0  ;;  %v670_v20 = vmul.f32 0.1, %v636_v18 }
 0x11d   :  { %v686_v22 = vsel %vm654_vm0, %v636_v18, %v670_v20 }
 0x11e   :  { %703 = vst.msk [vmem:[%s1402_s3 + $0x70] sm:$0xff] %vm688_vm2, %v686_v22  ;;  %v588_v24 = vpop.f32.mrf.mxu2 }
 0x11f   :  { %v589_v25 = vadd.f32 %v588_v24, %v540_v23 }
 0x121   :  { %v638_v27 = vadd.f32 %v637_v26, %v589_v25 }
 0x123   :  { %vm655_vm1 = vcmp.ge.f32.partialorder %v638_v27, 0.0  ;;  %v671_v28 = vmul.f32 0.1, %v638_v27 }
 0x125   :  { %v687_v29 = vsel %vm655_vm1, %v638_v27, %v671_v28 }
 0x126   :  { %704 = vst.msk [vmem:[%s1402_s3 + $0x78] sm:$0xff] %vm688_vm2, %v687_v29 }

// kernel: _lambda_.13
= control target key start
LH: loop header
LB: loop body
LE: loop exit
PB: predicated region body
PF: predicated region fallthrough
CT: control target
= control target key end

     0   :  { %vm795_vm0 = vcmask 785408   ;;  %vm1211_vm2 = vcmask 261120   ;;  %s2550_s1 = inlined_call_operand.vmem [shape: bf16[864,32], index: 1, kind: input, shape index: {}]   ;;  %s2551_s2 = inlined_call_operand.vmem [shape: f32[1,32], index: 2, kind: input, shape index: {}]   ;;  %s2552_s0 = inlined_call_operand.vmem [shape: bf16[128,864], index: 0, kind: input, shape index: {}]   ;;  %s2553_s3 = inlined_call_operand.vmem [shape: f32[128,32], index: 3, kind: output, shape index: {}]  }
   0x1   :  { %v1743_v0 = vld [vmem:[%s2550_s1 + $0x38] sm:$0xff]  ;;  %v1742_v3 = vld [vmem:[%s2550_s1 + $0x30] sm:$0xff]  ;;  %v1741_v6 = vld [vmem:[%s2550_s1 + $0x28] sm:$0xff] }
   0x2   :  { %v1841_v1 = vld [vmem:[%s2550_s1 + $0xb8] sm:$0xff]  ;;  %820 = vmatpush.bf16.msra.mxu0 %v1743_v0  ;;  %1790 = vmatpush.bf16.msra.mxu3 %v1743_v0  ;;  %v1856_v4 = vld [vmem:[%s2550_s1 + $0xb0] sm:$0xff]  ;;  %v1871_v7 = vld [vmem:[%s2550_s1 + $0xa8] sm:$0xff] }
   0x3   :  { %v1846_v2 = vld [vmem:[%s2550_s1 + $0x78] sm:$0xff]  ;;  %1806 = vmatpush.bf16.msra.mxu2 %v1841_v1  ;;  %v1861_v5 = vld [vmem:[%s2550_s1 + $0x70] sm:$0xff]  ;;  %v1876_v8 = vld [vmem:[%s2550_s1 + $0x68] sm:$0xff] }
   0x4   :  { %1798 = vmatpush.bf16.msra.mxu1 %v1846_v2  ;;  %v1740_v9 = vld [vmem:[%s2550_s1 + $0x20] sm:$0xff]  ;;  %v1739_v12 = vld [vmem:[%s2550_s1 + $0x18] sm:$0xff]  ;;  %v1738_v15 = vld [vmem:[%s2550_s1 + $0x10] sm:$0xff] }
   0x5   :  { %v1886_v10 = vld [vmem:[%s2550_s1 + $0xa0] sm:$0xff]  ;;  %v1901_v13 = vld [vmem:[%s2550_s1 + $0x98] sm:$0xff]  ;;  %v1916_v16 = vld [vmem:[%s2550_s1 + $0x90] sm:$0xff] }
   0x6   :  { %821 = vmatpush.bf16.msra.mxu0 %v1742_v3  ;;  %1791 = vmatpush.bf16.msra.mxu3 %v1742_v3  ;;  %v1891_v11 = vld [vmem:[%s2550_s1 + $0x60] sm:$0xff]  ;;  %v1906_v14 = vld [vmem:[%s2550_s1 + $0x58] sm:$0xff]  ;;  %v1921_v17 = vld [vmem:[%s2550_s1 + $0x50] sm:$0xff] }
   0x7   :  { %1807 = vmatpush.bf16.msra.mxu2 %v1856_v4  ;;  %v1737_v18 = vld [vmem:[%s2550_s1 + $0x8] sm:$0xff]  ;;  %v1736_v21 = vld [vmem:[%s2550_s1] sm:$0xff]  ;;  %v1683_v25 = vld [vmem:[%s2552_s0 + $0x18] sm:$0xf0] }
   0x8   :  { %1799 = vmatpush.bf16.msra.mxu1 %v1861_v5  ;;  %v1931_v19 = vld [vmem:[%s2550_s1 + $0x88] sm:$0xff]  ;;  %v1944_v22 = vld [vmem:[%s2550_s1 + $0x80] sm:$0xff]  ;;  %v1290_v26 = vld [vmem:[%s2552_s0 + $0x70] sm:$0xf] }
   0x9   :  { %v1936_v20 = vld [vmem:[%s2550_s1 + $0x48] sm:$0xff]  ;;  %v1949_v23 = vld [vmem:[%s2550_s1 + $0x40] sm:$0xff]  ;;  %v1298_v28 = vld [vmem:[%s2552_s0 + $0x78] sm:$0xf] }
   0xa   :  { %822 = vmatpush.bf16.msra.mxu0 %v1741_v6  ;;  %1792 = vmatpush.bf16.msra.mxu3 %v1741_v6  ;;  %v1234_v24 = vld [vmem:[%s2552_s0] sm:$0xf]  ;;  %v1697_v27 = vld [vmem:[%s2552_s0 + $0x88] sm:$0xf0]  ;;  %v1698_v29 = vld [vmem:[%s2552_s0 + $0x90] sm:$0xf0] }
   0xb   :  { %1808 = vmatpush.bf16.msra.mxu2 %v1871_v7  ;;  %v1694_v30 = vld [vmem:[%s2552_s0 + $0x74] sm:$0xf]  ;;  %v1292_v31 = vld [vmem:[%s2552_s0 + $0x8c] sm:$0xf0]  ;;  %v1767_v32 = vld [vmem:[%s2550_s1 + $0xf8] sm:$0xff]  ;;  %v1235_v33 = vor.u32 %v1683_v25, %v1234_v24  ;;  %v1291_v34 = vor.u32 %v1697_v27, %v1290_v26  ;;  %v1299_v35 = vor.u32 %v1698_v29, %v1298_v28 }
   0xc   :  { %1800 = vmatpush.bf16.msra.mxu1 %v1876_v8  ;;  %v1295_v36 = vor.u32 %v1694_v30, %v1292_v31  ;;  %v1789_v37 = vld [vmem:[%s2550_s1 + $0x1a8] sm:$0xff]  ;;  %v1783_v38 = vld [vmem:[%s2550_s1 + $0x178] sm:$0xff]  ;;  %v1766_v39 = vld [vmem:[%s2550_s1 + $0xf0] sm:$0xff] }
   0xd   :  { %v1782_v40 = vld [vmem:[%s2550_s1 + $0x170] sm:$0xff]  ;;  %v1788_v41 = vld [vmem:[%s2550_s1 + $0x1a0] sm:$0xff]  ;;  %v1765_v42 = vld [vmem:[%s2550_s1 + $0xe8] sm:$0xff] }
   0xe   :  { %823 = vmatpush.bf16.msra.mxu0 %v1740_v9  ;;  %1793 = vmatpush.bf16.msra.mxu3 %v1740_v9  ;;  %v1781_v43 = vld [vmem:[%s2550_s1 + $0x168] sm:$0xff]  ;;  %v1787_v44 = vld [vmem:[%s2550_s1 + $0x198] sm:$0xff]  ;;  %v1764_v45 = vld [vmem:[%s2550_s1 + $0xe0] sm:$0xff] }
   0xf   :  { %1809 = vmatpush.bf16.msra.mxu2 %v1886_v10  ;;  %v1262_v46 = vld [vmem:[%s2552_s0 + $0x38] sm:$0xf]  ;;  %v1690_v47 = vld [vmem:[%s2552_s0 + $0x50] sm:$0xf0]  ;;  %v1318_v48 = vld [vmem:[%s2552_s0 + $0xa8] sm:$0xf] }
  0x10   :  { %1801 = vmatpush.bf16.msra.mxu1 %v1891_v11  ;;  %v1704_v49 = vld [vmem:[%s2552_s0 + $0xc0] sm:$0xf0]  ;;  %v1326_v50 = vld [vmem:[%s2552_s0 + $0xb0] sm:$0xf]  ;;  %v1705_v51 = vld [vmem:[%s2552_s0 + $0xc8] sm:$0xf0]  ;;  %v1263_v55 = vor.u32 %v1690_v47, %v1262_v46 }
  0x11   :  { %v1701_v52 = vld [vmem:[%s2552_s0 + $0xac] sm:$0xf]  ;;  %v1320_v53 = vld [vmem:[%s2552_s0 + $0xc4] sm:$0xf0]  ;;  %v1780_v54 = vld [vmem:[%s2550_s1 + $0x160] sm:$0xff]  ;;  %v1319_v56 = vor.u32 %v1704_v49, %v1318_v48  ;;  %v1327_v57 = vor.u32 %v1705_v51, %v1326_v50 }
  0x12   :  { %824 = vmatpush.bf16.msra.mxu0 %v1739_v12  ;;  %1794 = vmatpush.bf16.msra.mxu3 %v1739_v12  ;;  %v1323_v58 = vor.u32 %v1701_v52, %v1320_v53  ;;  %v1763_v59 = vld [vmem:[%s2550_s1 + $0xd8] sm:$0xff]  ;;  %v1786_v60 = vld [vmem:[%s2550_s1 + $0x190] sm:$0xff]  ;;  %v1346_v63 = vld [vmem:[%s2552_s0 + $0xe0] sm:$0xf] }
  0x13   :  { %1810 = vmatpush.bf16.msra.mxu2 %v1901_v13  ;;  %v1779_v61 = vld [vmem:[%s2550_s1 + $0x158] sm:$0xff]  ;;  %v1762_v62 = vld [vmem:[%s2550_s1 + $0xd0] sm:$0xff]  ;;  %v1236_v3 = vld [vmem:[%s2552_s0 + $0x1c] sm:$0xf0] }
  0x14   :  { %1802 = vmatpush.bf16.msra.mxu1 %v1906_v14  ;;  %v1711_v0 = vld [vmem:[%s2552_s0 + $0xf8] sm:$0xf0]  ;;  %v1712_v6 = vld [vmem:[%s2552_s0 + $0x100] sm:$0xf0]  ;;  %v1348_v9 = vld [vmem:[%s2552_s0 + $0xfc] sm:$0xf0] }
  0x15   :  { %v1719_v24 = vld [vmem:[%s2552_s0 + $0x138] sm:$0xf0]  ;;  %v1376_v26 = vld [vmem:[%s2552_s0 + $0x134] sm:$0xf0]  ;;  %v1760_v31 = vld [vmem:[%s2550_s1 + $0xc0] sm:$0xff] }
  0x16   :  { %825 = vmatpush.bf16.msra.mxu0 %v1738_v15  ;;  %1795 = vmatpush.bf16.msra.mxu3 %v1738_v15  ;;  %v1715_v25 = vld [vmem:[%s2552_s0 + $0x11c] sm:$0xf]  ;;  %v1430_v47 = vld [vmem:[%s2552_s0 + $0x188] sm:$0xf]  ;;  %v1732_v48 = vld [vmem:[%s2552_s0 + $0x1a0] sm:$0xf0] }
  0x17   :  { %1811 = vmatpush.bf16.msra.mxu2 %v1916_v16  ;;  %v1379_v30 = vor.u32 %v1715_v25, %v1376_v26  ;;  %v1771_v46 = vld [vmem:[%s2550_s1 + $0x118] sm:$0xff]  ;;  %v1270_v49 = vld [vmem:[%s2552_s0 + $0x40] sm:$0xf]  ;;  %v1438_v51 = vld [vmem:[%s2552_s0 + $0x190] sm:$0xf] }
  0x18   :  { %1803 = vmatpush.bf16.msra.mxu1 %v1921_v17  ;;  %v1691_v50 = vld [vmem:[%s2552_s0 + $0x58] sm:$0xf0]  ;;  %v1733_v52 = vld [vmem:[%s2552_s0 + $0x1a8] sm:$0xf0] }
  0x19   :  { %v1729_v53 = vld [vmem:[%s2552_s0 + $0x18c] sm:$0xf] }
  0x1a   :  { %826 = vmatpush.bf16.msra.mxu0 %v1737_v18  ;;  %1796 = vmatpush.bf16.msra.mxu3 %v1737_v18  ;;  %v1785_v18 = vld [vmem:[%s2550_s1 + $0x188] sm:$0xff] }
  0x1b   :  { %1812 = vmatpush.bf16.msra.mxu2 %v1931_v19 }
  0x1c   :  { %1804 = vmatpush.bf16.msra.mxu1 %v1936_v20 }
  0x1e   :  { %827 = vmatpush.bf16.msra.mxu0 %v1736_v21  ;;  %1797 = vmatpush.bf16.msra.mxu3 %v1736_v21  ;;  %v1718_v21 = vld [vmem:[%s2552_s0 + $0x130] sm:$0xf0] }
  0x1f   :  { %1813 = vmatpush.bf16.msra.mxu2 %v1944_v22 }
  0x20   :  { %1805 = vmatpush.bf16.msra.mxu1 %v1949_v23 }
  0x21   :  { %828 = vmatmul.bf16.vlgmr.msra.gmra.mxu0 %v1235_v33  ;;  %838 = vmatmul.bf16.vlgmr.msra.gmra.mxu3 %v1291_v34  ;;  %v1776_v33 = vld [vmem:[%s2550_s1 + $0x140] sm:$0xff]  ;;  %v1725_v34 = vld [vmem:[%s2552_s0 + $0x168] sm:$0xf0] }
  0x22   :  { %967 = vmatpush.bf16.msrb.mxu3 %v1767_v32  ;;  %869 = vmatpush.bf16.msrb.mxu0 %v1846_v2  ;;  %v1680_v2 = vld [vmem:[%s2552_s0 + $0x4] sm:$0xf] }
  0x23   :  { %936 = vmatmul.bf16.vlgmr.msra.gmra.mxu2 %v1299_v35  ;;  %887 = vmatmul.bf16.vlgmr.msra.gmra.mxu1 %v1295_v36  ;;  %v1239_v12 = vor.u32 %v1680_v2, %v1236_v3  ;;  %v1784_v32 = vld [vmem:[%s2550_s1 + $0x180] sm:$0xff]  ;;  %v1410_v36 = vld [vmem:[%s2552_s0 + $0x158] sm:$0xf]  ;;  %v1685_v2 = vld [vmem:[%s2552_s0 + $0x28] sm:$0xf0] }
  0x24   :  { %1116 = vmatpush.bf16.msrb.mxu2 %v1789_v37  ;;  %1065 = vmatpush.bf16.msrb.mxu1 %v1783_v38  ;;  %v1684_v35 = vld [vmem:[%s2552_s0 + $0x20] sm:$0xf0]  ;;  %v1726_v37 = vld [vmem:[%s2552_s0 + $0x170] sm:$0xf0]  ;;  %v1258_v3 = vld [vmem:[%s2552_s0 + $0x18] sm:$0xf] }
  0x25   :  { %v1722_v38 = vld [vmem:[%s2552_s0 + $0x154] sm:$0xf] }
  0x26   :  { %870 = vmatpush.bf16.msrb.mxu0 %v1861_v5  ;;  %968 = vmatpush.bf16.msrb.mxu3 %v1766_v39  ;;  %v1354_v5 = vld [vmem:[%s2552_s0 + $0xe8] sm:$0xf]  ;;  %v1404_v39 = vld [vmem:[%s2552_s0 + $0x16c] sm:$0xf0] }
  0x28   :  { %1066 = vmatpush.bf16.msrb.mxu1 %v1782_v40  ;;  %1117 = vmatpush.bf16.msrb.mxu2 %v1788_v41  ;;  %v1774_v40 = vld [vmem:[%s2550_s1 + $0x130] sm:$0xff] }
  0x2a   :  { %871 = vmatpush.bf16.msrb.mxu0 %v1876_v8  ;;  %969 = vmatpush.bf16.msrb.mxu3 %v1765_v42  ;;  %v1708_v8 = vld [vmem:[%s2552_s0 + $0xe4] sm:$0xf] }
  0x2b   :  { %v1351_v15 = vor.u32 %v1708_v8, %v1348_v9  ;;  %v1252_v8 = vld [vmem:[%s2552_s0 + $0x2c] sm:$0xf0] }
  0x2c   :  { %1067 = vmatpush.bf16.msrb.mxu1 %v1781_v43  ;;  %1118 = vmatpush.bf16.msrb.mxu2 %v1787_v44  ;;  %v1407_v43 = vor.u32 %v1722_v38, %v1404_v39  ;;  %v1773_v44 = vld [vmem:[%s2550_s1 + $0x128] sm:$0xff] }
  0x2e   :  { %872 = vmatpush.bf16.msrb.mxu0 %v1891_v11  ;;  %970 = vmatpush.bf16.msrb.mxu3 %v1764_v45  ;;  %v1347_v11 = vor.u32 %v1711_v0, %v1346_v63  ;;  %v1772_v45 = vld [vmem:[%s2550_s1 + $0x120] sm:$0xff]  ;;  %v1244_v63 = vld [vmem:[%s2552_s0 + $0x24] sm:$0xf0]  ;;  %v1250_v0 = vld [vmem:[%s2552_s0 + $0x10] sm:$0xf] }
  0x30   :  { %1068 = vmatpush.bf16.msrb.mxu1 %v1780_v54  ;;  %1119 = vmatpush.bf16.msrb.mxu2 %v1786_v60  ;;  %v1432_v54 = vld [vmem:[%s2552_s0 + $0x1a4] sm:$0xf0] }
  0x31   :  { %833 = vmatmul.bf16.gmra.mxu0 %v1263_v55  ;;  %843 = vmatmul.bf16.gmra.mxu3 %v1319_v56  ;;  %v1770_v55 = vld [vmem:[%s2550_s1 + $0x110] sm:$0xff]  ;;  %v1431_v56 = vor.u32 %v1732_v48, %v1430_v47  ;;  %v1769_v60 = vld [vmem:[%s2550_s1 + $0x108] sm:$0xff]  ;;  %v1342_v48 = vld [vmem:[%s2552_s0 + $0xc0] sm:$0xf] }
  0x32   :  { %873 = vmatpush.bf16.msrb.mxu0 %v1906_v14  ;;  %971 = vmatpush.bf16.msrb.mxu3 %v1763_v59  ;;  %v1355_v14 = vor.u32 %v1712_v6, %v1354_v5  ;;  %v1435_v59 = vor.u32 %v1729_v53, %v1432_v54  ;;  %v1686_v5 = vld [vmem:[%s2552_s0 + $0x30] sm:$0xf0] }
  0x33   :  { %941 = vmatmul.bf16.gmra.mxu2 %v1327_v57  ;;  %892 = vmatmul.bf16.gmra.mxu1 %v1323_v58  ;;  %v1271_v57 = vor.u32 %v1691_v50, %v1270_v49  ;;  %v1439_v58 = vor.u32 %v1733_v52, %v1438_v51  ;;  %v1682_v6 = vld [vmem:[%s2552_s0 + $0x14] sm:$0xf]  ;;  %v1707_v49 = vld [vmem:[%s2552_s0 + $0xd8] sm:$0xf0]  ;;  %v1336_v51 = vld [vmem:[%s2552_s0 + $0xd4] sm:$0xf0] }
  0x34   :  { %1069 = vmatpush.bf16.msrb.mxu1 %v1779_v61  ;;  %1120 = vmatpush.bf16.msrb.mxu2 %v1785_v18  ;;  %v1768_v61 = vld [vmem:[%s2550_s1 + $0x100] sm:$0xff]  ;;  %v1278_v18 = vld [vmem:[%s2552_s0 + $0x48] sm:$0xf]  ;;  %v1706_v47 = vld [vmem:[%s2552_s0 + $0xd0] sm:$0xf0] }
  0x35   :  { %v1703_v50 = vld [vmem:[%s2552_s0 + $0xbc] sm:$0xf] }
  0x36   :  { %874 = vmatpush.bf16.msrb.mxu0 %v1921_v17  ;;  %972 = vmatpush.bf16.msrb.mxu3 %v1762_v62  ;;  %v1778_v17 = vld [vmem:[%s2550_s1 + $0x150] sm:$0xff]  ;;  %v1681_v62 = vld [vmem:[%s2552_s0 + $0xc] sm:$0xf] }
  0x37   :  { %v1247_v9 = vor.u32 %v1681_v62, %v1244_v63 }
  0x38   :  { %1070 = vmatpush.bf16.msrb.mxu1 %v1778_v17  ;;  %1121 = vmatpush.bf16.msrb.mxu2 %v1784_v32  ;;  %v1272_v17 = vld [vmem:[%s2552_s0 + $0x5c] sm:$0xf0]  ;;  %v1696_v32 = vld [vmem:[%s2552_s0 + $0x84] sm:$0xf] }
  0x3a   :  { %875 = vmatpush.bf16.msrb.mxu0 %v1936_v20  ;;  %v1374_v20 = vld [vmem:[%s2552_s0 + $0x118] sm:$0xf] }
  0x3b   :  { %v1375_v27 = vor.u32 %v1718_v21, %v1374_v20  ;;  %v1286_v20 = vld [vmem:[%s2552_s0 + $0x50] sm:$0xf]  ;;  %v1693_v21 = vld [vmem:[%s2552_s0 + $0x68] sm:$0xf0] }
  0x3c   :  { %v1287_v25 = vor.u32 %v1693_v21, %v1286_v20 }
  0x3e   :  { %876 = vmatpush.bf16.msrb.mxu0 %v1949_v23  ;;  %v1264_v23 = vld [vmem:[%s2552_s0 + $0x54] sm:$0xf0] }
  0x41   :  { %848 = vmatmul.bf16.gmra.mxu3 %v1347_v11  ;;  %877 = vmatmul.bf16.vlgmr.msrb.gmra.mxu0 %v1239_v12  ;;  %v1251_v11 = vor.u32 %v1685_v2, %v1250_v0  ;;  %v1259_v12 = vor.u32 %v1686_v5, %v1258_v3 }
  0x42   :  { %918 = vmatpush.bf16.msra.mxu0 %v1841_v1  ;;  %v1761_v1 = vld [vmem:[%s2550_s1 + $0xc8] sm:$0xff] }
  0x43   :  { %946 = vmatmul.bf16.gmra.mxu2 %v1355_v14  ;;  %897 = vmatmul.bf16.gmra.mxu1 %v1351_v15  ;;  %v1255_v14 = vor.u32 %v1682_v6, %v1252_v8  ;;  %v1688_v15 = vld [vmem:[%s2552_s0 + $0x44] sm:$0xf] }
  0x44   :  { %973 = vmatpush.bf16.msrb.mxu3 %v1761_v1  ;;  %v1692_v1 = vld [vmem:[%s2552_s0 + $0x60] sm:$0xf0] }
  0x46   :  { %919 = vmatpush.bf16.msra.mxu0 %v1856_v4  ;;  %v1687_v4 = vld [vmem:[%s2552_s0 + $0x3c] sm:$0xf] }
  0x47   :  { %v1267_v28 = vor.u32 %v1687_v4, %v1264_v23  ;;  %v1689_v4 = vld [vmem:[%s2552_s0 + $0x4c] sm:$0xf]  ;;  %v1280_v23 = vld [vmem:[%s2552_s0 + $0x64] sm:$0xf0] }
  0x48   :  { %974 = vmatpush.bf16.msrb.mxu3 %v1760_v31  ;;  %v1283_v26 = vor.u32 %v1689_v4, %v1280_v23  ;;  %v1700_v31 = vld [vmem:[%s2552_s0 + $0xa0] sm:$0xf0] }
  0x4a   :  { %920 = vmatpush.bf16.msra.mxu0 %v1871_v7  ;;  %v1382_v7 = vld [vmem:[%s2552_s0 + $0x120] sm:$0xf] }
  0x4b   :  { %v1383_v29 = vor.u32 %v1719_v24, %v1382_v7  ;;  %v1275_v7 = vor.u32 %v1688_v15, %v1272_v17  ;;  %v1279_v24 = vor.u32 %v1692_v1, %v1278_v18  ;;  %v1370_v15 = vld [vmem:[%s2552_s0 + $0xf8] sm:$0xf]  ;;  %v1714_v17 = vld [vmem:[%s2552_s0 + $0x110] sm:$0xf0]  ;;  %v1364_v1 = vld [vmem:[%s2552_s0 + $0x10c] sm:$0xf0] }
  0x4c   :  { %v1710_v18 = vld [vmem:[%s2552_s0 + $0xf4] sm:$0xf] }
  0x4e   :  { %921 = vmatpush.bf16.msra.mxu0 %v1886_v10  ;;  %v1777_v10 = vld [vmem:[%s2550_s1 + $0x148] sm:$0xff] }
  0x4f   :  { %1071 = vmatpush.bf16.msrb.mxu1 %v1777_v10  ;;  %v1314_v10 = vld [vmem:[%s2552_s0 + $0x88] sm:$0xf] }
  0x51   :  { %853 = vmatmul.bf16.gmra.mxu3 %v1375_v27  ;;  %882 = vmatmul.bf16.gmra.mxu0 %v1267_v28  ;;  %v1695_v27 = vld [vmem:[%s2552_s0 + $0x7c] sm:$0xf]  ;;  %v1300_v28 = vld [vmem:[%s2552_s0 + $0x94] sm:$0xf0] }
  0x52   :  { %922 = vmatpush.bf16.msra.mxu0 %v1901_v13  ;;  %v1775_v13 = vld [vmem:[%s2550_s1 + $0x138] sm:$0xff] }
  0x53   :  { %951 = vmatmul.bf16.gmra.mxu2 %v1383_v29  ;;  %902 = vmatmul.bf16.gmra.mxu1 %v1379_v30  ;;  %v1306_v29 = vld [vmem:[%s2552_s0 + $0x80] sm:$0xf]  ;;  %v1699_v30 = vld [vmem:[%s2552_s0 + $0x98] sm:$0xf0] }
  0x54   :  { %1072 = vmatpush.bf16.msrb.mxu1 %v1776_v33  ;;  %v1303_v33 = vor.u32 %v1695_v27, %v1300_v28 }
  0x56   :  { %923 = vmatpush.bf16.msra.mxu0 %v1916_v16  ;;  %v1402_v16 = vld [vmem:[%s2552_s0 + $0x150] sm:$0xf] }
  0x57   :  { %v1403_v41 = vor.u32 %v1725_v34, %v1402_v16  ;;  %v1307_v16 = vor.u32 %v1699_v30, %v1306_v29 }
  0x5a   :  { %924 = vmatpush.bf16.msra.mxu0 %v1931_v19  ;;  %v1242_v19 = vld [vmem:[%s2552_s0 + $0x8] sm:$0xf] }
  0x5b   :  { %v1243_v42 = vor.u32 %v1684_v35, %v1242_v19  ;;  %v1315_v19 = vor.u32 %v1700_v31, %v1314_v10 }
  0x5e   :  { %925 = vmatpush.bf16.msra.mxu0 %v1944_v22  ;;  %v1411_v22 = vor.u32 %v1726_v37, %v1410_v36  ;;  %v2284_v37 = vld [vmem:[%s2551_s2] ss:$0 sm:$0xff] }
  0x61   :  { %858 = vmatmul.bf16.gmra.mxu3 %v1403_v41  ;;  %926 = vmatmul.bf16.vlgmr.msra.gmra.mxu0 %v1243_v42 }
  0x62   :  { %1016 = vmatpush.bf16.msrb.mxu0 %v1775_v13  ;;  %v1308_v13 = vld [vmem:[%s2552_s0 + $0x9c] sm:$0xf0] }
  0x63   :  { %956 = vmatmul.bf16.gmra.mxu2 %v1411_v22  ;;  %907 = vmatmul.bf16.gmra.mxu1 %v1407_v43  ;;  %v1311_v35 = vor.u32 %v1696_v32, %v1308_v13 }
  0x66   :  { %1017 = vmatpush.bf16.msrb.mxu0 %v1774_v40 }
  0x6a   :  { %1018 = vmatpush.bf16.msrb.mxu0 %v1773_v44  ;;  %v1702_v44 = vld [vmem:[%s2552_s0 + $0xb4] sm:$0xf] }
  0x6e   :  { %1019 = vmatpush.bf16.msrb.mxu0 %v1772_v45  ;;  %v1328_v45 = vld [vmem:[%s2552_s0 + $0xcc] sm:$0xf0] }
  0x71   :  { %863 = vmatmul.bf16.gmra.mxu3 %v1431_v56  ;;  %931 = vmatmul.bf16.gmra.mxu0 %v1271_v57 }
  0x72   :  { %1020 = vmatpush.bf16.msrb.mxu0 %v1771_v46  ;;  %v1334_v46 = vld [vmem:[%s2552_s0 + $0xb8] sm:$0xf] }
  0x73   :  { %961 = vmatmul.bf16.gmra.mxu2 %v1439_v58  ;;  %912 = vmatmul.bf16.gmra.mxu1 %v1435_v59  ;;  %v1335_v56 = vor.u32 %v1706_v47, %v1334_v46  ;;  %v1343_v58 = vor.u32 %v1707_v49, %v1342_v48  ;;  %v1339_v59 = vor.u32 %v1703_v50, %v1336_v51 }
  0x76   :  { %1021 = vmatpush.bf16.msrb.mxu0 %v1770_v55  ;;  %v1331_v55 = vor.u32 %v1702_v44, %v1328_v45 }
  0x7a   :  { %1022 = vmatpush.bf16.msrb.mxu0 %v1769_v60 }
  0x7e   :  { %1023 = vmatpush.bf16.msrb.mxu0 %v1768_v61 }
  0x81   :  { %975 = vmatmul.bf16.vlgmr.msrb.gmra.mxu3 %v1247_v9  ;;  %1024 = vmatmul.bf16.vlgmr.msrb.gmra.mxu0 %v1251_v11  ;;  %v1709_v9 = vld [vmem:[%s2552_s0 + $0xec] sm:$0xf]  ;;  %v1356_v11 = vld [vmem:[%s2552_s0 + $0x104] sm:$0xf0] }
  0x82   :  { %v1359_v23 = vor.u32 %v1709_v9, %v1356_v11  ;;  %v1426_v9 = vld [vmem:[%s2552_s0 + $0x168] sm:$0xf]  ;;  %v1728_v11 = vld [vmem:[%s2552_s0 + $0x180] sm:$0xf0] }
  0x83   :  { %1672 = vmatmul.msk.bf16.vlgmr.msrb.gmra.mxu2 %vm795_vm0, %v1259_v12  ;;  %1073 = vmatmul.bf16.vlgmr.msrb.gmra.mxu1 %v1255_v14  ;;  %v1362_v12 = vld [vmem:[%s2552_s0 + $0xf0] sm:$0xf]  ;;  %v1713_v14 = vld [vmem:[%s2552_s0 + $0x108] sm:$0xf0] }
  0x91   :  { %980 = vmatmul.bf16.gmra.mxu3 %v1275_v7  ;;  %1029 = vmatmul.bf16.gmra.mxu0 %v1279_v24  ;;  %v1363_v7 = vor.u32 %v1713_v14, %v1362_v12  ;;  %v1724_v12 = vld [vmem:[%s2552_s0 + $0x164] sm:$0xf]  ;;  %v1420_v14 = vld [vmem:[%s2552_s0 + $0x17c] sm:$0xf0] }
  0x93   :  { %1673 = vmatmul.msk.bf16.gmra.mxu2 %vm795_vm0, %v1287_v25  ;;  %1078 = vmatmul.bf16.gmra.mxu1 %v1283_v26  ;;  %v1371_v25 = vor.u32 %v1714_v17, %v1370_v15  ;;  %v1367_v26 = vor.u32 %v1710_v18, %v1364_v1 }
  0x9e   :  { %v2279_v34 = vpop.f32.mrf.mxu0 }
  0xa0   :  { %v888_v36 = vpop.f32.mrf.mxu1 }
  0xa1   :  { %985 = vmatmul.bf16.gmra.mxu3 %v1303_v33  ;;  %1034 = vmatmul.bf16.gmra.mxu0 %v1307_v16 }
  0xa3   :  { %1674 = vmatmul.msk.bf16.gmra.mxu2 %vm795_vm0, %v1315_v19  ;;  %1083 = vmatmul.bf16.gmra.mxu1 %v1311_v35  ;;  %v1716_v19 = vld [vmem:[%s2552_s0 + $0x124] sm:$0xf]  ;;  %v1384_v35 = vld [vmem:[%s2552_s0 + $0x13c] sm:$0xf0] }
  0xa4   :  { %v839_v38 = vpop.f32.mrf.mxu3  ;;  %v1387_v47 = vor.u32 %v1716_v19, %v1384_v35  ;;  %v1730_v19 = vld [vmem:[%s2552_s0 + $0x194] sm:$0xf]  ;;  %v1440_v35 = vld [vmem:[%s2552_s0 + $0x1ac] sm:$0xf0] }
  0xa5   :  { %v840_v39 = vadd.f32 %v2284_v37, %v839_v38  ;;  %v1720_v38 = vld [vmem:[%s2552_s0 + $0x140] sm:$0xf0] }
  0xa6   :  { %v937_v40 = vpop.f32.mrf.mxu2  ;;  %v2288_v41 = vpop.f32.mrf.mxu0 }
  0xa7   :  { %v889_v42 = vadd.f32 %v888_v36, %v840_v39  ;;  %v1390_v36 = vld [vmem:[%s2552_s0 + $0x128] sm:$0xf]  ;;  %v1398_v39 = vld [vmem:[%s2552_s0 + $0x130] sm:$0xf] }
  0xa8   :  { %v890_v22 = vpop.f32.mrf.mxu1  ;;  %v1391_v48 = vor.u32 %v1720_v38, %v1390_v36  ;;  %v1446_v36 = vld [vmem:[%s2552_s0 + $0x198] sm:$0xf]  ;;  %v1734_v38 = vld [vmem:[%s2552_s0 + $0x1b0] sm:$0xf0] }
  0xa9   :  { %v2290_v43 = vadd.f32 %v937_v40, %v889_v42  ;;  %v1721_v40 = vld [vmem:[%s2552_s0 + $0x148] sm:$0xf0] }
  0xaa   :  { %v1717_v42 = vld [vmem:[%s2552_s0 + $0x12c] sm:$0xf]  ;;  %v1399_v50 = vor.u32 %v1721_v40, %v1398_v39  ;;  %v1454_v39 = vld [vmem:[%s2552_s0 + $0x1a0] sm:$0xf]  ;;  %v1735_v40 = vld [vmem:[%s2552_s0 + $0x1b8] sm:$0xf0] }
  0xac   :  { %v841_v52 = vpop.f32.mrf.mxu3 }
  0xad   :  { %v842_v53 = vadd.f32 %v2284_v37, %v841_v52 }
  0xae   :  { %v939_v54 = vpop.f32.mrf.mxu2  ;;  %v2317_v57 = vpop.f32.mrf.mxu0 }
  0xaf   :  { %v891_v60 = vadd.f32 %v890_v22, %v842_v53  ;;  %v1392_v22 = vld [vmem:[%s2552_s0 + $0x144] sm:$0xf0] }
  0xb0   :  { %v893_v61 = vpop.f32.mrf.mxu1  ;;  %v1395_v51 = vor.u32 %v1717_v42, %v1392_v22  ;;  %v1731_v42 = vld [vmem:[%s2552_s0 + $0x19c] sm:$0xf]  ;;  %v1448_v22 = vld [vmem:[%s2552_s0 + $0x1b4] sm:$0xf0] }
  0xb1   :  { %v2319_v62 = vadd.f32 %v939_v54, %v891_v60  ;;  %990 = vmatmul.bf16.gmra.mxu3 %v1331_v55  ;;  %1039 = vmatmul.bf16.gmra.mxu0 %v1335_v56 }
  0xb3   :  { %1675 = vmatmul.msk.bf16.gmra.mxu2 %vm795_vm0, %v1343_v58  ;;  %1088 = vmatmul.bf16.gmra.mxu1 %v1339_v59 }
  0xb4   :  { %v844_v63 = vpop.f32.mrf.mxu3 }
  0xb5   :  { %v845_v0 = vadd.f32 %v2284_v37, %v844_v63 }
  0xb6   :  { %v942_v2 = vpop.f32.mrf.mxu2  ;;  %v2323_v3 = vpop.f32.mrf.mxu0 }
  0xb7   :  { %v894_v5 = vadd.f32 %v893_v61, %v845_v0  ;;  %v1723_v0 = vld [vmem:[%s2552_s0 + $0x15c] sm:$0xf] }
  0xb8   :  { %v895_v6 = vpop.f32.mrf.mxu1 }
  0xb9   :  { %v2325_v8 = vadd.f32 %v942_v2, %v894_v5  ;;  %v1412_v2 = vld [vmem:[%s2552_s0 + $0x174] sm:$0xf0]  ;;  %v1418_v5 = vld [vmem:[%s2552_s0 + $0x160] sm:$0xf] }
  0xba   :  { %v1415_v1 = vor.u32 %v1723_v0, %v1412_v2 }
  0xbc   :  { %v846_v20 = vpop.f32.mrf.mxu3 }
  0xbd   :  { %v847_v21 = vadd.f32 %v2284_v37, %v846_v20 }
  0xbe   :  { %v944_v4 = vpop.f32.mrf.mxu2  ;;  %v2352_v24 = vpop.f32.mrf.mxu0 }
  0xbf   :  { %v896_v27 = vadd.f32 %v895_v6, %v847_v21  ;;  %v1727_v6 = vld [vmem:[%s2552_s0 + $0x178] sm:$0xf0] }
  0xc0   :  { %v898_v28 = vpop.f32.mrf.mxu1  ;;  %v1419_v20 = vor.u32 %v1727_v6, %v1418_v5 }
  0xc1   :  { %v2354_v29 = vadd.f32 %v944_v4, %v896_v27  ;;  %995 = vmatmul.bf16.gmra.mxu3 %v1359_v23  ;;  %1044 = vmatmul.bf16.gmra.mxu0 %v1363_v7  ;;  %v1427_v4 = vor.u32 %v1728_v11, %v1426_v9  ;;  %v1423_v23 = vor.u32 %v1724_v12, %v1420_v14 }
  0xc3   :  { %1676 = vmatmul.msk.bf16.gmra.mxu2 %vm795_vm0, %v1371_v25  ;;  %1093 = vmatmul.bf16.gmra.mxu1 %v1367_v26 }
  0xc4   :  { %v849_v30 = vpop.f32.mrf.mxu3 }
  0xc5   :  { %v850_v10 = vadd.f32 %v2284_v37, %v849_v30 }
  0xc6   :  { %v947_v31 = vpop.f32.mrf.mxu2  ;;  %v2358_v32 = vpop.f32.mrf.mxu0 }
  0xc7   :  { %v899_v13 = vadd.f32 %v898_v28, %v850_v10 }
  0xc8   :  { %v900_v33 = vpop.f32.mrf.mxu1 }
  0xc9   :  { %v2360_v16 = vadd.f32 %v947_v31, %v899_v13 }
  0xcc   :  { %v851_v44 = vpop.f32.mrf.mxu3 }
  0xcd   :  { %v852_v45 = vadd.f32 %v2284_v37, %v851_v44 }
  0xce   :  { %v949_v46 = vpop.f32.mrf.mxu2  ;;  %v2387_v49 = vpop.f32.mrf.mxu0 }
  0xcf   :  { %v901_v52 = vadd.f32 %v900_v33, %v852_v45 }
  0xd0   :  { %v903_v53 = vpop.f32.mrf.mxu1 }
  0xd1   :  { %v2389_v54 = vadd.f32 %v949_v46, %v901_v52  ;;  %1000 = vmatmul.bf16.gmra.mxu3 %v1387_v47  ;;  %1049 = vmatmul.bf16.gmra.mxu0 %v1391_v48  ;;  %v1443_v47 = vor.u32 %v1730_v19, %v1440_v35  ;;  %v1447_v48 = vor.u32 %v1734_v38, %v1446_v36 }
  0xd2   :  { %v1451_v52 = vor.u32 %v1731_v42, %v1448_v22 }
  0xd3   :  { %1677 = vmatmul.msk.bf16.gmra.mxu2 %vm795_vm0, %v1399_v50  ;;  %1098 = vmatmul.bf16.gmra.mxu1 %v1395_v51  ;;  %v1455_v51 = vor.u32 %v1735_v40, %v1454_v39  ;;  %v835_v40 = vadd.f32 %v2284_v37, %v2317_v57  ;;  %v837_v57 = vadd.f32 %v2284_v37, %v2323_v3 }
  0xd4   :  { %v854_v55 = vpop.f32.mrf.mxu3 }
  0xd5   :  { %v855_v56 = vadd.f32 %v2284_v37, %v854_v55 }
  0xd6   :  { %v952_v58 = vpop.f32.mrf.mxu2  ;;  %v2393_v59 = vpop.f32.mrf.mxu0 }
  0xd7   :  { %v904_v60 = vadd.f32 %v903_v53, %v855_v56 }
  0xd8   :  { %v905_v61 = vpop.f32.mrf.mxu1 }
  0xd9   :  { %v2395_v63 = vadd.f32 %v952_v58, %v904_v60 }
  0xdc   :  { %v856_v15 = vpop.f32.mrf.mxu3 }
  0xdd   :  { %v857_v17 = vadd.f32 %v2284_v37, %v856_v15  ;;  %v830_v15 = vadd.f32 %v2284_v37, %v2279_v34 }
  0xde   :  { %v954_v18 = vpop.f32.mrf.mxu2  ;;  %v927_v21 = vpop.f32.mrf.mxu0 }
  0xdf   :  { %v906_v7 = vadd.f32 %v905_v61, %v857_v17 }
  0xe0   :  { %v908_v25 = vpop.f32.mrf.mxu1 }
  0xe1   :  { %v2422_v26 = vadd.f32 %v954_v18, %v906_v7  ;;  %1005 = vmatmul.bf16.gmra.mxu3 %v1415_v1  ;;  %1054 = vmatmul.bf16.gmra.mxu0 %v1419_v20  ;;  %v879_v1 = vadd.f32 %v2352_v24, %v830_v15 }
  0xe3   :  { %1678 = vmatmul.msk.bf16.gmra.mxu2 %vm795_vm0, %v1427_v4  ;;  %1103 = vmatmul.bf16.gmra.mxu1 %v1423_v23  ;;  %v928_v4 = vadd.f32 %v927_v21, %v879_v1 }
  0xe4   :  { %v859_v27 = vpop.f32.mrf.mxu3 }
  0xe5   :  { %v860_v28 = vadd.f32 %v2284_v37, %v859_v27 }
  0xe6   :  { %v957_v30 = vpop.f32.mrf.mxu2  ;;  %v929_v10 = vpop.f32.mrf.mxu0 }
  0xe7   :  { %v909_v31 = vadd.f32 %v908_v25, %v860_v28  ;;  %v832_v28 = vadd.f32 %v2284_v37, %v2288_v41 }
  0xe8   :  { %v910_v13 = vpop.f32.mrf.mxu1 }
  0xe9   :  { %v2426_v33 = vadd.f32 %v957_v30, %v909_v31 }
  0xec   :  { %v861_v44 = vpop.f32.mrf.mxu3 }
  0xed   :  { %v862_v45 = vadd.f32 %v2284_v37, %v861_v44 }
  0xee   :  { %v959_v46 = vpop.f32.mrf.mxu2  ;;  %v932_v50 = vpop.f32.mrf.mxu0 }
  0xef   :  { %v911_v53 = vadd.f32 %v910_v13, %v862_v45  ;;  %v881_v13 = vadd.f32 %v2358_v32, %v832_v28  ;;  %v884_v32 = vadd.f32 %v2387_v49, %v835_v40  ;;  %v886_v49 = vadd.f32 %v2393_v59, %v837_v57 }
  0xf0   :  { %v913_v55 = vpop.f32.mrf.mxu1 }
  0xf1   :  { %v2453_v56 = vadd.f32 %v959_v46, %v911_v53  ;;  %1010 = vmatmul.bf16.gmra.mxu3 %v1443_v47  ;;  %1059 = vmatmul.bf16.gmra.mxu0 %v1447_v48  ;;  %v930_v34 = vadd.f32 %v929_v10, %v881_v13  ;;  %v933_v44 = vadd.f32 %v932_v50, %v884_v32 }
  0xf3   :  { %1679 = vmatmul.msk.bf16.gmra.mxu2 %vm795_vm0, %v1455_v51  ;;  %1108 = vmatmul.bf16.gmra.mxu1 %v1451_v52 }
  0xf4   :  { %v864_v58 = vpop.f32.mrf.mxu3 }
  0xf5   :  { %v865_v60 = vadd.f32 %v2284_v37, %v864_v58 }
  0xf6   :  { %v962_v61 = vpop.f32.mrf.mxu2  ;;  %v934_v0 = vpop.f32.mrf.mxu0 }
  0xf7   :  { %v914_v2 = vadd.f32 %v913_v55, %v865_v60  ;;  %v935_v60 = vadd.f32 %v934_v0, %v886_v49 }
  0xf8   :  { %v915_v5 = vpop.f32.mrf.mxu1 }
  0xf9   :  { %v2457_v6 = vadd.f32 %v962_v61, %v914_v2 }
  0xfc   :  { %v866_v9 = vpop.f32.mrf.mxu3 }
  0xfd   :  { %v867_v11 = vadd.f32 %v2284_v37, %v866_v9 }
  0xfe   :  { %v964_v12 = vpop.f32.mrf.mxu2  ;;  %v1025_v14 = vpop.f32.mrf.mxu0 }
  0xff   :  { %v916_v17 = vadd.f32 %v915_v5, %v867_v11 }
 0x100   :  { %v1074_v18 = vpop.f32.mrf.mxu1 }
 0x101   :  { %v2463_v20 = vadd.f32 %v964_v12, %v916_v17 }
 0x104   :  { %v976_v23 = vpop.f32.mrf.mxu3 }
 0x105   :  { %v977_v7 = vadd.f32 %v976_v23, %v928_v4 }
 0x106   :  { %v1123_v25 = vpop.f32.mrf.mxu2  ;;  %v1027_v27 = vpop.f32.mrf.mxu0 }
 0x107   :  { %v1026_v30 = vadd.f32 %v1025_v14, %v977_v7 }
 0x108   :  { %v1076_v31 = vpop.f32.mrf.mxu1 }
 0x109   :  { %v1075_v19 = vadd.f32 %v1074_v18, %v1026_v30 }
 0x10b   :  { %v1124_v35 = vadd.f32 %v1123_v25, %v1075_v19 }
 0x10c   :  { %v978_v36 = vpop.f32.mrf.mxu3 }
 0x10d   :  { %vm1163_vm1 = vcmp.ge.f32.partialorder %v1124_v35, 0.0  ;;  %v1179_v24 = vmul.f32 0.1, %v1124_v35  ;;  %v979_v38 = vadd.f32 %v978_v36, %v930_v34 }
 0x10e   :  { %v1125_v21 = vpop.f32.mrf.mxu2  ;;  %v1030_v39 = vpop.f32.mrf.mxu0 }
 0x10f   :  { %v1195_v42 = vsel %vm1163_vm1, %v1124_v35, %v1179_v24  ;;  %v1028_v22 = vadd.f32 %v1027_v27, %v979_v38 }
 0x110   :  { %v1079_v41 = vpop.f32.mrf.mxu1  ;;  %1212 = vst.msk [vmem:[%s2553_s3] sm:$0xff] %vm1211_vm2, %v1195_v42 }
 0x111   :  { %v1077_v10 = vadd.f32 %v1076_v31, %v1028_v22 }
 0x113   :  { %v1126_v45 = vadd.f32 %v1125_v21, %v1077_v10 }
 0x114   :  { %v981_v46 = vpop.f32.mrf.mxu3 }
 0x115   :  { %vm1164_vm3 = vcmp.ge.f32.partialorder %v1126_v45, 0.0  ;;  %v1180_v47 = vmul.f32 0.1, %v1126_v45  ;;  %v982_v48 = vadd.f32 %v981_v46, %v933_v44 }
 0x116   :  { %v1128_v51 = vpop.f32.mrf.mxu2  ;;  %v1032_v52 = vpop.f32.mrf.mxu0 }
 0x117   :  { %v1196_v53 = vsel %vm1164_vm3, %v1126_v45, %v1180_v47  ;;  %v1031_v55 = vadd.f32 %v1030_v39, %v982_v48 }
 0x118   :  { %v1081_v58 = vpop.f32.mrf.mxu1  ;;  %1213 = vst.msk [vmem:[%s2553_s3 + $0x8] sm:$0xff] %vm1211_vm2, %v1196_v53 }
 0x119   :  { %v1080_v50 = vadd.f32 %v1079_v41, %v1031_v55 }
 0x11b   :  { %v1129_v61 = vadd.f32 %v1128_v51, %v1080_v50 }
 0x11c   :  { %v983_v2 = vpop.f32.mrf.mxu3 }
 0x11d   :  { %vm1165_vm4 = vcmp.ge.f32.partialorder %v1129_v61, 0.0  ;;  %v1181_v5 = vmul.f32 0.1, %v1129_v61  ;;  %v984_v9 = vadd.f32 %v983_v2, %v935_v60 }
 0x11e   :  { %v1130_v11 = vpop.f32.mrf.mxu2  ;;  %v1035_v12 = vpop.f32.mrf.mxu0 }
 0x11f   :  { %v1197_v37 = vsel %vm1165_vm4, %v1129_v61, %v1181_v5  ;;  %v1033_v3 = vadd.f32 %v1032_v52, %v984_v9 }
 0x120   :  { %v1084_v14 = vpop.f32.mrf.mxu1  ;;  %1214 = vst.msk [vmem:[%s2553_s3 + $0x10] sm:$0xff] %vm1211_vm2, %v1197_v37 }
 0x121   :  { %v1082_v15 = vadd.f32 %v1081_v58, %v1033_v3 }
 0x123   :  { %v1131_v17 = vadd.f32 %v1130_v11, %v1082_v15 }
 0x124   :  { %v986_v59 = vpop.f32.mrf.mxu3 }
 0x125   :  { %vm1166_vm5 = vcmp.ge.f32.partialorder %v1131_v17, 0.0  ;;  %v1182_v0 = vmul.f32 0.1, %v1131_v17  ;;  %v987_v18 = vadd.f32 %v986_v59, %v2290_v43 }
 0x126   :  { %v1133_v1 = vpop.f32.mrf.mxu2  ;;  %v1037_v4 = vpop.f32.mrf.mxu0 }
 0x127   :  { %v1198_v23 = vsel %vm1166_vm5, %v1131_v17, %v1182_v0  ;;  %v1036_v7 = vadd.f32 %v1035_v12, %v987_v18 }
 0x128   :  { %v1086_v25 = vpop.f32.mrf.mxu1  ;;  %1215 = vst.msk [vmem:[%s2553_s3 + $0x18] sm:$0xff] %vm1211_vm2, %v1198_v23 }
 0x129   :  { %v1085_v27 = vadd.f32 %v1084_v14, %v1036_v7 }
 0x12b   :  { %v1134_v28 = vadd.f32 %v1133_v1, %v1085_v27 }
 0x12c   :  { %v988_v30 = vpop.f32.mrf.mxu3 }
 0x12d   :  { %vm1167_vm6 = vcmp.ge.f32.partialorder %v1134_v28, 0.0  ;;  %v1183_v31 = vmul.f32 0.1, %v1134_v28  ;;  %v989_v13 = vadd.f32 %v988_v30, %v2319_v62 }
 0x12e   :  { %v1135_v19 = vpop.f32.mrf.mxu2  ;;  %v1040_v34 = vpop.f32.mrf.mxu0 }
 0x12f   :  { %v1199_v43 = vsel %vm1167_vm6, %v1134_v28, %v1183_v31  ;;  %v1038_v35 = vadd.f32 %v1037_v4, %v989_v13 }
 0x130   :  { %v1089_v36 = vpop.f32.mrf.mxu1  ;;  %1216 = vst.msk [vmem:[%s2553_s3 + $0x20] sm:$0xff] %vm1211_vm2, %v1199_v43 }
 0x131   :  { %v1087_v24 = vadd.f32 %v1086_v25, %v1038_v35 }
 0x133   :  { %v1136_v38 = vadd.f32 %v1135_v19, %v1087_v24 }
 0x134   :  { %v991_v21 = vpop.f32.mrf.mxu3 }
 0x135   :  { %vm1168_vm7 = vcmp.ge.f32.partialorder %v1136_v38, 0.0  ;;  %v1184_v39 = vmul.f32 0.1, %v1136_v38  ;;  %v992_v40 = vadd.f32 %v991_v21, %v2325_v8 }
 0x136   :  { %v1138_v42 = vpop.f32.mrf.mxu2  ;;  %v1042_v22 = vpop.f32.mrf.mxu0 }
 0x137   :  { %v1200_v62 = vsel %vm1168_vm7, %v1136_v38, %v1184_v39  ;;  %v1041_v41 = vadd.f32 %v1040_v34, %v992_v40 }
 0x138   :  { %v1091_v32 = vpop.f32.mrf.mxu1  ;;  %1217 = vst.msk [vmem:[%s2553_s3 + $0x28] sm:$0xff] %vm1211_vm2, %v1200_v62 }
 0x139   :  { %v1090_v10 = vadd.f32 %v1089_v36, %v1041_v41 }
 0x13b   :  { %v1139_v44 = vadd.f32 %v1138_v42, %v1090_v10 }
 0x13c   :  { %v993_v45 = vpop.f32.mrf.mxu3 }
 0x13d   :  { %vm1169_vm8 = vcmp.ge.f32.partialorder %v1139_v44, 0.0  ;;  %v1185_v46 = vmul.f32 0.1, %v1139_v44  ;;  %v994_v47 = vadd.f32 %v993_v45, %v2354_v29 }
 0x13e   :  { %v1140_v48 = vpop.f32.mrf.mxu2  ;;  %v1045_v51 = vpop.f32.mrf.mxu0 }
 0x13f   :  { %v1201_v8 = vsel %vm1169_vm8, %v1139_v44, %v1185_v46  ;;  %v1043_v52 = vadd.f32 %v1042_v22, %v994_v47 }
 0x140   :  { %v1094_v57 = vpop.f32.mrf.mxu1  ;;  %1218 = vst.msk [vmem:[%s2553_s3 + $0x30] sm:$0xff] %vm1211_vm2, %v1201_v8 }
 0x141   :  { %v1092_v53 = vadd.f32 %v1091_v32, %v1043_v52 }
 0x143   :  { %v1141_v55 = vadd.f32 %v1140_v48, %v1092_v53 }
 0x144   :  { %v996_v58 = vpop.f32.mrf.mxu3 }
 0x145   :  { %vm1170_vm9 = vcmp.ge.f32.partialorder %v1141_v55, 0.0  ;;  %v1186_v49 = vmul.f32 0.1, %v1141_v55  ;;  %v997_v50 = vadd.f32 %v996_v58, %v2360_v16 }
 0x146   :  { %v1143_v60 = vpop.f32.mrf.mxu2  ;;  %v1047_v61 = vpop.f32.mrf.mxu0 }
 0x147   :  { %v1202_v29 = vsel %vm1170_vm9, %v1141_v55, %v1186_v49  ;;  %v1046_v2 = vadd.f32 %v1045_v51, %v997_v50 }
 0x148   :  { %v1096_v5 = vpop.f32.mrf.mxu1  ;;  %1219 = vst.msk [vmem:[%s2553_s3 + $0x38] sm:$0xff] %vm1211_vm2, %v1202_v29 }
 0x149   :  { %v1095_v9 = vadd.f32 %v1094_v57, %v1046_v2 }
 0x14b   :  { %v1144_v11 = vadd.f32 %v1143_v60, %v1095_v9 }
 0x14c   :  { %v998_v12 = vpop.f32.mrf.mxu3 }
 0x14d   :  { %vm1171_vm10 = vcmp.ge.f32.partialorder %v1144_v11, 0.0  ;;  %v1187_v37 = vmul.f32 0.1, %v1144_v11  ;;  %v999_v3 = vadd.f32 %v998_v12, %v2389_v54 }
 0x14e   :  { %v1145_v14 = vpop.f32.mrf.mxu2  ;;  %v1050_v15 = vpop.f32.mrf.mxu0 }
 0x14f   :  { %v1203_v16 = vsel %vm1171_vm10, %v1144_v11, %v1187_v37  ;;  %v1048_v17 = vadd.f32 %v1047_v61, %v999_v3 }
 0x150   :  { %v1099_v59 = vpop.f32.mrf.mxu1  ;;  %1220 = vst.msk [vmem:[%s2553_s3 + $0x40] sm:$0xff] %vm1211_vm2, %v1203_v16 }
 0x151   :  { %v1097_v0 = vadd.f32 %v1096_v5, %v1048_v17 }
 0x153   :  { %v1146_v18 = vadd.f32 %v1145_v14, %v1097_v0 }
 0x154   :  { %v1001_v1 = vpop.f32.mrf.mxu3 }
 0x155   :  { %vm1172_vm11 = vcmp.ge.f32.partialorder %v1146_v18, 0.0  ;;  %v1188_v4 = vmul.f32 0.1, %v1146_v18  ;;  %v1002_v23 = vadd.f32 %v1001_v1, %v2395_v63 }
 0x156   :  { %v1148_v7 = vpop.f32.mrf.mxu2  ;;  %v1052_v25 = vpop.f32.mrf.mxu0 }
 0x157   :  { %v1204_v54 = vsel %vm1172_vm11, %v1146_v18, %v1188_v4  ;;  %v1051_v27 = vadd.f32 %v1050_v15, %v1002_v23 }
 0x158   :  { %1221 = vst.msk [vmem:[%s2553_s3 + $0x48] sm:$0xff] %vm1211_vm2, %v1204_v54  ;;  %v1101_v28 = vpop.f32.mrf.mxu1 }
 0x159   :  { %v1100_v30 = vadd.f32 %v1099_v59, %v1051_v27 }
 0x15b   :  { %v1149_v31 = vadd.f32 %v1148_v7, %v1100_v30 }
 0x15c   :  { %v1003_v13 = vpop.f32.mrf.mxu3 }
 0x15d   :  { %vm1173_vm12 = vcmp.ge.f32.partialorder %v1149_v31, 0.0  ;;  %v1189_v19 = vmul.f32 0.1, %v1149_v31  ;;  %v1004_v34 = vadd.f32 %v1003_v13, %v2422_v26 }
 0x15e   :  { %v1150_v43 = vpop.f32.mrf.mxu2  ;;  %v1055_v36 = vpop.f32.mrf.mxu0 }
 0x15f   :  { %v1205_v35 = vsel %vm1173_vm12, %v1149_v31, %v1189_v19  ;;  %v1053_v63 = vadd.f32 %v1052_v25, %v1004_v34 }
 0x160   :  { %1222 = vst.msk [vmem:[%s2553_s3 + $0x50] sm:$0xff] %vm1211_vm2, %v1205_v35  ;;  %v1104_v38 = vpop.f32.mrf.mxu1 }
 0x161   :  { %v1102_v24 = vadd.f32 %v1101_v28, %v1053_v63 }
 0x163   :  { %v1151_v21 = vadd.f32 %v1150_v43, %v1102_v24 }
 0x164   :  { %v1006_v39 = vpop.f32.mrf.mxu3 }
 0x165   :  { %vm1174_vm13 = vcmp.ge.f32.partialorder %v1151_v21, 0.0  ;;  %v1190_v40 = vmul.f32 0.1, %v1151_v21  ;;  %v1007_v42 = vadd.f32 %v1006_v39, %v2426_v33 }
 0x166   :  { %v1153_v22 = vpop.f32.mrf.mxu2  ;;  %v1057_v32 = vpop.f32.mrf.mxu0 }
 0x167   :  { %v1206_v62 = vsel %vm1174_vm13, %v1151_v21, %v1190_v40  ;;  %v1056_v26 = vadd.f32 %v1055_v36, %v1007_v42 }
 0x168   :  { %1223 = vst.msk [vmem:[%s2553_s3 + $0x58] sm:$0xff] %vm1211_vm2, %v1206_v62  ;;  %v1106_v44 = vpop.f32.mrf.mxu1 }
 0x169   :  { %v1105_v41 = vadd.f32 %v1104_v38, %v1056_v26 }
 0x16b   :  { %v1154_v10 = vadd.f32 %v1153_v22, %v1105_v41 }
 0x16c   :  { %v1008_v45 = vpop.f32.mrf.mxu3 }
 0x16d   :  { %vm1175_vm14 = vcmp.ge.f32.partialorder %v1154_v10, 0.0  ;;  %v1191_v46 = vmul.f32 0.1, %v1154_v10  ;;  %v1009_v47 = vadd.f32 %v1008_v45, %v2453_v56 }
 0x16e   :  { %v1155_v48 = vpop.f32.mrf.mxu2  ;;  %v1060_v57 = vpop.f32.mrf.mxu0 }
 0x16f   :  { %v1207_v51 = vsel %vm1175_vm14, %v1154_v10, %v1191_v46  ;;  %v1058_v33 = vadd.f32 %v1057_v32, %v1009_v47 }
 0x170   :  { %1224 = vst.msk [vmem:[%s2553_s3 + $0x60] sm:$0xff] %vm1211_vm2, %v1207_v51  ;;  %v1109_v49 = vpop.f32.mrf.mxu1 }
 0x171   :  { %v1107_v8 = vadd.f32 %v1106_v44, %v1058_v33 }
 0x173   :  { %v1156_v52 = vadd.f32 %v1155_v48, %v1107_v8 }
 0x174   :  { %v1011_v53 = vpop.f32.mrf.mxu3 }
 0x175   :  { %vm1176_vm15 = vcmp.ge.f32.partialorder %v1156_v52, 0.0  ;;  %v1192_v55 = vmul.f32 0.1, %v1156_v52  ;;  %v1012_v58 = vadd.f32 %v1011_v53, %v2457_v6 }
 0x176   :  { %v1158_v56 = vpop.f32.mrf.mxu2  ;;  %v1062_v11 = vpop.f32.mrf.mxu0 }
 0x177   :  { %v1208_v50 = vsel %vm1176_vm15, %v1156_v52, %v1192_v55  ;;  %v1061_v60 = vadd.f32 %v1060_v57, %v1012_v58 }
 0x178   :  { %1225 = vst.msk [vmem:[%s2553_s3 + $0x68] sm:$0xff] %vm1211_vm2, %v1208_v50  ;;  %v1111_v6 = vpop.f32.mrf.mxu1 }
 0x179   :  { %v1110_v61 = vadd.f32 %v1109_v49, %v1061_v60 }
 0x17b   :  { %v1159_v29 = vadd.f32 %v1158_v56, %v1110_v61 }
 0x17c   :  { %v1013_v2 = vpop.f32.mrf.mxu3 }
 0x17d   :  { %vm1177_vm0 = vcmp.ge.f32.partialorder %v1159_v29, 0.0  ;;  %v1193_v5 = vmul.f32 0.1, %v1159_v29  ;;  %v1014_v9 = vadd.f32 %v1013_v2, %v2463_v20 }
 0x17e   :  { %v1160_v14 = vpop.f32.mrf.mxu2 }
 0x17f   :  { %v1209_v12 = vsel %vm1177_vm0, %v1159_v29, %v1193_v5  ;;  %v1063_v37 = vadd.f32 %v1062_v11, %v1014_v9 }
 0x180   :  { %1226 = vst.msk [vmem:[%s2553_s3 + $0x70] sm:$0xff] %vm1211_vm2, %v1209_v12 }
 0x181   :  { %v1112_v3 = vadd.f32 %v1111_v6, %v1063_v37 }
 0x183   :  { %v1161_v15 = vadd.f32 %v1160_v14, %v1112_v3 }
 0x185   :  { %vm1178_vm1 = vcmp.ge.f32.partialorder %v1161_v15, 0.0  ;;  %v1194_v16 = vmul.f32 0.1, %v1161_v15 }
 0x187   :  { %v1210_v17 = vsel %vm1178_vm1, %v1161_v15, %v1194_v16 }
 0x188   :  { %1227 = vst.msk [vmem:[%s2553_s3 + $0x78] sm:$0xff] %vm1211_vm2, %v1210_v17 }

// kernel: _lambda_.15
= control target key start
LH: loop header
LB: loop body
LE: loop exit
PB: predicated region body
PF: predicated region fallthrough
CT: control target
= control target key end

     0   :  { %vm494_vm0 = vcmask 785408   ;;  %vm602_vm2 = vcmask 523264   ;;  %s1149_s1 = inlined_call_operand.vmem [shape: bf16[864,64], index: 1, kind: input, shape index: {}]   ;;  %s1150_s2 = inlined_call_operand.vmem [shape: f32[1,64], index: 2, kind: input, shape index: {}]   ;;  %s1151_s0 = inlined_call_operand.vmem [shape: bf16[16,864], index: 0, kind: input, shape index: {}]   ;;  %s1152_s3 = inlined_call_operand.vmem [shape: f32[16,64], index: 3, kind: output, shape index: {}]  }
   0x1   :  { %v868_v0 = vld [vmem:[%s1149_s1 + $0x38] sm:$0xff]  ;;  %v867_v3 = vld [vmem:[%s1149_s1 + $0x30] sm:$0xff]  ;;  %v866_v8 = vld [vmem:[%s1149_s1 + $0x28] sm:$0xff] }
   0x2   :  { %v876_v1 = vld [vmem:[%s1149_s1 + $0x78] sm:$0xff]  ;;  %498 = vmatpush.bf16.msra.mxu0 %v868_v0  ;;  %v875_v4 = vld [vmem:[%s1149_s1 + $0x70] sm:$0xff]  ;;  %v874_v9 = vld [vmem:[%s1149_s1 + $0x68] sm:$0xff] }
   0x3   :  { %v884_v2 = vld [vmem:[%s1149_s1 + $0xb8] sm:$0xff]  ;;  %512 = vmatpush.bf16.msra.mxu1 %v876_v1  ;;  %v883_v6 = vld [vmem:[%s1149_s1 + $0xb0] sm:$0xff]  ;;  %v882_v10 = vld [vmem:[%s1149_s1 + $0xa8] sm:$0xff] }
   0x4   :  { %v892_v5 = vld [vmem:[%s1149_s1 + $0xf8] sm:$0xff]  ;;  %526 = vmatpush.bf16.msra.mxu2 %v884_v2  ;;  %v891_v7 = vld [vmem:[%s1149_s1 + $0xf0] sm:$0xff]  ;;  %v890_v11 = vld [vmem:[%s1149_s1 + $0xe8] sm:$0xff] }
   0x5   :  { %540 = vmatpush.bf16.msra.mxu3 %v892_v5  ;;  %v865_v12 = vld [vmem:[%s1149_s1 + $0x20] sm:$0xff]  ;;  %v864_v16 = vld [vmem:[%s1149_s1 + $0x18] sm:$0xff]  ;;  %v863_v20 = vld [vmem:[%s1149_s1 + $0x10] sm:$0xff] }
   0x6   :  { %499 = vmatpush.bf16.msra.mxu0 %v867_v3  ;;  %v873_v13 = vld [vmem:[%s1149_s1 + $0x60] sm:$0xff]  ;;  %v872_v17 = vld [vmem:[%s1149_s1 + $0x58] sm:$0xff]  ;;  %v871_v21 = vld [vmem:[%s1149_s1 + $0x50] sm:$0xff] }
   0x7   :  { %513 = vmatpush.bf16.msra.mxu1 %v875_v4  ;;  %v881_v14 = vld [vmem:[%s1149_s1 + $0xa0] sm:$0xff]  ;;  %v880_v18 = vld [vmem:[%s1149_s1 + $0x98] sm:$0xff]  ;;  %v879_v22 = vld [vmem:[%s1149_s1 + $0x90] sm:$0xff] }
   0x8   :  { %527 = vmatpush.bf16.msra.mxu2 %v883_v6  ;;  %v889_v15 = vld [vmem:[%s1149_s1 + $0xe0] sm:$0xff]  ;;  %v888_v19 = vld [vmem:[%s1149_s1 + $0xd8] sm:$0xff]  ;;  %v887_v23 = vld [vmem:[%s1149_s1 + $0xd0] sm:$0xff] }
   0x9   :  { %541 = vmatpush.bf16.msra.mxu3 %v891_v7  ;;  %v862_v24 = vld [vmem:[%s1149_s1 + $0x8] sm:$0xff]  ;;  %v861_v27 = vld [vmem:[%s1149_s1] sm:$0xff]  ;;  %v900_v31 = vld [vmem:[%s1149_s1 + $0x138] sm:$0xff] }
   0xa   :  { %500 = vmatpush.bf16.msra.mxu0 %v866_v8  ;;  %v870_v25 = vld [vmem:[%s1149_s1 + $0x48] sm:$0xff]  ;;  %v869_v29 = vld [vmem:[%s1149_s1 + $0x40] sm:$0xff]  ;;  %v857_v34 = vld [vmem:[%s1151_s0 + $0x18] sm:$0xf0] }
   0xb   :  { %514 = vmatpush.bf16.msra.mxu1 %v874_v9  ;;  %v878_v26 = vld [vmem:[%s1149_s1 + $0x88] sm:$0xff]  ;;  %v877_v30 = vld [vmem:[%s1149_s1 + $0x80] sm:$0xff]  ;;  %v908_v38 = vld [vmem:[%s1149_s1 + $0x178] sm:$0xff] }
   0xc   :  { %528 = vmatpush.bf16.msra.mxu2 %v882_v10  ;;  %v886_v28 = vld [vmem:[%s1149_s1 + $0xc8] sm:$0xff]  ;;  %v611_v33 = vld [vmem:[%s1151_s0] sm:$0xf]  ;;  %v858_v35 = vld [vmem:[%s1151_s0 + $0x20] sm:$0xf0] }
   0xd   :  { %542 = vmatpush.bf16.msra.mxu3 %v890_v11  ;;  %v619_v32 = vld [vmem:[%s1151_s0 + $0x8] sm:$0xf]  ;;  %v854_v36 = vld [vmem:[%s1151_s0 + $0x4] sm:$0xf]  ;;  %v613_v37 = vld [vmem:[%s1151_s0 + $0x1c] sm:$0xf0]  ;;  %v612_v41 = vor.u32 %v857_v34, %v611_v33 }
   0xe   :  { %501 = vmatpush.bf16.msra.mxu0 %v865_v12  ;;  %v914_v39 = vld [vmem:[%s1149_s1 + $0x1a8] sm:$0xff]  ;;  %v885_v40 = vld [vmem:[%s1149_s1 + $0xc0] sm:$0xff]  ;;  %v620_v42 = vor.u32 %v858_v35, %v619_v32  ;;  %v616_v45 = vor.u32 %v854_v36, %v613_v37  ;;  %v899_v46 = vld [vmem:[%s1149_s1 + $0x130] sm:$0xff] }
   0xf   :  { %515 = vmatpush.bf16.msra.mxu1 %v873_v13  ;;  %v855_v43 = vld [vmem:[%s1151_s0 + $0xc] sm:$0xf]  ;;  %v621_v44 = vld [vmem:[%s1151_s0 + $0x24] sm:$0xf0]  ;;  %v907_v47 = vld [vmem:[%s1149_s1 + $0x170] sm:$0xff] }
  0x10   :  { %529 = vmatpush.bf16.msra.mxu2 %v881_v14  ;;  %v913_v48 = vld [vmem:[%s1149_s1 + $0x1a0] sm:$0xff]  ;;  %v624_v49 = vor.u32 %v855_v43, %v621_v44  ;;  %v898_v50 = vld [vmem:[%s1149_s1 + $0x128] sm:$0xff]  ;;  %v912_v52 = vld [vmem:[%s1149_s1 + $0x198] sm:$0xff] }
  0x11   :  { %543 = vmatpush.bf16.msra.mxu3 %v889_v15  ;;  %v906_v51 = vld [vmem:[%s1149_s1 + $0x168] sm:$0xff]  ;;  %v897_v53 = vld [vmem:[%s1149_s1 + $0x120] sm:$0xff]  ;;  %v911_v55 = vld [vmem:[%s1149_s1 + $0x190] sm:$0xff] }
  0x12   :  { %502 = vmatpush.bf16.msra.mxu0 %v864_v16  ;;  %v905_v54 = vld [vmem:[%s1149_s1 + $0x160] sm:$0xff]  ;;  %v896_v56 = vld [vmem:[%s1149_s1 + $0x118] sm:$0xff]  ;;  %v910_v58 = vld [vmem:[%s1149_s1 + $0x188] sm:$0xff] }
  0x13   :  { %516 = vmatpush.bf16.msra.mxu1 %v872_v17  ;;  %v904_v57 = vld [vmem:[%s1149_s1 + $0x158] sm:$0xff]  ;;  %v895_v59 = vld [vmem:[%s1149_s1 + $0x110] sm:$0xff]  ;;  %v909_v61 = vld [vmem:[%s1149_s1 + $0x180] sm:$0xff] }
  0x14   :  { %530 = vmatpush.bf16.msra.mxu2 %v880_v18  ;;  %v903_v60 = vld [vmem:[%s1149_s1 + $0x150] sm:$0xff]  ;;  %v635_v62 = vld [vmem:[%s1151_s0 + $0x18] sm:$0xf]  ;;  %v894_v1 = vld [vmem:[%s1149_s1 + $0x108] sm:$0xff] }
  0x15   :  { %544 = vmatpush.bf16.msra.mxu3 %v888_v19  ;;  %v860_v63 = vld [vmem:[%s1151_s0 + $0x30] sm:$0xf0]  ;;  %v902_v2 = vld [vmem:[%s1149_s1 + $0x148] sm:$0xff]  ;;  %v893_v3 = vld [vmem:[%s1149_s1 + $0x100] sm:$0xff] }
  0x16   :  { %503 = vmatpush.bf16.msra.mxu0 %v863_v20  ;;  %v636_v0 = vor.u32 %v860_v63, %v635_v62  ;;  %v627_v4 = vld [vmem:[%s1151_s0 + $0x10] sm:$0xf]  ;;  %v859_v5 = vld [vmem:[%s1151_s0 + $0x28] sm:$0xf0]  ;;  %v901_v6 = vld [vmem:[%s1149_s1 + $0x140] sm:$0xff] }
  0x17   :  { %517 = vmatpush.bf16.msra.mxu1 %v871_v21  ;;  %v856_v7 = vld [vmem:[%s1151_s0 + $0x14] sm:$0xf]  ;;  %v629_v8 = vld [vmem:[%s1151_s0 + $0x2c] sm:$0xf0]  ;;  %v628_v9 = vor.u32 %v859_v5, %v627_v4  ;;  %v915_v12 = vld [vmem:[%s1150_s2] ss:$0 sm:$0xff] }
  0x18   :  { %531 = vmatpush.bf16.msra.mxu2 %v879_v22  ;;  %v632_v10 = vor.u32 %v856_v7, %v629_v8 }
  0x19   :  { %545 = vmatpush.bf16.msra.mxu3 %v887_v23 }
  0x1a   :  { %504 = vmatpush.bf16.msra.mxu0 %v862_v24 }
  0x1b   :  { %518 = vmatpush.bf16.msra.mxu1 %v870_v25 }
  0x1c   :  { %532 = vmatpush.bf16.msra.mxu2 %v878_v26 }
  0x1d   :  { %546 = vmatpush.bf16.msra.mxu3 %v886_v28 }
  0x1e   :  { %505 = vmatpush.bf16.msra.mxu0 %v861_v27 }
  0x1f   :  { %519 = vmatpush.bf16.msra.mxu1 %v869_v29 }
  0x20   :  { %533 = vmatpush.bf16.msra.mxu2 %v877_v30 }
  0x21   :  { %547 = vmatpush.bf16.msra.mxu3 %v885_v40  ;;  %506 = vmatmul.bf16.vlgmr.msra.gmra.mxu0 %v612_v41 }
  0x22   :  { %554 = vmatpush.bf16.msrb.mxu0 %v900_v31  ;;  %520 = vmatmul.bf16.vlgmr.msra.gmra.mxu1 %v616_v45 }
  0x23   :  { %568 = vmatpush.bf16.msrb.mxu1 %v908_v38  ;;  %534 = vmatmul.bf16.vlgmr.msra.gmra.mxu2 %v620_v42 }
  0x24   :  { %584 = vmatpush.bf16.msrb.mxu2 %v914_v39  ;;  %548 = vmatmul.bf16.vlgmr.msra.gmra.mxu3 %v624_v49 }
  0x26   :  { %555 = vmatpush.bf16.msrb.mxu0 %v899_v46 }
  0x27   :  { %569 = vmatpush.bf16.msrb.mxu1 %v907_v47 }
  0x28   :  { %585 = vmatpush.bf16.msrb.mxu2 %v913_v48 }
  0x2a   :  { %556 = vmatpush.bf16.msrb.mxu0 %v898_v50 }
  0x2b   :  { %570 = vmatpush.bf16.msrb.mxu1 %v906_v51 }
  0x2c   :  { %586 = vmatpush.bf16.msrb.mxu2 %v912_v52 }
  0x2e   :  { %557 = vmatpush.bf16.msrb.mxu0 %v897_v53 }
  0x2f   :  { %571 = vmatpush.bf16.msrb.mxu1 %v905_v54 }
  0x30   :  { %587 = vmatpush.bf16.msrb.mxu2 %v911_v55 }
  0x32   :  { %558 = vmatpush.bf16.msrb.mxu0 %v896_v56 }
  0x33   :  { %572 = vmatpush.bf16.msrb.mxu1 %v904_v57 }
  0x34   :  { %588 = vmatpush.bf16.msrb.mxu2 %v910_v58 }
  0x36   :  { %559 = vmatpush.bf16.msrb.mxu0 %v895_v59 }
  0x37   :  { %573 = vmatpush.bf16.msrb.mxu1 %v903_v60 }
  0x38   :  { %589 = vmatpush.bf16.msrb.mxu2 %v909_v61 }
  0x3a   :  { %560 = vmatpush.bf16.msrb.mxu0 %v894_v1 }
  0x3b   :  { %853 = vmatmul.msk.bf16.vlgmr.msrb.gmra.mxu2 %vm494_vm0, %v636_v0  ;;  %574 = vmatpush.bf16.msrb.mxu1 %v902_v2 }
  0x3e   :  { %561 = vmatpush.bf16.msrb.mxu0 %v893_v3 }
  0x3f   :  { %575 = vmatpush.bf16.msrb.mxu1 %v901_v6 }
  0x41   :  { %562 = vmatmul.bf16.vlgmr.msrb.gmra.mxu0 %v628_v9 }
  0x42   :  { %576 = vmatmul.bf16.vlgmr.msrb.gmra.mxu1 %v632_v10 }
  0x9e   :  { %v507_v11 = vpop.f32.mrf.mxu0 }
  0x9f   :  { %v521_v13 = vpop.f32.mrf.mxu1  ;;  %v508_v15 = vadd.f32 %v915_v12, %v507_v11 }
  0xa1   :  { %v522_v16 = vadd.f32 %v521_v13, %v508_v15 }
  0xa6   :  { %v535_v14 = vpop.f32.mrf.mxu2  ;;  %v509_v17 = vpop.f32.mrf.mxu0 }
  0xa7   :  { %v523_v18 = vpop.f32.mrf.mxu1  ;;  %v549_v19 = vpop.f32.mrf.mxu3  ;;  %v536_v21 = vadd.f32 %v535_v14, %v522_v16  ;;  %v510_v22 = vadd.f32 %v915_v12, %v509_v17 }
  0xa9   :  { %v550_v23 = vadd.f32 %v549_v19, %v536_v21  ;;  %v524_v24 = vadd.f32 %v523_v18, %v510_v22 }
  0xae   :  { %v537_v20 = vpop.f32.mrf.mxu2 }
  0xaf   :  { %v538_v29 = vadd.f32 %v537_v20, %v524_v24  ;;  %v551_v31 = vpop.f32.mrf.mxu3 }
  0xb1   :  { %v552_v33 = vadd.f32 %v551_v31, %v538_v29 }
  0xbe   :  { %v563_v25 = vpop.f32.mrf.mxu0  ;;  %v591_v28 = vpop.f32.mrf.mxu2 }
  0xbf   :  { %v564_v26 = vadd.f32 %v563_v25, %v550_v23  ;;  %v577_v27 = vpop.f32.mrf.mxu1 }
  0xc1   :  { %v578_v30 = vadd.f32 %v577_v27, %v564_v26 }
  0xc3   :  { %v592_v32 = vadd.f32 %v591_v28, %v578_v30 }
  0xc5   :  { %vm596_vm1 = vcmp.ge.f32.partialorder %v592_v32, 0.0  ;;  %v598_v34 = vmul.f32 0.1, %v592_v32 }
  0xc6   :  { %v565_v35 = vpop.f32.mrf.mxu0  ;;  %v593_v40 = vpop.f32.mrf.mxu2 }
  0xc7   :  { %v600_v36 = vsel %vm596_vm1, %v592_v32, %v598_v34  ;;  %v566_v37 = vadd.f32 %v565_v35, %v552_v33  ;;  %v579_v38 = vpop.f32.mrf.mxu1 }
  0xc8   :  { %603 = vst.msk [vmem:[%s1152_s3] sm:$0xff] %vm602_vm2, %v600_v36 }
  0xc9   :  { %v580_v39 = vadd.f32 %v579_v38, %v566_v37 }
  0xcb   :  { %v594_v41 = vadd.f32 %v593_v40, %v580_v39 }
  0xcd   :  { %vm597_vm3 = vcmp.ge.f32.partialorder %v594_v41, 0.0  ;;  %v599_v42 = vmul.f32 0.1, %v594_v41 }
  0xcf   :  { %v601_v43 = vsel %vm597_vm3, %v594_v41, %v599_v42 }
  0xd0   :  { %604 = vst.msk [vmem:[%s1152_s3 + $0x8] sm:$0xff] %vm602_vm2, %v601_v43 }

// kernel: _lambda_.17
= control target key start
LH: loop header
LB: loop body
LE: loop exit
PB: predicated region body
PF: predicated region fallthrough
CT: control target
= control target key end

     0   :  { %s2274_s0 = inlined_call_operand.vmem [shape: bf16[16,1728], index: 0, kind: input, shape index: {}]   ;;  %s2275_s1 = inlined_call_operand.vmem [shape: bf16[1728,64], index: 1, kind: input, shape index: {}]   ;;  %s2276_s2 = inlined_call_operand.vmem [shape: f32[1,64], index: 2, kind: input, shape index: {}]   ;;  %s2277_s3 = inlined_call_operand.hbm [shape: f32[16,64], index: 3, kind: output, shape index: {}]  }
   0x1   :  { %v1703_v0 = vld [vmem:[%s2275_s1 + $0x38] sm:$0xff]  ;;  %v1702_v4 = vld [vmem:[%s2275_s1 + $0x30] sm:$0xff]  ;;  %v1701_v8 = vld [vmem:[%s2275_s1 + $0x28] sm:$0xff] }
   0x2   :  { %v1719_v1 = vld [vmem:[%s2275_s1 + $0xb8] sm:$0xff]  ;;  %971 = vmatpush.bf16.msra.mxu0 %v1703_v0  ;;  %v1718_v5 = vld [vmem:[%s2275_s1 + $0xb0] sm:$0xff]  ;;  %v1717_v9 = vld [vmem:[%s2275_s1 + $0xa8] sm:$0xff] }
   0x3   :  { %v1711_v2 = vld [vmem:[%s2275_s1 + $0x78] sm:$0xff]  ;;  %999 = vmatpush.bf16.msra.mxu2 %v1719_v1  ;;  %v1710_v6 = vld [vmem:[%s2275_s1 + $0x70] sm:$0xff]  ;;  %v1709_v10 = vld [vmem:[%s2275_s1 + $0x68] sm:$0xff] }
   0x4   :  { %v1727_v3 = vld [vmem:[%s2275_s1 + $0xf8] sm:$0xff]  ;;  %985 = vmatpush.bf16.msra.mxu1 %v1711_v2  ;;  %v1726_v7 = vld [vmem:[%s2275_s1 + $0xf0] sm:$0xff]  ;;  %v1725_v11 = vld [vmem:[%s2275_s1 + $0xe8] sm:$0xff] }
   0x5   :  { %1013 = vmatpush.bf16.msra.mxu3 %v1727_v3  ;;  %v1700_v12 = vld [vmem:[%s2275_s1 + $0x20] sm:$0xff]  ;;  %v1699_v16 = vld [vmem:[%s2275_s1 + $0x18] sm:$0xff]  ;;  %v1698_v20 = vld [vmem:[%s2275_s1 + $0x10] sm:$0xff] }
   0x6   :  { %972 = vmatpush.bf16.msra.mxu0 %v1702_v4  ;;  %v1716_v13 = vld [vmem:[%s2275_s1 + $0xa0] sm:$0xff]  ;;  %v1715_v17 = vld [vmem:[%s2275_s1 + $0x98] sm:$0xff]  ;;  %v1714_v21 = vld [vmem:[%s2275_s1 + $0x90] sm:$0xff] }
   0x7   :  { %1000 = vmatpush.bf16.msra.mxu2 %v1718_v5  ;;  %v1708_v14 = vld [vmem:[%s2275_s1 + $0x60] sm:$0xff]  ;;  %v1707_v18 = vld [vmem:[%s2275_s1 + $0x58] sm:$0xff]  ;;  %v1706_v22 = vld [vmem:[%s2275_s1 + $0x50] sm:$0xff] }
   0x8   :  { %986 = vmatpush.bf16.msra.mxu1 %v1710_v6  ;;  %v1724_v15 = vld [vmem:[%s2275_s1 + $0xe0] sm:$0xff]  ;;  %v1723_v19 = vld [vmem:[%s2275_s1 + $0xd8] sm:$0xff]  ;;  %v1722_v23 = vld [vmem:[%s2275_s1 + $0xd0] sm:$0xff] }
   0x9   :  { %1014 = vmatpush.bf16.msra.mxu3 %v1726_v7  ;;  %v1697_v24 = vld [vmem:[%s2275_s1 + $0x8] sm:$0xff] }
   0xa   :  { %973 = vmatpush.bf16.msra.mxu0 %v1701_v8  ;;  %v1713_v25 = vld [vmem:[%s2275_s1 + $0x88] sm:$0xff] }
   0xb   :  { %1001 = vmatpush.bf16.msra.mxu2 %v1717_v9 }
   0xc   :  { %987 = vmatpush.bf16.msra.mxu1 %v1709_v10 }
   0xd   :  { %1015 = vmatpush.bf16.msra.mxu3 %v1725_v11 }
   0xe   :  { %974 = vmatpush.bf16.msra.mxu0 %v1700_v12 }
   0xf   :  { %1002 = vmatpush.bf16.msra.mxu2 %v1716_v13 }
  0x10   :  { %988 = vmatpush.bf16.msra.mxu1 %v1708_v14 }
  0x11   :  { %1016 = vmatpush.bf16.msra.mxu3 %v1724_v15 }
  0x12   :  { %975 = vmatpush.bf16.msra.mxu0 %v1699_v16 }
  0x13   :  { %1003 = vmatpush.bf16.msra.mxu2 %v1715_v17 }
  0x14   :  { %989 = vmatpush.bf16.msra.mxu1 %v1707_v18 }
  0x15   :  { %1017 = vmatpush.bf16.msra.mxu3 %v1723_v19 }
  0x16   :  { %976 = vmatpush.bf16.msra.mxu0 %v1698_v20 }
  0x17   :  { %1004 = vmatpush.bf16.msra.mxu2 %v1714_v21 }
  0x18   :  { %8 = vsyncpa [#allocation3], 0  ;;  %990 = vmatpush.bf16.msra.mxu1 %v1706_v22  ;;  %v1705_v26 = vld [vmem:[%s2275_s1 + $0x48] sm:$0xff]  ;;  %v1696_v28 = vld [vmem:[%s2275_s1] sm:$0xff]  ;;  %vm967_vm0 = vcmask 523264   ;;  %s1181_s17 = sshll.u32 %s2277_s3, 4  ;;  %s1182_s17 = int_to_ptr.hbm [resolvable:$true] %s1181_s17 }
  0x19   :  { %1018 = vmatpush.bf16.msra.mxu3 %v1722_v23  ;;  %v1721_v27 = vld [vmem:[%s2275_s1 + $0xc8] sm:$0xff]  ;;  %v1712_v29 = vld [vmem:[%s2275_s1 + $0x80] sm:$0xff]  ;;  %v1735_v30 = vld [vmem:[%s2275_s1 + $0x138] sm:$0xff]  ;;  %s1835_s18 = smov 128   ;;  %s1836_s19 = smov 8  }
  0x1a   :  { %v1751_v31 = vld [vmem:[%s2275_s1 + $0x1b8] sm:$0xff]  ;;  %977 = vmatpush.bf16.msra.mxu0 %v1697_v24  ;;  %v1704_v32 = vld [vmem:[%s2275_s1 + $0x40] sm:$0xff]  ;;  %v1203_v36 = vld [vmem:[%s2274_s0 + $0x8] sm:$0xf] }
  0x1b   :  { %1005 = vmatpush.bf16.msra.mxu2 %v1713_v25  ;;  %v1720_v33 = vld [vmem:[%s2275_s1 + $0xc0] sm:$0xff]  ;;  %v1689_v35 = vld [vmem:[%s2274_s0 + $0x34] sm:$0xf0]  ;;  %v1197_v41 = vld [vmem:[%s2274_s0 + $0x38] sm:$0xf0] }
  0x1c   :  { %v1195_v34 = vld [vmem:[%s2274_s0] sm:$0xf]  ;;  %991 = vmatpush.bf16.msra.mxu1 %v1705_v26  ;;  %v1743_v38 = vld [vmem:[%s2275_s1 + $0x178] sm:$0xff]  ;;  %v1682_v40 = vld [vmem:[%s2274_s0 + $0x4] sm:$0xf] }
  0x1d   :  { %1019 = vmatpush.bf16.msra.mxu3 %v1721_v27  ;;  %v1690_v37 = vld [vmem:[%s2274_s0 + $0x3c] sm:$0xf0]  ;;  %v1759_v39 = vld [vmem:[%s2275_s1 + $0x1f8] sm:$0xff]  ;;  %v1683_v42 = vld [vmem:[%s2274_s0 + $0xc] sm:$0xf]  ;;  %v1196_v44 = vor.u32 %v1689_v35, %v1195_v34  ;;  %v1200_v48 = vor.u32 %v1682_v40, %v1197_v41 }
  0x1e   :  { %v1205_v43 = vld [vmem:[%s2274_s0 + $0x40] sm:$0xf0]  ;;  %978 = vmatpush.bf16.msra.mxu0 %v1696_v28  ;;  %v1204_v45 = vor.u32 %v1690_v37, %v1203_v36  ;;  %v1734_v46 = vld [vmem:[%s2275_s1 + $0x130] sm:$0xff]  ;;  %v1733_v52 = vld [vmem:[%s2275_s1 + $0x128] sm:$0xff] }
  0x1f   :  { %1006 = vmatpush.bf16.msra.mxu2 %v1712_v29  ;;  %v1750_v47 = vld [vmem:[%s2275_s1 + $0x1b0] sm:$0xff]  ;;  %v1208_v49 = vor.u32 %v1683_v42, %v1205_v43  ;;  %v1749_v53 = vld [vmem:[%s2275_s1 + $0x1a8] sm:$0xff]  ;;  %v1732_v56 = vld [vmem:[%s2275_s1 + $0x120] sm:$0xff] }
  0x20   :  { %992 = vmatpush.bf16.msra.mxu1 %v1704_v32  ;;  %v1742_v50 = vld [vmem:[%s2275_s1 + $0x170] sm:$0xff]  ;;  %v1741_v54 = vld [vmem:[%s2275_s1 + $0x168] sm:$0xff]  ;;  %v1748_v57 = vld [vmem:[%s2275_s1 + $0x1a0] sm:$0xff] }
  0x21   :  { %1020 = vmatpush.bf16.msra.mxu3 %v1720_v33  ;;  %v1758_v51 = vld [vmem:[%s2275_s1 + $0x1f0] sm:$0xff]  ;;  %979 = vmatmul.bf16.vlgmr.msra.gmra.mxu0 %v1196_v44  ;;  %v1757_v55 = vld [vmem:[%s2275_s1 + $0x1e8] sm:$0xff]  ;;  %v1740_v58 = vld [vmem:[%s2275_s1 + $0x160] sm:$0xff] }
  0x22   :  { %1027 = vmatpush.bf16.msrb.mxu0 %v1735_v30  ;;  %1007 = vmatmul.bf16.vlgmr.msra.gmra.mxu2 %v1204_v45  ;;  %v1756_v59 = vld [vmem:[%s2275_s1 + $0x1e0] sm:$0xff]  ;;  %v1731_v60 = vld [vmem:[%s2275_s1 + $0x118] sm:$0xff]  ;;  %v1730_v0 = vld [vmem:[%s2275_s1 + $0x110] sm:$0xff] }
  0x23   :  { %1055 = vmatpush.bf16.msrb.mxu2 %v1751_v31  ;;  %993 = vmatmul.bf16.vlgmr.msra.gmra.mxu1 %v1200_v48  ;;  %v1747_v61 = vld [vmem:[%s2275_s1 + $0x198] sm:$0xff]  ;;  %v1746_v1 = vld [vmem:[%s2275_s1 + $0x190] sm:$0xff]  ;;  %v1729_v4 = vld [vmem:[%s2275_s1 + $0x108] sm:$0xff] }
  0x24   :  { %1041 = vmatpush.bf16.msrb.mxu1 %v1743_v38  ;;  %1021 = vmatmul.bf16.vlgmr.msra.gmra.mxu3 %v1208_v49  ;;  %v1739_v62 = vld [vmem:[%s2275_s1 + $0x158] sm:$0xff]  ;;  %v1738_v2 = vld [vmem:[%s2275_s1 + $0x150] sm:$0xff]  ;;  %v1745_v5 = vld [vmem:[%s2275_s1 + $0x188] sm:$0xff] }
  0x25   :  { %1069 = vmatpush.bf16.msrb.mxu3 %v1759_v39  ;;  %v1755_v63 = vld [vmem:[%s2275_s1 + $0x1d8] sm:$0xff]  ;;  %v1754_v3 = vld [vmem:[%s2275_s1 + $0x1d0] sm:$0xff]  ;;  %v1737_v6 = vld [vmem:[%s2275_s1 + $0x148] sm:$0xff] }
  0x26   :  { %1028 = vmatpush.bf16.msrb.mxu0 %v1734_v46  ;;  %v1753_v7 = vld [vmem:[%s2275_s1 + $0x1c8] sm:$0xff]  ;;  %v1728_v8 = vld [vmem:[%s2275_s1 + $0x100] sm:$0xff]  ;;  %v1767_v10 = vld [vmem:[%s2275_s1 + $0x238] sm:$0xff] }
  0x27   :  { %1056 = vmatpush.bf16.msrb.mxu2 %v1750_v47  ;;  %v1744_v9 = vld [vmem:[%s2275_s1 + $0x180] sm:$0xff]  ;;  %v1783_v11 = vld [vmem:[%s2275_s1 + $0x2b8] sm:$0xff]  ;;  %v1211_v12 = vld [vmem:[%s2274_s0 + $0x10] sm:$0xf] }
  0x28   :  { %1042 = vmatpush.bf16.msrb.mxu1 %v1742_v50  ;;  %v1691_v13 = vld [vmem:[%s2274_s0 + $0x44] sm:$0xf0]  ;;  %v1219_v14 = vld [vmem:[%s2274_s0 + $0x18] sm:$0xf]  ;;  %v1692_v15 = vld [vmem:[%s2274_s0 + $0x4c] sm:$0xf0] }
  0x29   :  { %1070 = vmatpush.bf16.msrb.mxu3 %v1758_v51  ;;  %v1736_v16 = vld [vmem:[%s2275_s1 + $0x140] sm:$0xff]  ;;  %v1684_v18 = vld [vmem:[%s2274_s0 + $0x14] sm:$0xf]  ;;  %v1213_v19 = vld [vmem:[%s2274_s0 + $0x48] sm:$0xf0]  ;;  %v1212_v22 = vor.u32 %v1691_v13, %v1211_v12  ;;  %v1220_v23 = vor.u32 %v1692_v15, %v1219_v14 }
  0x2a   :  { %1029 = vmatpush.bf16.msrb.mxu0 %v1733_v52  ;;  %v1752_v17 = vld [vmem:[%s2275_s1 + $0x1c0] sm:$0xff]  ;;  %v1685_v20 = vld [vmem:[%s2274_s0 + $0x1c] sm:$0xf]  ;;  %v1221_v21 = vld [vmem:[%s2274_s0 + $0x50] sm:$0xf0]  ;;  %v1216_v26 = vor.u32 %v1684_v18, %v1213_v19 }
  0x2b   :  { %1057 = vmatpush.bf16.msrb.mxu2 %v1749_v53  ;;  %v1775_v24 = vld [vmem:[%s2275_s1 + $0x278] sm:$0xff]  ;;  %v1224_v27 = vor.u32 %v1685_v20, %v1221_v21  ;;  %v1766_v28 = vld [vmem:[%s2275_s1 + $0x230] sm:$0xff]  ;;  %v1765_v32 = vld [vmem:[%s2275_s1 + $0x228] sm:$0xff] }
  0x2c   :  { %1043 = vmatpush.bf16.msrb.mxu1 %v1741_v54  ;;  %v1791_v25 = vld [vmem:[%s2275_s1 + $0x2f8] sm:$0xff]  ;;  %v1782_v29 = vld [vmem:[%s2275_s1 + $0x2b0] sm:$0xff]  ;;  %v1781_v33 = vld [vmem:[%s2275_s1 + $0x2a8] sm:$0xff] }
  0x2d   :  { %1071 = vmatpush.bf16.msrb.mxu3 %v1757_v55  ;;  %v1774_v30 = vld [vmem:[%s2275_s1 + $0x270] sm:$0xff]  ;;  %v1773_v34 = vld [vmem:[%s2275_s1 + $0x268] sm:$0xff]  ;;  %v1764_v36 = vld [vmem:[%s2275_s1 + $0x220] sm:$0xff] }
  0x2e   :  { %1030 = vmatpush.bf16.msrb.mxu0 %v1732_v56  ;;  %v1790_v31 = vld [vmem:[%s2275_s1 + $0x2f0] sm:$0xff]  ;;  %v1789_v35 = vld [vmem:[%s2275_s1 + $0x2e8] sm:$0xff]  ;;  %v1780_v37 = vld [vmem:[%s2275_s1 + $0x2a0] sm:$0xff] }
  0x2f   :  { %1058 = vmatpush.bf16.msrb.mxu2 %v1748_v57  ;;  %v1772_v38 = vld [vmem:[%s2275_s1 + $0x260] sm:$0xff]  ;;  %v1763_v40 = vld [vmem:[%s2275_s1 + $0x218] sm:$0xff]  ;;  %v1762_v44 = vld [vmem:[%s2275_s1 + $0x210] sm:$0xff] }
  0x30   :  { %1044 = vmatpush.bf16.msrb.mxu1 %v1740_v58  ;;  %v1788_v39 = vld [vmem:[%s2275_s1 + $0x2e0] sm:$0xff]  ;;  %v1779_v41 = vld [vmem:[%s2275_s1 + $0x298] sm:$0xff]  ;;  %v1778_v45 = vld [vmem:[%s2275_s1 + $0x290] sm:$0xff] }
  0x31   :  { %1072 = vmatpush.bf16.msrb.mxu3 %v1756_v59  ;;  %v1771_v42 = vld [vmem:[%s2275_s1 + $0x258] sm:$0xff]  ;;  %v1770_v46 = vld [vmem:[%s2275_s1 + $0x250] sm:$0xff]  ;;  %v1761_v48 = vld [vmem:[%s2275_s1 + $0x208] sm:$0xff] }
  0x32   :  { %1031 = vmatpush.bf16.msrb.mxu0 %v1731_v60  ;;  %v1787_v43 = vld [vmem:[%s2275_s1 + $0x2d8] sm:$0xff]  ;;  %v1786_v47 = vld [vmem:[%s2275_s1 + $0x2d0] sm:$0xff]  ;;  %v1777_v49 = vld [vmem:[%s2275_s1 + $0x288] sm:$0xff] }
  0x33   :  { %1059 = vmatpush.bf16.msrb.mxu2 %v1747_v61  ;;  %v1769_v50 = vld [vmem:[%s2275_s1 + $0x248] sm:$0xff]  ;;  %v1760_v52 = vld [vmem:[%s2275_s1 + $0x200] sm:$0xff]  ;;  %v1799_v54 = vld [vmem:[%s2275_s1 + $0x338] sm:$0xff] }
  0x34   :  { %1045 = vmatpush.bf16.msrb.mxu1 %v1739_v62  ;;  %v1785_v51 = vld [vmem:[%s2275_s1 + $0x2c8] sm:$0xff]  ;;  %v1776_v53 = vld [vmem:[%s2275_s1 + $0x280] sm:$0xff]  ;;  %v1693_v56 = vld [vmem:[%s2274_s0 + $0x54] sm:$0xf0] }
  0x35   :  { %1073 = vmatpush.bf16.msrb.mxu3 %v1755_v63  ;;  %v1227_v55 = vld [vmem:[%s2274_s0 + $0x20] sm:$0xf]  ;;  %v1235_v57 = vld [vmem:[%s2274_s0 + $0x28] sm:$0xf]  ;;  %v1686_v61 = vld [vmem:[%s2274_s0 + $0x24] sm:$0xf] }
  0x36   :  { %1032 = vmatpush.bf16.msrb.mxu0 %v1730_v0  ;;  %v1694_v58 = vld [vmem:[%s2274_s0 + $0x5c] sm:$0xf0]  ;;  %v1229_v62 = vld [vmem:[%s2274_s0 + $0x58] sm:$0xf0]  ;;  %v1687_v63 = vld [vmem:[%s2274_s0 + $0x2c] sm:$0xf] }
  0x37   :  { %1060 = vmatpush.bf16.msrb.mxu2 %v1746_v1  ;;  %v1768_v59 = vld [vmem:[%s2275_s1 + $0x240] sm:$0xff]  ;;  %v1228_v1 = vor.u32 %v1693_v56, %v1227_v55  ;;  %v1795_v12 = vld [vmem:[%s2275_s1 + $0x318] sm:$0xff]  ;;  %v1688_v13 = vld [vmem:[%s2274_s0 + $0x34] sm:$0xf] }
  0x38   :  { %1046 = vmatpush.bf16.msrb.mxu1 %v1738_v2  ;;  %v1784_v60 = vld [vmem:[%s2275_s1 + $0x2c0] sm:$0xff]  ;;  %v1236_v2 = vor.u32 %v1694_v58, %v1235_v57  ;;  %v1245_v14 = vld [vmem:[%s2274_s0 + $0x68] sm:$0xf0]  ;;  %v1243_v19 = vld [vmem:[%s2274_s0 + $0x30] sm:$0xf] }
  0x39   :  { %1074 = vmatpush.bf16.msrb.mxu3 %v1754_v3  ;;  %v1237_v0 = vld [vmem:[%s2274_s0 + $0x60] sm:$0xf0]  ;;  %v1803_v3 = vld [vmem:[%s2275_s1 + $0x358] sm:$0xff]  ;;  %v1248_v15 = vor.u32 %v1688_v13, %v1245_v14  ;;  %v1695_v20 = vld [vmem:[%s2274_s0 + $0x64] sm:$0xf0]  ;;  %s1834_s0 = smov [#allocation2]  }
  0x3a   :  { %1033 = vmatpush.bf16.msrb.mxu0 %v1729_v4  ;;  %v1232_v4 = vor.u32 %v1686_v61, %v1229_v62  ;;  %v1792_v18 = vld [vmem:[%s2275_s1 + $0x300] sm:$0xff]  ;;  %v1244_v21 = vor.u32 %v1695_v20, %v1243_v19 }
  0x3b   :  { %1061 = vmatpush.bf16.msrb.mxu2 %v1745_v5  ;;  %v1240_v5 = vor.u32 %v1687_v63, %v1237_v0 }
  0x3c   :  { %1047 = vmatpush.bf16.msrb.mxu1 %v1737_v6  ;;  %v1798_v6 = vld [vmem:[%s2275_s1 + $0x330] sm:$0xff] }
  0x3d   :  { %1075 = vmatpush.bf16.msrb.mxu3 %v1753_v7  ;;  %v1802_v7 = vld [vmem:[%s2275_s1 + $0x350] sm:$0xff] }
  0x3e   :  { %1034 = vmatpush.bf16.msrb.mxu0 %v1728_v8  ;;  %v1797_v8 = vld [vmem:[%s2275_s1 + $0x328] sm:$0xff] }
  0x3f   :  { %1062 = vmatpush.bf16.msrb.mxu2 %v1744_v9  ;;  %v1801_v9 = vld [vmem:[%s2275_s1 + $0x348] sm:$0xff] }
  0x40   :  { %1048 = vmatpush.bf16.msrb.mxu1 %v1736_v16  ;;  %v1794_v16 = vld [vmem:[%s2275_s1 + $0x310] sm:$0xff] }
  0x41   :  { %1076 = vmatpush.bf16.msrb.mxu3 %v1752_v17  ;;  %1035 = vmatmul.bf16.vlgmr.msrb.gmra.mxu0 %v1212_v22  ;;  %v1793_v17 = vld [vmem:[%s2275_s1 + $0x308] sm:$0xff] }
  0x42   :  { %1083 = vmatpush.bf16.msra.mxu0 %v1767_v10  ;;  %1063 = vmatmul.bf16.vlgmr.msrb.gmra.mxu2 %v1220_v23  ;;  %v1796_v10 = vld [vmem:[%s2275_s1 + $0x320] sm:$0xff] }
  0x43   :  { %1111 = vmatpush.bf16.msra.mxu2 %v1783_v11  ;;  %1049 = vmatmul.bf16.vlgmr.msrb.gmra.mxu1 %v1216_v26  ;;  %v1800_v11 = vld [vmem:[%s2275_s1 + $0x340] sm:$0xff]  ;;  %s1179_s1 = sshll.u32 %s1834_s0, 4  ;;  %s1180_s1 = int_to_ptr.vmem [resolvable:$true] %s1179_s1 }
  0x44   :  { %1097 = vmatpush.bf16.msra.mxu1 %v1775_v24  ;;  %1077 = vmatmul.bf16.vlgmr.msrb.gmra.mxu3 %v1224_v27  ;;  %v1807_v27 = vld [vmem:[%s2276_s2] ss:$0 sm:$0xff] }
  0x45   :  { %1125 = vmatpush.bf16.msra.mxu3 %v1791_v25 }
  0x46   :  { %1084 = vmatpush.bf16.msra.mxu0 %v1766_v28 }
  0x47   :  { %1112 = vmatpush.bf16.msra.mxu2 %v1782_v29 }
  0x48   :  { %1098 = vmatpush.bf16.msra.mxu1 %v1774_v30 }
  0x49   :  { %1126 = vmatpush.bf16.msra.mxu3 %v1790_v31 }
  0x4a   :  { %1085 = vmatpush.bf16.msra.mxu0 %v1765_v32 }
  0x4b   :  { %1113 = vmatpush.bf16.msra.mxu2 %v1781_v33 }
  0x4c   :  { %1099 = vmatpush.bf16.msra.mxu1 %v1773_v34 }
  0x4d   :  { %1127 = vmatpush.bf16.msra.mxu3 %v1789_v35 }
  0x4e   :  { %1086 = vmatpush.bf16.msra.mxu0 %v1764_v36 }
  0x4f   :  { %1114 = vmatpush.bf16.msra.mxu2 %v1780_v37 }
  0x50   :  { %1100 = vmatpush.bf16.msra.mxu1 %v1772_v38 }
  0x51   :  { %1128 = vmatpush.bf16.msra.mxu3 %v1788_v39 }
  0x52   :  { %1087 = vmatpush.bf16.msra.mxu0 %v1763_v40 }
  0x53   :  { %1115 = vmatpush.bf16.msra.mxu2 %v1779_v41 }
  0x54   :  { %1101 = vmatpush.bf16.msra.mxu1 %v1771_v42 }
  0x55   :  { %1129 = vmatpush.bf16.msra.mxu3 %v1787_v43 }
  0x56   :  { %1088 = vmatpush.bf16.msra.mxu0 %v1762_v44 }
  0x57   :  { %1116 = vmatpush.bf16.msra.mxu2 %v1778_v45 }
  0x58   :  { %1102 = vmatpush.bf16.msra.mxu1 %v1770_v46 }
  0x59   :  { %1130 = vmatpush.bf16.msra.mxu3 %v1786_v47 }
  0x5a   :  { %1089 = vmatpush.bf16.msra.mxu0 %v1761_v48 }
  0x5b   :  { %1117 = vmatpush.bf16.msra.mxu2 %v1777_v49 }
  0x5c   :  { %1103 = vmatpush.bf16.msra.mxu1 %v1769_v50 }
  0x5d   :  { %1131 = vmatpush.bf16.msra.mxu3 %v1785_v51 }
  0x5e   :  { %1090 = vmatpush.bf16.msra.mxu0 %v1760_v52 }
  0x5f   :  { %1118 = vmatpush.bf16.msra.mxu2 %v1776_v53 }
  0x60   :  { %1104 = vmatpush.bf16.msra.mxu1 %v1768_v59 }
  0x61   :  { %1132 = vmatpush.bf16.msra.mxu3 %v1784_v60  ;;  %1091 = vmatmul.bf16.vlgmr.msra.gmra.mxu0 %v1228_v1 }
  0x62   :  { %1139 = vmatpush.bf16.msrb.mxu0 %v1799_v54  ;;  %1119 = vmatmul.bf16.vlgmr.msra.gmra.mxu2 %v1236_v2 }
  0x63   :  { %1105 = vmatmul.bf16.vlgmr.msra.gmra.mxu1 %v1232_v4 }
  0x64   :  { %1157 = vmatpush.bf16.msrb.mxu1 %v1803_v3  ;;  %1133 = vmatmul.bf16.vlgmr.msra.gmra.mxu3 %v1240_v5 }
  0x66   :  { %1140 = vmatpush.bf16.msrb.mxu0 %v1798_v6 }
  0x68   :  { %1158 = vmatpush.bf16.msrb.mxu1 %v1802_v7 }
  0x6a   :  { %1141 = vmatpush.bf16.msrb.mxu0 %v1797_v8 }
  0x6c   :  { %1159 = vmatpush.bf16.msrb.mxu1 %v1801_v9 }
  0x6e   :  { %1142 = vmatpush.bf16.msrb.mxu0 %v1796_v10 }
  0x70   :  { %1160 = vmatpush.bf16.msrb.mxu1 %v1800_v11 }
  0x72   :  { %1143 = vmatpush.bf16.msrb.mxu0 %v1795_v12 }
  0x73   :  { %1681 = vmatmul.msk.bf16.vlgmr.msrb.gmra.mxu1 %vm967_vm0, %v1248_v15 }
  0x76   :  { %1144 = vmatpush.bf16.msrb.mxu0 %v1794_v16 }
  0x7a   :  { %1145 = vmatpush.bf16.msrb.mxu0 %v1793_v17 }
  0x7e   :  { %1146 = vmatpush.bf16.msrb.mxu0 %v1792_v18 }
  0x81   :  { %1147 = vmatmul.bf16.vlgmr.msrb.gmra.mxu0 %v1244_v21 }
  0x9e   :  { %v980_v22 = vpop.f32.mrf.mxu0 }
  0x9f   :  { %v981_v29 = vadd.f32 %v1807_v27, %v980_v22 }
  0xa0   :  { %v994_v23 = vpop.f32.mrf.mxu1 }
  0xa1   :  { %v995_v31 = vadd.f32 %v994_v23, %v981_v29 }
  0xa5   :  { %v1008_v24 = vpop.f32.mrf.mxu2 }
  0xa6   :  { %v982_v25 = vpop.f32.mrf.mxu0  ;;  %v1009_v35 = vadd.f32 %v1008_v24, %v995_v31 }
  0xa7   :  { %v1022_v28 = vpop.f32.mrf.mxu3  ;;  %v983_v36 = vadd.f32 %v1807_v27, %v982_v25 }
  0xa8   :  { %v996_v26 = vpop.f32.mrf.mxu1  ;;  %v1023_v37 = vadd.f32 %v1022_v28, %v1009_v35 }
  0xa9   :  { %v997_v41 = vadd.f32 %v996_v26, %v983_v36 }
  0xad   :  { %v1010_v30 = vpop.f32.mrf.mxu2 }
  0xae   :  { %v1011_v44 = vadd.f32 %v1010_v30, %v997_v41 }
  0xaf   :  { %v1024_v34 = vpop.f32.mrf.mxu3 }
  0xb0   :  { %v1025_v49 = vadd.f32 %v1024_v34, %v1011_v44 }
  0xbe   :  { %v1036_v32 = vpop.f32.mrf.mxu0 }
  0xbf   :  { %v1037_v42 = vadd.f32 %v1036_v32, %v1023_v37 }
  0xc0   :  { %v1050_v33 = vpop.f32.mrf.mxu1 }
  0xc1   :  { %v1051_v45 = vadd.f32 %v1050_v33, %v1037_v42 }
  0xc5   :  { %v1064_v38 = vpop.f32.mrf.mxu2 }
  0xc6   :  { %v1038_v39 = vpop.f32.mrf.mxu0  ;;  %v1065_v50 = vadd.f32 %v1064_v38, %v1051_v45 }
  0xc7   :  { %v1078_v43 = vpop.f32.mrf.mxu3  ;;  %v1039_v51 = vadd.f32 %v1038_v39, %v1025_v49 }
  0xc8   :  { %v1052_v40 = vpop.f32.mrf.mxu1  ;;  %v1079_v53 = vadd.f32 %v1078_v43, %v1065_v50 }
  0xc9   :  { %v1053_v54 = vadd.f32 %v1052_v40, %v1039_v51 }
  0xcd   :  { %v1066_v46 = vpop.f32.mrf.mxu2 }
  0xce   :  { %v1067_v57 = vadd.f32 %v1066_v46, %v1053_v54 }
  0xcf   :  { %v1080_v52 = vpop.f32.mrf.mxu3 }
  0xd0   :  { %v1081_v62 = vadd.f32 %v1080_v52, %v1067_v57 }
  0xde   :  { %v1092_v47 = vpop.f32.mrf.mxu0 }
  0xdf   :  { %v1093_v55 = vadd.f32 %v1092_v47, %v1079_v53 }
  0xe0   :  { %v1106_v48 = vpop.f32.mrf.mxu1 }
  0xe1   :  { %v1107_v60 = vadd.f32 %v1106_v48, %v1093_v55 }
  0xe5   :  { %v1120_v56 = vpop.f32.mrf.mxu2 }
  0xe6   :  { %v1094_v58 = vpop.f32.mrf.mxu0  ;;  %v1121_v63 = vadd.f32 %v1120_v56, %v1107_v60 }
  0xe7   :  { %v1134_v61 = vpop.f32.mrf.mxu3  ;;  %v1095_v0 = vadd.f32 %v1094_v58, %v1081_v62 }
  0xe8   :  { %v1108_v59 = vpop.f32.mrf.mxu1  ;;  %v1135_v1 = vadd.f32 %v1134_v61, %v1121_v63 }
  0xe9   :  { %v1109_v5 = vadd.f32 %v1108_v59, %v1095_v0 }
  0xed   :  { %v1122_v2 = vpop.f32.mrf.mxu2 }
  0xee   :  { %v1123_v7 = vadd.f32 %v1122_v2, %v1109_v5 }
  0xef   :  { %v1136_v9 = vpop.f32.mrf.mxu3 }
  0xf0   :  { %v1162_v3 = vpop.f32.mrf.mxu1  ;;  %v1137_v11 = vadd.f32 %v1136_v9, %v1123_v7 }
  0xf8   :  { %v1164_v15 = vpop.f32.mrf.mxu1 }
  0xfe   :  { %v1148_v4 = vpop.f32.mrf.mxu0 }
  0xff   :  { %v1149_v6 = vadd.f32 %v1148_v4, %v1135_v1 }
 0x101   :  { %v1163_v8 = vadd.f32 %v1162_v3, %v1149_v6 }
 0x103   :  { %vm1167_vm1 = vcmp.ge.f32.partialorder %v1163_v8, 0.0  ;;  %v1169_v10 = vmul.f32 0.1, %v1163_v8 }
 0x105   :  { %v1171_v12 = vsel %vm1167_vm1, %v1163_v8, %v1169_v10 }
 0x106   :  { %1173 = vst.msk [vmem:[#allocation2] sm:$0xff] %vm967_vm0, %v1171_v12  ;;  %v1150_v13 = vpop.f32.mrf.mxu0 }
 0x107   :  { %v1151_v14 = vadd.f32 %v1150_v13, %v1137_v11 }
 0x109   :  { %v1165_v16 = vadd.f32 %v1164_v15, %v1151_v14 }
 0x10b   :  { %vm1168_vm2 = vcmp.ge.f32.partialorder %v1165_v16, 0.0  ;;  %v1170_v17 = vmul.f32 0.1, %v1165_v16 }
 0x10d   :  { %v1172_v18 = vsel %vm1168_vm2, %v1165_v16, %v1170_v17 }
 0x10e   :  { %1174 = vst.msk [vmem:[#allocation2 + $0x8] sm:$0xff] %vm967_vm0, %v1172_v18 }
 0x10f   :  { %1187 = dma.vmem_to_hbm [thread:$0]  %s1180_s1, 256, %s1182_s17, [#allocation3], %s1835_s18, %s1835_s18, %s1836_s19  }
 0x110   :  { %1832 = dma.done.wait [#allocation3], 256  }
 0x111   :  { %1833 = vsyncadd [#allocation3], 4294967040 }
 0x112   :  { %1192 = vsyncpa [#allocation3], 1 }

// kernel: _lambda_.16
= control target key start
LH: loop header
LB: loop body
LE: loop exit
PB: predicated region body
PF: predicated region fallthrough
CT: control target
= control target key end

     0   :  { %vm966_vm0 = vcmask 523264   ;;  %s2230_s1 = inlined_call_operand.vmem [shape: bf16[1728,64], index: 1, kind: input, shape index: {}]   ;;  %s2231_s2 = inlined_call_operand.vmem [shape: f32[1,64], index: 2, kind: input, shape index: {}]   ;;  %s2232_s0 = inlined_call_operand.vmem [shape: bf16[16,1728], index: 0, kind: input, shape index: {}]   ;;  %s2233_s3 = inlined_call_operand.vmem [shape: f32[16,64], index: 3, kind: output, shape index: {}]  }
   0x1   :  { %v1688_v0 = vld [vmem:[%s2230_s1 + $0x38] sm:$0xff]  ;;  %v1687_v4 = vld [vmem:[%s2230_s1 + $0x30] sm:$0xff]  ;;  %v1686_v8 = vld [vmem:[%s2230_s1 + $0x28] sm:$0xff] }
   0x2   :  { %v1704_v1 = vld [vmem:[%s2230_s1 + $0xb8] sm:$0xff]  ;;  %970 = vmatpush.bf16.msra.mxu0 %v1688_v0  ;;  %v1703_v5 = vld [vmem:[%s2230_s1 + $0xb0] sm:$0xff]  ;;  %v1702_v9 = vld [vmem:[%s2230_s1 + $0xa8] sm:$0xff] }
   0x3   :  { %v1696_v2 = vld [vmem:[%s2230_s1 + $0x78] sm:$0xff]  ;;  %998 = vmatpush.bf16.msra.mxu2 %v1704_v1  ;;  %v1695_v6 = vld [vmem:[%s2230_s1 + $0x70] sm:$0xff]  ;;  %v1694_v10 = vld [vmem:[%s2230_s1 + $0x68] sm:$0xff] }
   0x4   :  { %v1712_v3 = vld [vmem:[%s2230_s1 + $0xf8] sm:$0xff]  ;;  %984 = vmatpush.bf16.msra.mxu1 %v1696_v2  ;;  %v1711_v7 = vld [vmem:[%s2230_s1 + $0xf0] sm:$0xff]  ;;  %v1710_v11 = vld [vmem:[%s2230_s1 + $0xe8] sm:$0xff] }
   0x5   :  { %1012 = vmatpush.bf16.msra.mxu3 %v1712_v3  ;;  %v1685_v12 = vld [vmem:[%s2230_s1 + $0x20] sm:$0xff]  ;;  %v1684_v16 = vld [vmem:[%s2230_s1 + $0x18] sm:$0xff]  ;;  %v1683_v20 = vld [vmem:[%s2230_s1 + $0x10] sm:$0xff] }
   0x6   :  { %971 = vmatpush.bf16.msra.mxu0 %v1687_v4  ;;  %v1701_v13 = vld [vmem:[%s2230_s1 + $0xa0] sm:$0xff]  ;;  %v1700_v17 = vld [vmem:[%s2230_s1 + $0x98] sm:$0xff]  ;;  %v1699_v21 = vld [vmem:[%s2230_s1 + $0x90] sm:$0xff] }
   0x7   :  { %999 = vmatpush.bf16.msra.mxu2 %v1703_v5  ;;  %v1693_v14 = vld [vmem:[%s2230_s1 + $0x60] sm:$0xff]  ;;  %v1692_v18 = vld [vmem:[%s2230_s1 + $0x58] sm:$0xff]  ;;  %v1691_v22 = vld [vmem:[%s2230_s1 + $0x50] sm:$0xff] }
   0x8   :  { %985 = vmatpush.bf16.msra.mxu1 %v1695_v6  ;;  %v1709_v15 = vld [vmem:[%s2230_s1 + $0xe0] sm:$0xff]  ;;  %v1708_v19 = vld [vmem:[%s2230_s1 + $0xd8] sm:$0xff]  ;;  %v1707_v23 = vld [vmem:[%s2230_s1 + $0xd0] sm:$0xff] }
   0x9   :  { %1013 = vmatpush.bf16.msra.mxu3 %v1711_v7  ;;  %v1682_v24 = vld [vmem:[%s2230_s1 + $0x8] sm:$0xff]  ;;  %v1681_v28 = vld [vmem:[%s2230_s1] sm:$0xff]  ;;  %v1720_v30 = vld [vmem:[%s2230_s1 + $0x138] sm:$0xff] }
   0xa   :  { %972 = vmatpush.bf16.msra.mxu0 %v1686_v8  ;;  %v1698_v25 = vld [vmem:[%s2230_s1 + $0x88] sm:$0xff]  ;;  %v1697_v29 = vld [vmem:[%s2230_s1 + $0x80] sm:$0xff]  ;;  %v1736_v31 = vld [vmem:[%s2230_s1 + $0x1b8] sm:$0xff] }
   0xb   :  { %1000 = vmatpush.bf16.msra.mxu2 %v1702_v9  ;;  %v1690_v26 = vld [vmem:[%s2230_s1 + $0x48] sm:$0xff]  ;;  %v1689_v32 = vld [vmem:[%s2230_s1 + $0x40] sm:$0xff]  ;;  %v1674_v35 = vld [vmem:[%s2232_s0 + $0x34] sm:$0xf0] }
   0xc   :  { %986 = vmatpush.bf16.msra.mxu1 %v1694_v10  ;;  %v1706_v27 = vld [vmem:[%s2230_s1 + $0xc8] sm:$0xff]  ;;  %v1705_v33 = vld [vmem:[%s2230_s1 + $0xc0] sm:$0xff]  ;;  %v1728_v38 = vld [vmem:[%s2230_s1 + $0x178] sm:$0xff] }
   0xd   :  { %1014 = vmatpush.bf16.msra.mxu3 %v1710_v11  ;;  %v1180_v34 = vld [vmem:[%s2232_s0] sm:$0xf]  ;;  %v1188_v36 = vld [vmem:[%s2232_s0 + $0x8] sm:$0xf]  ;;  %v1744_v39 = vld [vmem:[%s2230_s1 + $0x1f8] sm:$0xff] }
   0xe   :  { %973 = vmatpush.bf16.msra.mxu0 %v1685_v12  ;;  %v1675_v37 = vld [vmem:[%s2232_s0 + $0x3c] sm:$0xf0]  ;;  %v1667_v40 = vld [vmem:[%s2232_s0 + $0x4] sm:$0xf]  ;;  %v1182_v41 = vld [vmem:[%s2232_s0 + $0x38] sm:$0xf0]  ;;  %v1181_v44 = vor.u32 %v1674_v35, %v1180_v34 }
   0xf   :  { %1001 = vmatpush.bf16.msra.mxu2 %v1701_v13  ;;  %v1668_v42 = vld [vmem:[%s2232_s0 + $0xc] sm:$0xf]  ;;  %v1190_v43 = vld [vmem:[%s2232_s0 + $0x40] sm:$0xf0]  ;;  %v1189_v45 = vor.u32 %v1675_v37, %v1188_v36  ;;  %v1719_v46 = vld [vmem:[%s2230_s1 + $0x130] sm:$0xff]  ;;  %v1185_v48 = vor.u32 %v1667_v40, %v1182_v41 }
  0x10   :  { %987 = vmatpush.bf16.msra.mxu1 %v1693_v14  ;;  %v1735_v47 = vld [vmem:[%s2230_s1 + $0x1b0] sm:$0xff]  ;;  %v1193_v49 = vor.u32 %v1668_v42, %v1190_v43  ;;  %v1718_v52 = vld [vmem:[%s2230_s1 + $0x128] sm:$0xff]  ;;  %v1717_v56 = vld [vmem:[%s2230_s1 + $0x120] sm:$0xff] }
  0x11   :  { %1015 = vmatpush.bf16.msra.mxu3 %v1709_v15  ;;  %v1727_v50 = vld [vmem:[%s2230_s1 + $0x170] sm:$0xff]  ;;  %v1734_v53 = vld [vmem:[%s2230_s1 + $0x1a8] sm:$0xff]  ;;  %v1733_v57 = vld [vmem:[%s2230_s1 + $0x1a0] sm:$0xff] }
  0x12   :  { %974 = vmatpush.bf16.msra.mxu0 %v1684_v16  ;;  %v1743_v51 = vld [vmem:[%s2230_s1 + $0x1f0] sm:$0xff]  ;;  %v1726_v54 = vld [vmem:[%s2230_s1 + $0x168] sm:$0xff]  ;;  %v1725_v58 = vld [vmem:[%s2230_s1 + $0x160] sm:$0xff] }
  0x13   :  { %1002 = vmatpush.bf16.msra.mxu2 %v1700_v17  ;;  %v1742_v55 = vld [vmem:[%s2230_s1 + $0x1e8] sm:$0xff]  ;;  %v1741_v59 = vld [vmem:[%s2230_s1 + $0x1e0] sm:$0xff]  ;;  %v1716_v60 = vld [vmem:[%s2230_s1 + $0x118] sm:$0xff] }
  0x14   :  { %988 = vmatpush.bf16.msra.mxu1 %v1692_v18  ;;  %v1732_v61 = vld [vmem:[%s2230_s1 + $0x198] sm:$0xff]  ;;  %v1715_v0 = vld [vmem:[%s2230_s1 + $0x110] sm:$0xff]  ;;  %v1714_v4 = vld [vmem:[%s2230_s1 + $0x108] sm:$0xff] }
  0x15   :  { %1016 = vmatpush.bf16.msra.mxu3 %v1708_v19  ;;  %v1724_v62 = vld [vmem:[%s2230_s1 + $0x158] sm:$0xff]  ;;  %v1731_v1 = vld [vmem:[%s2230_s1 + $0x190] sm:$0xff]  ;;  %v1730_v5 = vld [vmem:[%s2230_s1 + $0x188] sm:$0xff] }
  0x16   :  { %975 = vmatpush.bf16.msra.mxu0 %v1683_v20  ;;  %v1740_v63 = vld [vmem:[%s2230_s1 + $0x1d8] sm:$0xff]  ;;  %v1723_v2 = vld [vmem:[%s2230_s1 + $0x150] sm:$0xff]  ;;  %v1722_v6 = vld [vmem:[%s2230_s1 + $0x148] sm:$0xff] }
  0x17   :  { %1003 = vmatpush.bf16.msra.mxu2 %v1699_v21  ;;  %v1739_v3 = vld [vmem:[%s2230_s1 + $0x1d0] sm:$0xff]  ;;  %v1738_v7 = vld [vmem:[%s2230_s1 + $0x1c8] sm:$0xff]  ;;  %v1713_v8 = vld [vmem:[%s2230_s1 + $0x100] sm:$0xff] }
  0x18   :  { %989 = vmatpush.bf16.msra.mxu1 %v1691_v22  ;;  %v1729_v9 = vld [vmem:[%s2230_s1 + $0x180] sm:$0xff]  ;;  %v1752_v10 = vld [vmem:[%s2230_s1 + $0x238] sm:$0xff]  ;;  %v1196_v12 = vld [vmem:[%s2232_s0 + $0x10] sm:$0xf] }
  0x19   :  { %1017 = vmatpush.bf16.msra.mxu3 %v1707_v23  ;;  %v1768_v11 = vld [vmem:[%s2230_s1 + $0x2b8] sm:$0xff]  ;;  %v1676_v13 = vld [vmem:[%s2232_s0 + $0x44] sm:$0xf0]  ;;  %v1677_v15 = vld [vmem:[%s2232_s0 + $0x4c] sm:$0xf0] }
  0x1a   :  { %976 = vmatpush.bf16.msra.mxu0 %v1682_v24  ;;  %v1204_v14 = vld [vmem:[%s2232_s0 + $0x18] sm:$0xf]  ;;  %v1721_v16 = vld [vmem:[%s2230_s1 + $0x140] sm:$0xff]  ;;  %v1669_v18 = vld [vmem:[%s2232_s0 + $0x14] sm:$0xf]  ;;  %v1197_v22 = vor.u32 %v1676_v13, %v1196_v12 }
  0x1b   :  { %1004 = vmatpush.bf16.msra.mxu2 %v1698_v25  ;;  %v1737_v17 = vld [vmem:[%s2230_s1 + $0x1c0] sm:$0xff]  ;;  %v1198_v19 = vld [vmem:[%s2232_s0 + $0x48] sm:$0xf0]  ;;  %v1670_v20 = vld [vmem:[%s2232_s0 + $0x1c] sm:$0xf]  ;;  %v1205_v23 = vor.u32 %v1677_v15, %v1204_v14 }
  0x1c   :  { %990 = vmatpush.bf16.msra.mxu1 %v1690_v26  ;;  %v1206_v21 = vld [vmem:[%s2232_s0 + $0x50] sm:$0xf0]  ;;  %v1760_v24 = vld [vmem:[%s2230_s1 + $0x278] sm:$0xff]  ;;  %v1201_v26 = vor.u32 %v1669_v18, %v1198_v19  ;;  %v1758_v34 = vld [vmem:[%s2230_s1 + $0x268] sm:$0xff] }
  0x1d   :  { %1018 = vmatpush.bf16.msra.mxu3 %v1706_v27  ;;  %v1776_v25 = vld [vmem:[%s2230_s1 + $0x2f8] sm:$0xff]  ;;  %v1209_v27 = vor.u32 %v1670_v20, %v1206_v21  ;;  %v1774_v35 = vld [vmem:[%s2230_s1 + $0x2e8] sm:$0xff]  ;;  %v1749_v36 = vld [vmem:[%s2230_s1 + $0x220] sm:$0xff] }
  0x1e   :  { %977 = vmatpush.bf16.msra.mxu0 %v1681_v28  ;;  %v1751_v28 = vld [vmem:[%s2230_s1 + $0x230] sm:$0xff]  ;;  %v1765_v37 = vld [vmem:[%s2230_s1 + $0x2a0] sm:$0xff]  ;;  %v1748_v40 = vld [vmem:[%s2230_s1 + $0x218] sm:$0xff] }
  0x1f   :  { %1005 = vmatpush.bf16.msra.mxu2 %v1697_v29  ;;  %v1767_v29 = vld [vmem:[%s2230_s1 + $0x2b0] sm:$0xff]  ;;  %v1764_v41 = vld [vmem:[%s2230_s1 + $0x298] sm:$0xff]  ;;  %v1230_v14 = vld [vmem:[%s2232_s0 + $0x68] sm:$0xf0] }
  0x20   :  { %991 = vmatpush.bf16.msra.mxu1 %v1689_v32  ;;  %v1750_v32 = vld [vmem:[%s2230_s1 + $0x228] sm:$0xff]  ;;  %v1756_v42 = vld [vmem:[%s2230_s1 + $0x258] sm:$0xff]  ;;  %v1673_v13 = vld [vmem:[%s2232_s0 + $0x34] sm:$0xf] }
  0x21   :  { %1019 = vmatpush.bf16.msra.mxu3 %v1705_v33  ;;  %978 = vmatmul.bf16.vlgmr.msra.gmra.mxu0 %v1181_v44  ;;  %v1766_v33 = vld [vmem:[%s2230_s1 + $0x2a8] sm:$0xff]  ;;  %v1772_v43 = vld [vmem:[%s2230_s1 + $0x2d8] sm:$0xff]  ;;  %v1747_v44 = vld [vmem:[%s2230_s1 + $0x210] sm:$0xff]  ;;  %v1233_v15 = vor.u32 %v1673_v13, %v1230_v14 }
  0x22   :  { %1026 = vmatpush.bf16.msrb.mxu0 %v1720_v30  ;;  %1006 = vmatmul.bf16.vlgmr.msra.gmra.mxu2 %v1189_v45  ;;  %v1759_v30 = vld [vmem:[%s2230_s1 + $0x270] sm:$0xff]  ;;  %v1780_v12 = vld [vmem:[%s2230_s1 + $0x318] sm:$0xff]  ;;  %v1777_v18 = vld [vmem:[%s2230_s1 + $0x300] sm:$0xff] }
  0x23   :  { %1054 = vmatpush.bf16.msrb.mxu2 %v1736_v31  ;;  %992 = vmatmul.bf16.vlgmr.msra.gmra.mxu1 %v1185_v48  ;;  %v1775_v31 = vld [vmem:[%s2230_s1 + $0x2f0] sm:$0xff]  ;;  %v1746_v48 = vld [vmem:[%s2230_s1 + $0x208] sm:$0xff] }
  0x24   :  { %1040 = vmatpush.bf16.msrb.mxu1 %v1728_v38  ;;  %1020 = vmatmul.bf16.vlgmr.msra.gmra.mxu3 %v1193_v49  ;;  %v1757_v38 = vld [vmem:[%s2230_s1 + $0x260] sm:$0xff]  ;;  %v1763_v45 = vld [vmem:[%s2230_s1 + $0x290] sm:$0xff]  ;;  %v1762_v49 = vld [vmem:[%s2230_s1 + $0x288] sm:$0xff] }
  0x25   :  { %1068 = vmatpush.bf16.msrb.mxu3 %v1744_v39  ;;  %v1773_v39 = vld [vmem:[%s2230_s1 + $0x2e0] sm:$0xff]  ;;  %v1228_v19 = vld [vmem:[%s2232_s0 + $0x30] sm:$0xf]  ;;  %v1680_v20 = vld [vmem:[%s2232_s0 + $0x64] sm:$0xf0] }
  0x26   :  { %1027 = vmatpush.bf16.msrb.mxu0 %v1719_v46  ;;  %v1755_v46 = vld [vmem:[%s2230_s1 + $0x250] sm:$0xff]  ;;  %v1229_v21 = vor.u32 %v1680_v20, %v1228_v19 }
  0x27   :  { %1055 = vmatpush.bf16.msrb.mxu2 %v1735_v47  ;;  %v1771_v47 = vld [vmem:[%s2230_s1 + $0x2d0] sm:$0xff] }
  0x28   :  { %1041 = vmatpush.bf16.msrb.mxu1 %v1727_v50  ;;  %v1754_v50 = vld [vmem:[%s2230_s1 + $0x248] sm:$0xff] }
  0x29   :  { %1069 = vmatpush.bf16.msrb.mxu3 %v1743_v51  ;;  %v1770_v51 = vld [vmem:[%s2230_s1 + $0x2c8] sm:$0xff] }
  0x2a   :  { %1028 = vmatpush.bf16.msrb.mxu0 %v1718_v52  ;;  %v1745_v52 = vld [vmem:[%s2230_s1 + $0x200] sm:$0xff] }
  0x2b   :  { %1056 = vmatpush.bf16.msrb.mxu2 %v1734_v53  ;;  %v1761_v53 = vld [vmem:[%s2230_s1 + $0x280] sm:$0xff] }
  0x2c   :  { %1042 = vmatpush.bf16.msrb.mxu1 %v1726_v54  ;;  %v1784_v54 = vld [vmem:[%s2230_s1 + $0x338] sm:$0xff] }
  0x2d   :  { %1070 = vmatpush.bf16.msrb.mxu3 %v1742_v55  ;;  %v1212_v55 = vld [vmem:[%s2232_s0 + $0x20] sm:$0xf] }
  0x2e   :  { %1029 = vmatpush.bf16.msrb.mxu0 %v1717_v56  ;;  %v1678_v56 = vld [vmem:[%s2232_s0 + $0x54] sm:$0xf0] }
  0x2f   :  { %1057 = vmatpush.bf16.msrb.mxu2 %v1733_v57  ;;  %v1220_v57 = vld [vmem:[%s2232_s0 + $0x28] sm:$0xf] }
  0x30   :  { %1043 = vmatpush.bf16.msrb.mxu1 %v1725_v58  ;;  %v1679_v58 = vld [vmem:[%s2232_s0 + $0x5c] sm:$0xf0] }
  0x31   :  { %1071 = vmatpush.bf16.msrb.mxu3 %v1741_v59  ;;  %v1753_v59 = vld [vmem:[%s2230_s1 + $0x240] sm:$0xff] }
  0x32   :  { %1030 = vmatpush.bf16.msrb.mxu0 %v1716_v60  ;;  %v1769_v60 = vld [vmem:[%s2230_s1 + $0x2c0] sm:$0xff] }
  0x33   :  { %1058 = vmatpush.bf16.msrb.mxu2 %v1732_v61  ;;  %v1671_v61 = vld [vmem:[%s2232_s0 + $0x24] sm:$0xf] }
  0x34   :  { %1044 = vmatpush.bf16.msrb.mxu1 %v1724_v62  ;;  %v1214_v62 = vld [vmem:[%s2232_s0 + $0x58] sm:$0xf0] }
  0x35   :  { %1072 = vmatpush.bf16.msrb.mxu3 %v1740_v63  ;;  %v1672_v63 = vld [vmem:[%s2232_s0 + $0x2c] sm:$0xf] }
  0x36   :  { %1031 = vmatpush.bf16.msrb.mxu0 %v1715_v0  ;;  %v1222_v0 = vld [vmem:[%s2232_s0 + $0x60] sm:$0xf0] }
  0x37   :  { %1059 = vmatpush.bf16.msrb.mxu2 %v1731_v1  ;;  %v1213_v1 = vor.u32 %v1678_v56, %v1212_v55 }
  0x38   :  { %1045 = vmatpush.bf16.msrb.mxu1 %v1723_v2  ;;  %v1221_v2 = vor.u32 %v1679_v58, %v1220_v57 }
  0x39   :  { %1073 = vmatpush.bf16.msrb.mxu3 %v1739_v3  ;;  %v1788_v3 = vld [vmem:[%s2230_s1 + $0x358] sm:$0xff] }
  0x3a   :  { %1032 = vmatpush.bf16.msrb.mxu0 %v1714_v4  ;;  %v1217_v4 = vor.u32 %v1671_v61, %v1214_v62 }
  0x3b   :  { %1060 = vmatpush.bf16.msrb.mxu2 %v1730_v5  ;;  %v1225_v5 = vor.u32 %v1672_v63, %v1222_v0 }
  0x3c   :  { %1046 = vmatpush.bf16.msrb.mxu1 %v1722_v6  ;;  %v1783_v6 = vld [vmem:[%s2230_s1 + $0x330] sm:$0xff] }
  0x3d   :  { %1074 = vmatpush.bf16.msrb.mxu3 %v1738_v7  ;;  %v1787_v7 = vld [vmem:[%s2230_s1 + $0x350] sm:$0xff] }
  0x3e   :  { %1033 = vmatpush.bf16.msrb.mxu0 %v1713_v8  ;;  %v1782_v8 = vld [vmem:[%s2230_s1 + $0x328] sm:$0xff] }
  0x3f   :  { %1061 = vmatpush.bf16.msrb.mxu2 %v1729_v9  ;;  %v1786_v9 = vld [vmem:[%s2230_s1 + $0x348] sm:$0xff] }
  0x40   :  { %1047 = vmatpush.bf16.msrb.mxu1 %v1721_v16  ;;  %v1779_v16 = vld [vmem:[%s2230_s1 + $0x310] sm:$0xff] }
  0x41   :  { %1075 = vmatpush.bf16.msrb.mxu3 %v1737_v17  ;;  %1034 = vmatmul.bf16.vlgmr.msrb.gmra.mxu0 %v1197_v22  ;;  %v1778_v17 = vld [vmem:[%s2230_s1 + $0x308] sm:$0xff] }
  0x42   :  { %1082 = vmatpush.bf16.msra.mxu0 %v1752_v10  ;;  %1062 = vmatmul.bf16.vlgmr.msrb.gmra.mxu2 %v1205_v23  ;;  %v1781_v10 = vld [vmem:[%s2230_s1 + $0x320] sm:$0xff] }
  0x43   :  { %1110 = vmatpush.bf16.msra.mxu2 %v1768_v11  ;;  %1048 = vmatmul.bf16.vlgmr.msrb.gmra.mxu1 %v1201_v26  ;;  %v1785_v11 = vld [vmem:[%s2230_s1 + $0x340] sm:$0xff] }
  0x44   :  { %1096 = vmatpush.bf16.msra.mxu1 %v1760_v24  ;;  %1076 = vmatmul.bf16.vlgmr.msrb.gmra.mxu3 %v1209_v27  ;;  %v1789_v27 = vld [vmem:[%s2231_s2] ss:$0 sm:$0xff] }
  0x45   :  { %1124 = vmatpush.bf16.msra.mxu3 %v1776_v25 }
  0x46   :  { %1083 = vmatpush.bf16.msra.mxu0 %v1751_v28 }
  0x47   :  { %1111 = vmatpush.bf16.msra.mxu2 %v1767_v29 }
  0x48   :  { %1097 = vmatpush.bf16.msra.mxu1 %v1759_v30 }
  0x49   :  { %1125 = vmatpush.bf16.msra.mxu3 %v1775_v31 }
  0x4a   :  { %1084 = vmatpush.bf16.msra.mxu0 %v1750_v32 }
  0x4b   :  { %1112 = vmatpush.bf16.msra.mxu2 %v1766_v33 }
  0x4c   :  { %1098 = vmatpush.bf16.msra.mxu1 %v1758_v34 }
  0x4d   :  { %1126 = vmatpush.bf16.msra.mxu3 %v1774_v35 }
  0x4e   :  { %1085 = vmatpush.bf16.msra.mxu0 %v1749_v36 }
  0x4f   :  { %1113 = vmatpush.bf16.msra.mxu2 %v1765_v37 }
  0x50   :  { %1099 = vmatpush.bf16.msra.mxu1 %v1757_v38 }
  0x51   :  { %1127 = vmatpush.bf16.msra.mxu3 %v1773_v39 }
  0x52   :  { %1086 = vmatpush.bf16.msra.mxu0 %v1748_v40 }
  0x53   :  { %1114 = vmatpush.bf16.msra.mxu2 %v1764_v41 }
  0x54   :  { %1100 = vmatpush.bf16.msra.mxu1 %v1756_v42 }
  0x55   :  { %1128 = vmatpush.bf16.msra.mxu3 %v1772_v43 }
  0x56   :  { %1087 = vmatpush.bf16.msra.mxu0 %v1747_v44 }
  0x57   :  { %1115 = vmatpush.bf16.msra.mxu2 %v1763_v45 }
  0x58   :  { %1101 = vmatpush.bf16.msra.mxu1 %v1755_v46 }
  0x59   :  { %1129 = vmatpush.bf16.msra.mxu3 %v1771_v47 }
  0x5a   :  { %1088 = vmatpush.bf16.msra.mxu0 %v1746_v48 }
  0x5b   :  { %1116 = vmatpush.bf16.msra.mxu2 %v1762_v49 }
  0x5c   :  { %1102 = vmatpush.bf16.msra.mxu1 %v1754_v50 }
  0x5d   :  { %1130 = vmatpush.bf16.msra.mxu3 %v1770_v51 }
  0x5e   :  { %1089 = vmatpush.bf16.msra.mxu0 %v1745_v52 }
  0x5f   :  { %1117 = vmatpush.bf16.msra.mxu2 %v1761_v53 }
  0x60   :  { %1103 = vmatpush.bf16.msra.mxu1 %v1753_v59 }
  0x61   :  { %1131 = vmatpush.bf16.msra.mxu3 %v1769_v60  ;;  %1090 = vmatmul.bf16.vlgmr.msra.gmra.mxu0 %v1213_v1 }
  0x62   :  { %1138 = vmatpush.bf16.msrb.mxu0 %v1784_v54  ;;  %1118 = vmatmul.bf16.vlgmr.msra.gmra.mxu2 %v1221_v2 }
  0x63   :  { %1104 = vmatmul.bf16.vlgmr.msra.gmra.mxu1 %v1217_v4 }
  0x64   :  { %1156 = vmatpush.bf16.msrb.mxu1 %v1788_v3  ;;  %1132 = vmatmul.bf16.vlgmr.msra.gmra.mxu3 %v1225_v5 }
  0x66   :  { %1139 = vmatpush.bf16.msrb.mxu0 %v1783_v6 }
  0x68   :  { %1157 = vmatpush.bf16.msrb.mxu1 %v1787_v7 }
  0x6a   :  { %1140 = vmatpush.bf16.msrb.mxu0 %v1782_v8 }
  0x6c   :  { %1158 = vmatpush.bf16.msrb.mxu1 %v1786_v9 }
  0x6e   :  { %1141 = vmatpush.bf16.msrb.mxu0 %v1781_v10 }
  0x70   :  { %1159 = vmatpush.bf16.msrb.mxu1 %v1785_v11 }
  0x72   :  { %1142 = vmatpush.bf16.msrb.mxu0 %v1780_v12 }
  0x73   :  { %1666 = vmatmul.msk.bf16.vlgmr.msrb.gmra.mxu1 %vm966_vm0, %v1233_v15 }
  0x76   :  { %1143 = vmatpush.bf16.msrb.mxu0 %v1779_v16 }
  0x7a   :  { %1144 = vmatpush.bf16.msrb.mxu0 %v1778_v17 }
  0x7e   :  { %1145 = vmatpush.bf16.msrb.mxu0 %v1777_v18 }
  0x81   :  { %1146 = vmatmul.bf16.vlgmr.msrb.gmra.mxu0 %v1229_v21 }
  0x9e   :  { %v979_v22 = vpop.f32.mrf.mxu0 }
  0x9f   :  { %v980_v29 = vadd.f32 %v1789_v27, %v979_v22 }
  0xa0   :  { %v993_v23 = vpop.f32.mrf.mxu1 }
  0xa1   :  { %v994_v31 = vadd.f32 %v993_v23, %v980_v29 }
  0xa5   :  { %v1007_v24 = vpop.f32.mrf.mxu2 }
  0xa6   :  { %v981_v25 = vpop.f32.mrf.mxu0  ;;  %v1008_v35 = vadd.f32 %v1007_v24, %v994_v31 }
  0xa7   :  { %v1021_v28 = vpop.f32.mrf.mxu3  ;;  %v982_v36 = vadd.f32 %v1789_v27, %v981_v25 }
  0xa8   :  { %v995_v26 = vpop.f32.mrf.mxu1  ;;  %v1022_v37 = vadd.f32 %v1021_v28, %v1008_v35 }
  0xa9   :  { %v996_v41 = vadd.f32 %v995_v26, %v982_v36 }
  0xad   :  { %v1009_v30 = vpop.f32.mrf.mxu2 }
  0xae   :  { %v1010_v44 = vadd.f32 %v1009_v30, %v996_v41 }
  0xaf   :  { %v1023_v34 = vpop.f32.mrf.mxu3 }
  0xb0   :  { %v1024_v49 = vadd.f32 %v1023_v34, %v1010_v44 }
  0xbe   :  { %v1035_v32 = vpop.f32.mrf.mxu0 }
  0xbf   :  { %v1036_v42 = vadd.f32 %v1035_v32, %v1022_v37 }
  0xc0   :  { %v1049_v33 = vpop.f32.mrf.mxu1 }
  0xc1   :  { %v1050_v45 = vadd.f32 %v1049_v33, %v1036_v42 }
  0xc5   :  { %v1063_v38 = vpop.f32.mrf.mxu2 }
  0xc6   :  { %v1037_v39 = vpop.f32.mrf.mxu0  ;;  %v1064_v50 = vadd.f32 %v1063_v38, %v1050_v45 }
  0xc7   :  { %v1077_v43 = vpop.f32.mrf.mxu3  ;;  %v1038_v51 = vadd.f32 %v1037_v39, %v1024_v49 }
  0xc8   :  { %v1051_v40 = vpop.f32.mrf.mxu1  ;;  %v1078_v53 = vadd.f32 %v1077_v43, %v1064_v50 }
  0xc9   :  { %v1052_v54 = vadd.f32 %v1051_v40, %v1038_v51 }
  0xcd   :  { %v1065_v46 = vpop.f32.mrf.mxu2 }
  0xce   :  { %v1066_v57 = vadd.f32 %v1065_v46, %v1052_v54 }
  0xcf   :  { %v1079_v52 = vpop.f32.mrf.mxu3 }
  0xd0   :  { %v1080_v62 = vadd.f32 %v1079_v52, %v1066_v57 }
  0xde   :  { %v1091_v47 = vpop.f32.mrf.mxu0 }
  0xdf   :  { %v1092_v55 = vadd.f32 %v1091_v47, %v1078_v53 }
  0xe0   :  { %v1105_v48 = vpop.f32.mrf.mxu1 }
  0xe1   :  { %v1106_v60 = vadd.f32 %v1105_v48, %v1092_v55 }
  0xe5   :  { %v1119_v56 = vpop.f32.mrf.mxu2 }
  0xe6   :  { %v1093_v58 = vpop.f32.mrf.mxu0  ;;  %v1120_v63 = vadd.f32 %v1119_v56, %v1106_v60 }
  0xe7   :  { %v1133_v61 = vpop.f32.mrf.mxu3  ;;  %v1094_v0 = vadd.f32 %v1093_v58, %v1080_v62 }
  0xe8   :  { %v1107_v59 = vpop.f32.mrf.mxu1  ;;  %v1134_v1 = vadd.f32 %v1133_v61, %v1120_v63 }
  0xe9   :  { %v1108_v5 = vadd.f32 %v1107_v59, %v1094_v0 }
  0xed   :  { %v1121_v2 = vpop.f32.mrf.mxu2 }
  0xee   :  { %v1122_v7 = vadd.f32 %v1121_v2, %v1108_v5 }
  0xef   :  { %v1135_v9 = vpop.f32.mrf.mxu3 }
  0xf0   :  { %v1161_v3 = vpop.f32.mrf.mxu1  ;;  %v1136_v11 = vadd.f32 %v1135_v9, %v1122_v7 }
  0xf8   :  { %v1163_v15 = vpop.f32.mrf.mxu1 }
  0xfe   :  { %v1147_v4 = vpop.f32.mrf.mxu0 }
  0xff   :  { %v1148_v6 = vadd.f32 %v1147_v4, %v1134_v1 }
 0x101   :  { %v1162_v8 = vadd.f32 %v1161_v3, %v1148_v6 }
 0x103   :  { %vm1166_vm1 = vcmp.ge.f32.partialorder %v1162_v8, 0.0  ;;  %v1168_v10 = vmul.f32 0.1, %v1162_v8 }
 0x105   :  { %v1170_v12 = vsel %vm1166_vm1, %v1162_v8, %v1168_v10 }
 0x106   :  { %1172 = vst.msk [vmem:[%s2233_s3] sm:$0xff] %vm966_vm0, %v1170_v12  ;;  %v1149_v13 = vpop.f32.mrf.mxu0 }
 0x107   :  { %v1150_v14 = vadd.f32 %v1149_v13, %v1136_v11 }
 0x109   :  { %v1164_v16 = vadd.f32 %v1163_v15, %v1150_v14 }
 0x10b   :  { %vm1167_vm2 = vcmp.ge.f32.partialorder %v1164_v16, 0.0  ;;  %v1169_v17 = vmul.f32 0.1, %v1164_v16 }
 0x10d   :  { %v1171_v18 = vsel %vm1167_vm2, %v1164_v16, %v1169_v17 }
 0x10e   :  { %1173 = vst.msk [vmem:[%s2233_s3 + $0x8] sm:$0xff] %vm966_vm0, %v1171_v18 }

</bundles_post_ra>
